<compile_context>
chip_gen: v5e
topology: v5e:2x2
jax: 0.10.0
libtpu: 0.0.40
codegen_flags: <defaults>
</compile_context>

<pallas_src>
import functools

import numpy as np
import jax
import jax.numpy as jnp
from jax.experimental import pallas as pl
from jax.experimental.pallas import tpu as pltpu


CFG = dict(vocab=64, d_model=64, d_kv=16, heads=4, d_ff=128,
           num_layers=2, rel_buckets=8, rel_max_dist=20,
           eos_id=1, num_classes=7)


# --------------------------------------------------------------------------
# The single fused Pallas kernel
# --------------------------------------------------------------------------

def _t5_fused_kernel(emb_ref,
                     enc_bias_ref, dec_self_bias_ref, cross_bias_ref,
                     enc_wqkv_ref, enc_wo_ref, enc_ln_attn_ref,
                     enc_wi_ref, enc_wo_ff_ref, enc_ln_ffn_ref, enc_final_ln_ref,
                     dec_wqkv_ref, dec_wo_self_ref, dec_ln_self_ref,
                     dec_wq_ref, dec_wkv_ref, dec_wo_cross_ref, dec_ln_cross_ref,
                     dec_wi_ref, dec_wo_ff_ref, dec_ln_ffn_ref, dec_final_ln_ref,
                     sel_ref, cls_w_ref, cls_b_ref,
                     logits_ref,
                     qkv_ref, ctx_ref,
                     *, B, T, H, dk, d_ff, L):
    inner = H * dk

    def rmsnorm(x, g):
        # T5 RMSNorm: no mean subtraction, no bias.
        var = jnp.mean(x * x, axis=-1, keepdims=True)
        return (x * jax.lax.rsqrt(var + 1e-6)) * g

    def mha(bias_ref):
        # qkv_ref holds [Q | K | V] lane-concatenated: (B*T, 3*inner) f32.
        # Writes a lane-merged (B*T, inner) context into ctx_ref, returns bf16.
        # T5 attention: no 1/sqrt(dk) scaling; bias already holds rel-pos +
        # causal + padding additive terms.
        for b in range(B):
            r0 = b * T
            for h in range(H):
                q = qkv_ref[r0:r0 + T, h * dk:(h + 1) * dk].astype(jnp.bfloat16)
                k = qkv_ref[r0:r0 + T,
                            inner + h * dk: inner + (h + 1) * dk].astype(jnp.bfloat16)
                v = qkv_ref[r0:r0 + T,
                            2 * inner + h * dk: 2 * inner + (h + 1) * dk
                            ].astype(jnp.bfloat16)
                s = jnp.einsum('qd,kd->qk', q, k,
                               preferred_element_type=jnp.float32)        # (T, T)
                s = s + bias_ref[b * H + h]
                s = s - jnp.max(s, axis=-1, keepdims=True)
                e = jnp.exp(s)
                p = e * pl.reciprocal(jnp.sum(e, axis=-1, keepdims=True),
                                      approx=True)
                ctx_ref[r0:r0 + T, h * dk:(h + 1) * dk] = jnp.dot(
                    p.astype(jnp.bfloat16), v, preferred_element_type=jnp.float32)
        return ctx_ref[...].astype(jnp.bfloat16)

    def gated_ffn(h, g, wi_ref, wo_ref, l):
        xn = rmsnorm(h, g).astype(jnp.bfloat16)
        hg = jnp.dot(xn, wi_ref[l], preferred_element_type=jnp.float32)   # (M, 2F)
        act = (jax.nn.gelu(hg[:, :d_ff], approximate=True)
               * hg[:, d_ff:]).astype(jnp.bfloat16)
        return h + jnp.dot(act, wo_ref[l], preferred_element_type=jnp.float32)

    # ------------------------------ encoder ------------------------------
    h_enc = emb_ref[...]                                                   # (M, D) f32
    for l in range(L):
        xn = rmsnorm(h_enc, enc_ln_attn_ref[l]).astype(jnp.bfloat16)
        qkv_ref[...] = jnp.dot(xn, enc_wqkv_ref[l],
                               preferred_element_type=jnp.float32)
        ctx = mha(enc_bias_ref)
        h_enc = h_enc + jnp.dot(ctx, enc_wo_ref[l],
                                preferred_element_type=jnp.float32)
        h_enc = gated_ffn(h_enc, enc_ln_ffn_ref[l], enc_wi_ref, enc_wo_ff_ref, l)

    # encoder final RMSNorm fused here (never leaves VMEM)
    enc_norm = rmsnorm(h_enc, enc_final_ln_ref[...]).astype(jnp.bfloat16)

    # ------------------------------ decoder ------------------------------
    h_dec = emb_ref[...]        # module passes decoder_input_ids=input_ids (unshifted)
    for l in range(L):
        # self-attention (rel-pos + causal bias)
        xn = rmsnorm(h_dec, dec_ln_self_ref[l]).astype(jnp.bfloat16)
        qkv_ref[...] = jnp.dot(xn, dec_wqkv_ref[l],
                               preferred_element_type=jnp.float32)
        ctx = mha(dec_self_bias_ref)
        h_dec = h_dec + jnp.dot(ctx, dec_wo_self_ref[l],
                                preferred_element_type=jnp.float32)

        # cross-attention over the normalized encoder output
        xn = rmsnorm(h_dec, dec_ln_cross_ref[l]).astype(jnp.bfloat16)
        qkv_ref[:, :inner] = jnp.dot(xn, dec_wq_ref[l],
                                     preferred_element_type=jnp.float32)
        qkv_ref[:, inner:] = jnp.dot(enc_norm, dec_wkv_ref[l],
                                     preferred_element_type=jnp.float32)
        ctx = mha(cross_bias_ref)
        h_dec = h_dec + jnp.dot(ctx, dec_wo_cross_ref[l],
                                preferred_element_type=jnp.float32)

        # gated-gelu FFN
        h_dec = gated_ffn(h_dec, dec_ln_ffn_ref[l], dec_wi_ref, dec_wo_ff_ref, l)

    dec_norm = rmsnorm(h_dec, dec_final_ln_ref[...])                       # (M, D) f32

    # sentence representation (last-<eos> row) via one-hot matmul + classifier head
    sent = jnp.dot(sel_ref[...], dec_norm,
                   preferred_element_type=jnp.float32)                     # (B, D)
    logits_ref[...] = (jnp.dot(sent, cls_w_ref[...],
                               preferred_element_type=jnp.float32)
                       + cls_b_ref[...])


# --------------------------------------------------------------------------
# T5 glue (plain JAX around the single Pallas call)
# --------------------------------------------------------------------------

def _relative_position_bucket(rel_pos, bidirectional, num_buckets, max_distance):
    rel_buckets = jnp.zeros_like(rel_pos)
    if bidirectional:
        num_buckets //= 2
        rel_buckets += (rel_pos > 0).astype(jnp.int32) * num_buckets
        rel_pos = jnp.abs(rel_pos)
    else:
        rel_pos = -jnp.minimum(rel_pos, 0)
    max_exact = num_buckets // 2
    is_small = rel_pos < max_exact
    rp_f = jnp.maximum(rel_pos, 1).astype(jnp.float32)
    rel_if_large = max_exact + (
        jnp.log(rp_f / max_exact) / np.log(max_distance / max_exact)
        * (num_buckets - max_exact)).astype(jnp.int32)
    rel_if_large = jnp.minimum(rel_if_large, num_buckets - 1)
    return rel_buckets + jnp.where(is_small, rel_pos, rel_if_large)


def compute_position_bias(Tq, Tk, rel_emb, bidirectional, cfg):
    ctx = jnp.arange(Tq)[:, None]
    mem = jnp.arange(Tk)[None, :]
    buckets = _relative_position_bucket(mem - ctx, bidirectional,
                                        cfg['rel_buckets'], cfg['rel_max_dist'])
    values = rel_emb[buckets]                   # (Tq, Tk, H)
    return jnp.transpose(values, (2, 0, 1))     # (H, Tq, Tk)


def t5_classifier_forward(params, input_ids, attention_mask, cfg):
    B, T = input_ids.shape
    D, H, dk = cfg['d_model'], cfg['heads'], cfg['d_kv']
    F, L, C = cfg['d_ff'], cfg['num_layers'], cfg['num_classes']
    M = B * T

    # Shared encoder/decoder token embeddings (decoder_input_ids = input_ids).
    emb = jnp.take(params['embed'], input_ids, axis=0).reshape(M, D)

    # Additive attention biases, flattened to (B*H, Tq, Tk) for in-kernel indexing.
    mask_add = (1.0 - attention_mask.astype(jnp.float32)) * -1e9            # (B, T)
    enc_pos = compute_position_bias(T, T, params['enc_rel_bias'], True, cfg)
    enc_bias = (enc_pos[None] + mask_add[:, None, None, :]).reshape(B * H, T, T)

    causal = jnp.tril(jnp.ones((T, T), jnp.float32))
    dec_pos = compute_position_bias(T, T, params['dec_rel_bias'], False, cfg)
    dec_self = dec_pos + (1.0 - causal)[None] * -1e9
    # TODO(synk): decoder self-attention ignores decoder padding (HF default
    # decoder_attention_mask = ones); padded rows are never gathered below.
    dec_self_bias = jnp.broadcast_to(dec_self[None],
                                     (B, H, T, T)).reshape(B * H, T, T)
    cross_bias = jnp.broadcast_to(mask_add[:, None, None, :],
                                  (B, H, T, T)).reshape(B * H, T, T)

    # last-<eos> selection as a one-hot matrix (gather done in-kernel as a matmul)
    eos_mask = (input_ids == cfg['eos_id'])
    last_eos = T - 1 - jnp.argmax(eos_mask[:, ::-1].astype(jnp.int32), axis=1)
    sel = jax.nn.one_hot(jnp.arange(B) * T + last_eos, M, dtype=jnp.float32)  # (B, M)

    kernel = functools.partial(_t5_fused_kernel, B=B, T=T, H=H, dk=dk,
                               d_ff=F, L=L)
    inputs = (emb, enc_bias, dec_self_bias, cross_bias,
              params['enc_wqkv'], params['enc_wo'], params['enc_ln_attn'],
              params['enc_wi'], params['enc_wo_ff'], params['enc_ln_ffn'],
              params['enc_final_ln'],
              params['dec_wqkv'], params['dec_wo_self'], params['dec_ln_self'],
              params['dec_wq'], params['dec_wkv'], params['dec_wo_cross'],
              params['dec_ln_cross'], params['dec_wi'], params['dec_wo_ff'],
              params['dec_ln_ffn'], params['dec_final_ln'],
              sel, params['cls_w'], params['cls_b'])

    vmem = pl.BlockSpec(memory_space=pltpu.MemorySpace.VMEM)
    return pl.pallas_call(
        kernel,
        out_shape=jax.ShapeDtypeStruct((B, C), jnp.float32),
        in_specs=[vmem] * len(inputs),
        out_specs=vmem,
        scratch_shapes=[pltpu.VMEM((M, 3 * H * dk), jnp.float32),   # [Q|K|V] slab
                        pltpu.VMEM((M, H * dk), jnp.float32)],      # merged context
    )(*inputs)


# --------------------------------------------------------------------------
# Deterministic parameter init (layer-stacked, MXU weights stored bf16)
# --------------------------------------------------------------------------

def init_params(key, cfg):
    D, F, H, dk = cfg['d_model'], cfg['d_ff'], cfg['heads'], cfg['d_kv']
    L = cfg['num_layers']
    inner = H * dk
    keys = iter(jax.random.split(key, 256))

    def nrm(shape, scale=0.05):
        return jax.random.normal(next(keys), shape, dtype=jnp.float32) * scale

    def stack_bf16(shape):
        return jnp.stack([nrm(shape) for _ in range(L)]).astype(jnp.bfloat16)

    return {
        'embed': nrm((cfg['vocab'], D), 0.1),
        'enc_rel_bias': nrm((cfg['rel_buckets'], H), 0.1),
        'dec_rel_bias': nrm((cfg['rel_buckets'], H), 0.1),
        # encoder (stacked over layers)
        'enc_wqkv': stack_bf16((D, 3 * inner)),
        'enc_wo': stack_bf16((inner, D)),
        'enc_ln_attn': jnp.ones((L, 1, D), jnp.float32),
        'enc_wi': stack_bf16((D, 2 * F)),
        'enc_wo_ff': stack_bf16((F, D)),
        'enc_ln_ffn': jnp.ones((L, 1, D), jnp.float32),
        'enc_final_ln': jnp.ones((1, D), jnp.float32),
        # decoder (stacked over layers)
        'dec_wqkv': stack_bf16((D, 3 * inner)),
        'dec_wo_self': stack_bf16((inner, D)),
        'dec_ln_self': jnp.ones((L, 1, D), jnp.float32),
        'dec_wq': stack_bf16((D, inner)),
        'dec_wkv': stack_bf16((D, 2 * inner)),
        'dec_wo_cross': stack_bf16((inner, D)),
        'dec_ln_cross': jnp.ones((L, 1, D), jnp.float32),
        'dec_wi': stack_bf16((D, 2 * F)),
        'dec_wo_ff': stack_bf16((F, D)),
        'dec_ln_ffn': jnp.ones((L, 1, D), jnp.float32),
        'dec_final_ln': jnp.ones((1, D), jnp.float32),
        # classifier head
        'cls_w': nrm((D, cfg['num_classes'])),
        'cls_b': jnp.zeros((1, cfg['num_classes']), jnp.float32),
    }


# --------------------------------------------------------------------------
# main
# --------------------------------------------------------------------------

if __name__ == "__main__":
    key = jax.random.PRNGKey(0)
    params = init_params(key, CFG)

    # batch=2, seq=8; token id 1 is <eos>, exactly one per example.
    input_ids = jnp.array([[5, 9, 12, 3, 1, 0, 0, 0],
                           [7, 2, 8, 4, 6, 10, 1, 0]], dtype=jnp.int32)
    attention_mask = jnp.array([[1, 1, 1, 1, 1, 0, 0, 0],
                                [1, 1, 1, 1, 1, 1, 1, 0]], dtype=jnp.int32)

    # same check as the PyTorch module (host-side):
    eos_counts = np.asarray(input_ids == CFG['eos_id']).sum(axis=1)
    if len(np.unique(eos_counts)) > 1:
        raise ValueError('All examples must have the same number of <eos> tokens.')

    forward = jax.jit(functools.partial(t5_classifier_forward, cfg=CFG))
    logits = forward(params, input_ids, attention_mask)
    logits = jax.block_until_ready(logits)
    assert logits.shape == (2, CFG['num_classes'])
    assert bool(jnp.all(jnp.isfinite(logits)))
    print("KERNEL_OK")
</pallas_src>

<mosaic_0001>
module attributes {stable_mosaic.version = 11 : i64} {
  func.func @_t5_fused_kernel(%arg0: memref<16x64xf32, #tpu.memory_space<vmem>>, %arg1: memref<8x8x8xf32, #tpu.memory_space<vmem>>, %arg2: memref<8x8x8xf32, #tpu.memory_space<vmem>>, %arg3: memref<8x8x8xf32, #tpu.memory_space<vmem>>, %arg4: memref<2x64x192xbf16, #tpu.memory_space<vmem>>, %arg5: memref<2x64x64xbf16, #tpu.memory_space<vmem>>, %arg6: memref<2x1x64xf32, #tpu.memory_space<vmem>>, %arg7: memref<2x64x256xbf16, #tpu.memory_space<vmem>>, %arg8: memref<2x128x64xbf16, #tpu.memory_space<vmem>>, %arg9: memref<2x1x64xf32, #tpu.memory_space<vmem>>, %arg10: memref<1x64xf32, #tpu.memory_space<vmem>>, %arg11: memref<2x64x192xbf16, #tpu.memory_space<vmem>>, %arg12: memref<2x64x64xbf16, #tpu.memory_space<vmem>>, %arg13: memref<2x1x64xf32, #tpu.memory_space<vmem>>, %arg14: memref<2x64x64xbf16, #tpu.memory_space<vmem>>, %arg15: memref<2x64x128xbf16, #tpu.memory_space<vmem>>, %arg16: memref<2x64x64xbf16, #tpu.memory_space<vmem>>, %arg17: memref<2x1x64xf32, #tpu.memory_space<vmem>>, %arg18: memref<2x64x256xbf16, #tpu.memory_space<vmem>>, %arg19: memref<2x128x64xbf16, #tpu.memory_space<vmem>>, %arg20: memref<2x1x64xf32, #tpu.memory_space<vmem>>, %arg21: memref<1x64xf32, #tpu.memory_space<vmem>>, %arg22: memref<2x16xf32, #tpu.memory_space<vmem>>, %arg23: memref<64x7xf32, #tpu.memory_space<vmem>>, %arg24: memref<1x7xf32, #tpu.memory_space<vmem>>, %arg25: memref<2x7xf32, #tpu.memory_space<vmem>>, %arg26: memref<16x192xf32, #tpu.memory_space<vmem>>, %arg27: memref<16x64xf32, #tpu.memory_space<vmem>>) attributes {dimension_semantics = [], scalar_prefetch = 0 : i64, scratch_operands = 2 : i64, tpu.core_type = #tpu.core_type<tc>} {
    %c0 = arith.constant 0 : index
    %c0_0 = arith.constant 0 : index
    %0 = vector.load %arg0[%c0, %c0_0] : memref<16x64xf32, #tpu.memory_space<vmem>>, vector<16x64xf32>
    %c0_1 = arith.constant 0 : index
    %c0_2 = arith.constant 0 : index
    %c0_3 = arith.constant 0 : index
    %1 = vector.load %arg6[%c0_1, %c0_2, %c0_3] : memref<2x1x64xf32, #tpu.memory_space<vmem>>, vector<1x1x64xf32>
    %2 = vector.shape_cast %1 : vector<1x1x64xf32> to vector<1x64xf32>
    %3 = arith.mulf %0, %0 : vector<16x64xf32>
    %cst = arith.constant dense<0.000000e+00> : vector<16xf32>
    %4 = vector.multi_reduction <add>, %3, %cst [1] : vector<16x64xf32> to vector<16xf32>
    %5 = vector.shape_cast %4 : vector<16xf32> to vector<16x1xf32>
    %cst_4 = arith.constant 6.400000e+01 : f32
    %6 = vector.broadcast %cst_4 : f32 to vector<16x1xf32>
    %7 = arith.divf %5, %6 : vector<16x1xf32>
    %cst_5 = arith.constant 9.99999997E-7 : f32
    %8 = vector.broadcast %cst_5 : f32 to vector<16x1xf32>
    %9 = arith.addf %7, %8 : vector<16x1xf32>
    %10 = math.rsqrt %9 : vector<16x1xf32>
    %11 = vector.broadcast %10 : vector<16x1xf32> to vector<16x64xf32>
    %12 = arith.mulf %0, %11 : vector<16x64xf32>
    %13 = vector.broadcast %2 : vector<1x64xf32> to vector<16x64xf32>
    %14 = arith.mulf %12, %13 : vector<16x64xf32>
    %15 = arith.truncf %14 : vector<16x64xf32> to vector<16x64xbf16>
    %c0_6 = arith.constant 0 : index
    %c0_7 = arith.constant 0 : index
    %c0_8 = arith.constant 0 : index
    %16 = vector.load %arg4[%c0_6, %c0_7, %c0_8] : memref<2x64x192xbf16, #tpu.memory_space<vmem>>, vector<1x64x192xbf16>
    %17 = vector.shape_cast %16 : vector<1x64x192xbf16> to vector<64x192xbf16>
    %cst_9 = arith.constant dense<0.000000e+00> : vector<16x192xf32>
    %18 = tpu.matmul %15, %17, %cst_9 {dimension_numbers = #tpu.dot_dimension_numbers<[1], [0], [0], [1], [0, 0, 1, 1], [], []>} : vector<16x64xbf16>, vector<64x192xbf16>, vector<16x192xf32> -> vector<16x192xf32>
    %c0_10 = arith.constant 0 : index
    %c0_11 = arith.constant 0 : index
    %19 = vector.load %arg26[%c0_10, %c0_11] : memref<16x192xf32, #tpu.memory_space<vmem>>, vector<16x192xf32>
    tpu.vector_store %arg26[%c0_10, %c0_11], %18 {strides = array<i32>} : memref<16x192xf32, #tpu.memory_space<vmem>>, vector<16x192xf32>,
    %c0_12 = arith.constant 0 : index
    %c0_13 = arith.constant 0 : index
    %20 = vector.load %arg26[%c0_12, %c0_13] : memref<16x192xf32, #tpu.memory_space<vmem>>, vector<8x16xf32>
    %21 = arith.truncf %20 : vector<8x16xf32> to vector<8x16xbf16>
    %c0_14 = arith.constant 0 : index
    %c64 = arith.constant 64 : index
    %22 = vector.load %arg26[%c0_14, %c64] : memref<16x192xf32, #tpu.memory_space<vmem>>, vector<8x16xf32>
    %23 = arith.truncf %22 : vector<8x16xf32> to vector<8x16xbf16>
    %c0_15 = arith.constant 0 : index
    %c128 = arith.constant 128 : index
    %24 = vector.load %arg26[%c0_15, %c128] : memref<16x192xf32, #tpu.memory_space<vmem>>, vector<8x16xf32>
    %25 = arith.truncf %24 : vector<8x16xf32> to vector<8x16xbf16>
    "tpu.trace_start"() <{level = 10 : i32, message = "qd,kd->qk"}> : () -> ()
    %cst_16 = arith.constant dense<0.000000e+00> : vector<8x8xf32>
    %26 = tpu.matmul %21, %23, %cst_16 {dimension_numbers = #tpu.dot_dimension_numbers<[1], [1], [0], [0], [0, 0, 1, 0], [], []>} : vector<8x16xbf16>, vector<8x16xbf16>, vector<8x8xf32> -> vector<8x8xf32>
    "tpu.trace_stop"() : () -> ()
    %c0_17 = arith.constant 0 : index
    %c0_18 = arith.constant 0 : index
    %c0_19 = arith.constant 0 : index
    %27 = vector.load %arg1[%c0_17, %c0_18, %c0_19] : memref<8x8x8xf32, #tpu.memory_space<vmem>>, vector<1x8x8xf32>
    %28 = vector.shape_cast %27 : vector<1x8x8xf32> to vector<8x8xf32>
    %29 = arith.addf %26, %28 : vector<8x8xf32>
    %cst_20 = arith.constant dense<0xFF800000> : vector<8xf32>
    %30 = vector.multi_reduction <maximumf>, %29, %cst_20 [1] : vector<8x8xf32> to vector<8xf32>
    %31 = vector.shape_cast %30 : vector<8xf32> to vector<8x1xf32>
    %32 = vector.broadcast %31 : vector<8x1xf32> to vector<8x8xf32>
    %33 = arith.subf %29, %32 : vector<8x8xf32>
    %34 = math.exp %33 : vector<8x8xf32>
    %cst_21 = arith.constant dense<0.000000e+00> : vector<8xf32>
    %35 = vector.multi_reduction <add>, %34, %cst_21 [1] : vector<8x8xf32> to vector<8xf32>
    %36 = vector.shape_cast %35 : vector<8xf32> to vector<8x1xf32>
    %37 = tpu.reciprocal %36 {approx = true} : vector<8x1xf32> -> vector<8x1xf32>
    %38 = vector.broadcast %37 : vector<8x1xf32> to vector<8x8xf32>
    %39 = arith.mulf %34, %38 : vector<8x8xf32>
    %40 = arith.truncf %39 : vector<8x8xf32> to vector<8x8xbf16>
    %cst_22 = arith.constant dense<0.000000e+00> : vector<8x16xf32>
    %41 = tpu.matmul %40, %25, %cst_22 {dimension_numbers = #tpu.dot_dimension_numbers<[1], [0], [0], [1], [0, 0, 1, 1], [], []>} : vector<8x8xbf16>, vector<8x16xbf16>, vector<8x16xf32> -> vector<8x16xf32>
    %c0_23 = arith.constant 0 : index
    %c0_24 = arith.constant 0 : index
    %42 = vector.load %arg27[%c0_23, %c0_24] : memref<16x64xf32, #tpu.memory_space<vmem>>, vector<8x16xf32>
    tpu.vector_store %arg27[%c0_23, %c0_24], %41 {strides = array<i32>} : memref<16x64xf32, #tpu.memory_space<vmem>>, vector<8x16xf32>,
    %c0_25 = arith.constant 0 : index
    %c16 = arith.constant 16 : index
    %43 = vector.load %arg26[%c0_25, %c16] : memref<16x192xf32, #tpu.memory_space<vmem>>, vector<8x16xf32>
    %44 = arith.truncf %43 : vector<8x16xf32> to vector<8x16xbf16>
    %c0_26 = arith.constant 0 : index
    %c80 = arith.constant 80 : index
    %45 = vector.load %arg26[%c0_26, %c80] : memref<16x192xf32, #tpu.memory_space<vmem>>, vector<8x16xf32>
    %46 = arith.truncf %45 : vector<8x16xf32> to vector<8x16xbf16>
    %c0_27 = arith.constant 0 : index
    %c144 = arith.constant 144 : index
    %47 = vector.load %arg26[%c0_27, %c144] : memref<16x192xf32, #tpu.memory_space<vmem>>, vector<8x16xf32>
    %48 = arith.truncf %47 : vector<8x16xf32> to vector<8x16xbf16>
    "tpu.trace_start"() <{level = 10 : i32, message = "qd,kd->qk"}> : () -> ()
    %cst_28 = arith.constant dense<0.000000e+00> : vector<8x8xf32>
    %49 = tpu.matmul %44, %46, %cst_28 {dimension_numbers = #tpu.dot_dimension_numbers<[1], [1], [0], [0], [0, 0, 1, 0], [], []>} : vector<8x16xbf16>, vector<8x16xbf16>, vector<8x8xf32> -> vector<8x8xf32>
    "tpu.trace_stop"() : () -> ()
    %c1 = arith.constant 1 : index
    %c0_29 = arith.constant 0 : index
    %c0_30 = arith.constant 0 : index
    %50 = vector.load %arg1[%c1, %c0_29, %c0_30] : memref<8x8x8xf32, #tpu.memory_space<vmem>>, vector<1x8x8xf32>
    %51 = vector.shape_cast %50 : vector<1x8x8xf32> to vector<8x8xf32>
    %52 = arith.addf %49, %51 : vector<8x8xf32>
    %cst_31 = arith.constant dense<0xFF800000> : vector<8xf32>
    %53 = vector.multi_reduction <maximumf>, %52, %cst_31 [1] : vector<8x8xf32> to vector<8xf32>
    %54 = vector.shape_cast %53 : vector<8xf32> to vector<8x1xf32>
    %55 = vector.broadcast %54 : vector<8x1xf32> to vector<8x8xf32>
    %56 = arith.subf %52, %55 : vector<8x8xf32>
    %57 = math.exp %56 : vector<8x8xf32>
    %cst_32 = arith.constant dense<0.000000e+00> : vector<8xf32>
    %58 = vector.multi_reduction <add>, %57, %cst_32 [1] : vector<8x8xf32> to vector<8xf32>
    %59 = vector.shape_cast %58 : vector<8xf32> to vector<8x1xf32>
    %60 = tpu.reciprocal %59 {approx = true} : vector<8x1xf32> -> vector<8x1xf32>
    %61 = vector.broadcast %60 : vector<8x1xf32> to vector<8x8xf32>
    %62 = arith.mulf %57, %61 : vector<8x8xf32>
    %63 = arith.truncf %62 : vector<8x8xf32> to vector<8x8xbf16>
    %cst_33 = arith.constant dense<0.000000e+00> : vector<8x16xf32>
    %64 = tpu.matmul %63, %48, %cst_33 {dimension_numbers = #tpu.dot_dimension_numbers<[1], [0], [0], [1], [0, 0, 1, 1], [], []>} : vector<8x8xbf16>, vector<8x16xbf16>, vector<8x16xf32> -> vector<8x16xf32>
    %c0_34 = arith.constant 0 : index
    %c16_35 = arith.constant 16 : index
    %65 = vector.load %arg27[%c0_34, %c16_35] : memref<16x64xf32, #tpu.memory_space<vmem>>, vector<8x16xf32>
    tpu.vector_store %arg27[%c0_34, %c16_35], %64 {strides = array<i32>} : memref<16x64xf32, #tpu.memory_space<vmem>>, vector<8x16xf32>,
    %c0_36 = arith.constant 0 : index
    %c32 = arith.constant 32 : index
    %66 = vector.load %arg26[%c0_36, %c32] : memref<16x192xf32, #tpu.memory_space<vmem>>, vector<8x16xf32>
    %67 = arith.truncf %66 : vector<8x16xf32> to vector<8x16xbf16>
    %c0_37 = arith.constant 0 : index
    %c96 = arith.constant 96 : index
    %68 = vector.load %arg26[%c0_37, %c96] : memref<16x192xf32, #tpu.memory_space<vmem>>, vector<8x16xf32>
    %69 = arith.truncf %68 : vector<8x16xf32> to vector<8x16xbf16>
    %c0_38 = arith.constant 0 : index
    %c160 = arith.constant 160 : index
    %70 = vector.load %arg26[%c0_38, %c160] : memref<16x192xf32, #tpu.memory_space<vmem>>, vector<8x16xf32>
    %71 = arith.truncf %70 : vector<8x16xf32> to vector<8x16xbf16>
    "tpu.trace_start"() <{level = 10 : i32, message = "qd,kd->qk"}> : () -> ()
    %cst_39 = arith.constant dense<0.000000e+00> : vector<8x8xf32>
    %72 = tpu.matmul %67, %69, %cst_39 {dimension_numbers = #tpu.dot_dimension_numbers<[1], [1], [0], [0], [0, 0, 1, 0], [], []>} : vector<8x16xbf16>, vector<8x16xbf16>, vector<8x8xf32> -> vector<8x8xf32>
    "tpu.trace_stop"() : () -> ()
    %c2 = arith.constant 2 : index
    %c0_40 = arith.constant 0 : index
    %c0_41 = arith.constant 0 : index
    %73 = vector.load %arg1[%c2, %c0_40, %c0_41] : memref<8x8x8xf32, #tpu.memory_space<vmem>>, vector<1x8x8xf32>
    %74 = vector.shape_cast %73 : vector<1x8x8xf32> to vector<8x8xf32>
    %75 = arith.addf %72, %74 : vector<8x8xf32>
    %cst_42 = arith.constant dense<0xFF800000> : vector<8xf32>
    %76 = vector.multi_reduction <maximumf>, %75, %cst_42 [1] : vector<8x8xf32> to vector<8xf32>
    %77 = vector.shape_cast %76 : vector<8xf32> to vector<8x1xf32>
    %78 = vector.broadcast %77 : vector<8x1xf32> to vector<8x8xf32>
    %79 = arith.subf %75, %78 : vector<8x8xf32>
    %80 = math.exp %79 : vector<8x8xf32>
    %cst_43 = arith.constant dense<0.000000e+00> : vector<8xf32>
    %81 = vector.multi_reduction <add>, %80, %cst_43 [1] : vector<8x8xf32> to vector<8xf32>
    %82 = vector.shape_cast %81 : vector<8xf32> to vector<8x1xf32>
    %83 = tpu.reciprocal %82 {approx = true} : vector<8x1xf32> -> vector<8x1xf32>
    %84 = vector.broadcast %83 : vector<8x1xf32> to vector<8x8xf32>
    %85 = arith.mulf %80, %84 : vector<8x8xf32>
    %86 = arith.truncf %85 : vector<8x8xf32> to vector<8x8xbf16>
    %cst_44 = arith.constant dense<0.000000e+00> : vector<8x16xf32>
    %87 = tpu.matmul %86, %71, %cst_44 {dimension_numbers = #tpu.dot_dimension_numbers<[1], [0], [0], [1], [0, 0, 1, 1], [], []>} : vector<8x8xbf16>, vector<8x16xbf16>, vector<8x16xf32> -> vector<8x16xf32>
    %c0_45 = arith.constant 0 : index
    %c32_46 = arith.constant 32 : index
    %88 = vector.load %arg27[%c0_45, %c32_46] : memref<16x64xf32, #tpu.memory_space<vmem>>, vector<8x16xf32>
    tpu.vector_store %arg27[%c0_45, %c32_46], %87 {strides = array<i32>} : memref<16x64xf32, #tpu.memory_space<vmem>>, vector<8x16xf32>,
    %c0_47 = arith.constant 0 : index
    %c48 = arith.constant 48 : index
    %89 = vector.load %arg26[%c0_47, %c48] : memref<16x192xf32, #tpu.memory_space<vmem>>, vector<8x16xf32>
    %90 = arith.truncf %89 : vector<8x16xf32> to vector<8x16xbf16>
    %c0_48 = arith.constant 0 : index
    %c112 = arith.constant 112 : index
    %91 = vector.load %arg26[%c0_48, %c112] : memref<16x192xf32, #tpu.memory_space<vmem>>, vector<8x16xf32>
    %92 = arith.truncf %91 : vector<8x16xf32> to vector<8x16xbf16>
    %c0_49 = arith.constant 0 : index
    %c176 = arith.constant 176 : index
    %93 = vector.load %arg26[%c0_49, %c176] : memref<16x192xf32, #tpu.memory_space<vmem>>, vector<8x16xf32>
    %94 = arith.truncf %93 : vector<8x16xf32> to vector<8x16xbf16>
    "tpu.trace_start"() <{level = 10 : i32, message = "qd,kd->qk"}> : () -> ()
    %cst_50 = arith.constant dense<0.000000e+00> : vector<8x8xf32>
    %95 = tpu.matmul %90, %92, %cst_50 {dimension_numbers = #tpu.dot_dimension_numbers<[1], [1], [0], [0], [0, 0, 1, 0], [], []>} : vector<8x16xbf16>, vector<8x16xbf16>, vector<8x8xf32> -> vector<8x8xf32>
    "tpu.trace_stop"() : () -> ()
    %c3 = arith.constant 3 : index
    %c0_51 = arith.constant 0 : index
    %c0_52 = arith.constant 0 : index
    %96 = vector.load %arg1[%c3, %c0_51, %c0_52] : memref<8x8x8xf32, #tpu.memory_space<vmem>>, vector<1x8x8xf32>
    %97 = vector.shape_cast %96 : vector<1x8x8xf32> to vector<8x8xf32>
    %98 = arith.addf %95, %97 : vector<8x8xf32>
    %cst_53 = arith.constant dense<0xFF800000> : vector<8xf32>
    %99 = vector.multi_reduction <maximumf>, %98, %cst_53 [1] : vector<8x8xf32> to vector<8xf32>
    %100 = vector.shape_cast %99 : vector<8xf32> to vector<8x1xf32>
    %101 = vector.broadcast %100 : vector<8x1xf32> to vector<8x8xf32>
    %102 = arith.subf %98, %101 : vector<8x8xf32>
    %103 = math.exp %102 : vector<8x8xf32>
    %cst_54 = arith.constant dense<0.000000e+00> : vector<8xf32>
    %104 = vector.multi_reduction <add>, %103, %cst_54 [1] : vector<8x8xf32> to vector<8xf32>
    %105 = vector.shape_cast %104 : vector<8xf32> to vector<8x1xf32>
    %106 = tpu.reciprocal %105 {approx = true} : vector<8x1xf32> -> vector<8x1xf32>
    %107 = vector.broadcast %106 : vector<8x1xf32> to vector<8x8xf32>
    %108 = arith.mulf %103, %107 : vector<8x8xf32>
    %109 = arith.truncf %108 : vector<8x8xf32> to vector<8x8xbf16>
    %cst_55 = arith.constant dense<0.000000e+00> : vector<8x16xf32>
    %110 = tpu.matmul %109, %94, %cst_55 {dimension_numbers = #tpu.dot_dimension_numbers<[1], [0], [0], [1], [0, 0, 1, 1], [], []>} : vector<8x8xbf16>, vector<8x16xbf16>, vector<8x16xf32> -> vector<8x16xf32>
    %c0_56 = arith.constant 0 : index
    %c48_57 = arith.constant 48 : index
    %111 = vector.load %arg27[%c0_56, %c48_57] : memref<16x64xf32, #tpu.memory_space<vmem>>, vector<8x16xf32>
    tpu.vector_store %arg27[%c0_56, %c48_57], %110 {strides = array<i32>} : memref<16x64xf32, #tpu.memory_space<vmem>>, vector<8x16xf32>,
    %c8 = arith.constant 8 : index
    %c0_58 = arith.constant 0 : index
    %112 = vector.load %arg26[%c8, %c0_58] : memref<16x192xf32, #tpu.memory_space<vmem>>, vector<8x16xf32>
    %113 = arith.truncf %112 : vector<8x16xf32> to vector<8x16xbf16>
    %c8_59 = arith.constant 8 : index
    %c64_60 = arith.constant 64 : index
    %114 = vector.load %arg26[%c8_59, %c64_60] : memref<16x192xf32, #tpu.memory_space<vmem>>, vector<8x16xf32>
    %115 = arith.truncf %114 : vector<8x16xf32> to vector<8x16xbf16>
    %c8_61 = arith.constant 8 : index
    %c128_62 = arith.constant 128 : index
    %116 = vector.load %arg26[%c8_61, %c128_62] : memref<16x192xf32, #tpu.memory_space<vmem>>, vector<8x16xf32>
    %117 = arith.truncf %116 : vector<8x16xf32> to vector<8x16xbf16>
    "tpu.trace_start"() <{level = 10 : i32, message = "qd,kd->qk"}> : () -> ()
    %cst_63 = arith.constant dense<0.000000e+00> : vector<8x8xf32>
    %118 = tpu.matmul %113, %115, %cst_63 {dimension_numbers = #tpu.dot_dimension_numbers<[1], [1], [0], [0], [0, 0, 1, 0], [], []>} : vector<8x16xbf16>, vector<8x16xbf16>, vector<8x8xf32> -> vector<8x8xf32>
    "tpu.trace_stop"() : () -> ()
    %c4 = arith.constant 4 : index
    %c0_64 = arith.constant 0 : index
    %c0_65 = arith.constant 0 : index
    %119 = vector.load %arg1[%c4, %c0_64, %c0_65] : memref<8x8x8xf32, #tpu.memory_space<vmem>>, vector<1x8x8xf32>
    %120 = vector.shape_cast %119 : vector<1x8x8xf32> to vector<8x8xf32>
    %121 = arith.addf %118, %120 : vector<8x8xf32>
    %cst_66 = arith.constant dense<0xFF800000> : vector<8xf32>
    %122 = vector.multi_reduction <maximumf>, %121, %cst_66 [1] : vector<8x8xf32> to vector<8xf32>
    %123 = vector.shape_cast %122 : vector<8xf32> to vector<8x1xf32>
    %124 = vector.broadcast %123 : vector<8x1xf32> to vector<8x8xf32>
    %125 = arith.subf %121, %124 : vector<8x8xf32>
    %126 = math.exp %125 : vector<8x8xf32>
    %cst_67 = arith.constant dense<0.000000e+00> : vector<8xf32>
    %127 = vector.multi_reduction <add>, %126, %cst_67 [1] : vector<8x8xf32> to vector<8xf32>
    %128 = vector.shape_cast %127 : vector<8xf32> to vector<8x1xf32>
    %129 = tpu.reciprocal %128 {approx = true} : vector<8x1xf32> -> vector<8x1xf32>
    %130 = vector.broadcast %129 : vector<8x1xf32> to vector<8x8xf32>
    %131 = arith.mulf %126, %130 : vector<8x8xf32>
    %132 = arith.truncf %131 : vector<8x8xf32> to vector<8x8xbf16>
    %cst_68 = arith.constant dense<0.000000e+00> : vector<8x16xf32>
    %133 = tpu.matmul %132, %117, %cst_68 {dimension_numbers = #tpu.dot_dimension_numbers<[1], [0], [0], [1], [0, 0, 1, 1], [], []>} : vector<8x8xbf16>, vector<8x16xbf16>, vector<8x16xf32> -> vector<8x16xf32>
    %c8_69 = arith.constant 8 : index
    %c0_70 = arith.constant 0 : index
    %134 = vector.load %arg27[%c8_69, %c0_70] : memref<16x64xf32, #tpu.memory_space<vmem>>, vector<8x16xf32>
    tpu.vector_store %arg27[%c8_69, %c0_70], %133 {strides = array<i32>} : memref<16x64xf32, #tpu.memory_space<vmem>>, vector<8x16xf32>,
    %c8_71 = arith.constant 8 : index
    %c16_72 = arith.constant 16 : index
    %135 = vector.load %arg26[%c8_71, %c16_72] : memref<16x192xf32, #tpu.memory_space<vmem>>, vector<8x16xf32>
    %136 = arith.truncf %135 : vector<8x16xf32> to vector<8x16xbf16>
    %c8_73 = arith.constant 8 : index
    %c80_74 = arith.constant 80 : index
    %137 = vector.load %arg26[%c8_73, %c80_74] : memref<16x192xf32, #tpu.memory_space<vmem>>, vector<8x16xf32>
    %138 = arith.truncf %137 : vector<8x16xf32> to vector<8x16xbf16>
    %c8_75 = arith.constant 8 : index
    %c144_76 = arith.constant 144 : index
    %139 = vector.load %arg26[%c8_75, %c144_76] : memref<16x192xf32, #tpu.memory_space<vmem>>, vector<8x16xf32>
    %140 = arith.truncf %139 : vector<8x16xf32> to vector<8x16xbf16>
    "tpu.trace_start"() <{level = 10 : i32, message = "qd,kd->qk"}> : () -> ()
    %cst_77 = arith.constant dense<0.000000e+00> : vector<8x8xf32>
    %141 = tpu.matmul %136, %138, %cst_77 {dimension_numbers = #tpu.dot_dimension_numbers<[1], [1], [0], [0], [0, 0, 1, 0], [], []>} : vector<8x16xbf16>, vector<8x16xbf16>, vector<8x8xf32> -> vector<8x8xf32>
    "tpu.trace_stop"() : () -> ()
    %c5 = arith.constant 5 : index
    %c0_78 = arith.constant 0 : index
    %c0_79 = arith.constant 0 : index
    %142 = vector.load %arg1[%c5, %c0_78, %c0_79] : memref<8x8x8xf32, #tpu.memory_space<vmem>>, vector<1x8x8xf32>
    %143 = vector.shape_cast %142 : vector<1x8x8xf32> to vector<8x8xf32>
    %144 = arith.addf %141, %143 : vector<8x8xf32>
    %cst_80 = arith.constant dense<0xFF800000> : vector<8xf32>
    %145 = vector.multi_reduction <maximumf>, %144, %cst_80 [1] : vector<8x8xf32> to vector<8xf32>
    %146 = vector.shape_cast %145 : vector<8xf32> to vector<8x1xf32>
    %147 = vector.broadcast %146 : vector<8x1xf32> to vector<8x8xf32>
    %148 = arith.subf %144, %147 : vector<8x8xf32>
    %149 = math.exp %148 : vector<8x8xf32>
    %cst_81 = arith.constant dense<0.000000e+00> : vector<8xf32>
    %150 = vector.multi_reduction <add>, %149, %cst_81 [1] : vector<8x8xf32> to vector<8xf32>
    %151 = vector.shape_cast %150 : vector<8xf32> to vector<8x1xf32>
    %152 = tpu.reciprocal %151 {approx = true} : vector<8x1xf32> -> vector<8x1xf32>
    %153 = vector.broadcast %152 : vector<8x1xf32> to vector<8x8xf32>
    %154 = arith.mulf %149, %153 : vector<8x8xf32>
    %155 = arith.truncf %154 : vector<8x8xf32> to vector<8x8xbf16>
    %cst_82 = arith.constant dense<0.000000e+00> : vector<8x16xf32>
    %156 = tpu.matmul %155, %140, %cst_82 {dimension_numbers = #tpu.dot_dimension_numbers<[1], [0], [0], [1], [0, 0, 1, 1], [], []>} : vector<8x8xbf16>, vector<8x16xbf16>, vector<8x16xf32> -> vector<8x16xf32>
    %c8_83 = arith.constant 8 : index
    %c16_84 = arith.constant 16 : index
    %157 = vector.load %arg27[%c8_83, %c16_84] : memref<16x64xf32, #tpu.memory_space<vmem>>, vector<8x16xf32>
    tpu.vector_store %arg27[%c8_83, %c16_84], %156 {strides = array<i32>} : memref<16x64xf32, #tpu.memory_space<vmem>>, vector<8x16xf32>,
    %c8_85 = arith.constant 8 : index
    %c32_86 = arith.constant 32 : index
    %158 = vector.load %arg26[%c8_85, %c32_86] : memref<16x192xf32, #tpu.memory_space<vmem>>, vector<8x16xf32>
    %159 = arith.truncf %158 : vector<8x16xf32> to vector<8x16xbf16>
    %c8_87 = arith.constant 8 : index
    %c96_88 = arith.constant 96 : index
    %160 = vector.load %arg26[%c8_87, %c96_88] : memref<16x192xf32, #tpu.memory_space<vmem>>, vector<8x16xf32>
    %161 = arith.truncf %160 : vector<8x16xf32> to vector<8x16xbf16>
    %c8_89 = arith.constant 8 : index
    %c160_90 = arith.constant 160 : index
    %162 = vector.load %arg26[%c8_89, %c160_90] : memref<16x192xf32, #tpu.memory_space<vmem>>, vector<8x16xf32>
    %163 = arith.truncf %162 : vector<8x16xf32> to vector<8x16xbf16>
    "tpu.trace_start"() <{level = 10 : i32, message = "qd,kd->qk"}> : () -> ()
    %cst_91 = arith.constant dense<0.000000e+00> : vector<8x8xf32>
    %164 = tpu.matmul %159, %161, %cst_91 {dimension_numbers = #tpu.dot_dimension_numbers<[1], [1], [0], [0], [0, 0, 1, 0], [], []>} : vector<8x16xbf16>, vector<8x16xbf16>, vector<8x8xf32> -> vector<8x8xf32>
    "tpu.trace_stop"() : () -> ()
    %c6 = arith.constant 6 : index
    %c0_92 = arith.constant 0 : index
    %c0_93 = arith.constant 0 : index
    %165 = vector.load %arg1[%c6, %c0_92, %c0_93] : memref<8x8x8xf32, #tpu.memory_space<vmem>>, vector<1x8x8xf32>
    %166 = vector.shape_cast %165 : vector<1x8x8xf32> to vector<8x8xf32>
    %167 = arith.addf %164, %166 : vector<8x8xf32>
    %cst_94 = arith.constant dense<0xFF800000> : vector<8xf32>
    %168 = vector.multi_reduction <maximumf>, %167, %cst_94 [1] : vector<8x8xf32> to vector<8xf32>
    %169 = vector.shape_cast %168 : vector<8xf32> to vector<8x1xf32>
    %170 = vector.broadcast %169 : vector<8x1xf32> to vector<8x8xf32>
    %171 = arith.subf %167, %170 : vector<8x8xf32>
    %172 = math.exp %171 : vector<8x8xf32>
    %cst_95 = arith.constant dense<0.000000e+00> : vector<8xf32>
    %173 = vector.multi_reduction <add>, %172, %cst_95 [1] : vector<8x8xf32> to vector<8xf32>
    %174 = vector.shape_cast %173 : vector<8xf32> to vector<8x1xf32>
    %175 = tpu.reciprocal %174 {approx = true} : vector<8x1xf32> -> vector<8x1xf32>
    %176 = vector.broadcast %175 : vector<8x1xf32> to vector<8x8xf32>
    %177 = arith.mulf %172, %176 : vector<8x8xf32>
    %178 = arith.truncf %177 : vector<8x8xf32> to vector<8x8xbf16>
    %cst_96 = arith.constant dense<0.000000e+00> : vector<8x16xf32>
    %179 = tpu.matmul %178, %163, %cst_96 {dimension_numbers = #tpu.dot_dimension_numbers<[1], [0], [0], [1], [0, 0, 1, 1], [], []>} : vector<8x8xbf16>, vector<8x16xbf16>, vector<8x16xf32> -> vector<8x16xf32>
    %c8_97 = arith.constant 8 : index
    %c32_98 = arith.constant 32 : index
    %180 = vector.load %arg27[%c8_97, %c32_98] : memref<16x64xf32, #tpu.memory_space<vmem>>, vector<8x16xf32>
    tpu.vector_store %arg27[%c8_97, %c32_98], %179 {strides = array<i32>} : memref<16x64xf32, #tpu.memory_space<vmem>>, vector<8x16xf32>,
    %c8_99 = arith.constant 8 : index
    %c48_100 = arith.constant 48 : index
    %181 = vector.load %arg26[%c8_99, %c48_100] : memref<16x192xf32, #tpu.memory_space<vmem>>, vector<8x16xf32>
    %182 = arith.truncf %181 : vector<8x16xf32> to vector<8x16xbf16>
    %c8_101 = arith.constant 8 : index
    %c112_102 = arith.constant 112 : index
    %183 = vector.load %arg26[%c8_101, %c112_102] : memref<16x192xf32, #tpu.memory_space<vmem>>, vector<8x16xf32>
    %184 = arith.truncf %183 : vector<8x16xf32> to vector<8x16xbf16>
    %c8_103 = arith.constant 8 : index
    %c176_104 = arith.constant 176 : index
    %185 = vector.load %arg26[%c8_103, %c176_104] : memref<16x192xf32, #tpu.memory_space<vmem>>, vector<8x16xf32>
    %186 = arith.truncf %185 : vector<8x16xf32> to vector<8x16xbf16>
    "tpu.trace_start"() <{level = 10 : i32, message = "qd,kd->qk"}> : () -> ()
    %cst_105 = arith.constant dense<0.000000e+00> : vector<8x8xf32>
    %187 = tpu.matmul %182, %184, %cst_105 {dimension_numbers = #tpu.dot_dimension_numbers<[1], [1], [0], [0], [0, 0, 1, 0], [], []>} : vector<8x16xbf16>, vector<8x16xbf16>, vector<8x8xf32> -> vector<8x8xf32>
    "tpu.trace_stop"() : () -> ()
    %c7 = arith.constant 7 : index
    %c0_106 = arith.constant 0 : index
    %c0_107 = arith.constant 0 : index
    %188 = vector.load %arg1[%c7, %c0_106, %c0_107] : memref<8x8x8xf32, #tpu.memory_space<vmem>>, vector<1x8x8xf32>
    %189 = vector.shape_cast %188 : vector<1x8x8xf32> to vector<8x8xf32>
    %190 = arith.addf %187, %189 : vector<8x8xf32>
    %cst_108 = arith.constant dense<0xFF800000> : vector<8xf32>
    %191 = vector.multi_reduction <maximumf>, %190, %cst_108 [1] : vector<8x8xf32> to vector<8xf32>
    %192 = vector.shape_cast %191 : vector<8xf32> to vector<8x1xf32>
    %193 = vector.broadcast %192 : vector<8x1xf32> to vector<8x8xf32>
    %194 = arith.subf %190, %193 : vector<8x8xf32>
    %195 = math.exp %194 : vector<8x8xf32>
    %cst_109 = arith.constant dense<0.000000e+00> : vector<8xf32>
    %196 = vector.multi_reduction <add>, %195, %cst_109 [1] : vector<8x8xf32> to vector<8xf32>
    %197 = vector.shape_cast %196 : vector<8xf32> to vector<8x1xf32>
    %198 = tpu.reciprocal %197 {approx = true} : vector<8x1xf32> -> vector<8x1xf32>
    %199 = vector.broadcast %198 : vector<8x1xf32> to vector<8x8xf32>
    %200 = arith.mulf %195, %199 : vector<8x8xf32>
    %201 = arith.truncf %200 : vector<8x8xf32> to vector<8x8xbf16>
    %cst_110 = arith.constant dense<0.000000e+00> : vector<8x16xf32>
    %202 = tpu.matmul %201, %186, %cst_110 {dimension_numbers = #tpu.dot_dimension_numbers<[1], [0], [0], [1], [0, 0, 1, 1], [], []>} : vector<8x8xbf16>, vector<8x16xbf16>, vector<8x16xf32> -> vector<8x16xf32>
    %c8_111 = arith.constant 8 : index
    %c48_112 = arith.constant 48 : index
    %203 = vector.load %arg27[%c8_111, %c48_112] : memref<16x64xf32, #tpu.memory_space<vmem>>, vector<8x16xf32>
    tpu.vector_store %arg27[%c8_111, %c48_112], %202 {strides = array<i32>} : memref<16x64xf32, #tpu.memory_space<vmem>>, vector<8x16xf32>,
    %c0_113 = arith.constant 0 : index
    %c0_114 = arith.constant 0 : index
    %204 = vector.load %arg27[%c0_113, %c0_114] : memref<16x64xf32, #tpu.memory_space<vmem>>, vector<16x64xf32>
    %205 = arith.truncf %204 : vector<16x64xf32> to vector<16x64xbf16>
    %c0_115 = arith.constant 0 : index
    %c0_116 = arith.constant 0 : index
    %c0_117 = arith.constant 0 : index
    %206 = vector.load %arg5[%c0_115, %c0_116, %c0_117] : memref<2x64x64xbf16, #tpu.memory_space<vmem>>, vector<1x64x64xbf16>
    %207 = vector.shape_cast %206 : vector<1x64x64xbf16> to vector<64x64xbf16>
    %cst_118 = arith.constant dense<0.000000e+00> : vector<16x64xf32>
    %208 = tpu.matmul %205, %207, %cst_118 {dimension_numbers = #tpu.dot_dimension_numbers<[1], [0], [0], [1], [0, 0, 1, 1], [], []>} : vector<16x64xbf16>, vector<64x64xbf16>, vector<16x64xf32> -> vector<16x64xf32>
    %209 = arith.addf %0, %208 : vector<16x64xf32>
    %c0_119 = arith.constant 0 : index
    %c0_120 = arith.constant 0 : index
    %c0_121 = arith.constant 0 : index
    %210 = vector.load %arg9[%c0_119, %c0_120, %c0_121] : memref<2x1x64xf32, #tpu.memory_space<vmem>>, vector<1x1x64xf32>
    %211 = vector.shape_cast %210 : vector<1x1x64xf32> to vector<1x64xf32>
    %212 = arith.mulf %209, %209 : vector<16x64xf32>
    %cst_122 = arith.constant dense<0.000000e+00> : vector<16xf32>
    %213 = vector.multi_reduction <add>, %212, %cst_122 [1] : vector<16x64xf32> to vector<16xf32>
    %214 = vector.shape_cast %213 : vector<16xf32> to vector<16x1xf32>
    %cst_123 = arith.constant 6.400000e+01 : f32
    %215 = vector.broadcast %cst_123 : f32 to vector<16x1xf32>
    %216 = arith.divf %214, %215 : vector<16x1xf32>
    %cst_124 = arith.constant 9.99999997E-7 : f32
    %217 = vector.broadcast %cst_124 : f32 to vector<16x1xf32>
    %218 = arith.addf %216, %217 : vector<16x1xf32>
    %219 = math.rsqrt %218 : vector<16x1xf32>
    %220 = vector.broadcast %219 : vector<16x1xf32> to vector<16x64xf32>
    %221 = arith.mulf %209, %220 : vector<16x64xf32>
    %222 = vector.broadcast %211 : vector<1x64xf32> to vector<16x64xf32>
    %223 = arith.mulf %221, %222 : vector<16x64xf32>
    %224 = arith.truncf %223 : vector<16x64xf32> to vector<16x64xbf16>
    %c0_125 = arith.constant 0 : index
    %c0_126 = arith.constant 0 : index
    %c0_127 = arith.constant 0 : index
    %225 = vector.load %arg7[%c0_125, %c0_126, %c0_127] : memref<2x64x256xbf16, #tpu.memory_space<vmem>>, vector<1x64x256xbf16>
    %226 = vector.shape_cast %225 : vector<1x64x256xbf16> to vector<64x256xbf16>
    %cst_128 = arith.constant dense<0.000000e+00> : vector<16x256xf32>
    %227 = tpu.matmul %224, %226, %cst_128 {dimension_numbers = #tpu.dot_dimension_numbers<[1], [0], [0], [1], [0, 0, 1, 1], [], []>} : vector<16x64xbf16>, vector<64x256xbf16>, vector<16x256xf32> -> vector<16x256xf32>
    %228 = vector.extract_strided_slice %227 {offsets = [0, 0], sizes = [16, 128], strides = [1, 1]} : vector<16x256xf32> to vector<16x128xf32>
    %229 = arith.mulf %228, %228 : vector<16x128xf32>
    %230 = arith.mulf %228, %229 : vector<16x128xf32>
    %cst_129 = arith.constant 4.471500e-02 : f32
    %231 = vector.broadcast %cst_129 : f32 to vector<16x128xf32>
    %232 = arith.mulf %231, %230 : vector<16x128xf32>
    %233 = arith.addf %228, %232 : vector<16x128xf32>
    %cst_130 = arith.constant 0.797884583 : f32
    %234 = vector.broadcast %cst_130 : f32 to vector<16x128xf32>
    %235 = arith.mulf %234, %233 : vector<16x128xf32>
    %236 = math.tanh %235 : vector<16x128xf32>
    %cst_131 = arith.constant 1.000000e+00 : f32
    %237 = vector.broadcast %cst_131 : f32 to vector<16x128xf32>
    %238 = arith.addf %237, %236 : vector<16x128xf32>
    %cst_132 = arith.constant 5.000000e-01 : f32
    %239 = vector.broadcast %cst_132 : f32 to vector<16x128xf32>
    %240 = arith.mulf %239, %238 : vector<16x128xf32>
    %241 = arith.mulf %228, %240 : vector<16x128xf32>
    %242 = vector.extract_strided_slice %227 {offsets = [0, 128], sizes = [16, 128], strides = [1, 1]} : vector<16x256xf32> to vector<16x128xf32>
    %243 = arith.mulf %241, %242 : vector<16x128xf32>
    %244 = arith.truncf %243 : vector<16x128xf32> to vector<16x128xbf16>
    %c0_133 = arith.constant 0 : index
    %c0_134 = arith.constant 0 : index
    %c0_135 = arith.constant 0 : index
    %245 = vector.load %arg8[%c0_133, %c0_134, %c0_135] : memref<2x128x64xbf16, #tpu.memory_space<vmem>>, vector<1x128x64xbf16>
    %246 = vector.shape_cast %245 : vector<1x128x64xbf16> to vector<128x64xbf16>
    %cst_136 = arith.constant dense<0.000000e+00> : vector<16x64xf32>
    %247 = tpu.matmul %244, %246, %cst_136 {dimension_numbers = #tpu.dot_dimension_numbers<[1], [0], [0], [1], [0, 0, 1, 1], [], []>} : vector<16x128xbf16>, vector<128x64xbf16>, vector<16x64xf32> -> vector<16x64xf32>
    %248 = arith.addf %209, %247 : vector<16x64xf32>
    %c1_137 = arith.constant 1 : index
    %c0_138 = arith.constant 0 : index
    %c0_139 = arith.constant 0 : index
    %249 = vector.load %arg6[%c1_137, %c0_138, %c0_139] : memref<2x1x64xf32, #tpu.memory_space<vmem>>, vector<1x1x64xf32>
    %250 = vector.shape_cast %249 : vector<1x1x64xf32> to vector<1x64xf32>
    %251 = arith.mulf %248, %248 : vector<16x64xf32>
    %cst_140 = arith.constant dense<0.000000e+00> : vector<16xf32>
    %252 = vector.multi_reduction <add>, %251, %cst_140 [1] : vector<16x64xf32> to vector<16xf32>
    %253 = vector.shape_cast %252 : vector<16xf32> to vector<16x1xf32>
    %cst_141 = arith.constant 6.400000e+01 : f32
    %254 = vector.broadcast %cst_141 : f32 to vector<16x1xf32>
    %255 = arith.divf %253, %254 : vector<16x1xf32>
    %cst_142 = arith.constant 9.99999997E-7 : f32
    %256 = vector.broadcast %cst_142 : f32 to vector<16x1xf32>
    %257 = arith.addf %255, %256 : vector<16x1xf32>
    %258 = math.rsqrt %257 : vector<16x1xf32>
    %259 = vector.broadcast %258 : vector<16x1xf32> to vector<16x64xf32>
    %260 = arith.mulf %248, %259 : vector<16x64xf32>
    %261 = vector.broadcast %250 : vector<1x64xf32> to vector<16x64xf32>
    %262 = arith.mulf %260, %261 : vector<16x64xf32>
    %263 = arith.truncf %262 : vector<16x64xf32> to vector<16x64xbf16>
    %c1_143 = arith.constant 1 : index
    %c0_144 = arith.constant 0 : index
    %c0_145 = arith.constant 0 : index
    %264 = vector.load %arg4[%c1_143, %c0_144, %c0_145] : memref<2x64x192xbf16, #tpu.memory_space<vmem>>, vector<1x64x192xbf16>
    %265 = vector.shape_cast %264 : vector<1x64x192xbf16> to vector<64x192xbf16>
    %cst_146 = arith.constant dense<0.000000e+00> : vector<16x192xf32>
    %266 = tpu.matmul %263, %265, %cst_146 {dimension_numbers = #tpu.dot_dimension_numbers<[1], [0], [0], [1], [0, 0, 1, 1], [], []>} : vector<16x64xbf16>, vector<64x192xbf16>, vector<16x192xf32> -> vector<16x192xf32>
    %c0_147 = arith.constant 0 : index
    %c0_148 = arith.constant 0 : index
    %267 = vector.load %arg26[%c0_147, %c0_148] : memref<16x192xf32, #tpu.memory_space<vmem>>, vector<16x192xf32>
    tpu.vector_store %arg26[%c0_147, %c0_148], %266 {strides = array<i32>} : memref<16x192xf32, #tpu.memory_space<vmem>>, vector<16x192xf32>,
    %c0_149 = arith.constant 0 : index
    %c0_150 = arith.constant 0 : index
    %268 = vector.load %arg26[%c0_149, %c0_150] : memref<16x192xf32, #tpu.memory_space<vmem>>, vector<8x16xf32>
    %269 = arith.truncf %268 : vector<8x16xf32> to vector<8x16xbf16>
    %c0_151 = arith.constant 0 : index
    %c64_152 = arith.constant 64 : index
    %270 = vector.load %arg26[%c0_151, %c64_152] : memref<16x192xf32, #tpu.memory_space<vmem>>, vector<8x16xf32>
    %271 = arith.truncf %270 : vector<8x16xf32> to vector<8x16xbf16>
    %c0_153 = arith.constant 0 : index
    %c128_154 = arith.constant 128 : index
    %272 = vector.load %arg26[%c0_153, %c128_154] : memref<16x192xf32, #tpu.memory_space<vmem>>, vector<8x16xf32>
    %273 = arith.truncf %272 : vector<8x16xf32> to vector<8x16xbf16>
    "tpu.trace_start"() <{level = 10 : i32, message = "qd,kd->qk"}> : () -> ()
    %cst_155 = arith.constant dense<0.000000e+00> : vector<8x8xf32>
    %274 = tpu.matmul %269, %271, %cst_155 {dimension_numbers = #tpu.dot_dimension_numbers<[1], [1], [0], [0], [0, 0, 1, 0], [], []>} : vector<8x16xbf16>, vector<8x16xbf16>, vector<8x8xf32> -> vector<8x8xf32>
    "tpu.trace_stop"() : () -> ()
    %c0_156 = arith.constant 0 : index
    %c0_157 = arith.constant 0 : index
    %c0_158 = arith.constant 0 : index
    %275 = vector.load %arg1[%c0_156, %c0_157, %c0_158] : memref<8x8x8xf32, #tpu.memory_space<vmem>>, vector<1x8x8xf32>
    %276 = vector.shape_cast %275 : vector<1x8x8xf32> to vector<8x8xf32>
    %277 = arith.addf %274, %276 : vector<8x8xf32>
    %cst_159 = arith.constant dense<0xFF800000> : vector<8xf32>
    %278 = vector.multi_reduction <maximumf>, %277, %cst_159 [1] : vector<8x8xf32> to vector<8xf32>
    %279 = vector.shape_cast %278 : vector<8xf32> to vector<8x1xf32>
    %280 = vector.broadcast %279 : vector<8x1xf32> to vector<8x8xf32>
    %281 = arith.subf %277, %280 : vector<8x8xf32>
    %282 = math.exp %281 : vector<8x8xf32>
    %cst_160 = arith.constant dense<0.000000e+00> : vector<8xf32>
    %283 = vector.multi_reduction <add>, %282, %cst_160 [1] : vector<8x8xf32> to vector<8xf32>
    %284 = vector.shape_cast %283 : vector<8xf32> to vector<8x1xf32>
    %285 = tpu.reciprocal %284 {approx = true} : vector<8x1xf32> -> vector<8x1xf32>
    %286 = vector.broadcast %285 : vector<8x1xf32> to vector<8x8xf32>
    %287 = arith.mulf %282, %286 : vector<8x8xf32>
    %288 = arith.truncf %287 : vector<8x8xf32> to vector<8x8xbf16>
    %cst_161 = arith.constant dense<0.000000e+00> : vector<8x16xf32>
    %289 = tpu.matmul %288, %273, %cst_161 {dimension_numbers = #tpu.dot_dimension_numbers<[1], [0], [0], [1], [0, 0, 1, 1], [], []>} : vector<8x8xbf16>, vector<8x16xbf16>, vector<8x16xf32> -> vector<8x16xf32>
    %c0_162 = arith.constant 0 : index
    %c0_163 = arith.constant 0 : index
    %290 = vector.load %arg27[%c0_162, %c0_163] : memref<16x64xf32, #tpu.memory_space<vmem>>, vector<8x16xf32>
    tpu.vector_store %arg27[%c0_162, %c0_163], %289 {strides = array<i32>} : memref<16x64xf32, #tpu.memory_space<vmem>>, vector<8x16xf32>,
    %c0_164 = arith.constant 0 : index
    %c16_165 = arith.constant 16 : index
    %291 = vector.load %arg26[%c0_164, %c16_165] : memref<16x192xf32, #tpu.memory_space<vmem>>, vector<8x16xf32>
    %292 = arith.truncf %291 : vector<8x16xf32> to vector<8x16xbf16>
    %c0_166 = arith.constant 0 : index
    %c80_167 = arith.constant 80 : index
    %293 = vector.load %arg26[%c0_166, %c80_167] : memref<16x192xf32, #tpu.memory_space<vmem>>, vector<8x16xf32>
    %294 = arith.truncf %293 : vector<8x16xf32> to vector<8x16xbf16>
    %c0_168 = arith.constant 0 : index
    %c144_169 = arith.constant 144 : index
    %295 = vector.load %arg26[%c0_168, %c144_169] : memref<16x192xf32, #tpu.memory_space<vmem>>, vector<8x16xf32>
    %296 = arith.truncf %295 : vector<8x16xf32> to vector<8x16xbf16>
    "tpu.trace_start"() <{level = 10 : i32, message = "qd,kd->qk"}> : () -> ()
    %cst_170 = arith.constant dense<0.000000e+00> : vector<8x8xf32>
    %297 = tpu.matmul %292, %294, %cst_170 {dimension_numbers = #tpu.dot_dimension_numbers<[1], [1], [0], [0], [0, 0, 1, 0], [], []>} : vector<8x16xbf16>, vector<8x16xbf16>, vector<8x8xf32> -> vector<8x8xf32>
    "tpu.trace_stop"() : () -> ()
    %c1_171 = arith.constant 1 : index
    %c0_172 = arith.constant 0 : index
    %c0_173 = arith.constant 0 : index
    %298 = vector.load %arg1[%c1_171, %c0_172, %c0_173] : memref<8x8x8xf32, #tpu.memory_space<vmem>>, vector<1x8x8xf32>
    %299 = vector.shape_cast %298 : vector<1x8x8xf32> to vector<8x8xf32>
    %300 = arith.addf %297, %299 : vector<8x8xf32>
    %cst_174 = arith.constant dense<0xFF800000> : vector<8xf32>
    %301 = vector.multi_reduction <maximumf>, %300, %cst_174 [1] : vector<8x8xf32> to vector<8xf32>
    %302 = vector.shape_cast %301 : vector<8xf32> to vector<8x1xf32>
    %303 = vector.broadcast %302 : vector<8x1xf32> to vector<8x8xf32>
    %304 = arith.subf %300, %303 : vector<8x8xf32>
    %305 = math.exp %304 : vector<8x8xf32>
    %cst_175 = arith.constant dense<0.000000e+00> : vector<8xf32>
    %306 = vector.multi_reduction <add>, %305, %cst_175 [1] : vector<8x8xf32> to vector<8xf32>
    %307 = vector.shape_cast %306 : vector<8xf32> to vector<8x1xf32>
    %308 = tpu.reciprocal %307 {approx = true} : vector<8x1xf32> -> vector<8x1xf32>
    %309 = vector.broadcast %308 : vector<8x1xf32> to vector<8x8xf32>
    %310 = arith.mulf %305, %309 : vector<8x8xf32>
    %311 = arith.truncf %310 : vector<8x8xf32> to vector<8x8xbf16>
    %cst_176 = arith.constant dense<0.000000e+00> : vector<8x16xf32>
    %312 = tpu.matmul %311, %296, %cst_176 {dimension_numbers = #tpu.dot_dimension_numbers<[1], [0], [0], [1], [0, 0, 1, 1], [], []>} : vector<8x8xbf16>, vector<8x16xbf16>, vector<8x16xf32> -> vector<8x16xf32>
    %c0_177 = arith.constant 0 : index
    %c16_178 = arith.constant 16 : index
    %313 = vector.load %arg27[%c0_177, %c16_178] : memref<16x64xf32, #tpu.memory_space<vmem>>, vector<8x16xf32>
    tpu.vector_store %arg27[%c0_177, %c16_178], %312 {strides = array<i32>} : memref<16x64xf32, #tpu.memory_space<vmem>>, vector<8x16xf32>,
    %c0_179 = arith.constant 0 : index
    %c32_180 = arith.constant 32 : index
    %314 = vector.load %arg26[%c0_179, %c32_180] : memref<16x192xf32, #tpu.memory_space<vmem>>, vector<8x16xf32>
    %315 = arith.truncf %314 : vector<8x16xf32> to vector<8x16xbf16>
    %c0_181 = arith.constant 0 : index
    %c96_182 = arith.constant 96 : index
    %316 = vector.load %arg26[%c0_181, %c96_182] : memref<16x192xf32, #tpu.memory_space<vmem>>, vector<8x16xf32>
    %317 = arith.truncf %316 : vector<8x16xf32> to vector<8x16xbf16>
    %c0_183 = arith.constant 0 : index
    %c160_184 = arith.constant 160 : index
    %318 = vector.load %arg26[%c0_183, %c160_184] : memref<16x192xf32, #tpu.memory_space<vmem>>, vector<8x16xf32>
    %319 = arith.truncf %318 : vector<8x16xf32> to vector<8x16xbf16>
    "tpu.trace_start"() <{level = 10 : i32, message = "qd,kd->qk"}> : () -> ()
    %cst_185 = arith.constant dense<0.000000e+00> : vector<8x8xf32>
    %320 = tpu.matmul %315, %317, %cst_185 {dimension_numbers = #tpu.dot_dimension_numbers<[1], [1], [0], [0], [0, 0, 1, 0], [], []>} : vector<8x16xbf16>, vector<8x16xbf16>, vector<8x8xf32> -> vector<8x8xf32>
    "tpu.trace_stop"() : () -> ()
    %c2_186 = arith.constant 2 : index
    %c0_187 = arith.constant 0 : index
    %c0_188 = arith.constant 0 : index
    %321 = vector.load %arg1[%c2_186, %c0_187, %c0_188] : memref<8x8x8xf32, #tpu.memory_space<vmem>>, vector<1x8x8xf32>
    %322 = vector.shape_cast %321 : vector<1x8x8xf32> to vector<8x8xf32>
    %323 = arith.addf %320, %322 : vector<8x8xf32>
    %cst_189 = arith.constant dense<0xFF800000> : vector<8xf32>
    %324 = vector.multi_reduction <maximumf>, %323, %cst_189 [1] : vector<8x8xf32> to vector<8xf32>
    %325 = vector.shape_cast %324 : vector<8xf32> to vector<8x1xf32>
    %326 = vector.broadcast %325 : vector<8x1xf32> to vector<8x8xf32>
    %327 = arith.subf %323, %326 : vector<8x8xf32>
    %328 = math.exp %327 : vector<8x8xf32>
    %cst_190 = arith.constant dense<0.000000e+00> : vector<8xf32>
    %329 = vector.multi_reduction <add>, %328, %cst_190 [1] : vector<8x8xf32> to vector<8xf32>
    %330 = vector.shape_cast %329 : vector<8xf32> to vector<8x1xf32>
    %331 = tpu.reciprocal %330 {approx = true} : vector<8x1xf32> -> vector<8x1xf32>
    %332 = vector.broadcast %331 : vector<8x1xf32> to vector<8x8xf32>
    %333 = arith.mulf %328, %332 : vector<8x8xf32>
    %334 = arith.truncf %333 : vector<8x8xf32> to vector<8x8xbf16>
    %cst_191 = arith.constant dense<0.000000e+00> : vector<8x16xf32>
    %335 = tpu.matmul %334, %319, %cst_191 {dimension_numbers = #tpu.dot_dimension_numbers<[1], [0], [0], [1], [0, 0, 1, 1], [], []>} : vector<8x8xbf16>, vector<8x16xbf16>, vector<8x16xf32> -> vector<8x16xf32>
    %c0_192 = arith.constant 0 : index
    %c32_193 = arith.constant 32 : index
    %336 = vector.load %arg27[%c0_192, %c32_193] : memref<16x64xf32, #tpu.memory_space<vmem>>, vector<8x16xf32>
    tpu.vector_store %arg27[%c0_192, %c32_193], %335 {strides = array<i32>} : memref<16x64xf32, #tpu.memory_space<vmem>>, vector<8x16xf32>,
    %c0_194 = arith.constant 0 : index
    %c48_195 = arith.constant 48 : index
    %337 = vector.load %arg26[%c0_194, %c48_195] : memref<16x192xf32, #tpu.memory_space<vmem>>, vector<8x16xf32>
    %338 = arith.truncf %337 : vector<8x16xf32> to vector<8x16xbf16>
    %c0_196 = arith.constant 0 : index
    %c112_197 = arith.constant 112 : index
    %339 = vector.load %arg26[%c0_196, %c112_197] : memref<16x192xf32, #tpu.memory_space<vmem>>, vector<8x16xf32>
    %340 = arith.truncf %339 : vector<8x16xf32> to vector<8x16xbf16>
    %c0_198 = arith.constant 0 : index
    %c176_199 = arith.constant 176 : index
    %341 = vector.load %arg26[%c0_198, %c176_199] : memref<16x192xf32, #tpu.memory_space<vmem>>, vector<8x16xf32>
    %342 = arith.truncf %341 : vector<8x16xf32> to vector<8x16xbf16>
    "tpu.trace_start"() <{level = 10 : i32, message = "qd,kd->qk"}> : () -> ()
    %cst_200 = arith.constant dense<0.000000e+00> : vector<8x8xf32>
    %343 = tpu.matmul %338, %340, %cst_200 {dimension_numbers = #tpu.dot_dimension_numbers<[1], [1], [0], [0], [0, 0, 1, 0], [], []>} : vector<8x16xbf16>, vector<8x16xbf16>, vector<8x8xf32> -> vector<8x8xf32>
    "tpu.trace_stop"() : () -> ()
    %c3_201 = arith.constant 3 : index
    %c0_202 = arith.constant 0 : index
    %c0_203 = arith.constant 0 : index
    %344 = vector.load %arg1[%c3_201, %c0_202, %c0_203] : memref<8x8x8xf32, #tpu.memory_space<vmem>>, vector<1x8x8xf32>
    %345 = vector.shape_cast %344 : vector<1x8x8xf32> to vector<8x8xf32>
    %346 = arith.addf %343, %345 : vector<8x8xf32>
    %cst_204 = arith.constant dense<0xFF800000> : vector<8xf32>
    %347 = vector.multi_reduction <maximumf>, %346, %cst_204 [1] : vector<8x8xf32> to vector<8xf32>
    %348 = vector.shape_cast %347 : vector<8xf32> to vector<8x1xf32>
    %349 = vector.broadcast %348 : vector<8x1xf32> to vector<8x8xf32>
    %350 = arith.subf %346, %349 : vector<8x8xf32>
    %351 = math.exp %350 : vector<8x8xf32>
    %cst_205 = arith.constant dense<0.000000e+00> : vector<8xf32>
    %352 = vector.multi_reduction <add>, %351, %cst_205 [1] : vector<8x8xf32> to vector<8xf32>
    %353 = vector.shape_cast %352 : vector<8xf32> to vector<8x1xf32>
    %354 = tpu.reciprocal %353 {approx = true} : vector<8x1xf32> -> vector<8x1xf32>
    %355 = vector.broadcast %354 : vector<8x1xf32> to vector<8x8xf32>
    %356 = arith.mulf %351, %355 : vector<8x8xf32>
    %357 = arith.truncf %356 : vector<8x8xf32> to vector<8x8xbf16>
    %cst_206 = arith.constant dense<0.000000e+00> : vector<8x16xf32>
    %358 = tpu.matmul %357, %342, %cst_206 {dimension_numbers = #tpu.dot_dimension_numbers<[1], [0], [0], [1], [0, 0, 1, 1], [], []>} : vector<8x8xbf16>, vector<8x16xbf16>, vector<8x16xf32> -> vector<8x16xf32>
    %c0_207 = arith.constant 0 : index
    %c48_208 = arith.constant 48 : index
    %359 = vector.load %arg27[%c0_207, %c48_208] : memref<16x64xf32, #tpu.memory_space<vmem>>, vector<8x16xf32>
    tpu.vector_store %arg27[%c0_207, %c48_208], %358 {strides = array<i32>} : memref<16x64xf32, #tpu.memory_space<vmem>>, vector<8x16xf32>,
    %c8_209 = arith.constant 8 : index
    %c0_210 = arith.constant 0 : index
    %360 = vector.load %arg26[%c8_209, %c0_210] : memref<16x192xf32, #tpu.memory_space<vmem>>, vector<8x16xf32>
    %361 = arith.truncf %360 : vector<8x16xf32> to vector<8x16xbf16>
    %c8_211 = arith.constant 8 : index
    %c64_212 = arith.constant 64 : index
    %362 = vector.load %arg26[%c8_211, %c64_212] : memref<16x192xf32, #tpu.memory_space<vmem>>, vector<8x16xf32>
    %363 = arith.truncf %362 : vector<8x16xf32> to vector<8x16xbf16>
    %c8_213 = arith.constant 8 : index
    %c128_214 = arith.constant 128 : index
    %364 = vector.load %arg26[%c8_213, %c128_214] : memref<16x192xf32, #tpu.memory_space<vmem>>, vector<8x16xf32>
    %365 = arith.truncf %364 : vector<8x16xf32> to vector<8x16xbf16>
    "tpu.trace_start"() <{level = 10 : i32, message = "qd,kd->qk"}> : () -> ()
    %cst_215 = arith.constant dense<0.000000e+00> : vector<8x8xf32>
    %366 = tpu.matmul %361, %363, %cst_215 {dimension_numbers = #tpu.dot_dimension_numbers<[1], [1], [0], [0], [0, 0, 1, 0], [], []>} : vector<8x16xbf16>, vector<8x16xbf16>, vector<8x8xf32> -> vector<8x8xf32>
    "tpu.trace_stop"() : () -> ()
    %c4_216 = arith.constant 4 : index
    %c0_217 = arith.constant 0 : index
    %c0_218 = arith.constant 0 : index
    %367 = vector.load %arg1[%c4_216, %c0_217, %c0_218] : memref<8x8x8xf32, #tpu.memory_space<vmem>>, vector<1x8x8xf32>
    %368 = vector.shape_cast %367 : vector<1x8x8xf32> to vector<8x8xf32>
    %369 = arith.addf %366, %368 : vector<8x8xf32>
    %cst_219 = arith.constant dense<0xFF800000> : vector<8xf32>
    %370 = vector.multi_reduction <maximumf>, %369, %cst_219 [1] : vector<8x8xf32> to vector<8xf32>
    %371 = vector.shape_cast %370 : vector<8xf32> to vector<8x1xf32>
    %372 = vector.broadcast %371 : vector<8x1xf32> to vector<8x8xf32>
    %373 = arith.subf %369, %372 : vector<8x8xf32>
    %374 = math.exp %373 : vector<8x8xf32>
    %cst_220 = arith.constant dense<0.000000e+00> : vector<8xf32>
    %375 = vector.multi_reduction <add>, %374, %cst_220 [1] : vector<8x8xf32> to vector<8xf32>
    %376 = vector.shape_cast %375 : vector<8xf32> to vector<8x1xf32>
    %377 = tpu.reciprocal %376 {approx = true} : vector<8x1xf32> -> vector<8x1xf32>
    %378 = vector.broadcast %377 : vector<8x1xf32> to vector<8x8xf32>
    %379 = arith.mulf %374, %378 : vector<8x8xf32>
    %380 = arith.truncf %379 : vector<8x8xf32> to vector<8x8xbf16>
    %cst_221 = arith.constant dense<0.000000e+00> : vector<8x16xf32>
    %381 = tpu.matmul %380, %365, %cst_221 {dimension_numbers = #tpu.dot_dimension_numbers<[1], [0], [0], [1], [0, 0, 1, 1], [], []>} : vector<8x8xbf16>, vector<8x16xbf16>, vector<8x16xf32> -> vector<8x16xf32>
    %c8_222 = arith.constant 8 : index
    %c0_223 = arith.constant 0 : index
    %382 = vector.load %arg27[%c8_222, %c0_223] : memref<16x64xf32, #tpu.memory_space<vmem>>, vector<8x16xf32>
    tpu.vector_store %arg27[%c8_222, %c0_223], %381 {strides = array<i32>} : memref<16x64xf32, #tpu.memory_space<vmem>>, vector<8x16xf32>,
    %c8_224 = arith.constant 8 : index
    %c16_225 = arith.constant 16 : index
    %383 = vector.load %arg26[%c8_224, %c16_225] : memref<16x192xf32, #tpu.memory_space<vmem>>, vector<8x16xf32>
    %384 = arith.truncf %383 : vector<8x16xf32> to vector<8x16xbf16>
    %c8_226 = arith.constant 8 : index
    %c80_227 = arith.constant 80 : index
    %385 = vector.load %arg26[%c8_226, %c80_227] : memref<16x192xf32, #tpu.memory_space<vmem>>, vector<8x16xf32>
    %386 = arith.truncf %385 : vector<8x16xf32> to vector<8x16xbf16>
    %c8_228 = arith.constant 8 : index
    %c144_229 = arith.constant 144 : index
    %387 = vector.load %arg26[%c8_228, %c144_229] : memref<16x192xf32, #tpu.memory_space<vmem>>, vector<8x16xf32>
    %388 = arith.truncf %387 : vector<8x16xf32> to vector<8x16xbf16>
    "tpu.trace_start"() <{level = 10 : i32, message = "qd,kd->qk"}> : () -> ()
    %cst_230 = arith.constant dense<0.000000e+00> : vector<8x8xf32>
    %389 = tpu.matmul %384, %386, %cst_230 {dimension_numbers = #tpu.dot_dimension_numbers<[1], [1], [0], [0], [0, 0, 1, 0], [], []>} : vector<8x16xbf16>, vector<8x16xbf16>, vector<8x8xf32> -> vector<8x8xf32>
    "tpu.trace_stop"() : () -> ()
    %c5_231 = arith.constant 5 : index
    %c0_232 = arith.constant 0 : index
    %c0_233 = arith.constant 0 : index
    %390 = vector.load %arg1[%c5_231, %c0_232, %c0_233] : memref<8x8x8xf32, #tpu.memory_space<vmem>>, vector<1x8x8xf32>
    %391 = vector.shape_cast %390 : vector<1x8x8xf32> to vector<8x8xf32>
    %392 = arith.addf %389, %391 : vector<8x8xf32>
    %cst_234 = arith.constant dense<0xFF800000> : vector<8xf32>
    %393 = vector.multi_reduction <maximumf>, %392, %cst_234 [1] : vector<8x8xf32> to vector<8xf32>
    %394 = vector.shape_cast %393 : vector<8xf32> to vector<8x1xf32>
    %395 = vector.broadcast %394 : vector<8x1xf32> to vector<8x8xf32>
    %396 = arith.subf %392, %395 : vector<8x8xf32>
    %397 = math.exp %396 : vector<8x8xf32>
    %cst_235 = arith.constant dense<0.000000e+00> : vector<8xf32>
    %398 = vector.multi_reduction <add>, %397, %cst_235 [1] : vector<8x8xf32> to vector<8xf32>
    %399 = vector.shape_cast %398 : vector<8xf32> to vector<8x1xf32>
    %400 = tpu.reciprocal %399 {approx = true} : vector<8x1xf32> -> vector<8x1xf32>
    %401 = vector.broadcast %400 : vector<8x1xf32> to vector<8x8xf32>
    %402 = arith.mulf %397, %401 : vector<8x8xf32>
    %403 = arith.truncf %402 : vector<8x8xf32> to vector<8x8xbf16>
    %cst_236 = arith.constant dense<0.000000e+00> : vector<8x16xf32>
    %404 = tpu.matmul %403, %388, %cst_236 {dimension_numbers = #tpu.dot_dimension_numbers<[1], [0], [0], [1], [0, 0, 1, 1], [], []>} : vector<8x8xbf16>, vector<8x16xbf16>, vector<8x16xf32> -> vector<8x16xf32>
    %c8_237 = arith.constant 8 : index
    %c16_238 = arith.constant 16 : index
    %405 = vector.load %arg27[%c8_237, %c16_238] : memref<16x64xf32, #tpu.memory_space<vmem>>, vector<8x16xf32>
    tpu.vector_store %arg27[%c8_237, %c16_238], %404 {strides = array<i32>} : memref<16x64xf32, #tpu.memory_space<vmem>>, vector<8x16xf32>,
    %c8_239 = arith.constant 8 : index
    %c32_240 = arith.constant 32 : index
    %406 = vector.load %arg26[%c8_239, %c32_240] : memref<16x192xf32, #tpu.memory_space<vmem>>, vector<8x16xf32>
    %407 = arith.truncf %406 : vector<8x16xf32> to vector<8x16xbf16>
    %c8_241 = arith.constant 8 : index
    %c96_242 = arith.constant 96 : index
    %408 = vector.load %arg26[%c8_241, %c96_242] : memref<16x192xf32, #tpu.memory_space<vmem>>, vector<8x16xf32>
    %409 = arith.truncf %408 : vector<8x16xf32> to vector<8x16xbf16>
    %c8_243 = arith.constant 8 : index
    %c160_244 = arith.constant 160 : index
    %410 = vector.load %arg26[%c8_243, %c160_244] : memref<16x192xf32, #tpu.memory_space<vmem>>, vector<8x16xf32>
    %411 = arith.truncf %410 : vector<8x16xf32> to vector<8x16xbf16>
    "tpu.trace_start"() <{level = 10 : i32, message = "qd,kd->qk"}> : () -> ()
    %cst_245 = arith.constant dense<0.000000e+00> : vector<8x8xf32>
    %412 = tpu.matmul %407, %409, %cst_245 {dimension_numbers = #tpu.dot_dimension_numbers<[1], [1], [0], [0], [0, 0, 1, 0], [], []>} : vector<8x16xbf16>, vector<8x16xbf16>, vector<8x8xf32> -> vector<8x8xf32>
    "tpu.trace_stop"() : () -> ()
    %c6_246 = arith.constant 6 : index
    %c0_247 = arith.constant 0 : index
    %c0_248 = arith.constant 0 : index
    %413 = vector.load %arg1[%c6_246, %c0_247, %c0_248] : memref<8x8x8xf32, #tpu.memory_space<vmem>>, vector<1x8x8xf32>
    %414 = vector.shape_cast %413 : vector<1x8x8xf32> to vector<8x8xf32>
    %415 = arith.addf %412, %414 : vector<8x8xf32>
    %cst_249 = arith.constant dense<0xFF800000> : vector<8xf32>
    %416 = vector.multi_reduction <maximumf>, %415, %cst_249 [1] : vector<8x8xf32> to vector<8xf32>
    %417 = vector.shape_cast %416 : vector<8xf32> to vector<8x1xf32>
    %418 = vector.broadcast %417 : vector<8x1xf32> to vector<8x8xf32>
    %419 = arith.subf %415, %418 : vector<8x8xf32>
    %420 = math.exp %419 : vector<8x8xf32>
    %cst_250 = arith.constant dense<0.000000e+00> : vector<8xf32>
    %421 = vector.multi_reduction <add>, %420, %cst_250 [1] : vector<8x8xf32> to vector<8xf32>
    %422 = vector.shape_cast %421 : vector<8xf32> to vector<8x1xf32>
    %423 = tpu.reciprocal %422 {approx = true} : vector<8x1xf32> -> vector<8x1xf32>
    %424 = vector.broadcast %423 : vector<8x1xf32> to vector<8x8xf32>
    %425 = arith.mulf %420, %424 : vector<8x8xf32>
    %426 = arith.truncf %425 : vector<8x8xf32> to vector<8x8xbf16>
    %cst_251 = arith.constant dense<0.000000e+00> : vector<8x16xf32>
    %427 = tpu.matmul %426, %411, %cst_251 {dimension_numbers = #tpu.dot_dimension_numbers<[1], [0], [0], [1], [0, 0, 1, 1], [], []>} : vector<8x8xbf16>, vector<8x16xbf16>, vector<8x16xf32> -> vector<8x16xf32>
    %c8_252 = arith.constant 8 : index
    %c32_253 = arith.constant 32 : index
    %428 = vector.load %arg27[%c8_252, %c32_253] : memref<16x64xf32, #tpu.memory_space<vmem>>, vector<8x16xf32>
    tpu.vector_store %arg27[%c8_252, %c32_253], %427 {strides = array<i32>} : memref<16x64xf32, #tpu.memory_space<vmem>>, vector<8x16xf32>,
    %c8_254 = arith.constant 8 : index
    %c48_255 = arith.constant 48 : index
    %429 = vector.load %arg26[%c8_254, %c48_255] : memref<16x192xf32, #tpu.memory_space<vmem>>, vector<8x16xf32>
    %430 = arith.truncf %429 : vector<8x16xf32> to vector<8x16xbf16>
    %c8_256 = arith.constant 8 : index
    %c112_257 = arith.constant 112 : index
    %431 = vector.load %arg26[%c8_256, %c112_257] : memref<16x192xf32, #tpu.memory_space<vmem>>, vector<8x16xf32>
    %432 = arith.truncf %431 : vector<8x16xf32> to vector<8x16xbf16>
    %c8_258 = arith.constant 8 : index
    %c176_259 = arith.constant 176 : index
    %433 = vector.load %arg26[%c8_258, %c176_259] : memref<16x192xf32, #tpu.memory_space<vmem>>, vector<8x16xf32>
    %434 = arith.truncf %433 : vector<8x16xf32> to vector<8x16xbf16>
    "tpu.trace_start"() <{level = 10 : i32, message = "qd,kd->qk"}> : () -> ()
    %cst_260 = arith.constant dense<0.000000e+00> : vector<8x8xf32>
    %435 = tpu.matmul %430, %432, %cst_260 {dimension_numbers = #tpu.dot_dimension_numbers<[1], [1], [0], [0], [0, 0, 1, 0], [], []>} : vector<8x16xbf16>, vector<8x16xbf16>, vector<8x8xf32> -> vector<8x8xf32>
    "tpu.trace_stop"() : () -> ()
    %c7_261 = arith.constant 7 : index
    %c0_262 = arith.constant 0 : index
    %c0_263 = arith.constant 0 : index
    %436 = vector.load %arg1[%c7_261, %c0_262, %c0_263] : memref<8x8x8xf32, #tpu.memory_space<vmem>>, vector<1x8x8xf32>
    %437 = vector.shape_cast %436 : vector<1x8x8xf32> to vector<8x8xf32>
    %438 = arith.addf %435, %437 : vector<8x8xf32>
    %cst_264 = arith.constant dense<0xFF800000> : vector<8xf32>
    %439 = vector.multi_reduction <maximumf>, %438, %cst_264 [1] : vector<8x8xf32> to vector<8xf32>
    %440 = vector.shape_cast %439 : vector<8xf32> to vector<8x1xf32>
    %441 = vector.broadcast %440 : vector<8x1xf32> to vector<8x8xf32>
    %442 = arith.subf %438, %441 : vector<8x8xf32>
    %443 = math.exp %442 : vector<8x8xf32>
    %cst_265 = arith.constant dense<0.000000e+00> : vector<8xf32>
    %444 = vector.multi_reduction <add>, %443, %cst_265 [1] : vector<8x8xf32> to vector<8xf32>
    %445 = vector.shape_cast %444 : vector<8xf32> to vector<8x1xf32>
    %446 = tpu.reciprocal %445 {approx = true} : vector<8x1xf32> -> vector<8x1xf32>
    %447 = vector.broadcast %446 : vector<8x1xf32> to vector<8x8xf32>
    %448 = arith.mulf %443, %447 : vector<8x8xf32>
    %449 = arith.truncf %448 : vector<8x8xf32> to vector<8x8xbf16>
    %cst_266 = arith.constant dense<0.000000e+00> : vector<8x16xf32>
    %450 = tpu.matmul %449, %434, %cst_266 {dimension_numbers = #tpu.dot_dimension_numbers<[1], [0], [0], [1], [0, 0, 1, 1], [], []>} : vector<8x8xbf16>, vector<8x16xbf16>, vector<8x16xf32> -> vector<8x16xf32>
    %c8_267 = arith.constant 8 : index
    %c48_268 = arith.constant 48 : index
    %451 = vector.load %arg27[%c8_267, %c48_268] : memref<16x64xf32, #tpu.memory_space<vmem>>, vector<8x16xf32>
    tpu.vector_store %arg27[%c8_267, %c48_268], %450 {strides = array<i32>} : memref<16x64xf32, #tpu.memory_space<vmem>>, vector<8x16xf32>,
    %c0_269 = arith.constant 0 : index
    %c0_270 = arith.constant 0 : index
    %452 = vector.load %arg27[%c0_269, %c0_270] : memref<16x64xf32, #tpu.memory_space<vmem>>, vector<16x64xf32>
    %453 = arith.truncf %452 : vector<16x64xf32> to vector<16x64xbf16>
    %c1_271 = arith.constant 1 : index
    %c0_272 = arith.constant 0 : index
    %c0_273 = arith.constant 0 : index
    %454 = vector.load %arg5[%c1_271, %c0_272, %c0_273] : memref<2x64x64xbf16, #tpu.memory_space<vmem>>, vector<1x64x64xbf16>
    %455 = vector.shape_cast %454 : vector<1x64x64xbf16> to vector<64x64xbf16>
    %cst_274 = arith.constant dense<0.000000e+00> : vector<16x64xf32>
    %456 = tpu.matmul %453, %455, %cst_274 {dimension_numbers = #tpu.dot_dimension_numbers<[1], [0], [0], [1], [0, 0, 1, 1], [], []>} : vector<16x64xbf16>, vector<64x64xbf16>, vector<16x64xf32> -> vector<16x64xf32>
    %457 = arith.addf %248, %456 : vector<16x64xf32>
    %c1_275 = arith.constant 1 : index
    %c0_276 = arith.constant 0 : index
    %c0_277 = arith.constant 0 : index
    %458 = vector.load %arg9[%c1_275, %c0_276, %c0_277] : memref<2x1x64xf32, #tpu.memory_space<vmem>>, vector<1x1x64xf32>
    %459 = vector.shape_cast %458 : vector<1x1x64xf32> to vector<1x64xf32>
    %460 = arith.mulf %457, %457 : vector<16x64xf32>
    %cst_278 = arith.constant dense<0.000000e+00> : vector<16xf32>
    %461 = vector.multi_reduction <add>, %460, %cst_278 [1] : vector<16x64xf32> to vector<16xf32>
    %462 = vector.shape_cast %461 : vector<16xf32> to vector<16x1xf32>
    %cst_279 = arith.constant 6.400000e+01 : f32
    %463 = vector.broadcast %cst_279 : f32 to vector<16x1xf32>
    %464 = arith.divf %462, %463 : vector<16x1xf32>
    %cst_280 = arith.constant 9.99999997E-7 : f32
    %465 = vector.broadcast %cst_280 : f32 to vector<16x1xf32>
    %466 = arith.addf %464, %465 : vector<16x1xf32>
    %467 = math.rsqrt %466 : vector<16x1xf32>
    %468 = vector.broadcast %467 : vector<16x1xf32> to vector<16x64xf32>
    %469 = arith.mulf %457, %468 : vector<16x64xf32>
    %470 = vector.broadcast %459 : vector<1x64xf32> to vector<16x64xf32>
    %471 = arith.mulf %469, %470 : vector<16x64xf32>
    %472 = arith.truncf %471 : vector<16x64xf32> to vector<16x64xbf16>
    %c1_281 = arith.constant 1 : index
    %c0_282 = arith.constant 0 : index
    %c0_283 = arith.constant 0 : index
    %473 = vector.load %arg7[%c1_281, %c0_282, %c0_283] : memref<2x64x256xbf16, #tpu.memory_space<vmem>>, vector<1x64x256xbf16>
    %474 = vector.shape_cast %473 : vector<1x64x256xbf16> to vector<64x256xbf16>
    %cst_284 = arith.constant dense<0.000000e+00> : vector<16x256xf32>
    %475 = tpu.matmul %472, %474, %cst_284 {dimension_numbers = #tpu.dot_dimension_numbers<[1], [0], [0], [1], [0, 0, 1, 1], [], []>} : vector<16x64xbf16>, vector<64x256xbf16>, vector<16x256xf32> -> vector<16x256xf32>
    %476 = vector.extract_strided_slice %475 {offsets = [0, 0], sizes = [16, 128], strides = [1, 1]} : vector<16x256xf32> to vector<16x128xf32>
    %477 = arith.mulf %476, %476 : vector<16x128xf32>
    %478 = arith.mulf %476, %477 : vector<16x128xf32>
    %cst_285 = arith.constant 4.471500e-02 : f32
    %479 = vector.broadcast %cst_285 : f32 to vector<16x128xf32>
    %480 = arith.mulf %479, %478 : vector<16x128xf32>
    %481 = arith.addf %476, %480 : vector<16x128xf32>
    %cst_286 = arith.constant 0.797884583 : f32
    %482 = vector.broadcast %cst_286 : f32 to vector<16x128xf32>
    %483 = arith.mulf %482, %481 : vector<16x128xf32>
    %484 = math.tanh %483 : vector<16x128xf32>
    %cst_287 = arith.constant 1.000000e+00 : f32
    %485 = vector.broadcast %cst_287 : f32 to vector<16x128xf32>
    %486 = arith.addf %485, %484 : vector<16x128xf32>
    %cst_288 = arith.constant 5.000000e-01 : f32
    %487 = vector.broadcast %cst_288 : f32 to vector<16x128xf32>
    %488 = arith.mulf %487, %486 : vector<16x128xf32>
    %489 = arith.mulf %476, %488 : vector<16x128xf32>
    %490 = vector.extract_strided_slice %475 {offsets = [0, 128], sizes = [16, 128], strides = [1, 1]} : vector<16x256xf32> to vector<16x128xf32>
    %491 = arith.mulf %489, %490 : vector<16x128xf32>
    %492 = arith.truncf %491 : vector<16x128xf32> to vector<16x128xbf16>
    %c1_289 = arith.constant 1 : index
    %c0_290 = arith.constant 0 : index
    %c0_291 = arith.constant 0 : index
    %493 = vector.load %arg8[%c1_289, %c0_290, %c0_291] : memref<2x128x64xbf16, #tpu.memory_space<vmem>>, vector<1x128x64xbf16>
    %494 = vector.shape_cast %493 : vector<1x128x64xbf16> to vector<128x64xbf16>
    %cst_292 = arith.constant dense<0.000000e+00> : vector<16x64xf32>
    %495 = tpu.matmul %492, %494, %cst_292 {dimension_numbers = #tpu.dot_dimension_numbers<[1], [0], [0], [1], [0, 0, 1, 1], [], []>} : vector<16x128xbf16>, vector<128x64xbf16>, vector<16x64xf32> -> vector<16x64xf32>
    %496 = arith.addf %457, %495 : vector<16x64xf32>
    %c0_293 = arith.constant 0 : index
    %c0_294 = arith.constant 0 : index
    %497 = vector.load %arg10[%c0_293, %c0_294] : memref<1x64xf32, #tpu.memory_space<vmem>>, vector<1x64xf32>
    %498 = arith.mulf %496, %496 : vector<16x64xf32>
    %cst_295 = arith.constant dense<0.000000e+00> : vector<16xf32>
    %499 = vector.multi_reduction <add>, %498, %cst_295 [1] : vector<16x64xf32> to vector<16xf32>
    %500 = vector.shape_cast %499 : vector<16xf32> to vector<16x1xf32>
    %cst_296 = arith.constant 6.400000e+01 : f32
    %501 = vector.broadcast %cst_296 : f32 to vector<16x1xf32>
    %502 = arith.divf %500, %501 : vector<16x1xf32>
    %cst_297 = arith.constant 9.99999997E-7 : f32
    %503 = vector.broadcast %cst_297 : f32 to vector<16x1xf32>
    %504 = arith.addf %502, %503 : vector<16x1xf32>
    %505 = math.rsqrt %504 : vector<16x1xf32>
    %506 = vector.broadcast %505 : vector<16x1xf32> to vector<16x64xf32>
    %507 = arith.mulf %496, %506 : vector<16x64xf32>
    %508 = vector.broadcast %497 : vector<1x64xf32> to vector<16x64xf32>
    %509 = arith.mulf %507, %508 : vector<16x64xf32>
    %510 = arith.truncf %509 : vector<16x64xf32> to vector<16x64xbf16>
    %c0_298 = arith.constant 0 : index
    %c0_299 = arith.constant 0 : index
    %511 = vector.load %arg0[%c0_298, %c0_299] : memref<16x64xf32, #tpu.memory_space<vmem>>, vector<16x64xf32>
    %c0_300 = arith.constant 0 : index
    %c0_301 = arith.constant 0 : index
    %c0_302 = arith.constant 0 : index
    %512 = vector.load %arg13[%c0_300, %c0_301, %c0_302] : memref<2x1x64xf32, #tpu.memory_space<vmem>>, vector<1x1x64xf32>
    %513 = vector.shape_cast %512 : vector<1x1x64xf32> to vector<1x64xf32>
    %514 = arith.mulf %511, %511 : vector<16x64xf32>
    %cst_303 = arith.constant dense<0.000000e+00> : vector<16xf32>
    %515 = vector.multi_reduction <add>, %514, %cst_303 [1] : vector<16x64xf32> to vector<16xf32>
    %516 = vector.shape_cast %515 : vector<16xf32> to vector<16x1xf32>
    %cst_304 = arith.constant 6.400000e+01 : f32
    %517 = vector.broadcast %cst_304 : f32 to vector<16x1xf32>
    %518 = arith.divf %516, %517 : vector<16x1xf32>
    %cst_305 = arith.constant 9.99999997E-7 : f32
    %519 = vector.broadcast %cst_305 : f32 to vector<16x1xf32>
    %520 = arith.addf %518, %519 : vector<16x1xf32>
    %521 = math.rsqrt %520 : vector<16x1xf32>
    %522 = vector.broadcast %521 : vector<16x1xf32> to vector<16x64xf32>
    %523 = arith.mulf %511, %522 : vector<16x64xf32>
    %524 = vector.broadcast %513 : vector<1x64xf32> to vector<16x64xf32>
    %525 = arith.mulf %523, %524 : vector<16x64xf32>
    %526 = arith.truncf %525 : vector<16x64xf32> to vector<16x64xbf16>
    %c0_306 = arith.constant 0 : index
    %c0_307 = arith.constant 0 : index
    %c0_308 = arith.constant 0 : index
    %527 = vector.load %arg11[%c0_306, %c0_307, %c0_308] : memref<2x64x192xbf16, #tpu.memory_space<vmem>>, vector<1x64x192xbf16>
    %528 = vector.shape_cast %527 : vector<1x64x192xbf16> to vector<64x192xbf16>
    %cst_309 = arith.constant dense<0.000000e+00> : vector<16x192xf32>
    %529 = tpu.matmul %526, %528, %cst_309 {dimension_numbers = #tpu.dot_dimension_numbers<[1], [0], [0], [1], [0, 0, 1, 1], [], []>} : vector<16x64xbf16>, vector<64x192xbf16>, vector<16x192xf32> -> vector<16x192xf32>
    %c0_310 = arith.constant 0 : index
    %c0_311 = arith.constant 0 : index
    %530 = vector.load %arg26[%c0_310, %c0_311] : memref<16x192xf32, #tpu.memory_space<vmem>>, vector<16x192xf32>
    tpu.vector_store %arg26[%c0_310, %c0_311], %529 {strides = array<i32>} : memref<16x192xf32, #tpu.memory_space<vmem>>, vector<16x192xf32>,
    %c0_312 = arith.constant 0 : index
    %c0_313 = arith.constant 0 : index
    %531 = vector.load %arg26[%c0_312, %c0_313] : memref<16x192xf32, #tpu.memory_space<vmem>>, vector<8x16xf32>
    %532 = arith.truncf %531 : vector<8x16xf32> to vector<8x16xbf16>
    %c0_314 = arith.constant 0 : index
    %c64_315 = arith.constant 64 : index
    %533 = vector.load %arg26[%c0_314, %c64_315] : memref<16x192xf32, #tpu.memory_space<vmem>>, vector<8x16xf32>
    %534 = arith.truncf %533 : vector<8x16xf32> to vector<8x16xbf16>
    %c0_316 = arith.constant 0 : index
    %c128_317 = arith.constant 128 : index
    %535 = vector.load %arg26[%c0_316, %c128_317] : memref<16x192xf32, #tpu.memory_space<vmem>>, vector<8x16xf32>
    %536 = arith.truncf %535 : vector<8x16xf32> to vector<8x16xbf16>
    "tpu.trace_start"() <{level = 10 : i32, message = "qd,kd->qk"}> : () -> ()
    %cst_318 = arith.constant dense<0.000000e+00> : vector<8x8xf32>
    %537 = tpu.matmul %532, %534, %cst_318 {dimension_numbers = #tpu.dot_dimension_numbers<[1], [1], [0], [0], [0, 0, 1, 0], [], []>} : vector<8x16xbf16>, vector<8x16xbf16>, vector<8x8xf32> -> vector<8x8xf32>
    "tpu.trace_stop"() : () -> ()
    %c0_319 = arith.constant 0 : index
    %c0_320 = arith.constant 0 : index
    %c0_321 = arith.constant 0 : index
    %538 = vector.load %arg2[%c0_319, %c0_320, %c0_321] : memref<8x8x8xf32, #tpu.memory_space<vmem>>, vector<1x8x8xf32>
    %539 = vector.shape_cast %538 : vector<1x8x8xf32> to vector<8x8xf32>
    %540 = arith.addf %537, %539 : vector<8x8xf32>
    %cst_322 = arith.constant dense<0xFF800000> : vector<8xf32>
    %541 = vector.multi_reduction <maximumf>, %540, %cst_322 [1] : vector<8x8xf32> to vector<8xf32>
    %542 = vector.shape_cast %541 : vector<8xf32> to vector<8x1xf32>
    %543 = vector.broadcast %542 : vector<8x1xf32> to vector<8x8xf32>
    %544 = arith.subf %540, %543 : vector<8x8xf32>
    %545 = math.exp %544 : vector<8x8xf32>
    %cst_323 = arith.constant dense<0.000000e+00> : vector<8xf32>
    %546 = vector.multi_reduction <add>, %545, %cst_323 [1] : vector<8x8xf32> to vector<8xf32>
    %547 = vector.shape_cast %546 : vector<8xf32> to vector<8x1xf32>
    %548 = tpu.reciprocal %547 {approx = true} : vector<8x1xf32> -> vector<8x1xf32>
    %549 = vector.broadcast %548 : vector<8x1xf32> to vector<8x8xf32>
    %550 = arith.mulf %545, %549 : vector<8x8xf32>
    %551 = arith.truncf %550 : vector<8x8xf32> to vector<8x8xbf16>
    %cst_324 = arith.constant dense<0.000000e+00> : vector<8x16xf32>
    %552 = tpu.matmul %551, %536, %cst_324 {dimension_numbers = #tpu.dot_dimension_numbers<[1], [0], [0], [1], [0, 0, 1, 1], [], []>} : vector<8x8xbf16>, vector<8x16xbf16>, vector<8x16xf32> -> vector<8x16xf32>
    %c0_325 = arith.constant 0 : index
    %c0_326 = arith.constant 0 : index
    %553 = vector.load %arg27[%c0_325, %c0_326] : memref<16x64xf32, #tpu.memory_space<vmem>>, vector<8x16xf32>
    tpu.vector_store %arg27[%c0_325, %c0_326], %552 {strides = array<i32>} : memref<16x64xf32, #tpu.memory_space<vmem>>, vector<8x16xf32>,
    %c0_327 = arith.constant 0 : index
    %c16_328 = arith.constant 16 : index
    %554 = vector.load %arg26[%c0_327, %c16_328] : memref<16x192xf32, #tpu.memory_space<vmem>>, vector<8x16xf32>
    %555 = arith.truncf %554 : vector<8x16xf32> to vector<8x16xbf16>
    %c0_329 = arith.constant 0 : index
    %c80_330 = arith.constant 80 : index
    %556 = vector.load %arg26[%c0_329, %c80_330] : memref<16x192xf32, #tpu.memory_space<vmem>>, vector<8x16xf32>
    %557 = arith.truncf %556 : vector<8x16xf32> to vector<8x16xbf16>
    %c0_331 = arith.constant 0 : index
    %c144_332 = arith.constant 144 : index
    %558 = vector.load %arg26[%c0_331, %c144_332] : memref<16x192xf32, #tpu.memory_space<vmem>>, vector<8x16xf32>
    %559 = arith.truncf %558 : vector<8x16xf32> to vector<8x16xbf16>
    "tpu.trace_start"() <{level = 10 : i32, message = "qd,kd->qk"}> : () -> ()
    %cst_333 = arith.constant dense<0.000000e+00> : vector<8x8xf32>
    %560 = tpu.matmul %555, %557, %cst_333 {dimension_numbers = #tpu.dot_dimension_numbers<[1], [1], [0], [0], [0, 0, 1, 0], [], []>} : vector<8x16xbf16>, vector<8x16xbf16>, vector<8x8xf32> -> vector<8x8xf32>
    "tpu.trace_stop"() : () -> ()
    %c1_334 = arith.constant 1 : index
    %c0_335 = arith.constant 0 : index
    %c0_336 = arith.constant 0 : index
    %561 = vector.load %arg2[%c1_334, %c0_335, %c0_336] : memref<8x8x8xf32, #tpu.memory_space<vmem>>, vector<1x8x8xf32>
    %562 = vector.shape_cast %561 : vector<1x8x8xf32> to vector<8x8xf32>
    %563 = arith.addf %560, %562 : vector<8x8xf32>
    %cst_337 = arith.constant dense<0xFF800000> : vector<8xf32>
    %564 = vector.multi_reduction <maximumf>, %563, %cst_337 [1] : vector<8x8xf32> to vector<8xf32>
    %565 = vector.shape_cast %564 : vector<8xf32> to vector<8x1xf32>
    %566 = vector.broadcast %565 : vector<8x1xf32> to vector<8x8xf32>
    %567 = arith.subf %563, %566 : vector<8x8xf32>
    %568 = math.exp %567 : vector<8x8xf32>
    %cst_338 = arith.constant dense<0.000000e+00> : vector<8xf32>
    %569 = vector.multi_reduction <add>, %568, %cst_338 [1] : vector<8x8xf32> to vector<8xf32>
    %570 = vector.shape_cast %569 : vector<8xf32> to vector<8x1xf32>
    %571 = tpu.reciprocal %570 {approx = true} : vector<8x1xf32> -> vector<8x1xf32>
    %572 = vector.broadcast %571 : vector<8x1xf32> to vector<8x8xf32>
    %573 = arith.mulf %568, %572 : vector<8x8xf32>
    %574 = arith.truncf %573 : vector<8x8xf32> to vector<8x8xbf16>
    %cst_339 = arith.constant dense<0.000000e+00> : vector<8x16xf32>
    %575 = tpu.matmul %574, %559, %cst_339 {dimension_numbers = #tpu.dot_dimension_numbers<[1], [0], [0], [1], [0, 0, 1, 1], [], []>} : vector<8x8xbf16>, vector<8x16xbf16>, vector<8x16xf32> -> vector<8x16xf32>
    %c0_340 = arith.constant 0 : index
    %c16_341 = arith.constant 16 : index
    %576 = vector.load %arg27[%c0_340, %c16_341] : memref<16x64xf32, #tpu.memory_space<vmem>>, vector<8x16xf32>
    tpu.vector_store %arg27[%c0_340, %c16_341], %575 {strides = array<i32>} : memref<16x64xf32, #tpu.memory_space<vmem>>, vector<8x16xf32>,
    %c0_342 = arith.constant 0 : index
    %c32_343 = arith.constant 32 : index
    %577 = vector.load %arg26[%c0_342, %c32_343] : memref<16x192xf32, #tpu.memory_space<vmem>>, vector<8x16xf32>
    %578 = arith.truncf %577 : vector<8x16xf32> to vector<8x16xbf16>
    %c0_344 = arith.constant 0 : index
    %c96_345 = arith.constant 96 : index
    %579 = vector.load %arg26[%c0_344, %c96_345] : memref<16x192xf32, #tpu.memory_space<vmem>>, vector<8x16xf32>
    %580 = arith.truncf %579 : vector<8x16xf32> to vector<8x16xbf16>
    %c0_346 = arith.constant 0 : index
    %c160_347 = arith.constant 160 : index
    %581 = vector.load %arg26[%c0_346, %c160_347] : memref<16x192xf32, #tpu.memory_space<vmem>>, vector<8x16xf32>
    %582 = arith.truncf %581 : vector<8x16xf32> to vector<8x16xbf16>
    "tpu.trace_start"() <{level = 10 : i32, message = "qd,kd->qk"}> : () -> ()
    %cst_348 = arith.constant dense<0.000000e+00> : vector<8x8xf32>
    %583 = tpu.matmul %578, %580, %cst_348 {dimension_numbers = #tpu.dot_dimension_numbers<[1], [1], [0], [0], [0, 0, 1, 0], [], []>} : vector<8x16xbf16>, vector<8x16xbf16>, vector<8x8xf32> -> vector<8x8xf32>
    "tpu.trace_stop"() : () -> ()
    %c2_349 = arith.constant 2 : index
    %c0_350 = arith.constant 0 : index
    %c0_351 = arith.constant 0 : index
    %584 = vector.load %arg2[%c2_349, %c0_350, %c0_351] : memref<8x8x8xf32, #tpu.memory_space<vmem>>, vector<1x8x8xf32>
    %585 = vector.shape_cast %584 : vector<1x8x8xf32> to vector<8x8xf32>
    %586 = arith.addf %583, %585 : vector<8x8xf32>
    %cst_352 = arith.constant dense<0xFF800000> : vector<8xf32>
    %587 = vector.multi_reduction <maximumf>, %586, %cst_352 [1] : vector<8x8xf32> to vector<8xf32>
    %588 = vector.shape_cast %587 : vector<8xf32> to vector<8x1xf32>
    %589 = vector.broadcast %588 : vector<8x1xf32> to vector<8x8xf32>
    %590 = arith.subf %586, %589 : vector<8x8xf32>
    %591 = math.exp %590 : vector<8x8xf32>
    %cst_353 = arith.constant dense<0.000000e+00> : vector<8xf32>
    %592 = vector.multi_reduction <add>, %591, %cst_353 [1] : vector<8x8xf32> to vector<8xf32>
    %593 = vector.shape_cast %592 : vector<8xf32> to vector<8x1xf32>
    %594 = tpu.reciprocal %593 {approx = true} : vector<8x1xf32> -> vector<8x1xf32>
    %595 = vector.broadcast %594 : vector<8x1xf32> to vector<8x8xf32>
    %596 = arith.mulf %591, %595 : vector<8x8xf32>
    %597 = arith.truncf %596 : vector<8x8xf32> to vector<8x8xbf16>
    %cst_354 = arith.constant dense<0.000000e+00> : vector<8x16xf32>
    %598 = tpu.matmul %597, %582, %cst_354 {dimension_numbers = #tpu.dot_dimension_numbers<[1], [0], [0], [1], [0, 0, 1, 1], [], []>} : vector<8x8xbf16>, vector<8x16xbf16>, vector<8x16xf32> -> vector<8x16xf32>
    %c0_355 = arith.constant 0 : index
    %c32_356 = arith.constant 32 : index
    %599 = vector.load %arg27[%c0_355, %c32_356] : memref<16x64xf32, #tpu.memory_space<vmem>>, vector<8x16xf32>
    tpu.vector_store %arg27[%c0_355, %c32_356], %598 {strides = array<i32>} : memref<16x64xf32, #tpu.memory_space<vmem>>, vector<8x16xf32>,
    %c0_357 = arith.constant 0 : index
    %c48_358 = arith.constant 48 : index
    %600 = vector.load %arg26[%c0_357, %c48_358] : memref<16x192xf32, #tpu.memory_space<vmem>>, vector<8x16xf32>
    %601 = arith.truncf %600 : vector<8x16xf32> to vector<8x16xbf16>
    %c0_359 = arith.constant 0 : index
    %c112_360 = arith.constant 112 : index
    %602 = vector.load %arg26[%c0_359, %c112_360] : memref<16x192xf32, #tpu.memory_space<vmem>>, vector<8x16xf32>
    %603 = arith.truncf %602 : vector<8x16xf32> to vector<8x16xbf16>
    %c0_361 = arith.constant 0 : index
    %c176_362 = arith.constant 176 : index
    %604 = vector.load %arg26[%c0_361, %c176_362] : memref<16x192xf32, #tpu.memory_space<vmem>>, vector<8x16xf32>
    %605 = arith.truncf %604 : vector<8x16xf32> to vector<8x16xbf16>
    "tpu.trace_start"() <{level = 10 : i32, message = "qd,kd->qk"}> : () -> ()
    %cst_363 = arith.constant dense<0.000000e+00> : vector<8x8xf32>
    %606 = tpu.matmul %601, %603, %cst_363 {dimension_numbers = #tpu.dot_dimension_numbers<[1], [1], [0], [0], [0, 0, 1, 0], [], []>} : vector<8x16xbf16>, vector<8x16xbf16>, vector<8x8xf32> -> vector<8x8xf32>
    "tpu.trace_stop"() : () -> ()
    %c3_364 = arith.constant 3 : index
    %c0_365 = arith.constant 0 : index
    %c0_366 = arith.constant 0 : index
    %607 = vector.load %arg2[%c3_364, %c0_365, %c0_366] : memref<8x8x8xf32, #tpu.memory_space<vmem>>, vector<1x8x8xf32>
    %608 = vector.shape_cast %607 : vector<1x8x8xf32> to vector<8x8xf32>
    %609 = arith.addf %606, %608 : vector<8x8xf32>
    %cst_367 = arith.constant dense<0xFF800000> : vector<8xf32>
    %610 = vector.multi_reduction <maximumf>, %609, %cst_367 [1] : vector<8x8xf32> to vector<8xf32>
    %611 = vector.shape_cast %610 : vector<8xf32> to vector<8x1xf32>
    %612 = vector.broadcast %611 : vector<8x1xf32> to vector<8x8xf32>
    %613 = arith.subf %609, %612 : vector<8x8xf32>
    %614 = math.exp %613 : vector<8x8xf32>
    %cst_368 = arith.constant dense<0.000000e+00> : vector<8xf32>
    %615 = vector.multi_reduction <add>, %614, %cst_368 [1] : vector<8x8xf32> to vector<8xf32>
    %616 = vector.shape_cast %615 : vector<8xf32> to vector<8x1xf32>
    %617 = tpu.reciprocal %616 {approx = true} : vector<8x1xf32> -> vector<8x1xf32>
    %618 = vector.broadcast %617 : vector<8x1xf32> to vector<8x8xf32>
    %619 = arith.mulf %614, %618 : vector<8x8xf32>
    %620 = arith.truncf %619 : vector<8x8xf32> to vector<8x8xbf16>
    %cst_369 = arith.constant dense<0.000000e+00> : vector<8x16xf32>
    %621 = tpu.matmul %620, %605, %cst_369 {dimension_numbers = #tpu.dot_dimension_numbers<[1], [0], [0], [1], [0, 0, 1, 1], [], []>} : vector<8x8xbf16>, vector<8x16xbf16>, vector<8x16xf32> -> vector<8x16xf32>
    %c0_370 = arith.constant 0 : index
    %c48_371 = arith.constant 48 : index
    %622 = vector.load %arg27[%c0_370, %c48_371] : memref<16x64xf32, #tpu.memory_space<vmem>>, vector<8x16xf32>
    tpu.vector_store %arg27[%c0_370, %c48_371], %621 {strides = array<i32>} : memref<16x64xf32, #tpu.memory_space<vmem>>, vector<8x16xf32>,
    %c8_372 = arith.constant 8 : index
    %c0_373 = arith.constant 0 : index
    %623 = vector.load %arg26[%c8_372, %c0_373] : memref<16x192xf32, #tpu.memory_space<vmem>>, vector<8x16xf32>
    %624 = arith.truncf %623 : vector<8x16xf32> to vector<8x16xbf16>
    %c8_374 = arith.constant 8 : index
    %c64_375 = arith.constant 64 : index
    %625 = vector.load %arg26[%c8_374, %c64_375] : memref<16x192xf32, #tpu.memory_space<vmem>>, vector<8x16xf32>
    %626 = arith.truncf %625 : vector<8x16xf32> to vector<8x16xbf16>
    %c8_376 = arith.constant 8 : index
    %c128_377 = arith.constant 128 : index
    %627 = vector.load %arg26[%c8_376, %c128_377] : memref<16x192xf32, #tpu.memory_space<vmem>>, vector<8x16xf32>
    %628 = arith.truncf %627 : vector<8x16xf32> to vector<8x16xbf16>
    "tpu.trace_start"() <{level = 10 : i32, message = "qd,kd->qk"}> : () -> ()
    %cst_378 = arith.constant dense<0.000000e+00> : vector<8x8xf32>
    %629 = tpu.matmul %624, %626, %cst_378 {dimension_numbers = #tpu.dot_dimension_numbers<[1], [1], [0], [0], [0, 0, 1, 0], [], []>} : vector<8x16xbf16>, vector<8x16xbf16>, vector<8x8xf32> -> vector<8x8xf32>
    "tpu.trace_stop"() : () -> ()
    %c4_379 = arith.constant 4 : index
    %c0_380 = arith.constant 0 : index
    %c0_381 = arith.constant 0 : index
    %630 = vector.load %arg2[%c4_379, %c0_380, %c0_381] : memref<8x8x8xf32, #tpu.memory_space<vmem>>, vector<1x8x8xf32>
    %631 = vector.shape_cast %630 : vector<1x8x8xf32> to vector<8x8xf32>
    %632 = arith.addf %629, %631 : vector<8x8xf32>
    %cst_382 = arith.constant dense<0xFF800000> : vector<8xf32>
    %633 = vector.multi_reduction <maximumf>, %632, %cst_382 [1] : vector<8x8xf32> to vector<8xf32>
    %634 = vector.shape_cast %633 : vector<8xf32> to vector<8x1xf32>
    %635 = vector.broadcast %634 : vector<8x1xf32> to vector<8x8xf32>
    %636 = arith.subf %632, %635 : vector<8x8xf32>
    %637 = math.exp %636 : vector<8x8xf32>
    %cst_383 = arith.constant dense<0.000000e+00> : vector<8xf32>
    %638 = vector.multi_reduction <add>, %637, %cst_383 [1] : vector<8x8xf32> to vector<8xf32>
    %639 = vector.shape_cast %638 : vector<8xf32> to vector<8x1xf32>
    %640 = tpu.reciprocal %639 {approx = true} : vector<8x1xf32> -> vector<8x1xf32>
    %641 = vector.broadcast %640 : vector<8x1xf32> to vector<8x8xf32>
    %642 = arith.mulf %637, %641 : vector<8x8xf32>
    %643 = arith.truncf %642 : vector<8x8xf32> to vector<8x8xbf16>
    %cst_384 = arith.constant dense<0.000000e+00> : vector<8x16xf32>
    %644 = tpu.matmul %643, %628, %cst_384 {dimension_numbers = #tpu.dot_dimension_numbers<[1], [0], [0], [1], [0, 0, 1, 1], [], []>} : vector<8x8xbf16>, vector<8x16xbf16>, vector<8x16xf32> -> vector<8x16xf32>
    %c8_385 = arith.constant 8 : index
    %c0_386 = arith.constant 0 : index
    %645 = vector.load %arg27[%c8_385, %c0_386] : memref<16x64xf32, #tpu.memory_space<vmem>>, vector<8x16xf32>
    tpu.vector_store %arg27[%c8_385, %c0_386], %644 {strides = array<i32>} : memref<16x64xf32, #tpu.memory_space<vmem>>, vector<8x16xf32>,
    %c8_387 = arith.constant 8 : index
    %c16_388 = arith.constant 16 : index
    %646 = vector.load %arg26[%c8_387, %c16_388] : memref<16x192xf32, #tpu.memory_space<vmem>>, vector<8x16xf32>
    %647 = arith.truncf %646 : vector<8x16xf32> to vector<8x16xbf16>
    %c8_389 = arith.constant 8 : index
    %c80_390 = arith.constant 80 : index
    %648 = vector.load %arg26[%c8_389, %c80_390] : memref<16x192xf32, #tpu.memory_space<vmem>>, vector<8x16xf32>
    %649 = arith.truncf %648 : vector<8x16xf32> to vector<8x16xbf16>
    %c8_391 = arith.constant 8 : index
    %c144_392 = arith.constant 144 : index
    %650 = vector.load %arg26[%c8_391, %c144_392] : memref<16x192xf32, #tpu.memory_space<vmem>>, vector<8x16xf32>
    %651 = arith.truncf %650 : vector<8x16xf32> to vector<8x16xbf16>
    "tpu.trace_start"() <{level = 10 : i32, message = "qd,kd->qk"}> : () -> ()
    %cst_393 = arith.constant dense<0.000000e+00> : vector<8x8xf32>
    %652 = tpu.matmul %647, %649, %cst_393 {dimension_numbers = #tpu.dot_dimension_numbers<[1], [1], [0], [0], [0, 0, 1, 0], [], []>} : vector<8x16xbf16>, vector<8x16xbf16>, vector<8x8xf32> -> vector<8x8xf32>
    "tpu.trace_stop"() : () -> ()
    %c5_394 = arith.constant 5 : index
    %c0_395 = arith.constant 0 : index
    %c0_396 = arith.constant 0 : index
    %653 = vector.load %arg2[%c5_394, %c0_395, %c0_396] : memref<8x8x8xf32, #tpu.memory_space<vmem>>, vector<1x8x8xf32>
    %654 = vector.shape_cast %653 : vector<1x8x8xf32> to vector<8x8xf32>
    %655 = arith.addf %652, %654 : vector<8x8xf32>
    %cst_397 = arith.constant dense<0xFF800000> : vector<8xf32>
    %656 = vector.multi_reduction <maximumf>, %655, %cst_397 [1] : vector<8x8xf32> to vector<8xf32>
    %657 = vector.shape_cast %656 : vector<8xf32> to vector<8x1xf32>
    %658 = vector.broadcast %657 : vector<8x1xf32> to vector<8x8xf32>
    %659 = arith.subf %655, %658 : vector<8x8xf32>
    %660 = math.exp %659 : vector<8x8xf32>
    %cst_398 = arith.constant dense<0.000000e+00> : vector<8xf32>
    %661 = vector.multi_reduction <add>, %660, %cst_398 [1] : vector<8x8xf32> to vector<8xf32>
    %662 = vector.shape_cast %661 : vector<8xf32> to vector<8x1xf32>
    %663 = tpu.reciprocal %662 {approx = true} : vector<8x1xf32> -> vector<8x1xf32>
    %664 = vector.broadcast %663 : vector<8x1xf32> to vector<8x8xf32>
    %665 = arith.mulf %660, %664 : vector<8x8xf32>
    %666 = arith.truncf %665 : vector<8x8xf32> to vector<8x8xbf16>
    %cst_399 = arith.constant dense<0.000000e+00> : vector<8x16xf32>
    %667 = tpu.matmul %666, %651, %cst_399 {dimension_numbers = #tpu.dot_dimension_numbers<[1], [0], [0], [1], [0, 0, 1, 1], [], []>} : vector<8x8xbf16>, vector<8x16xbf16>, vector<8x16xf32> -> vector<8x16xf32>
    %c8_400 = arith.constant 8 : index
    %c16_401 = arith.constant 16 : index
    %668 = vector.load %arg27[%c8_400, %c16_401] : memref<16x64xf32, #tpu.memory_space<vmem>>, vector<8x16xf32>
    tpu.vector_store %arg27[%c8_400, %c16_401], %667 {strides = array<i32>} : memref<16x64xf32, #tpu.memory_space<vmem>>, vector<8x16xf32>,
    %c8_402 = arith.constant 8 : index
    %c32_403 = arith.constant 32 : index
    %669 = vector.load %arg26[%c8_402, %c32_403] : memref<16x192xf32, #tpu.memory_space<vmem>>, vector<8x16xf32>
    %670 = arith.truncf %669 : vector<8x16xf32> to vector<8x16xbf16>
    %c8_404 = arith.constant 8 : index
    %c96_405 = arith.constant 96 : index
    %671 = vector.load %arg26[%c8_404, %c96_405] : memref<16x192xf32, #tpu.memory_space<vmem>>, vector<8x16xf32>
    %672 = arith.truncf %671 : vector<8x16xf32> to vector<8x16xbf16>
    %c8_406 = arith.constant 8 : index
    %c160_407 = arith.constant 160 : index
    %673 = vector.load %arg26[%c8_406, %c160_407] : memref<16x192xf32, #tpu.memory_space<vmem>>, vector<8x16xf32>
    %674 = arith.truncf %673 : vector<8x16xf32> to vector<8x16xbf16>
    "tpu.trace_start"() <{level = 10 : i32, message = "qd,kd->qk"}> : () -> ()
    %cst_408 = arith.constant dense<0.000000e+00> : vector<8x8xf32>
    %675 = tpu.matmul %670, %672, %cst_408 {dimension_numbers = #tpu.dot_dimension_numbers<[1], [1], [0], [0], [0, 0, 1, 0], [], []>} : vector<8x16xbf16>, vector<8x16xbf16>, vector<8x8xf32> -> vector<8x8xf32>
    "tpu.trace_stop"() : () -> ()
    %c6_409 = arith.constant 6 : index
    %c0_410 = arith.constant 0 : index
    %c0_411 = arith.constant 0 : index
    %676 = vector.load %arg2[%c6_409, %c0_410, %c0_411] : memref<8x8x8xf32, #tpu.memory_space<vmem>>, vector<1x8x8xf32>
    %677 = vector.shape_cast %676 : vector<1x8x8xf32> to vector<8x8xf32>
    %678 = arith.addf %675, %677 : vector<8x8xf32>
    %cst_412 = arith.constant dense<0xFF800000> : vector<8xf32>
    %679 = vector.multi_reduction <maximumf>, %678, %cst_412 [1] : vector<8x8xf32> to vector<8xf32>
    %680 = vector.shape_cast %679 : vector<8xf32> to vector<8x1xf32>
    %681 = vector.broadcast %680 : vector<8x1xf32> to vector<8x8xf32>
    %682 = arith.subf %678, %681 : vector<8x8xf32>
    %683 = math.exp %682 : vector<8x8xf32>
    %cst_413 = arith.constant dense<0.000000e+00> : vector<8xf32>
    %684 = vector.multi_reduction <add>, %683, %cst_413 [1] : vector<8x8xf32> to vector<8xf32>
    %685 = vector.shape_cast %684 : vector<8xf32> to vector<8x1xf32>
    %686 = tpu.reciprocal %685 {approx = true} : vector<8x1xf32> -> vector<8x1xf32>
    %687 = vector.broadcast %686 : vector<8x1xf32> to vector<8x8xf32>
    %688 = arith.mulf %683, %687 : vector<8x8xf32>
    %689 = arith.truncf %688 : vector<8x8xf32> to vector<8x8xbf16>
    %cst_414 = arith.constant dense<0.000000e+00> : vector<8x16xf32>
    %690 = tpu.matmul %689, %674, %cst_414 {dimension_numbers = #tpu.dot_dimension_numbers<[1], [0], [0], [1], [0, 0, 1, 1], [], []>} : vector<8x8xbf16>, vector<8x16xbf16>, vector<8x16xf32> -> vector<8x16xf32>
    %c8_415 = arith.constant 8 : index
    %c32_416 = arith.constant 32 : index
    %691 = vector.load %arg27[%c8_415, %c32_416] : memref<16x64xf32, #tpu.memory_space<vmem>>, vector<8x16xf32>
    tpu.vector_store %arg27[%c8_415, %c32_416], %690 {strides = array<i32>} : memref<16x64xf32, #tpu.memory_space<vmem>>, vector<8x16xf32>,
    %c8_417 = arith.constant 8 : index
    %c48_418 = arith.constant 48 : index
    %692 = vector.load %arg26[%c8_417, %c48_418] : memref<16x192xf32, #tpu.memory_space<vmem>>, vector<8x16xf32>
    %693 = arith.truncf %692 : vector<8x16xf32> to vector<8x16xbf16>
    %c8_419 = arith.constant 8 : index
    %c112_420 = arith.constant 112 : index
    %694 = vector.load %arg26[%c8_419, %c112_420] : memref<16x192xf32, #tpu.memory_space<vmem>>, vector<8x16xf32>
    %695 = arith.truncf %694 : vector<8x16xf32> to vector<8x16xbf16>
    %c8_421 = arith.constant 8 : index
    %c176_422 = arith.constant 176 : index
    %696 = vector.load %arg26[%c8_421, %c176_422] : memref<16x192xf32, #tpu.memory_space<vmem>>, vector<8x16xf32>
    %697 = arith.truncf %696 : vector<8x16xf32> to vector<8x16xbf16>
    "tpu.trace_start"() <{level = 10 : i32, message = "qd,kd->qk"}> : () -> ()
    %cst_423 = arith.constant dense<0.000000e+00> : vector<8x8xf32>
    %698 = tpu.matmul %693, %695, %cst_423 {dimension_numbers = #tpu.dot_dimension_numbers<[1], [1], [0], [0], [0, 0, 1, 0], [], []>} : vector<8x16xbf16>, vector<8x16xbf16>, vector<8x8xf32> -> vector<8x8xf32>
    "tpu.trace_stop"() : () -> ()
    %c7_424 = arith.constant 7 : index
    %c0_425 = arith.constant 0 : index
    %c0_426 = arith.constant 0 : index
    %699 = vector.load %arg2[%c7_424, %c0_425, %c0_426] : memref<8x8x8xf32, #tpu.memory_space<vmem>>, vector<1x8x8xf32>
    %700 = vector.shape_cast %699 : vector<1x8x8xf32> to vector<8x8xf32>
    %701 = arith.addf %698, %700 : vector<8x8xf32>
    %cst_427 = arith.constant dense<0xFF800000> : vector<8xf32>
    %702 = vector.multi_reduction <maximumf>, %701, %cst_427 [1] : vector<8x8xf32> to vector<8xf32>
    %703 = vector.shape_cast %702 : vector<8xf32> to vector<8x1xf32>
    %704 = vector.broadcast %703 : vector<8x1xf32> to vector<8x8xf32>
    %705 = arith.subf %701, %704 : vector<8x8xf32>
    %706 = math.exp %705 : vector<8x8xf32>
    %cst_428 = arith.constant dense<0.000000e+00> : vector<8xf32>
    %707 = vector.multi_reduction <add>, %706, %cst_428 [1] : vector<8x8xf32> to vector<8xf32>
    %708 = vector.shape_cast %707 : vector<8xf32> to vector<8x1xf32>
    %709 = tpu.reciprocal %708 {approx = true} : vector<8x1xf32> -> vector<8x1xf32>
    %710 = vector.broadcast %709 : vector<8x1xf32> to vector<8x8xf32>
    %711 = arith.mulf %706, %710 : vector<8x8xf32>
    %712 = arith.truncf %711 : vector<8x8xf32> to vector<8x8xbf16>
    %cst_429 = arith.constant dense<0.000000e+00> : vector<8x16xf32>
    %713 = tpu.matmul %712, %697, %cst_429 {dimension_numbers = #tpu.dot_dimension_numbers<[1], [0], [0], [1], [0, 0, 1, 1], [], []>} : vector<8x8xbf16>, vector<8x16xbf16>, vector<8x16xf32> -> vector<8x16xf32>
    %c8_430 = arith.constant 8 : index
    %c48_431 = arith.constant 48 : index
    %714 = vector.load %arg27[%c8_430, %c48_431] : memref<16x64xf32, #tpu.memory_space<vmem>>, vector<8x16xf32>
    tpu.vector_store %arg27[%c8_430, %c48_431], %713 {strides = array<i32>} : memref<16x64xf32, #tpu.memory_space<vmem>>, vector<8x16xf32>,
    %c0_432 = arith.constant 0 : index
    %c0_433 = arith.constant 0 : index
    %715 = vector.load %arg27[%c0_432, %c0_433] : memref<16x64xf32, #tpu.memory_space<vmem>>, vector<16x64xf32>
    %716 = arith.truncf %715 : vector<16x64xf32> to vector<16x64xbf16>
    %c0_434 = arith.constant 0 : index
    %c0_435 = arith.constant 0 : index
    %c0_436 = arith.constant 0 : index
    %717 = vector.load %arg12[%c0_434, %c0_435, %c0_436] : memref<2x64x64xbf16, #tpu.memory_space<vmem>>, vector<1x64x64xbf16>
    %718 = vector.shape_cast %717 : vector<1x64x64xbf16> to vector<64x64xbf16>
    %cst_437 = arith.constant dense<0.000000e+00> : vector<16x64xf32>
    %719 = tpu.matmul %716, %718, %cst_437 {dimension_numbers = #tpu.dot_dimension_numbers<[1], [0], [0], [1], [0, 0, 1, 1], [], []>} : vector<16x64xbf16>, vector<64x64xbf16>, vector<16x64xf32> -> vector<16x64xf32>
    %720 = arith.addf %511, %719 : vector<16x64xf32>
    %c0_438 = arith.constant 0 : index
    %c0_439 = arith.constant 0 : index
    %c0_440 = arith.constant 0 : index
    %721 = vector.load %arg17[%c0_438, %c0_439, %c0_440] : memref<2x1x64xf32, #tpu.memory_space<vmem>>, vector<1x1x64xf32>
    %722 = vector.shape_cast %721 : vector<1x1x64xf32> to vector<1x64xf32>
    %723 = arith.mulf %720, %720 : vector<16x64xf32>
    %cst_441 = arith.constant dense<0.000000e+00> : vector<16xf32>
    %724 = vector.multi_reduction <add>, %723, %cst_441 [1] : vector<16x64xf32> to vector<16xf32>
    %725 = vector.shape_cast %724 : vector<16xf32> to vector<16x1xf32>
    %cst_442 = arith.constant 6.400000e+01 : f32
    %726 = vector.broadcast %cst_442 : f32 to vector<16x1xf32>
    %727 = arith.divf %725, %726 : vector<16x1xf32>
    %cst_443 = arith.constant 9.99999997E-7 : f32
    %728 = vector.broadcast %cst_443 : f32 to vector<16x1xf32>
    %729 = arith.addf %727, %728 : vector<16x1xf32>
    %730 = math.rsqrt %729 : vector<16x1xf32>
    %731 = vector.broadcast %730 : vector<16x1xf32> to vector<16x64xf32>
    %732 = arith.mulf %720, %731 : vector<16x64xf32>
    %733 = vector.broadcast %722 : vector<1x64xf32> to vector<16x64xf32>
    %734 = arith.mulf %732, %733 : vector<16x64xf32>
    %735 = arith.truncf %734 : vector<16x64xf32> to vector<16x64xbf16>
    %c0_444 = arith.constant 0 : index
    %c0_445 = arith.constant 0 : index
    %c0_446 = arith.constant 0 : index
    %736 = vector.load %arg14[%c0_444, %c0_445, %c0_446] : memref<2x64x64xbf16, #tpu.memory_space<vmem>>, vector<1x64x64xbf16>
    %737 = vector.shape_cast %736 : vector<1x64x64xbf16> to vector<64x64xbf16>
    %cst_447 = arith.constant dense<0.000000e+00> : vector<16x64xf32>
    %738 = tpu.matmul %735, %737, %cst_447 {dimension_numbers = #tpu.dot_dimension_numbers<[1], [0], [0], [1], [0, 0, 1, 1], [], []>} : vector<16x64xbf16>, vector<64x64xbf16>, vector<16x64xf32> -> vector<16x64xf32>
    %c0_448 = arith.constant 0 : index
    %c0_449 = arith.constant 0 : index
    %739 = vector.load %arg26[%c0_448, %c0_449] : memref<16x192xf32, #tpu.memory_space<vmem>>, vector<16x64xf32>
    tpu.vector_store %arg26[%c0_448, %c0_449], %738 {strides = array<i32>} : memref<16x192xf32, #tpu.memory_space<vmem>>, vector<16x64xf32>,
    %c0_450 = arith.constant 0 : index
    %c0_451 = arith.constant 0 : index
    %c0_452 = arith.constant 0 : index
    %740 = vector.load %arg15[%c0_450, %c0_451, %c0_452] : memref<2x64x128xbf16, #tpu.memory_space<vmem>>, vector<1x64x128xbf16>
    %741 = vector.shape_cast %740 : vector<1x64x128xbf16> to vector<64x128xbf16>
    %cst_453 = arith.constant dense<0.000000e+00> : vector<16x128xf32>
    %742 = tpu.matmul %510, %741, %cst_453 {dimension_numbers = #tpu.dot_dimension_numbers<[1], [0], [0], [1], [0, 0, 1, 1], [], []>} : vector<16x64xbf16>, vector<64x128xbf16>, vector<16x128xf32> -> vector<16x128xf32>
    %c0_454 = arith.constant 0 : index
    %c64_455 = arith.constant 64 : index
    %743 = vector.load %arg26[%c0_454, %c64_455] : memref<16x192xf32, #tpu.memory_space<vmem>>, vector<16x128xf32>
    tpu.vector_store %arg26[%c0_454, %c64_455], %742 {strides = array<i32>} : memref<16x192xf32, #tpu.memory_space<vmem>>, vector<16x128xf32>,
    %c0_456 = arith.constant 0 : index
    %c0_457 = arith.constant 0 : index
    %744 = vector.load %arg26[%c0_456, %c0_457] : memref<16x192xf32, #tpu.memory_space<vmem>>, vector<8x16xf32>
    %745 = arith.truncf %744 : vector<8x16xf32> to vector<8x16xbf16>
    %c0_458 = arith.constant 0 : index
    %c64_459 = arith.constant 64 : index
    %746 = vector.load %arg26[%c0_458, %c64_459] : memref<16x192xf32, #tpu.memory_space<vmem>>, vector<8x16xf32>
    %747 = arith.truncf %746 : vector<8x16xf32> to vector<8x16xbf16>
    %c0_460 = arith.constant 0 : index
    %c128_461 = arith.constant 128 : index
    %748 = vector.load %arg26[%c0_460, %c128_461] : memref<16x192xf32, #tpu.memory_space<vmem>>, vector<8x16xf32>
    %749 = arith.truncf %748 : vector<8x16xf32> to vector<8x16xbf16>
    "tpu.trace_start"() <{level = 10 : i32, message = "qd,kd->qk"}> : () -> ()
    %cst_462 = arith.constant dense<0.000000e+00> : vector<8x8xf32>
    %750 = tpu.matmul %745, %747, %cst_462 {dimension_numbers = #tpu.dot_dimension_numbers<[1], [1], [0], [0], [0, 0, 1, 0], [], []>} : vector<8x16xbf16>, vector<8x16xbf16>, vector<8x8xf32> -> vector<8x8xf32>
    "tpu.trace_stop"() : () -> ()
    %c0_463 = arith.constant 0 : index
    %c0_464 = arith.constant 0 : index
    %c0_465 = arith.constant 0 : index
    %751 = vector.load %arg3[%c0_463, %c0_464, %c0_465] : memref<8x8x8xf32, #tpu.memory_space<vmem>>, vector<1x8x8xf32>
    %752 = vector.shape_cast %751 : vector<1x8x8xf32> to vector<8x8xf32>
    %753 = arith.addf %750, %752 : vector<8x8xf32>
    %cst_466 = arith.constant dense<0xFF800000> : vector<8xf32>
    %754 = vector.multi_reduction <maximumf>, %753, %cst_466 [1] : vector<8x8xf32> to vector<8xf32>
    %755 = vector.shape_cast %754 : vector<8xf32> to vector<8x1xf32>
    %756 = vector.broadcast %755 : vector<8x1xf32> to vector<8x8xf32>
    %757 = arith.subf %753, %756 : vector<8x8xf32>
    %758 = math.exp %757 : vector<8x8xf32>
    %cst_467 = arith.constant dense<0.000000e+00> : vector<8xf32>
    %759 = vector.multi_reduction <add>, %758, %cst_467 [1] : vector<8x8xf32> to vector<8xf32>
    %760 = vector.shape_cast %759 : vector<8xf32> to vector<8x1xf32>
    %761 = tpu.reciprocal %760 {approx = true} : vector<8x1xf32> -> vector<8x1xf32>
    %762 = vector.broadcast %761 : vector<8x1xf32> to vector<8x8xf32>
    %763 = arith.mulf %758, %762 : vector<8x8xf32>
    %764 = arith.truncf %763 : vector<8x8xf32> to vector<8x8xbf16>
    %cst_468 = arith.constant dense<0.000000e+00> : vector<8x16xf32>
    %765 = tpu.matmul %764, %749, %cst_468 {dimension_numbers = #tpu.dot_dimension_numbers<[1], [0], [0], [1], [0, 0, 1, 1], [], []>} : vector<8x8xbf16>, vector<8x16xbf16>, vector<8x16xf32> -> vector<8x16xf32>
    %c0_469 = arith.constant 0 : index
    %c0_470 = arith.constant 0 : index
    %766 = vector.load %arg27[%c0_469, %c0_470] : memref<16x64xf32, #tpu.memory_space<vmem>>, vector<8x16xf32>
    tpu.vector_store %arg27[%c0_469, %c0_470], %765 {strides = array<i32>} : memref<16x64xf32, #tpu.memory_space<vmem>>, vector<8x16xf32>,
    %c0_471 = arith.constant 0 : index
    %c16_472 = arith.constant 16 : index
    %767 = vector.load %arg26[%c0_471, %c16_472] : memref<16x192xf32, #tpu.memory_space<vmem>>, vector<8x16xf32>
    %768 = arith.truncf %767 : vector<8x16xf32> to vector<8x16xbf16>
    %c0_473 = arith.constant 0 : index
    %c80_474 = arith.constant 80 : index
    %769 = vector.load %arg26[%c0_473, %c80_474] : memref<16x192xf32, #tpu.memory_space<vmem>>, vector<8x16xf32>
    %770 = arith.truncf %769 : vector<8x16xf32> to vector<8x16xbf16>
    %c0_475 = arith.constant 0 : index
    %c144_476 = arith.constant 144 : index
    %771 = vector.load %arg26[%c0_475, %c144_476] : memref<16x192xf32, #tpu.memory_space<vmem>>, vector<8x16xf32>
    %772 = arith.truncf %771 : vector<8x16xf32> to vector<8x16xbf16>
    "tpu.trace_start"() <{level = 10 : i32, message = "qd,kd->qk"}> : () -> ()
    %cst_477 = arith.constant dense<0.000000e+00> : vector<8x8xf32>
    %773 = tpu.matmul %768, %770, %cst_477 {dimension_numbers = #tpu.dot_dimension_numbers<[1], [1], [0], [0], [0, 0, 1, 0], [], []>} : vector<8x16xbf16>, vector<8x16xbf16>, vector<8x8xf32> -> vector<8x8xf32>
    "tpu.trace_stop"() : () -> ()
    %c1_478 = arith.constant 1 : index
    %c0_479 = arith.constant 0 : index
    %c0_480 = arith.constant 0 : index
    %774 = vector.load %arg3[%c1_478, %c0_479, %c0_480] : memref<8x8x8xf32, #tpu.memory_space<vmem>>, vector<1x8x8xf32>
    %775 = vector.shape_cast %774 : vector<1x8x8xf32> to vector<8x8xf32>
    %776 = arith.addf %773, %775 : vector<8x8xf32>
    %cst_481 = arith.constant dense<0xFF800000> : vector<8xf32>
    %777 = vector.multi_reduction <maximumf>, %776, %cst_481 [1] : vector<8x8xf32> to vector<8xf32>
    %778 = vector.shape_cast %777 : vector<8xf32> to vector<8x1xf32>
    %779 = vector.broadcast %778 : vector<8x1xf32> to vector<8x8xf32>
    %780 = arith.subf %776, %779 : vector<8x8xf32>
    %781 = math.exp %780 : vector<8x8xf32>
    %cst_482 = arith.constant dense<0.000000e+00> : vector<8xf32>
    %782 = vector.multi_reduction <add>, %781, %cst_482 [1] : vector<8x8xf32> to vector<8xf32>
    %783 = vector.shape_cast %782 : vector<8xf32> to vector<8x1xf32>
    %784 = tpu.reciprocal %783 {approx = true} : vector<8x1xf32> -> vector<8x1xf32>
    %785 = vector.broadcast %784 : vector<8x1xf32> to vector<8x8xf32>
    %786 = arith.mulf %781, %785 : vector<8x8xf32>
    %787 = arith.truncf %786 : vector<8x8xf32> to vector<8x8xbf16>
    %cst_483 = arith.constant dense<0.000000e+00> : vector<8x16xf32>
    %788 = tpu.matmul %787, %772, %cst_483 {dimension_numbers = #tpu.dot_dimension_numbers<[1], [0], [0], [1], [0, 0, 1, 1], [], []>} : vector<8x8xbf16>, vector<8x16xbf16>, vector<8x16xf32> -> vector<8x16xf32>
    %c0_484 = arith.constant 0 : index
    %c16_485 = arith.constant 16 : index
    %789 = vector.load %arg27[%c0_484, %c16_485] : memref<16x64xf32, #tpu.memory_space<vmem>>, vector<8x16xf32>
    tpu.vector_store %arg27[%c0_484, %c16_485], %788 {strides = array<i32>} : memref<16x64xf32, #tpu.memory_space<vmem>>, vector<8x16xf32>,
    %c0_486 = arith.constant 0 : index
    %c32_487 = arith.constant 32 : index
    %790 = vector.load %arg26[%c0_486, %c32_487] : memref<16x192xf32, #tpu.memory_space<vmem>>, vector<8x16xf32>
    %791 = arith.truncf %790 : vector<8x16xf32> to vector<8x16xbf16>
    %c0_488 = arith.constant 0 : index
    %c96_489 = arith.constant 96 : index
    %792 = vector.load %arg26[%c0_488, %c96_489] : memref<16x192xf32, #tpu.memory_space<vmem>>, vector<8x16xf32>
    %793 = arith.truncf %792 : vector<8x16xf32> to vector<8x16xbf16>
    %c0_490 = arith.constant 0 : index
    %c160_491 = arith.constant 160 : index
    %794 = vector.load %arg26[%c0_490, %c160_491] : memref<16x192xf32, #tpu.memory_space<vmem>>, vector<8x16xf32>
    %795 = arith.truncf %794 : vector<8x16xf32> to vector<8x16xbf16>
    "tpu.trace_start"() <{level = 10 : i32, message = "qd,kd->qk"}> : () -> ()
    %cst_492 = arith.constant dense<0.000000e+00> : vector<8x8xf32>
    %796 = tpu.matmul %791, %793, %cst_492 {dimension_numbers = #tpu.dot_dimension_numbers<[1], [1], [0], [0], [0, 0, 1, 0], [], []>} : vector<8x16xbf16>, vector<8x16xbf16>, vector<8x8xf32> -> vector<8x8xf32>
    "tpu.trace_stop"() : () -> ()
    %c2_493 = arith.constant 2 : index
    %c0_494 = arith.constant 0 : index
    %c0_495 = arith.constant 0 : index
    %797 = vector.load %arg3[%c2_493, %c0_494, %c0_495] : memref<8x8x8xf32, #tpu.memory_space<vmem>>, vector<1x8x8xf32>
    %798 = vector.shape_cast %797 : vector<1x8x8xf32> to vector<8x8xf32>
    %799 = arith.addf %796, %798 : vector<8x8xf32>
    %cst_496 = arith.constant dense<0xFF800000> : vector<8xf32>
    %800 = vector.multi_reduction <maximumf>, %799, %cst_496 [1] : vector<8x8xf32> to vector<8xf32>
    %801 = vector.shape_cast %800 : vector<8xf32> to vector<8x1xf32>
    %802 = vector.broadcast %801 : vector<8x1xf32> to vector<8x8xf32>
    %803 = arith.subf %799, %802 : vector<8x8xf32>
    %804 = math.exp %803 : vector<8x8xf32>
    %cst_497 = arith.constant dense<0.000000e+00> : vector<8xf32>
    %805 = vector.multi_reduction <add>, %804, %cst_497 [1] : vector<8x8xf32> to vector<8xf32>
    %806 = vector.shape_cast %805 : vector<8xf32> to vector<8x1xf32>
    %807 = tpu.reciprocal %806 {approx = true} : vector<8x1xf32> -> vector<8x1xf32>
    %808 = vector.broadcast %807 : vector<8x1xf32> to vector<8x8xf32>
    %809 = arith.mulf %804, %808 : vector<8x8xf32>
    %810 = arith.truncf %809 : vector<8x8xf32> to vector<8x8xbf16>
    %cst_498 = arith.constant dense<0.000000e+00> : vector<8x16xf32>
    %811 = tpu.matmul %810, %795, %cst_498 {dimension_numbers = #tpu.dot_dimension_numbers<[1], [0], [0], [1], [0, 0, 1, 1], [], []>} : vector<8x8xbf16>, vector<8x16xbf16>, vector<8x16xf32> -> vector<8x16xf32>
    %c0_499 = arith.constant 0 : index
    %c32_500 = arith.constant 32 : index
    %812 = vector.load %arg27[%c0_499, %c32_500] : memref<16x64xf32, #tpu.memory_space<vmem>>, vector<8x16xf32>
    tpu.vector_store %arg27[%c0_499, %c32_500], %811 {strides = array<i32>} : memref<16x64xf32, #tpu.memory_space<vmem>>, vector<8x16xf32>,
    %c0_501 = arith.constant 0 : index
    %c48_502 = arith.constant 48 : index
    %813 = vector.load %arg26[%c0_501, %c48_502] : memref<16x192xf32, #tpu.memory_space<vmem>>, vector<8x16xf32>
    %814 = arith.truncf %813 : vector<8x16xf32> to vector<8x16xbf16>
    %c0_503 = arith.constant 0 : index
    %c112_504 = arith.constant 112 : index
    %815 = vector.load %arg26[%c0_503, %c112_504] : memref<16x192xf32, #tpu.memory_space<vmem>>, vector<8x16xf32>
    %816 = arith.truncf %815 : vector<8x16xf32> to vector<8x16xbf16>
    %c0_505 = arith.constant 0 : index
    %c176_506 = arith.constant 176 : index
    %817 = vector.load %arg26[%c0_505, %c176_506] : memref<16x192xf32, #tpu.memory_space<vmem>>, vector<8x16xf32>
    %818 = arith.truncf %817 : vector<8x16xf32> to vector<8x16xbf16>
    "tpu.trace_start"() <{level = 10 : i32, message = "qd,kd->qk"}> : () -> ()
    %cst_507 = arith.constant dense<0.000000e+00> : vector<8x8xf32>
    %819 = tpu.matmul %814, %816, %cst_507 {dimension_numbers = #tpu.dot_dimension_numbers<[1], [1], [0], [0], [0, 0, 1, 0], [], []>} : vector<8x16xbf16>, vector<8x16xbf16>, vector<8x8xf32> -> vector<8x8xf32>
    "tpu.trace_stop"() : () -> ()
    %c3_508 = arith.constant 3 : index
    %c0_509 = arith.constant 0 : index
    %c0_510 = arith.constant 0 : index
    %820 = vector.load %arg3[%c3_508, %c0_509, %c0_510] : memref<8x8x8xf32, #tpu.memory_space<vmem>>, vector<1x8x8xf32>
    %821 = vector.shape_cast %820 : vector<1x8x8xf32> to vector<8x8xf32>
    %822 = arith.addf %819, %821 : vector<8x8xf32>
    %cst_511 = arith.constant dense<0xFF800000> : vector<8xf32>
    %823 = vector.multi_reduction <maximumf>, %822, %cst_511 [1] : vector<8x8xf32> to vector<8xf32>
    %824 = vector.shape_cast %823 : vector<8xf32> to vector<8x1xf32>
    %825 = vector.broadcast %824 : vector<8x1xf32> to vector<8x8xf32>
    %826 = arith.subf %822, %825 : vector<8x8xf32>
    %827 = math.exp %826 : vector<8x8xf32>
    %cst_512 = arith.constant dense<0.000000e+00> : vector<8xf32>
    %828 = vector.multi_reduction <add>, %827, %cst_512 [1] : vector<8x8xf32> to vector<8xf32>
    %829 = vector.shape_cast %828 : vector<8xf32> to vector<8x1xf32>
    %830 = tpu.reciprocal %829 {approx = true} : vector<8x1xf32> -> vector<8x1xf32>
    %831 = vector.broadcast %830 : vector<8x1xf32> to vector<8x8xf32>
    %832 = arith.mulf %827, %831 : vector<8x8xf32>
    %833 = arith.truncf %832 : vector<8x8xf32> to vector<8x8xbf16>
    %cst_513 = arith.constant dense<0.000000e+00> : vector<8x16xf32>
    %834 = tpu.matmul %833, %818, %cst_513 {dimension_numbers = #tpu.dot_dimension_numbers<[1], [0], [0], [1], [0, 0, 1, 1], [], []>} : vector<8x8xbf16>, vector<8x16xbf16>, vector<8x16xf32> -> vector<8x16xf32>
    %c0_514 = arith.constant 0 : index
    %c48_515 = arith.constant 48 : index
    %835 = vector.load %arg27[%c0_514, %c48_515] : memref<16x64xf32, #tpu.memory_space<vmem>>, vector<8x16xf32>
    tpu.vector_store %arg27[%c0_514, %c48_515], %834 {strides = array<i32>} : memref<16x64xf32, #tpu.memory_space<vmem>>, vector<8x16xf32>,
    %c8_516 = arith.constant 8 : index
    %c0_517 = arith.constant 0 : index
    %836 = vector.load %arg26[%c8_516, %c0_517] : memref<16x192xf32, #tpu.memory_space<vmem>>, vector<8x16xf32>
    %837 = arith.truncf %836 : vector<8x16xf32> to vector<8x16xbf16>
    %c8_518 = arith.constant 8 : index
    %c64_519 = arith.constant 64 : index
    %838 = vector.load %arg26[%c8_518, %c64_519] : memref<16x192xf32, #tpu.memory_space<vmem>>, vector<8x16xf32>
    %839 = arith.truncf %838 : vector<8x16xf32> to vector<8x16xbf16>
    %c8_520 = arith.constant 8 : index
    %c128_521 = arith.constant 128 : index
    %840 = vector.load %arg26[%c8_520, %c128_521] : memref<16x192xf32, #tpu.memory_space<vmem>>, vector<8x16xf32>
    %841 = arith.truncf %840 : vector<8x16xf32> to vector<8x16xbf16>
    "tpu.trace_start"() <{level = 10 : i32, message = "qd,kd->qk"}> : () -> ()
    %cst_522 = arith.constant dense<0.000000e+00> : vector<8x8xf32>
    %842 = tpu.matmul %837, %839, %cst_522 {dimension_numbers = #tpu.dot_dimension_numbers<[1], [1], [0], [0], [0, 0, 1, 0], [], []>} : vector<8x16xbf16>, vector<8x16xbf16>, vector<8x8xf32> -> vector<8x8xf32>
    "tpu.trace_stop"() : () -> ()
    %c4_523 = arith.constant 4 : index
    %c0_524 = arith.constant 0 : index
    %c0_525 = arith.constant 0 : index
    %843 = vector.load %arg3[%c4_523, %c0_524, %c0_525] : memref<8x8x8xf32, #tpu.memory_space<vmem>>, vector<1x8x8xf32>
    %844 = vector.shape_cast %843 : vector<1x8x8xf32> to vector<8x8xf32>
    %845 = arith.addf %842, %844 : vector<8x8xf32>
    %cst_526 = arith.constant dense<0xFF800000> : vector<8xf32>
    %846 = vector.multi_reduction <maximumf>, %845, %cst_526 [1] : vector<8x8xf32> to vector<8xf32>
    %847 = vector.shape_cast %846 : vector<8xf32> to vector<8x1xf32>
    %848 = vector.broadcast %847 : vector<8x1xf32> to vector<8x8xf32>
    %849 = arith.subf %845, %848 : vector<8x8xf32>
    %850 = math.exp %849 : vector<8x8xf32>
    %cst_527 = arith.constant dense<0.000000e+00> : vector<8xf32>
    %851 = vector.multi_reduction <add>, %850, %cst_527 [1] : vector<8x8xf32> to vector<8xf32>
    %852 = vector.shape_cast %851 : vector<8xf32> to vector<8x1xf32>
    %853 = tpu.reciprocal %852 {approx = true} : vector<8x1xf32> -> vector<8x1xf32>
    %854 = vector.broadcast %853 : vector<8x1xf32> to vector<8x8xf32>
    %855 = arith.mulf %850, %854 : vector<8x8xf32>
    %856 = arith.truncf %855 : vector<8x8xf32> to vector<8x8xbf16>
    %cst_528 = arith.constant dense<0.000000e+00> : vector<8x16xf32>
    %857 = tpu.matmul %856, %841, %cst_528 {dimension_numbers = #tpu.dot_dimension_numbers<[1], [0], [0], [1], [0, 0, 1, 1], [], []>} : vector<8x8xbf16>, vector<8x16xbf16>, vector<8x16xf32> -> vector<8x16xf32>
    %c8_529 = arith.constant 8 : index
    %c0_530 = arith.constant 0 : index
    %858 = vector.load %arg27[%c8_529, %c0_530] : memref<16x64xf32, #tpu.memory_space<vmem>>, vector<8x16xf32>
    tpu.vector_store %arg27[%c8_529, %c0_530], %857 {strides = array<i32>} : memref<16x64xf32, #tpu.memory_space<vmem>>, vector<8x16xf32>,
    %c8_531 = arith.constant 8 : index
    %c16_532 = arith.constant 16 : index
    %859 = vector.load %arg26[%c8_531, %c16_532] : memref<16x192xf32, #tpu.memory_space<vmem>>, vector<8x16xf32>
    %860 = arith.truncf %859 : vector<8x16xf32> to vector<8x16xbf16>
    %c8_533 = arith.constant 8 : index
    %c80_534 = arith.constant 80 : index
    %861 = vector.load %arg26[%c8_533, %c80_534] : memref<16x192xf32, #tpu.memory_space<vmem>>, vector<8x16xf32>
    %862 = arith.truncf %861 : vector<8x16xf32> to vector<8x16xbf16>
    %c8_535 = arith.constant 8 : index
    %c144_536 = arith.constant 144 : index
    %863 = vector.load %arg26[%c8_535, %c144_536] : memref<16x192xf32, #tpu.memory_space<vmem>>, vector<8x16xf32>
    %864 = arith.truncf %863 : vector<8x16xf32> to vector<8x16xbf16>
    "tpu.trace_start"() <{level = 10 : i32, message = "qd,kd->qk"}> : () -> ()
    %cst_537 = arith.constant dense<0.000000e+00> : vector<8x8xf32>
    %865 = tpu.matmul %860, %862, %cst_537 {dimension_numbers = #tpu.dot_dimension_numbers<[1], [1], [0], [0], [0, 0, 1, 0], [], []>} : vector<8x16xbf16>, vector<8x16xbf16>, vector<8x8xf32> -> vector<8x8xf32>
    "tpu.trace_stop"() : () -> ()
    %c5_538 = arith.constant 5 : index
    %c0_539 = arith.constant 0 : index
    %c0_540 = arith.constant 0 : index
    %866 = vector.load %arg3[%c5_538, %c0_539, %c0_540] : memref<8x8x8xf32, #tpu.memory_space<vmem>>, vector<1x8x8xf32>
    %867 = vector.shape_cast %866 : vector<1x8x8xf32> to vector<8x8xf32>
    %868 = arith.addf %865, %867 : vector<8x8xf32>
    %cst_541 = arith.constant dense<0xFF800000> : vector<8xf32>
    %869 = vector.multi_reduction <maximumf>, %868, %cst_541 [1] : vector<8x8xf32> to vector<8xf32>
    %870 = vector.shape_cast %869 : vector<8xf32> to vector<8x1xf32>
    %871 = vector.broadcast %870 : vector<8x1xf32> to vector<8x8xf32>
    %872 = arith.subf %868, %871 : vector<8x8xf32>
    %873 = math.exp %872 : vector<8x8xf32>
    %cst_542 = arith.constant dense<0.000000e+00> : vector<8xf32>
    %874 = vector.multi_reduction <add>, %873, %cst_542 [1] : vector<8x8xf32> to vector<8xf32>
    %875 = vector.shape_cast %874 : vector<8xf32> to vector<8x1xf32>
    %876 = tpu.reciprocal %875 {approx = true} : vector<8x1xf32> -> vector<8x1xf32>
    %877 = vector.broadcast %876 : vector<8x1xf32> to vector<8x8xf32>
    %878 = arith.mulf %873, %877 : vector<8x8xf32>
    %879 = arith.truncf %878 : vector<8x8xf32> to vector<8x8xbf16>
    %cst_543 = arith.constant dense<0.000000e+00> : vector<8x16xf32>
    %880 = tpu.matmul %879, %864, %cst_543 {dimension_numbers = #tpu.dot_dimension_numbers<[1], [0], [0], [1], [0, 0, 1, 1], [], []>} : vector<8x8xbf16>, vector<8x16xbf16>, vector<8x16xf32> -> vector<8x16xf32>
    %c8_544 = arith.constant 8 : index
    %c16_545 = arith.constant 16 : index
    %881 = vector.load %arg27[%c8_544, %c16_545] : memref<16x64xf32, #tpu.memory_space<vmem>>, vector<8x16xf32>
    tpu.vector_store %arg27[%c8_544, %c16_545], %880 {strides = array<i32>} : memref<16x64xf32, #tpu.memory_space<vmem>>, vector<8x16xf32>,
    %c8_546 = arith.constant 8 : index
    %c32_547 = arith.constant 32 : index
    %882 = vector.load %arg26[%c8_546, %c32_547] : memref<16x192xf32, #tpu.memory_space<vmem>>, vector<8x16xf32>
    %883 = arith.truncf %882 : vector<8x16xf32> to vector<8x16xbf16>
    %c8_548 = arith.constant 8 : index
    %c96_549 = arith.constant 96 : index
    %884 = vector.load %arg26[%c8_548, %c96_549] : memref<16x192xf32, #tpu.memory_space<vmem>>, vector<8x16xf32>
    %885 = arith.truncf %884 : vector<8x16xf32> to vector<8x16xbf16>
    %c8_550 = arith.constant 8 : index
    %c160_551 = arith.constant 160 : index
    %886 = vector.load %arg26[%c8_550, %c160_551] : memref<16x192xf32, #tpu.memory_space<vmem>>, vector<8x16xf32>
    %887 = arith.truncf %886 : vector<8x16xf32> to vector<8x16xbf16>
    "tpu.trace_start"() <{level = 10 : i32, message = "qd,kd->qk"}> : () -> ()
    %cst_552 = arith.constant dense<0.000000e+00> : vector<8x8xf32>
    %888 = tpu.matmul %883, %885, %cst_552 {dimension_numbers = #tpu.dot_dimension_numbers<[1], [1], [0], [0], [0, 0, 1, 0], [], []>} : vector<8x16xbf16>, vector<8x16xbf16>, vector<8x8xf32> -> vector<8x8xf32>
    "tpu.trace_stop"() : () -> ()
    %c6_553 = arith.constant 6 : index
    %c0_554 = arith.constant 0 : index
    %c0_555 = arith.constant 0 : index
    %889 = vector.load %arg3[%c6_553, %c0_554, %c0_555] : memref<8x8x8xf32, #tpu.memory_space<vmem>>, vector<1x8x8xf32>
    %890 = vector.shape_cast %889 : vector<1x8x8xf32> to vector<8x8xf32>
    %891 = arith.addf %888, %890 : vector<8x8xf32>
    %cst_556 = arith.constant dense<0xFF800000> : vector<8xf32>
    %892 = vector.multi_reduction <maximumf>, %891, %cst_556 [1] : vector<8x8xf32> to vector<8xf32>
    %893 = vector.shape_cast %892 : vector<8xf32> to vector<8x1xf32>
    %894 = vector.broadcast %893 : vector<8x1xf32> to vector<8x8xf32>
    %895 = arith.subf %891, %894 : vector<8x8xf32>
    %896 = math.exp %895 : vector<8x8xf32>
    %cst_557 = arith.constant dense<0.000000e+00> : vector<8xf32>
    %897 = vector.multi_reduction <add>, %896, %cst_557 [1] : vector<8x8xf32> to vector<8xf32>
    %898 = vector.shape_cast %897 : vector<8xf32> to vector<8x1xf32>
    %899 = tpu.reciprocal %898 {approx = true} : vector<8x1xf32> -> vector<8x1xf32>
    %900 = vector.broadcast %899 : vector<8x1xf32> to vector<8x8xf32>
    %901 = arith.mulf %896, %900 : vector<8x8xf32>
    %902 = arith.truncf %901 : vector<8x8xf32> to vector<8x8xbf16>
    %cst_558 = arith.constant dense<0.000000e+00> : vector<8x16xf32>
    %903 = tpu.matmul %902, %887, %cst_558 {dimension_numbers = #tpu.dot_dimension_numbers<[1], [0], [0], [1], [0, 0, 1, 1], [], []>} : vector<8x8xbf16>, vector<8x16xbf16>, vector<8x16xf32> -> vector<8x16xf32>
    %c8_559 = arith.constant 8 : index
    %c32_560 = arith.constant 32 : index
    %904 = vector.load %arg27[%c8_559, %c32_560] : memref<16x64xf32, #tpu.memory_space<vmem>>, vector<8x16xf32>
    tpu.vector_store %arg27[%c8_559, %c32_560], %903 {strides = array<i32>} : memref<16x64xf32, #tpu.memory_space<vmem>>, vector<8x16xf32>,
    %c8_561 = arith.constant 8 : index
    %c48_562 = arith.constant 48 : index
    %905 = vector.load %arg26[%c8_561, %c48_562] : memref<16x192xf32, #tpu.memory_space<vmem>>, vector<8x16xf32>
    %906 = arith.truncf %905 : vector<8x16xf32> to vector<8x16xbf16>
    %c8_563 = arith.constant 8 : index
    %c112_564 = arith.constant 112 : index
    %907 = vector.load %arg26[%c8_563, %c112_564] : memref<16x192xf32, #tpu.memory_space<vmem>>, vector<8x16xf32>
    %908 = arith.truncf %907 : vector<8x16xf32> to vector<8x16xbf16>
    %c8_565 = arith.constant 8 : index
    %c176_566 = arith.constant 176 : index
    %909 = vector.load %arg26[%c8_565, %c176_566] : memref<16x192xf32, #tpu.memory_space<vmem>>, vector<8x16xf32>
    %910 = arith.truncf %909 : vector<8x16xf32> to vector<8x16xbf16>
    "tpu.trace_start"() <{level = 10 : i32, message = "qd,kd->qk"}> : () -> ()
    %cst_567 = arith.constant dense<0.000000e+00> : vector<8x8xf32>
    %911 = tpu.matmul %906, %908, %cst_567 {dimension_numbers = #tpu.dot_dimension_numbers<[1], [1], [0], [0], [0, 0, 1, 0], [], []>} : vector<8x16xbf16>, vector<8x16xbf16>, vector<8x8xf32> -> vector<8x8xf32>
    "tpu.trace_stop"() : () -> ()
    %c7_568 = arith.constant 7 : index
    %c0_569 = arith.constant 0 : index
    %c0_570 = arith.constant 0 : index
    %912 = vector.load %arg3[%c7_568, %c0_569, %c0_570] : memref<8x8x8xf32, #tpu.memory_space<vmem>>, vector<1x8x8xf32>
    %913 = vector.shape_cast %912 : vector<1x8x8xf32> to vector<8x8xf32>
    %914 = arith.addf %911, %913 : vector<8x8xf32>
    %cst_571 = arith.constant dense<0xFF800000> : vector<8xf32>
    %915 = vector.multi_reduction <maximumf>, %914, %cst_571 [1] : vector<8x8xf32> to vector<8xf32>
    %916 = vector.shape_cast %915 : vector<8xf32> to vector<8x1xf32>
    %917 = vector.broadcast %916 : vector<8x1xf32> to vector<8x8xf32>
    %918 = arith.subf %914, %917 : vector<8x8xf32>
    %919 = math.exp %918 : vector<8x8xf32>
    %cst_572 = arith.constant dense<0.000000e+00> : vector<8xf32>
    %920 = vector.multi_reduction <add>, %919, %cst_572 [1] : vector<8x8xf32> to vector<8xf32>
    %921 = vector.shape_cast %920 : vector<8xf32> to vector<8x1xf32>
    %922 = tpu.reciprocal %921 {approx = true} : vector<8x1xf32> -> vector<8x1xf32>
    %923 = vector.broadcast %922 : vector<8x1xf32> to vector<8x8xf32>
    %924 = arith.mulf %919, %923 : vector<8x8xf32>
    %925 = arith.truncf %924 : vector<8x8xf32> to vector<8x8xbf16>
    %cst_573 = arith.constant dense<0.000000e+00> : vector<8x16xf32>
    %926 = tpu.matmul %925, %910, %cst_573 {dimension_numbers = #tpu.dot_dimension_numbers<[1], [0], [0], [1], [0, 0, 1, 1], [], []>} : vector<8x8xbf16>, vector<8x16xbf16>, vector<8x16xf32> -> vector<8x16xf32>
    %c8_574 = arith.constant 8 : index
    %c48_575 = arith.constant 48 : index
    %927 = vector.load %arg27[%c8_574, %c48_575] : memref<16x64xf32, #tpu.memory_space<vmem>>, vector<8x16xf32>
    tpu.vector_store %arg27[%c8_574, %c48_575], %926 {strides = array<i32>} : memref<16x64xf32, #tpu.memory_space<vmem>>, vector<8x16xf32>,
    %c0_576 = arith.constant 0 : index
    %c0_577 = arith.constant 0 : index
    %928 = vector.load %arg27[%c0_576, %c0_577] : memref<16x64xf32, #tpu.memory_space<vmem>>, vector<16x64xf32>
    %929 = arith.truncf %928 : vector<16x64xf32> to vector<16x64xbf16>
    %c0_578 = arith.constant 0 : index
    %c0_579 = arith.constant 0 : index
    %c0_580 = arith.constant 0 : index
    %930 = vector.load %arg16[%c0_578, %c0_579, %c0_580] : memref<2x64x64xbf16, #tpu.memory_space<vmem>>, vector<1x64x64xbf16>
    %931 = vector.shape_cast %930 : vector<1x64x64xbf16> to vector<64x64xbf16>
    %cst_581 = arith.constant dense<0.000000e+00> : vector<16x64xf32>
    %932 = tpu.matmul %929, %931, %cst_581 {dimension_numbers = #tpu.dot_dimension_numbers<[1], [0], [0], [1], [0, 0, 1, 1], [], []>} : vector<16x64xbf16>, vector<64x64xbf16>, vector<16x64xf32> -> vector<16x64xf32>
    %933 = arith.addf %720, %932 : vector<16x64xf32>
    %c0_582 = arith.constant 0 : index
    %c0_583 = arith.constant 0 : index
    %c0_584 = arith.constant 0 : index
    %934 = vector.load %arg20[%c0_582, %c0_583, %c0_584] : memref<2x1x64xf32, #tpu.memory_space<vmem>>, vector<1x1x64xf32>
    %935 = vector.shape_cast %934 : vector<1x1x64xf32> to vector<1x64xf32>
    %936 = arith.mulf %933, %933 : vector<16x64xf32>
    %cst_585 = arith.constant dense<0.000000e+00> : vector<16xf32>
    %937 = vector.multi_reduction <add>, %936, %cst_585 [1] : vector<16x64xf32> to vector<16xf32>
    %938 = vector.shape_cast %937 : vector<16xf32> to vector<16x1xf32>
    %cst_586 = arith.constant 6.400000e+01 : f32
    %939 = vector.broadcast %cst_586 : f32 to vector<16x1xf32>
    %940 = arith.divf %938, %939 : vector<16x1xf32>
    %cst_587 = arith.constant 9.99999997E-7 : f32
    %941 = vector.broadcast %cst_587 : f32 to vector<16x1xf32>
    %942 = arith.addf %940, %941 : vector<16x1xf32>
    %943 = math.rsqrt %942 : vector<16x1xf32>
    %944 = vector.broadcast %943 : vector<16x1xf32> to vector<16x64xf32>
    %945 = arith.mulf %933, %944 : vector<16x64xf32>
    %946 = vector.broadcast %935 : vector<1x64xf32> to vector<16x64xf32>
    %947 = arith.mulf %945, %946 : vector<16x64xf32>
    %948 = arith.truncf %947 : vector<16x64xf32> to vector<16x64xbf16>
    %c0_588 = arith.constant 0 : index
    %c0_589 = arith.constant 0 : index
    %c0_590 = arith.constant 0 : index
    %949 = vector.load %arg18[%c0_588, %c0_589, %c0_590] : memref<2x64x256xbf16, #tpu.memory_space<vmem>>, vector<1x64x256xbf16>
    %950 = vector.shape_cast %949 : vector<1x64x256xbf16> to vector<64x256xbf16>
    %cst_591 = arith.constant dense<0.000000e+00> : vector<16x256xf32>
    %951 = tpu.matmul %948, %950, %cst_591 {dimension_numbers = #tpu.dot_dimension_numbers<[1], [0], [0], [1], [0, 0, 1, 1], [], []>} : vector<16x64xbf16>, vector<64x256xbf16>, vector<16x256xf32> -> vector<16x256xf32>
    %952 = vector.extract_strided_slice %951 {offsets = [0, 0], sizes = [16, 128], strides = [1, 1]} : vector<16x256xf32> to vector<16x128xf32>
    %953 = arith.mulf %952, %952 : vector<16x128xf32>
    %954 = arith.mulf %952, %953 : vector<16x128xf32>
    %cst_592 = arith.constant 4.471500e-02 : f32
    %955 = vector.broadcast %cst_592 : f32 to vector<16x128xf32>
    %956 = arith.mulf %955, %954 : vector<16x128xf32>
    %957 = arith.addf %952, %956 : vector<16x128xf32>
    %cst_593 = arith.constant 0.797884583 : f32
    %958 = vector.broadcast %cst_593 : f32 to vector<16x128xf32>
    %959 = arith.mulf %958, %957 : vector<16x128xf32>
    %960 = math.tanh %959 : vector<16x128xf32>
    %cst_594 = arith.constant 1.000000e+00 : f32
    %961 = vector.broadcast %cst_594 : f32 to vector<16x128xf32>
    %962 = arith.addf %961, %960 : vector<16x128xf32>
    %cst_595 = arith.constant 5.000000e-01 : f32
    %963 = vector.broadcast %cst_595 : f32 to vector<16x128xf32>
    %964 = arith.mulf %963, %962 : vector<16x128xf32>
    %965 = arith.mulf %952, %964 : vector<16x128xf32>
    %966 = vector.extract_strided_slice %951 {offsets = [0, 128], sizes = [16, 128], strides = [1, 1]} : vector<16x256xf32> to vector<16x128xf32>
    %967 = arith.mulf %965, %966 : vector<16x128xf32>
    %968 = arith.truncf %967 : vector<16x128xf32> to vector<16x128xbf16>
    %c0_596 = arith.constant 0 : index
    %c0_597 = arith.constant 0 : index
    %c0_598 = arith.constant 0 : index
    %969 = vector.load %arg19[%c0_596, %c0_597, %c0_598] : memref<2x128x64xbf16, #tpu.memory_space<vmem>>, vector<1x128x64xbf16>
    %970 = vector.shape_cast %969 : vector<1x128x64xbf16> to vector<128x64xbf16>
    %cst_599 = arith.constant dense<0.000000e+00> : vector<16x64xf32>
    %971 = tpu.matmul %968, %970, %cst_599 {dimension_numbers = #tpu.dot_dimension_numbers<[1], [0], [0], [1], [0, 0, 1, 1], [], []>} : vector<16x128xbf16>, vector<128x64xbf16>, vector<16x64xf32> -> vector<16x64xf32>
    %972 = arith.addf %933, %971 : vector<16x64xf32>
    %c1_600 = arith.constant 1 : index
    %c0_601 = arith.constant 0 : index
    %c0_602 = arith.constant 0 : index
    %973 = vector.load %arg13[%c1_600, %c0_601, %c0_602] : memref<2x1x64xf32, #tpu.memory_space<vmem>>, vector<1x1x64xf32>
    %974 = vector.shape_cast %973 : vector<1x1x64xf32> to vector<1x64xf32>
    %975 = arith.mulf %972, %972 : vector<16x64xf32>
    %cst_603 = arith.constant dense<0.000000e+00> : vector<16xf32>
    %976 = vector.multi_reduction <add>, %975, %cst_603 [1] : vector<16x64xf32> to vector<16xf32>
    %977 = vector.shape_cast %976 : vector<16xf32> to vector<16x1xf32>
    %cst_604 = arith.constant 6.400000e+01 : f32
    %978 = vector.broadcast %cst_604 : f32 to vector<16x1xf32>
    %979 = arith.divf %977, %978 : vector<16x1xf32>
    %cst_605 = arith.constant 9.99999997E-7 : f32
    %980 = vector.broadcast %cst_605 : f32 to vector<16x1xf32>
    %981 = arith.addf %979, %980 : vector<16x1xf32>
    %982 = math.rsqrt %981 : vector<16x1xf32>
    %983 = vector.broadcast %982 : vector<16x1xf32> to vector<16x64xf32>
    %984 = arith.mulf %972, %983 : vector<16x64xf32>
    %985 = vector.broadcast %974 : vector<1x64xf32> to vector<16x64xf32>
    %986 = arith.mulf %984, %985 : vector<16x64xf32>
    %987 = arith.truncf %986 : vector<16x64xf32> to vector<16x64xbf16>
    %c1_606 = arith.constant 1 : index
    %c0_607 = arith.constant 0 : index
    %c0_608 = arith.constant 0 : index
    %988 = vector.load %arg11[%c1_606, %c0_607, %c0_608] : memref<2x64x192xbf16, #tpu.memory_space<vmem>>, vector<1x64x192xbf16>
    %989 = vector.shape_cast %988 : vector<1x64x192xbf16> to vector<64x192xbf16>
    %cst_609 = arith.constant dense<0.000000e+00> : vector<16x192xf32>
    %990 = tpu.matmul %987, %989, %cst_609 {dimension_numbers = #tpu.dot_dimension_numbers<[1], [0], [0], [1], [0, 0, 1, 1], [], []>} : vector<16x64xbf16>, vector<64x192xbf16>, vector<16x192xf32> -> vector<16x192xf32>
    %c0_610 = arith.constant 0 : index
    %c0_611 = arith.constant 0 : index
    %991 = vector.load %arg26[%c0_610, %c0_611] : memref<16x192xf32, #tpu.memory_space<vmem>>, vector<16x192xf32>
    tpu.vector_store %arg26[%c0_610, %c0_611], %990 {strides = array<i32>} : memref<16x192xf32, #tpu.memory_space<vmem>>, vector<16x192xf32>,
    %c0_612 = arith.constant 0 : index
    %c0_613 = arith.constant 0 : index
    %992 = vector.load %arg26[%c0_612, %c0_613] : memref<16x192xf32, #tpu.memory_space<vmem>>, vector<8x16xf32>
    %993 = arith.truncf %992 : vector<8x16xf32> to vector<8x16xbf16>
    %c0_614 = arith.constant 0 : index
    %c64_615 = arith.constant 64 : index
    %994 = vector.load %arg26[%c0_614, %c64_615] : memref<16x192xf32, #tpu.memory_space<vmem>>, vector<8x16xf32>
    %995 = arith.truncf %994 : vector<8x16xf32> to vector<8x16xbf16>
    %c0_616 = arith.constant 0 : index
    %c128_617 = arith.constant 128 : index
    %996 = vector.load %arg26[%c0_616, %c128_617] : memref<16x192xf32, #tpu.memory_space<vmem>>, vector<8x16xf32>
    %997 = arith.truncf %996 : vector<8x16xf32> to vector<8x16xbf16>
    "tpu.trace_start"() <{level = 10 : i32, message = "qd,kd->qk"}> : () -> ()
    %cst_618 = arith.constant dense<0.000000e+00> : vector<8x8xf32>
    %998 = tpu.matmul %993, %995, %cst_618 {dimension_numbers = #tpu.dot_dimension_numbers<[1], [1], [0], [0], [0, 0, 1, 0], [], []>} : vector<8x16xbf16>, vector<8x16xbf16>, vector<8x8xf32> -> vector<8x8xf32>
    "tpu.trace_stop"() : () -> ()
    %c0_619 = arith.constant 0 : index
    %c0_620 = arith.constant 0 : index
    %c0_621 = arith.constant 0 : index
    %999 = vector.load %arg2[%c0_619, %c0_620, %c0_621] : memref<8x8x8xf32, #tpu.memory_space<vmem>>, vector<1x8x8xf32>
    %1000 = vector.shape_cast %999 : vector<1x8x8xf32> to vector<8x8xf32>
    %1001 = arith.addf %998, %1000 : vector<8x8xf32>
    %cst_622 = arith.constant dense<0xFF800000> : vector<8xf32>
    %1002 = vector.multi_reduction <maximumf>, %1001, %cst_622 [1] : vector<8x8xf32> to vector<8xf32>
    %1003 = vector.shape_cast %1002 : vector<8xf32> to vector<8x1xf32>
    %1004 = vector.broadcast %1003 : vector<8x1xf32> to vector<8x8xf32>
    %1005 = arith.subf %1001, %1004 : vector<8x8xf32>
    %1006 = math.exp %1005 : vector<8x8xf32>
    %cst_623 = arith.constant dense<0.000000e+00> : vector<8xf32>
    %1007 = vector.multi_reduction <add>, %1006, %cst_623 [1] : vector<8x8xf32> to vector<8xf32>
    %1008 = vector.shape_cast %1007 : vector<8xf32> to vector<8x1xf32>
    %1009 = tpu.reciprocal %1008 {approx = true} : vector<8x1xf32> -> vector<8x1xf32>
    %1010 = vector.broadcast %1009 : vector<8x1xf32> to vector<8x8xf32>
    %1011 = arith.mulf %1006, %1010 : vector<8x8xf32>
    %1012 = arith.truncf %1011 : vector<8x8xf32> to vector<8x8xbf16>
    %cst_624 = arith.constant dense<0.000000e+00> : vector<8x16xf32>
    %1013 = tpu.matmul %1012, %997, %cst_624 {dimension_numbers = #tpu.dot_dimension_numbers<[1], [0], [0], [1], [0, 0, 1, 1], [], []>} : vector<8x8xbf16>, vector<8x16xbf16>, vector<8x16xf32> -> vector<8x16xf32>
    %c0_625 = arith.constant 0 : index
    %c0_626 = arith.constant 0 : index
    %1014 = vector.load %arg27[%c0_625, %c0_626] : memref<16x64xf32, #tpu.memory_space<vmem>>, vector<8x16xf32>
    tpu.vector_store %arg27[%c0_625, %c0_626], %1013 {strides = array<i32>} : memref<16x64xf32, #tpu.memory_space<vmem>>, vector<8x16xf32>,
    %c0_627 = arith.constant 0 : index
    %c16_628 = arith.constant 16 : index
    %1015 = vector.load %arg26[%c0_627, %c16_628] : memref<16x192xf32, #tpu.memory_space<vmem>>, vector<8x16xf32>
    %1016 = arith.truncf %1015 : vector<8x16xf32> to vector<8x16xbf16>
    %c0_629 = arith.constant 0 : index
    %c80_630 = arith.constant 80 : index
    %1017 = vector.load %arg26[%c0_629, %c80_630] : memref<16x192xf32, #tpu.memory_space<vmem>>, vector<8x16xf32>
    %1018 = arith.truncf %1017 : vector<8x16xf32> to vector<8x16xbf16>
    %c0_631 = arith.constant 0 : index
    %c144_632 = arith.constant 144 : index
    %1019 = vector.load %arg26[%c0_631, %c144_632] : memref<16x192xf32, #tpu.memory_space<vmem>>, vector<8x16xf32>
    %1020 = arith.truncf %1019 : vector<8x16xf32> to vector<8x16xbf16>
    "tpu.trace_start"() <{level = 10 : i32, message = "qd,kd->qk"}> : () -> ()
    %cst_633 = arith.constant dense<0.000000e+00> : vector<8x8xf32>
    %1021 = tpu.matmul %1016, %1018, %cst_633 {dimension_numbers = #tpu.dot_dimension_numbers<[1], [1], [0], [0], [0, 0, 1, 0], [], []>} : vector<8x16xbf16>, vector<8x16xbf16>, vector<8x8xf32> -> vector<8x8xf32>
    "tpu.trace_stop"() : () -> ()
    %c1_634 = arith.constant 1 : index
    %c0_635 = arith.constant 0 : index
    %c0_636 = arith.constant 0 : index
    %1022 = vector.load %arg2[%c1_634, %c0_635, %c0_636] : memref<8x8x8xf32, #tpu.memory_space<vmem>>, vector<1x8x8xf32>
    %1023 = vector.shape_cast %1022 : vector<1x8x8xf32> to vector<8x8xf32>
    %1024 = arith.addf %1021, %1023 : vector<8x8xf32>
    %cst_637 = arith.constant dense<0xFF800000> : vector<8xf32>
    %1025 = vector.multi_reduction <maximumf>, %1024, %cst_637 [1] : vector<8x8xf32> to vector<8xf32>
    %1026 = vector.shape_cast %1025 : vector<8xf32> to vector<8x1xf32>
    %1027 = vector.broadcast %1026 : vector<8x1xf32> to vector<8x8xf32>
    %1028 = arith.subf %1024, %1027 : vector<8x8xf32>
    %1029 = math.exp %1028 : vector<8x8xf32>
    %cst_638 = arith.constant dense<0.000000e+00> : vector<8xf32>
    %1030 = vector.multi_reduction <add>, %1029, %cst_638 [1] : vector<8x8xf32> to vector<8xf32>
    %1031 = vector.shape_cast %1030 : vector<8xf32> to vector<8x1xf32>
    %1032 = tpu.reciprocal %1031 {approx = true} : vector<8x1xf32> -> vector<8x1xf32>
    %1033 = vector.broadcast %1032 : vector<8x1xf32> to vector<8x8xf32>
    %1034 = arith.mulf %1029, %1033 : vector<8x8xf32>
    %1035 = arith.truncf %1034 : vector<8x8xf32> to vector<8x8xbf16>
    %cst_639 = arith.constant dense<0.000000e+00> : vector<8x16xf32>
    %1036 = tpu.matmul %1035, %1020, %cst_639 {dimension_numbers = #tpu.dot_dimension_numbers<[1], [0], [0], [1], [0, 0, 1, 1], [], []>} : vector<8x8xbf16>, vector<8x16xbf16>, vector<8x16xf32> -> vector<8x16xf32>
    %c0_640 = arith.constant 0 : index
    %c16_641 = arith.constant 16 : index
    %1037 = vector.load %arg27[%c0_640, %c16_641] : memref<16x64xf32, #tpu.memory_space<vmem>>, vector<8x16xf32>
    tpu.vector_store %arg27[%c0_640, %c16_641], %1036 {strides = array<i32>} : memref<16x64xf32, #tpu.memory_space<vmem>>, vector<8x16xf32>,
    %c0_642 = arith.constant 0 : index
    %c32_643 = arith.constant 32 : index
    %1038 = vector.load %arg26[%c0_642, %c32_643] : memref<16x192xf32, #tpu.memory_space<vmem>>, vector<8x16xf32>
    %1039 = arith.truncf %1038 : vector<8x16xf32> to vector<8x16xbf16>
    %c0_644 = arith.constant 0 : index
    %c96_645 = arith.constant 96 : index
    %1040 = vector.load %arg26[%c0_644, %c96_645] : memref<16x192xf32, #tpu.memory_space<vmem>>, vector<8x16xf32>
    %1041 = arith.truncf %1040 : vector<8x16xf32> to vector<8x16xbf16>
    %c0_646 = arith.constant 0 : index
    %c160_647 = arith.constant 160 : index
    %1042 = vector.load %arg26[%c0_646, %c160_647] : memref<16x192xf32, #tpu.memory_space<vmem>>, vector<8x16xf32>
    %1043 = arith.truncf %1042 : vector<8x16xf32> to vector<8x16xbf16>
    "tpu.trace_start"() <{level = 10 : i32, message = "qd,kd->qk"}> : () -> ()
    %cst_648 = arith.constant dense<0.000000e+00> : vector<8x8xf32>
    %1044 = tpu.matmul %1039, %1041, %cst_648 {dimension_numbers = #tpu.dot_dimension_numbers<[1], [1], [0], [0], [0, 0, 1, 0], [], []>} : vector<8x16xbf16>, vector<8x16xbf16>, vector<8x8xf32> -> vector<8x8xf32>
    "tpu.trace_stop"() : () -> ()
    %c2_649 = arith.constant 2 : index
    %c0_650 = arith.constant 0 : index
    %c0_651 = arith.constant 0 : index
    %1045 = vector.load %arg2[%c2_649, %c0_650, %c0_651] : memref<8x8x8xf32, #tpu.memory_space<vmem>>, vector<1x8x8xf32>
    %1046 = vector.shape_cast %1045 : vector<1x8x8xf32> to vector<8x8xf32>
    %1047 = arith.addf %1044, %1046 : vector<8x8xf32>
    %cst_652 = arith.constant dense<0xFF800000> : vector<8xf32>
    %1048 = vector.multi_reduction <maximumf>, %1047, %cst_652 [1] : vector<8x8xf32> to vector<8xf32>
    %1049 = vector.shape_cast %1048 : vector<8xf32> to vector<8x1xf32>
    %1050 = vector.broadcast %1049 : vector<8x1xf32> to vector<8x8xf32>
    %1051 = arith.subf %1047, %1050 : vector<8x8xf32>
    %1052 = math.exp %1051 : vector<8x8xf32>
    %cst_653 = arith.constant dense<0.000000e+00> : vector<8xf32>
    %1053 = vector.multi_reduction <add>, %1052, %cst_653 [1] : vector<8x8xf32> to vector<8xf32>
    %1054 = vector.shape_cast %1053 : vector<8xf32> to vector<8x1xf32>
    %1055 = tpu.reciprocal %1054 {approx = true} : vector<8x1xf32> -> vector<8x1xf32>
    %1056 = vector.broadcast %1055 : vector<8x1xf32> to vector<8x8xf32>
    %1057 = arith.mulf %1052, %1056 : vector<8x8xf32>
    %1058 = arith.truncf %1057 : vector<8x8xf32> to vector<8x8xbf16>
    %cst_654 = arith.constant dense<0.000000e+00> : vector<8x16xf32>
    %1059 = tpu.matmul %1058, %1043, %cst_654 {dimension_numbers = #tpu.dot_dimension_numbers<[1], [0], [0], [1], [0, 0, 1, 1], [], []>} : vector<8x8xbf16>, vector<8x16xbf16>, vector<8x16xf32> -> vector<8x16xf32>
    %c0_655 = arith.constant 0 : index
    %c32_656 = arith.constant 32 : index
    %1060 = vector.load %arg27[%c0_655, %c32_656] : memref<16x64xf32, #tpu.memory_space<vmem>>, vector<8x16xf32>
    tpu.vector_store %arg27[%c0_655, %c32_656], %1059 {strides = array<i32>} : memref<16x64xf32, #tpu.memory_space<vmem>>, vector<8x16xf32>,
    %c0_657 = arith.constant 0 : index
    %c48_658 = arith.constant 48 : index
    %1061 = vector.load %arg26[%c0_657, %c48_658] : memref<16x192xf32, #tpu.memory_space<vmem>>, vector<8x16xf32>
    %1062 = arith.truncf %1061 : vector<8x16xf32> to vector<8x16xbf16>
    %c0_659 = arith.constant 0 : index
    %c112_660 = arith.constant 112 : index
    %1063 = vector.load %arg26[%c0_659, %c112_660] : memref<16x192xf32, #tpu.memory_space<vmem>>, vector<8x16xf32>
    %1064 = arith.truncf %1063 : vector<8x16xf32> to vector<8x16xbf16>
    %c0_661 = arith.constant 0 : index
    %c176_662 = arith.constant 176 : index
    %1065 = vector.load %arg26[%c0_661, %c176_662] : memref<16x192xf32, #tpu.memory_space<vmem>>, vector<8x16xf32>
    %1066 = arith.truncf %1065 : vector<8x16xf32> to vector<8x16xbf16>
    "tpu.trace_start"() <{level = 10 : i32, message = "qd,kd->qk"}> : () -> ()
    %cst_663 = arith.constant dense<0.000000e+00> : vector<8x8xf32>
    %1067 = tpu.matmul %1062, %1064, %cst_663 {dimension_numbers = #tpu.dot_dimension_numbers<[1], [1], [0], [0], [0, 0, 1, 0], [], []>} : vector<8x16xbf16>, vector<8x16xbf16>, vector<8x8xf32> -> vector<8x8xf32>
    "tpu.trace_stop"() : () -> ()
    %c3_664 = arith.constant 3 : index
    %c0_665 = arith.constant 0 : index
    %c0_666 = arith.constant 0 : index
    %1068 = vector.load %arg2[%c3_664, %c0_665, %c0_666] : memref<8x8x8xf32, #tpu.memory_space<vmem>>, vector<1x8x8xf32>
    %1069 = vector.shape_cast %1068 : vector<1x8x8xf32> to vector<8x8xf32>
    %1070 = arith.addf %1067, %1069 : vector<8x8xf32>
    %cst_667 = arith.constant dense<0xFF800000> : vector<8xf32>
    %1071 = vector.multi_reduction <maximumf>, %1070, %cst_667 [1] : vector<8x8xf32> to vector<8xf32>
    %1072 = vector.shape_cast %1071 : vector<8xf32> to vector<8x1xf32>
    %1073 = vector.broadcast %1072 : vector<8x1xf32> to vector<8x8xf32>
    %1074 = arith.subf %1070, %1073 : vector<8x8xf32>
    %1075 = math.exp %1074 : vector<8x8xf32>
    %cst_668 = arith.constant dense<0.000000e+00> : vector<8xf32>
    %1076 = vector.multi_reduction <add>, %1075, %cst_668 [1] : vector<8x8xf32> to vector<8xf32>
    %1077 = vector.shape_cast %1076 : vector<8xf32> to vector<8x1xf32>
    %1078 = tpu.reciprocal %1077 {approx = true} : vector<8x1xf32> -> vector<8x1xf32>
    %1079 = vector.broadcast %1078 : vector<8x1xf32> to vector<8x8xf32>
    %1080 = arith.mulf %1075, %1079 : vector<8x8xf32>
    %1081 = arith.truncf %1080 : vector<8x8xf32> to vector<8x8xbf16>
    %cst_669 = arith.constant dense<0.000000e+00> : vector<8x16xf32>
    %1082 = tpu.matmul %1081, %1066, %cst_669 {dimension_numbers = #tpu.dot_dimension_numbers<[1], [0], [0], [1], [0, 0, 1, 1], [], []>} : vector<8x8xbf16>, vector<8x16xbf16>, vector<8x16xf32> -> vector<8x16xf32>
    %c0_670 = arith.constant 0 : index
    %c48_671 = arith.constant 48 : index
    %1083 = vector.load %arg27[%c0_670, %c48_671] : memref<16x64xf32, #tpu.memory_space<vmem>>, vector<8x16xf32>
    tpu.vector_store %arg27[%c0_670, %c48_671], %1082 {strides = array<i32>} : memref<16x64xf32, #tpu.memory_space<vmem>>, vector<8x16xf32>,
    %c8_672 = arith.constant 8 : index
    %c0_673 = arith.constant 0 : index
    %1084 = vector.load %arg26[%c8_672, %c0_673] : memref<16x192xf32, #tpu.memory_space<vmem>>, vector<8x16xf32>
    %1085 = arith.truncf %1084 : vector<8x16xf32> to vector<8x16xbf16>
    %c8_674 = arith.constant 8 : index
    %c64_675 = arith.constant 64 : index
    %1086 = vector.load %arg26[%c8_674, %c64_675] : memref<16x192xf32, #tpu.memory_space<vmem>>, vector<8x16xf32>
    %1087 = arith.truncf %1086 : vector<8x16xf32> to vector<8x16xbf16>
    %c8_676 = arith.constant 8 : index
    %c128_677 = arith.constant 128 : index
    %1088 = vector.load %arg26[%c8_676, %c128_677] : memref<16x192xf32, #tpu.memory_space<vmem>>, vector<8x16xf32>
    %1089 = arith.truncf %1088 : vector<8x16xf32> to vector<8x16xbf16>
    "tpu.trace_start"() <{level = 10 : i32, message = "qd,kd->qk"}> : () -> ()
    %cst_678 = arith.constant dense<0.000000e+00> : vector<8x8xf32>
    %1090 = tpu.matmul %1085, %1087, %cst_678 {dimension_numbers = #tpu.dot_dimension_numbers<[1], [1], [0], [0], [0, 0, 1, 0], [], []>} : vector<8x16xbf16>, vector<8x16xbf16>, vector<8x8xf32> -> vector<8x8xf32>
    "tpu.trace_stop"() : () -> ()
    %c4_679 = arith.constant 4 : index
    %c0_680 = arith.constant 0 : index
    %c0_681 = arith.constant 0 : index
    %1091 = vector.load %arg2[%c4_679, %c0_680, %c0_681] : memref<8x8x8xf32, #tpu.memory_space<vmem>>, vector<1x8x8xf32>
    %1092 = vector.shape_cast %1091 : vector<1x8x8xf32> to vector<8x8xf32>
    %1093 = arith.addf %1090, %1092 : vector<8x8xf32>
    %cst_682 = arith.constant dense<0xFF800000> : vector<8xf32>
    %1094 = vector.multi_reduction <maximumf>, %1093, %cst_682 [1] : vector<8x8xf32> to vector<8xf32>
    %1095 = vector.shape_cast %1094 : vector<8xf32> to vector<8x1xf32>
    %1096 = vector.broadcast %1095 : vector<8x1xf32> to vector<8x8xf32>
    %1097 = arith.subf %1093, %1096 : vector<8x8xf32>
    %1098 = math.exp %1097 : vector<8x8xf32>
    %cst_683 = arith.constant dense<0.000000e+00> : vector<8xf32>
    %1099 = vector.multi_reduction <add>, %1098, %cst_683 [1] : vector<8x8xf32> to vector<8xf32>
    %1100 = vector.shape_cast %1099 : vector<8xf32> to vector<8x1xf32>
    %1101 = tpu.reciprocal %1100 {approx = true} : vector<8x1xf32> -> vector<8x1xf32>
    %1102 = vector.broadcast %1101 : vector<8x1xf32> to vector<8x8xf32>
    %1103 = arith.mulf %1098, %1102 : vector<8x8xf32>
    %1104 = arith.truncf %1103 : vector<8x8xf32> to vector<8x8xbf16>
    %cst_684 = arith.constant dense<0.000000e+00> : vector<8x16xf32>
    %1105 = tpu.matmul %1104, %1089, %cst_684 {dimension_numbers = #tpu.dot_dimension_numbers<[1], [0], [0], [1], [0, 0, 1, 1], [], []>} : vector<8x8xbf16>, vector<8x16xbf16>, vector<8x16xf32> -> vector<8x16xf32>
    %c8_685 = arith.constant 8 : index
    %c0_686 = arith.constant 0 : index
    %1106 = vector.load %arg27[%c8_685, %c0_686] : memref<16x64xf32, #tpu.memory_space<vmem>>, vector<8x16xf32>
    tpu.vector_store %arg27[%c8_685, %c0_686], %1105 {strides = array<i32>} : memref<16x64xf32, #tpu.memory_space<vmem>>, vector<8x16xf32>,
    %c8_687 = arith.constant 8 : index
    %c16_688 = arith.constant 16 : index
    %1107 = vector.load %arg26[%c8_687, %c16_688] : memref<16x192xf32, #tpu.memory_space<vmem>>, vector<8x16xf32>
    %1108 = arith.truncf %1107 : vector<8x16xf32> to vector<8x16xbf16>
    %c8_689 = arith.constant 8 : index
    %c80_690 = arith.constant 80 : index
    %1109 = vector.load %arg26[%c8_689, %c80_690] : memref<16x192xf32, #tpu.memory_space<vmem>>, vector<8x16xf32>
    %1110 = arith.truncf %1109 : vector<8x16xf32> to vector<8x16xbf16>
    %c8_691 = arith.constant 8 : index
    %c144_692 = arith.constant 144 : index
    %1111 = vector.load %arg26[%c8_691, %c144_692] : memref<16x192xf32, #tpu.memory_space<vmem>>, vector<8x16xf32>
    %1112 = arith.truncf %1111 : vector<8x16xf32> to vector<8x16xbf16>
    "tpu.trace_start"() <{level = 10 : i32, message = "qd,kd->qk"}> : () -> ()
    %cst_693 = arith.constant dense<0.000000e+00> : vector<8x8xf32>
    %1113 = tpu.matmul %1108, %1110, %cst_693 {dimension_numbers = #tpu.dot_dimension_numbers<[1], [1], [0], [0], [0, 0, 1, 0], [], []>} : vector<8x16xbf16>, vector<8x16xbf16>, vector<8x8xf32> -> vector<8x8xf32>
    "tpu.trace_stop"() : () -> ()
    %c5_694 = arith.constant 5 : index
    %c0_695 = arith.constant 0 : index
    %c0_696 = arith.constant 0 : index
    %1114 = vector.load %arg2[%c5_694, %c0_695, %c0_696] : memref<8x8x8xf32, #tpu.memory_space<vmem>>, vector<1x8x8xf32>
    %1115 = vector.shape_cast %1114 : vector<1x8x8xf32> to vector<8x8xf32>
    %1116 = arith.addf %1113, %1115 : vector<8x8xf32>
    %cst_697 = arith.constant dense<0xFF800000> : vector<8xf32>
    %1117 = vector.multi_reduction <maximumf>, %1116, %cst_697 [1] : vector<8x8xf32> to vector<8xf32>
    %1118 = vector.shape_cast %1117 : vector<8xf32> to vector<8x1xf32>
    %1119 = vector.broadcast %1118 : vector<8x1xf32> to vector<8x8xf32>
    %1120 = arith.subf %1116, %1119 : vector<8x8xf32>
    %1121 = math.exp %1120 : vector<8x8xf32>
    %cst_698 = arith.constant dense<0.000000e+00> : vector<8xf32>
    %1122 = vector.multi_reduction <add>, %1121, %cst_698 [1] : vector<8x8xf32> to vector<8xf32>
    %1123 = vector.shape_cast %1122 : vector<8xf32> to vector<8x1xf32>
    %1124 = tpu.reciprocal %1123 {approx = true} : vector<8x1xf32> -> vector<8x1xf32>
    %1125 = vector.broadcast %1124 : vector<8x1xf32> to vector<8x8xf32>
    %1126 = arith.mulf %1121, %1125 : vector<8x8xf32>
    %1127 = arith.truncf %1126 : vector<8x8xf32> to vector<8x8xbf16>
    %cst_699 = arith.constant dense<0.000000e+00> : vector<8x16xf32>
    %1128 = tpu.matmul %1127, %1112, %cst_699 {dimension_numbers = #tpu.dot_dimension_numbers<[1], [0], [0], [1], [0, 0, 1, 1], [], []>} : vector<8x8xbf16>, vector<8x16xbf16>, vector<8x16xf32> -> vector<8x16xf32>
    %c8_700 = arith.constant 8 : index
    %c16_701 = arith.constant 16 : index
    %1129 = vector.load %arg27[%c8_700, %c16_701] : memref<16x64xf32, #tpu.memory_space<vmem>>, vector<8x16xf32>
    tpu.vector_store %arg27[%c8_700, %c16_701], %1128 {strides = array<i32>} : memref<16x64xf32, #tpu.memory_space<vmem>>, vector<8x16xf32>,
    %c8_702 = arith.constant 8 : index
    %c32_703 = arith.constant 32 : index
    %1130 = vector.load %arg26[%c8_702, %c32_703] : memref<16x192xf32, #tpu.memory_space<vmem>>, vector<8x16xf32>
    %1131 = arith.truncf %1130 : vector<8x16xf32> to vector<8x16xbf16>
    %c8_704 = arith.constant 8 : index
    %c96_705 = arith.constant 96 : index
    %1132 = vector.load %arg26[%c8_704, %c96_705] : memref<16x192xf32, #tpu.memory_space<vmem>>, vector<8x16xf32>
    %1133 = arith.truncf %1132 : vector<8x16xf32> to vector<8x16xbf16>
    %c8_706 = arith.constant 8 : index
    %c160_707 = arith.constant 160 : index
    %1134 = vector.load %arg26[%c8_706, %c160_707] : memref<16x192xf32, #tpu.memory_space<vmem>>, vector<8x16xf32>
    %1135 = arith.truncf %1134 : vector<8x16xf32> to vector<8x16xbf16>
    "tpu.trace_start"() <{level = 10 : i32, message = "qd,kd->qk"}> : () -> ()
    %cst_708 = arith.constant dense<0.000000e+00> : vector<8x8xf32>
    %1136 = tpu.matmul %1131, %1133, %cst_708 {dimension_numbers = #tpu.dot_dimension_numbers<[1], [1], [0], [0], [0, 0, 1, 0], [], []>} : vector<8x16xbf16>, vector<8x16xbf16>, vector<8x8xf32> -> vector<8x8xf32>
    "tpu.trace_stop"() : () -> ()
    %c6_709 = arith.constant 6 : index
    %c0_710 = arith.constant 0 : index
    %c0_711 = arith.constant 0 : index
    %1137 = vector.load %arg2[%c6_709, %c0_710, %c0_711] : memref<8x8x8xf32, #tpu.memory_space<vmem>>, vector<1x8x8xf32>
    %1138 = vector.shape_cast %1137 : vector<1x8x8xf32> to vector<8x8xf32>
    %1139 = arith.addf %1136, %1138 : vector<8x8xf32>
    %cst_712 = arith.constant dense<0xFF800000> : vector<8xf32>
    %1140 = vector.multi_reduction <maximumf>, %1139, %cst_712 [1] : vector<8x8xf32> to vector<8xf32>
    %1141 = vector.shape_cast %1140 : vector<8xf32> to vector<8x1xf32>
    %1142 = vector.broadcast %1141 : vector<8x1xf32> to vector<8x8xf32>
    %1143 = arith.subf %1139, %1142 : vector<8x8xf32>
    %1144 = math.exp %1143 : vector<8x8xf32>
    %cst_713 = arith.constant dense<0.000000e+00> : vector<8xf32>
    %1145 = vector.multi_reduction <add>, %1144, %cst_713 [1] : vector<8x8xf32> to vector<8xf32>
    %1146 = vector.shape_cast %1145 : vector<8xf32> to vector<8x1xf32>
    %1147 = tpu.reciprocal %1146 {approx = true} : vector<8x1xf32> -> vector<8x1xf32>
    %1148 = vector.broadcast %1147 : vector<8x1xf32> to vector<8x8xf32>
    %1149 = arith.mulf %1144, %1148 : vector<8x8xf32>
    %1150 = arith.truncf %1149 : vector<8x8xf32> to vector<8x8xbf16>
    %cst_714 = arith.constant dense<0.000000e+00> : vector<8x16xf32>
    %1151 = tpu.matmul %1150, %1135, %cst_714 {dimension_numbers = #tpu.dot_dimension_numbers<[1], [0], [0], [1], [0, 0, 1, 1], [], []>} : vector<8x8xbf16>, vector<8x16xbf16>, vector<8x16xf32> -> vector<8x16xf32>
    %c8_715 = arith.constant 8 : index
    %c32_716 = arith.constant 32 : index
    %1152 = vector.load %arg27[%c8_715, %c32_716] : memref<16x64xf32, #tpu.memory_space<vmem>>, vector<8x16xf32>
    tpu.vector_store %arg27[%c8_715, %c32_716], %1151 {strides = array<i32>} : memref<16x64xf32, #tpu.memory_space<vmem>>, vector<8x16xf32>,
    %c8_717 = arith.constant 8 : index
    %c48_718 = arith.constant 48 : index
    %1153 = vector.load %arg26[%c8_717, %c48_718] : memref<16x192xf32, #tpu.memory_space<vmem>>, vector<8x16xf32>
    %1154 = arith.truncf %1153 : vector<8x16xf32> to vector<8x16xbf16>
    %c8_719 = arith.constant 8 : index
    %c112_720 = arith.constant 112 : index
    %1155 = vector.load %arg26[%c8_719, %c112_720] : memref<16x192xf32, #tpu.memory_space<vmem>>, vector<8x16xf32>
    %1156 = arith.truncf %1155 : vector<8x16xf32> to vector<8x16xbf16>
    %c8_721 = arith.constant 8 : index
    %c176_722 = arith.constant 176 : index
    %1157 = vector.load %arg26[%c8_721, %c176_722] : memref<16x192xf32, #tpu.memory_space<vmem>>, vector<8x16xf32>
    %1158 = arith.truncf %1157 : vector<8x16xf32> to vector<8x16xbf16>
    "tpu.trace_start"() <{level = 10 : i32, message = "qd,kd->qk"}> : () -> ()
    %cst_723 = arith.constant dense<0.000000e+00> : vector<8x8xf32>
    %1159 = tpu.matmul %1154, %1156, %cst_723 {dimension_numbers = #tpu.dot_dimension_numbers<[1], [1], [0], [0], [0, 0, 1, 0], [], []>} : vector<8x16xbf16>, vector<8x16xbf16>, vector<8x8xf32> -> vector<8x8xf32>
    "tpu.trace_stop"() : () -> ()
    %c7_724 = arith.constant 7 : index
    %c0_725 = arith.constant 0 : index
    %c0_726 = arith.constant 0 : index
    %1160 = vector.load %arg2[%c7_724, %c0_725, %c0_726] : memref<8x8x8xf32, #tpu.memory_space<vmem>>, vector<1x8x8xf32>
    %1161 = vector.shape_cast %1160 : vector<1x8x8xf32> to vector<8x8xf32>
    %1162 = arith.addf %1159, %1161 : vector<8x8xf32>
    %cst_727 = arith.constant dense<0xFF800000> : vector<8xf32>
    %1163 = vector.multi_reduction <maximumf>, %1162, %cst_727 [1] : vector<8x8xf32> to vector<8xf32>
    %1164 = vector.shape_cast %1163 : vector<8xf32> to vector<8x1xf32>
    %1165 = vector.broadcast %1164 : vector<8x1xf32> to vector<8x8xf32>
    %1166 = arith.subf %1162, %1165 : vector<8x8xf32>
    %1167 = math.exp %1166 : vector<8x8xf32>
    %cst_728 = arith.constant dense<0.000000e+00> : vector<8xf32>
    %1168 = vector.multi_reduction <add>, %1167, %cst_728 [1] : vector<8x8xf32> to vector<8xf32>
    %1169 = vector.shape_cast %1168 : vector<8xf32> to vector<8x1xf32>
    %1170 = tpu.reciprocal %1169 {approx = true} : vector<8x1xf32> -> vector<8x1xf32>
    %1171 = vector.broadcast %1170 : vector<8x1xf32> to vector<8x8xf32>
    %1172 = arith.mulf %1167, %1171 : vector<8x8xf32>
    %1173 = arith.truncf %1172 : vector<8x8xf32> to vector<8x8xbf16>
    %cst_729 = arith.constant dense<0.000000e+00> : vector<8x16xf32>
    %1174 = tpu.matmul %1173, %1158, %cst_729 {dimension_numbers = #tpu.dot_dimension_numbers<[1], [0], [0], [1], [0, 0, 1, 1], [], []>} : vector<8x8xbf16>, vector<8x16xbf16>, vector<8x16xf32> -> vector<8x16xf32>
    %c8_730 = arith.constant 8 : index
    %c48_731 = arith.constant 48 : index
    %1175 = vector.load %arg27[%c8_730, %c48_731] : memref<16x64xf32, #tpu.memory_space<vmem>>, vector<8x16xf32>
    tpu.vector_store %arg27[%c8_730, %c48_731], %1174 {strides = array<i32>} : memref<16x64xf32, #tpu.memory_space<vmem>>, vector<8x16xf32>,
    %c0_732 = arith.constant 0 : index
    %c0_733 = arith.constant 0 : index
    %1176 = vector.load %arg27[%c0_732, %c0_733] : memref<16x64xf32, #tpu.memory_space<vmem>>, vector<16x64xf32>
    %1177 = arith.truncf %1176 : vector<16x64xf32> to vector<16x64xbf16>
    %c1_734 = arith.constant 1 : index
    %c0_735 = arith.constant 0 : index
    %c0_736 = arith.constant 0 : index
    %1178 = vector.load %arg12[%c1_734, %c0_735, %c0_736] : memref<2x64x64xbf16, #tpu.memory_space<vmem>>, vector<1x64x64xbf16>
    %1179 = vector.shape_cast %1178 : vector<1x64x64xbf16> to vector<64x64xbf16>
    %cst_737 = arith.constant dense<0.000000e+00> : vector<16x64xf32>
    %1180 = tpu.matmul %1177, %1179, %cst_737 {dimension_numbers = #tpu.dot_dimension_numbers<[1], [0], [0], [1], [0, 0, 1, 1], [], []>} : vector<16x64xbf16>, vector<64x64xbf16>, vector<16x64xf32> -> vector<16x64xf32>
    %1181 = arith.addf %972, %1180 : vector<16x64xf32>
    %c1_738 = arith.constant 1 : index
    %c0_739 = arith.constant 0 : index
    %c0_740 = arith.constant 0 : index
    %1182 = vector.load %arg17[%c1_738, %c0_739, %c0_740] : memref<2x1x64xf32, #tpu.memory_space<vmem>>, vector<1x1x64xf32>
    %1183 = vector.shape_cast %1182 : vector<1x1x64xf32> to vector<1x64xf32>
    %1184 = arith.mulf %1181, %1181 : vector<16x64xf32>
    %cst_741 = arith.constant dense<0.000000e+00> : vector<16xf32>
    %1185 = vector.multi_reduction <add>, %1184, %cst_741 [1] : vector<16x64xf32> to vector<16xf32>
    %1186 = vector.shape_cast %1185 : vector<16xf32> to vector<16x1xf32>
    %cst_742 = arith.constant 6.400000e+01 : f32
    %1187 = vector.broadcast %cst_742 : f32 to vector<16x1xf32>
    %1188 = arith.divf %1186, %1187 : vector<16x1xf32>
    %cst_743 = arith.constant 9.99999997E-7 : f32
    %1189 = vector.broadcast %cst_743 : f32 to vector<16x1xf32>
    %1190 = arith.addf %1188, %1189 : vector<16x1xf32>
    %1191 = math.rsqrt %1190 : vector<16x1xf32>
    %1192 = vector.broadcast %1191 : vector<16x1xf32> to vector<16x64xf32>
    %1193 = arith.mulf %1181, %1192 : vector<16x64xf32>
    %1194 = vector.broadcast %1183 : vector<1x64xf32> to vector<16x64xf32>
    %1195 = arith.mulf %1193, %1194 : vector<16x64xf32>
    %1196 = arith.truncf %1195 : vector<16x64xf32> to vector<16x64xbf16>
    %c1_744 = arith.constant 1 : index
    %c0_745 = arith.constant 0 : index
    %c0_746 = arith.constant 0 : index
    %1197 = vector.load %arg14[%c1_744, %c0_745, %c0_746] : memref<2x64x64xbf16, #tpu.memory_space<vmem>>, vector<1x64x64xbf16>
    %1198 = vector.shape_cast %1197 : vector<1x64x64xbf16> to vector<64x64xbf16>
    %cst_747 = arith.constant dense<0.000000e+00> : vector<16x64xf32>
    %1199 = tpu.matmul %1196, %1198, %cst_747 {dimension_numbers = #tpu.dot_dimension_numbers<[1], [0], [0], [1], [0, 0, 1, 1], [], []>} : vector<16x64xbf16>, vector<64x64xbf16>, vector<16x64xf32> -> vector<16x64xf32>
    %c0_748 = arith.constant 0 : index
    %c0_749 = arith.constant 0 : index
    %1200 = vector.load %arg26[%c0_748, %c0_749] : memref<16x192xf32, #tpu.memory_space<vmem>>, vector<16x64xf32>
    tpu.vector_store %arg26[%c0_748, %c0_749], %1199 {strides = array<i32>} : memref<16x192xf32, #tpu.memory_space<vmem>>, vector<16x64xf32>,
    %c1_750 = arith.constant 1 : index
    %c0_751 = arith.constant 0 : index
    %c0_752 = arith.constant 0 : index
    %1201 = vector.load %arg15[%c1_750, %c0_751, %c0_752] : memref<2x64x128xbf16, #tpu.memory_space<vmem>>, vector<1x64x128xbf16>
    %1202 = vector.shape_cast %1201 : vector<1x64x128xbf16> to vector<64x128xbf16>
    %cst_753 = arith.constant dense<0.000000e+00> : vector<16x128xf32>
    %1203 = tpu.matmul %510, %1202, %cst_753 {dimension_numbers = #tpu.dot_dimension_numbers<[1], [0], [0], [1], [0, 0, 1, 1], [], []>} : vector<16x64xbf16>, vector<64x128xbf16>, vector<16x128xf32> -> vector<16x128xf32>
    %c0_754 = arith.constant 0 : index
    %c64_755 = arith.constant 64 : index
    %1204 = vector.load %arg26[%c0_754, %c64_755] : memref<16x192xf32, #tpu.memory_space<vmem>>, vector<16x128xf32>
    tpu.vector_store %arg26[%c0_754, %c64_755], %1203 {strides = array<i32>} : memref<16x192xf32, #tpu.memory_space<vmem>>, vector<16x128xf32>,
    %c0_756 = arith.constant 0 : index
    %c0_757 = arith.constant 0 : index
    %1205 = vector.load %arg26[%c0_756, %c0_757] : memref<16x192xf32, #tpu.memory_space<vmem>>, vector<8x16xf32>
    %1206 = arith.truncf %1205 : vector<8x16xf32> to vector<8x16xbf16>
    %c0_758 = arith.constant 0 : index
    %c64_759 = arith.constant 64 : index
    %1207 = vector.load %arg26[%c0_758, %c64_759] : memref<16x192xf32, #tpu.memory_space<vmem>>, vector<8x16xf32>
    %1208 = arith.truncf %1207 : vector<8x16xf32> to vector<8x16xbf16>
    %c0_760 = arith.constant 0 : index
    %c128_761 = arith.constant 128 : index
    %1209 = vector.load %arg26[%c0_760, %c128_761] : memref<16x192xf32, #tpu.memory_space<vmem>>, vector<8x16xf32>
    %1210 = arith.truncf %1209 : vector<8x16xf32> to vector<8x16xbf16>
    "tpu.trace_start"() <{level = 10 : i32, message = "qd,kd->qk"}> : () -> ()
    %cst_762 = arith.constant dense<0.000000e+00> : vector<8x8xf32>
    %1211 = tpu.matmul %1206, %1208, %cst_762 {dimension_numbers = #tpu.dot_dimension_numbers<[1], [1], [0], [0], [0, 0, 1, 0], [], []>} : vector<8x16xbf16>, vector<8x16xbf16>, vector<8x8xf32> -> vector<8x8xf32>
    "tpu.trace_stop"() : () -> ()
    %c0_763 = arith.constant 0 : index
    %c0_764 = arith.constant 0 : index
    %c0_765 = arith.constant 0 : index
    %1212 = vector.load %arg3[%c0_763, %c0_764, %c0_765] : memref<8x8x8xf32, #tpu.memory_space<vmem>>, vector<1x8x8xf32>
    %1213 = vector.shape_cast %1212 : vector<1x8x8xf32> to vector<8x8xf32>
    %1214 = arith.addf %1211, %1213 : vector<8x8xf32>
    %cst_766 = arith.constant dense<0xFF800000> : vector<8xf32>
    %1215 = vector.multi_reduction <maximumf>, %1214, %cst_766 [1] : vector<8x8xf32> to vector<8xf32>
    %1216 = vector.shape_cast %1215 : vector<8xf32> to vector<8x1xf32>
    %1217 = vector.broadcast %1216 : vector<8x1xf32> to vector<8x8xf32>
    %1218 = arith.subf %1214, %1217 : vector<8x8xf32>
    %1219 = math.exp %1218 : vector<8x8xf32>
    %cst_767 = arith.constant dense<0.000000e+00> : vector<8xf32>
    %1220 = vector.multi_reduction <add>, %1219, %cst_767 [1] : vector<8x8xf32> to vector<8xf32>
    %1221 = vector.shape_cast %1220 : vector<8xf32> to vector<8x1xf32>
    %1222 = tpu.reciprocal %1221 {approx = true} : vector<8x1xf32> -> vector<8x1xf32>
    %1223 = vector.broadcast %1222 : vector<8x1xf32> to vector<8x8xf32>
    %1224 = arith.mulf %1219, %1223 : vector<8x8xf32>
    %1225 = arith.truncf %1224 : vector<8x8xf32> to vector<8x8xbf16>
    %cst_768 = arith.constant dense<0.000000e+00> : vector<8x16xf32>
    %1226 = tpu.matmul %1225, %1210, %cst_768 {dimension_numbers = #tpu.dot_dimension_numbers<[1], [0], [0], [1], [0, 0, 1, 1], [], []>} : vector<8x8xbf16>, vector<8x16xbf16>, vector<8x16xf32> -> vector<8x16xf32>
    %c0_769 = arith.constant 0 : index
    %c0_770 = arith.constant 0 : index
    %1227 = vector.load %arg27[%c0_769, %c0_770] : memref<16x64xf32, #tpu.memory_space<vmem>>, vector<8x16xf32>
    tpu.vector_store %arg27[%c0_769, %c0_770], %1226 {strides = array<i32>} : memref<16x64xf32, #tpu.memory_space<vmem>>, vector<8x16xf32>,
    %c0_771 = arith.constant 0 : index
    %c16_772 = arith.constant 16 : index
    %1228 = vector.load %arg26[%c0_771, %c16_772] : memref<16x192xf32, #tpu.memory_space<vmem>>, vector<8x16xf32>
    %1229 = arith.truncf %1228 : vector<8x16xf32> to vector<8x16xbf16>
    %c0_773 = arith.constant 0 : index
    %c80_774 = arith.constant 80 : index
    %1230 = vector.load %arg26[%c0_773, %c80_774] : memref<16x192xf32, #tpu.memory_space<vmem>>, vector<8x16xf32>
    %1231 = arith.truncf %1230 : vector<8x16xf32> to vector<8x16xbf16>
    %c0_775 = arith.constant 0 : index
    %c144_776 = arith.constant 144 : index
    %1232 = vector.load %arg26[%c0_775, %c144_776] : memref<16x192xf32, #tpu.memory_space<vmem>>, vector<8x16xf32>
    %1233 = arith.truncf %1232 : vector<8x16xf32> to vector<8x16xbf16>
    "tpu.trace_start"() <{level = 10 : i32, message = "qd,kd->qk"}> : () -> ()
    %cst_777 = arith.constant dense<0.000000e+00> : vector<8x8xf32>
    %1234 = tpu.matmul %1229, %1231, %cst_777 {dimension_numbers = #tpu.dot_dimension_numbers<[1], [1], [0], [0], [0, 0, 1, 0], [], []>} : vector<8x16xbf16>, vector<8x16xbf16>, vector<8x8xf32> -> vector<8x8xf32>
    "tpu.trace_stop"() : () -> ()
    %c1_778 = arith.constant 1 : index
    %c0_779 = arith.constant 0 : index
    %c0_780 = arith.constant 0 : index
    %1235 = vector.load %arg3[%c1_778, %c0_779, %c0_780] : memref<8x8x8xf32, #tpu.memory_space<vmem>>, vector<1x8x8xf32>
    %1236 = vector.shape_cast %1235 : vector<1x8x8xf32> to vector<8x8xf32>
    %1237 = arith.addf %1234, %1236 : vector<8x8xf32>
    %cst_781 = arith.constant dense<0xFF800000> : vector<8xf32>
    %1238 = vector.multi_reduction <maximumf>, %1237, %cst_781 [1] : vector<8x8xf32> to vector<8xf32>
    %1239 = vector.shape_cast %1238 : vector<8xf32> to vector<8x1xf32>
    %1240 = vector.broadcast %1239 : vector<8x1xf32> to vector<8x8xf32>
    %1241 = arith.subf %1237, %1240 : vector<8x8xf32>
    %1242 = math.exp %1241 : vector<8x8xf32>
    %cst_782 = arith.constant dense<0.000000e+00> : vector<8xf32>
    %1243 = vector.multi_reduction <add>, %1242, %cst_782 [1] : vector<8x8xf32> to vector<8xf32>
    %1244 = vector.shape_cast %1243 : vector<8xf32> to vector<8x1xf32>
    %1245 = tpu.reciprocal %1244 {approx = true} : vector<8x1xf32> -> vector<8x1xf32>
    %1246 = vector.broadcast %1245 : vector<8x1xf32> to vector<8x8xf32>
    %1247 = arith.mulf %1242, %1246 : vector<8x8xf32>
    %1248 = arith.truncf %1247 : vector<8x8xf32> to vector<8x8xbf16>
    %cst_783 = arith.constant dense<0.000000e+00> : vector<8x16xf32>
    %1249 = tpu.matmul %1248, %1233, %cst_783 {dimension_numbers = #tpu.dot_dimension_numbers<[1], [0], [0], [1], [0, 0, 1, 1], [], []>} : vector<8x8xbf16>, vector<8x16xbf16>, vector<8x16xf32> -> vector<8x16xf32>
    %c0_784 = arith.constant 0 : index
    %c16_785 = arith.constant 16 : index
    %1250 = vector.load %arg27[%c0_784, %c16_785] : memref<16x64xf32, #tpu.memory_space<vmem>>, vector<8x16xf32>
    tpu.vector_store %arg27[%c0_784, %c16_785], %1249 {strides = array<i32>} : memref<16x64xf32, #tpu.memory_space<vmem>>, vector<8x16xf32>,
    %c0_786 = arith.constant 0 : index
    %c32_787 = arith.constant 32 : index
    %1251 = vector.load %arg26[%c0_786, %c32_787] : memref<16x192xf32, #tpu.memory_space<vmem>>, vector<8x16xf32>
    %1252 = arith.truncf %1251 : vector<8x16xf32> to vector<8x16xbf16>
    %c0_788 = arith.constant 0 : index
    %c96_789 = arith.constant 96 : index
    %1253 = vector.load %arg26[%c0_788, %c96_789] : memref<16x192xf32, #tpu.memory_space<vmem>>, vector<8x16xf32>
    %1254 = arith.truncf %1253 : vector<8x16xf32> to vector<8x16xbf16>
    %c0_790 = arith.constant 0 : index
    %c160_791 = arith.constant 160 : index
    %1255 = vector.load %arg26[%c0_790, %c160_791] : memref<16x192xf32, #tpu.memory_space<vmem>>, vector<8x16xf32>
    %1256 = arith.truncf %1255 : vector<8x16xf32> to vector<8x16xbf16>
    "tpu.trace_start"() <{level = 10 : i32, message = "qd,kd->qk"}> : () -> ()
    %cst_792 = arith.constant dense<0.000000e+00> : vector<8x8xf32>
    %1257 = tpu.matmul %1252, %1254, %cst_792 {dimension_numbers = #tpu.dot_dimension_numbers<[1], [1], [0], [0], [0, 0, 1, 0], [], []>} : vector<8x16xbf16>, vector<8x16xbf16>, vector<8x8xf32> -> vector<8x8xf32>
    "tpu.trace_stop"() : () -> ()
    %c2_793 = arith.constant 2 : index
    %c0_794 = arith.constant 0 : index
    %c0_795 = arith.constant 0 : index
    %1258 = vector.load %arg3[%c2_793, %c0_794, %c0_795] : memref<8x8x8xf32, #tpu.memory_space<vmem>>, vector<1x8x8xf32>
    %1259 = vector.shape_cast %1258 : vector<1x8x8xf32> to vector<8x8xf32>
    %1260 = arith.addf %1257, %1259 : vector<8x8xf32>
    %cst_796 = arith.constant dense<0xFF800000> : vector<8xf32>
    %1261 = vector.multi_reduction <maximumf>, %1260, %cst_796 [1] : vector<8x8xf32> to vector<8xf32>
    %1262 = vector.shape_cast %1261 : vector<8xf32> to vector<8x1xf32>
    %1263 = vector.broadcast %1262 : vector<8x1xf32> to vector<8x8xf32>
    %1264 = arith.subf %1260, %1263 : vector<8x8xf32>
    %1265 = math.exp %1264 : vector<8x8xf32>
    %cst_797 = arith.constant dense<0.000000e+00> : vector<8xf32>
    %1266 = vector.multi_reduction <add>, %1265, %cst_797 [1] : vector<8x8xf32> to vector<8xf32>
    %1267 = vector.shape_cast %1266 : vector<8xf32> to vector<8x1xf32>
    %1268 = tpu.reciprocal %1267 {approx = true} : vector<8x1xf32> -> vector<8x1xf32>
    %1269 = vector.broadcast %1268 : vector<8x1xf32> to vector<8x8xf32>
    %1270 = arith.mulf %1265, %1269 : vector<8x8xf32>
    %1271 = arith.truncf %1270 : vector<8x8xf32> to vector<8x8xbf16>
    %cst_798 = arith.constant dense<0.000000e+00> : vector<8x16xf32>
    %1272 = tpu.matmul %1271, %1256, %cst_798 {dimension_numbers = #tpu.dot_dimension_numbers<[1], [0], [0], [1], [0, 0, 1, 1], [], []>} : vector<8x8xbf16>, vector<8x16xbf16>, vector<8x16xf32> -> vector<8x16xf32>
    %c0_799 = arith.constant 0 : index
    %c32_800 = arith.constant 32 : index
    %1273 = vector.load %arg27[%c0_799, %c32_800] : memref<16x64xf32, #tpu.memory_space<vmem>>, vector<8x16xf32>
    tpu.vector_store %arg27[%c0_799, %c32_800], %1272 {strides = array<i32>} : memref<16x64xf32, #tpu.memory_space<vmem>>, vector<8x16xf32>,
    %c0_801 = arith.constant 0 : index
    %c48_802 = arith.constant 48 : index
    %1274 = vector.load %arg26[%c0_801, %c48_802] : memref<16x192xf32, #tpu.memory_space<vmem>>, vector<8x16xf32>
    %1275 = arith.truncf %1274 : vector<8x16xf32> to vector<8x16xbf16>
    %c0_803 = arith.constant 0 : index
    %c112_804 = arith.constant 112 : index
    %1276 = vector.load %arg26[%c0_803, %c112_804] : memref<16x192xf32, #tpu.memory_space<vmem>>, vector<8x16xf32>
    %1277 = arith.truncf %1276 : vector<8x16xf32> to vector<8x16xbf16>
    %c0_805 = arith.constant 0 : index
    %c176_806 = arith.constant 176 : index
    %1278 = vector.load %arg26[%c0_805, %c176_806] : memref<16x192xf32, #tpu.memory_space<vmem>>, vector<8x16xf32>
    %1279 = arith.truncf %1278 : vector<8x16xf32> to vector<8x16xbf16>
    "tpu.trace_start"() <{level = 10 : i32, message = "qd,kd->qk"}> : () -> ()
    %cst_807 = arith.constant dense<0.000000e+00> : vector<8x8xf32>
    %1280 = tpu.matmul %1275, %1277, %cst_807 {dimension_numbers = #tpu.dot_dimension_numbers<[1], [1], [0], [0], [0, 0, 1, 0], [], []>} : vector<8x16xbf16>, vector<8x16xbf16>, vector<8x8xf32> -> vector<8x8xf32>
    "tpu.trace_stop"() : () -> ()
    %c3_808 = arith.constant 3 : index
    %c0_809 = arith.constant 0 : index
    %c0_810 = arith.constant 0 : index
    %1281 = vector.load %arg3[%c3_808, %c0_809, %c0_810] : memref<8x8x8xf32, #tpu.memory_space<vmem>>, vector<1x8x8xf32>
    %1282 = vector.shape_cast %1281 : vector<1x8x8xf32> to vector<8x8xf32>
    %1283 = arith.addf %1280, %1282 : vector<8x8xf32>
    %cst_811 = arith.constant dense<0xFF800000> : vector<8xf32>
    %1284 = vector.multi_reduction <maximumf>, %1283, %cst_811 [1] : vector<8x8xf32> to vector<8xf32>
    %1285 = vector.shape_cast %1284 : vector<8xf32> to vector<8x1xf32>
    %1286 = vector.broadcast %1285 : vector<8x1xf32> to vector<8x8xf32>
    %1287 = arith.subf %1283, %1286 : vector<8x8xf32>
    %1288 = math.exp %1287 : vector<8x8xf32>
    %cst_812 = arith.constant dense<0.000000e+00> : vector<8xf32>
    %1289 = vector.multi_reduction <add>, %1288, %cst_812 [1] : vector<8x8xf32> to vector<8xf32>
    %1290 = vector.shape_cast %1289 : vector<8xf32> to vector<8x1xf32>
    %1291 = tpu.reciprocal %1290 {approx = true} : vector<8x1xf32> -> vector<8x1xf32>
    %1292 = vector.broadcast %1291 : vector<8x1xf32> to vector<8x8xf32>
    %1293 = arith.mulf %1288, %1292 : vector<8x8xf32>
    %1294 = arith.truncf %1293 : vector<8x8xf32> to vector<8x8xbf16>
    %cst_813 = arith.constant dense<0.000000e+00> : vector<8x16xf32>
    %1295 = tpu.matmul %1294, %1279, %cst_813 {dimension_numbers = #tpu.dot_dimension_numbers<[1], [0], [0], [1], [0, 0, 1, 1], [], []>} : vector<8x8xbf16>, vector<8x16xbf16>, vector<8x16xf32> -> vector<8x16xf32>
    %c0_814 = arith.constant 0 : index
    %c48_815 = arith.constant 48 : index
    %1296 = vector.load %arg27[%c0_814, %c48_815] : memref<16x64xf32, #tpu.memory_space<vmem>>, vector<8x16xf32>
    tpu.vector_store %arg27[%c0_814, %c48_815], %1295 {strides = array<i32>} : memref<16x64xf32, #tpu.memory_space<vmem>>, vector<8x16xf32>,
    %c8_816 = arith.constant 8 : index
    %c0_817 = arith.constant 0 : index
    %1297 = vector.load %arg26[%c8_816, %c0_817] : memref<16x192xf32, #tpu.memory_space<vmem>>, vector<8x16xf32>
    %1298 = arith.truncf %1297 : vector<8x16xf32> to vector<8x16xbf16>
    %c8_818 = arith.constant 8 : index
    %c64_819 = arith.constant 64 : index
    %1299 = vector.load %arg26[%c8_818, %c64_819] : memref<16x192xf32, #tpu.memory_space<vmem>>, vector<8x16xf32>
    %1300 = arith.truncf %1299 : vector<8x16xf32> to vector<8x16xbf16>
    %c8_820 = arith.constant 8 : index
    %c128_821 = arith.constant 128 : index
    %1301 = vector.load %arg26[%c8_820, %c128_821] : memref<16x192xf32, #tpu.memory_space<vmem>>, vector<8x16xf32>
    %1302 = arith.truncf %1301 : vector<8x16xf32> to vector<8x16xbf16>
    "tpu.trace_start"() <{level = 10 : i32, message = "qd,kd->qk"}> : () -> ()
    %cst_822 = arith.constant dense<0.000000e+00> : vector<8x8xf32>
    %1303 = tpu.matmul %1298, %1300, %cst_822 {dimension_numbers = #tpu.dot_dimension_numbers<[1], [1], [0], [0], [0, 0, 1, 0], [], []>} : vector<8x16xbf16>, vector<8x16xbf16>, vector<8x8xf32> -> vector<8x8xf32>
    "tpu.trace_stop"() : () -> ()
    %c4_823 = arith.constant 4 : index
    %c0_824 = arith.constant 0 : index
    %c0_825 = arith.constant 0 : index
    %1304 = vector.load %arg3[%c4_823, %c0_824, %c0_825] : memref<8x8x8xf32, #tpu.memory_space<vmem>>, vector<1x8x8xf32>
    %1305 = vector.shape_cast %1304 : vector<1x8x8xf32> to vector<8x8xf32>
    %1306 = arith.addf %1303, %1305 : vector<8x8xf32>
    %cst_826 = arith.constant dense<0xFF800000> : vector<8xf32>
    %1307 = vector.multi_reduction <maximumf>, %1306, %cst_826 [1] : vector<8x8xf32> to vector<8xf32>
    %1308 = vector.shape_cast %1307 : vector<8xf32> to vector<8x1xf32>
    %1309 = vector.broadcast %1308 : vector<8x1xf32> to vector<8x8xf32>
    %1310 = arith.subf %1306, %1309 : vector<8x8xf32>
    %1311 = math.exp %1310 : vector<8x8xf32>
    %cst_827 = arith.constant dense<0.000000e+00> : vector<8xf32>
    %1312 = vector.multi_reduction <add>, %1311, %cst_827 [1] : vector<8x8xf32> to vector<8xf32>
    %1313 = vector.shape_cast %1312 : vector<8xf32> to vector<8x1xf32>
    %1314 = tpu.reciprocal %1313 {approx = true} : vector<8x1xf32> -> vector<8x1xf32>
    %1315 = vector.broadcast %1314 : vector<8x1xf32> to vector<8x8xf32>
    %1316 = arith.mulf %1311, %1315 : vector<8x8xf32>
    %1317 = arith.truncf %1316 : vector<8x8xf32> to vector<8x8xbf16>
    %cst_828 = arith.constant dense<0.000000e+00> : vector<8x16xf32>
    %1318 = tpu.matmul %1317, %1302, %cst_828 {dimension_numbers = #tpu.dot_dimension_numbers<[1], [0], [0], [1], [0, 0, 1, 1], [], []>} : vector<8x8xbf16>, vector<8x16xbf16>, vector<8x16xf32> -> vector<8x16xf32>
    %c8_829 = arith.constant 8 : index
    %c0_830 = arith.constant 0 : index
    %1319 = vector.load %arg27[%c8_829, %c0_830] : memref<16x64xf32, #tpu.memory_space<vmem>>, vector<8x16xf32>
    tpu.vector_store %arg27[%c8_829, %c0_830], %1318 {strides = array<i32>} : memref<16x64xf32, #tpu.memory_space<vmem>>, vector<8x16xf32>,
    %c8_831 = arith.constant 8 : index
    %c16_832 = arith.constant 16 : index
    %1320 = vector.load %arg26[%c8_831, %c16_832] : memref<16x192xf32, #tpu.memory_space<vmem>>, vector<8x16xf32>
    %1321 = arith.truncf %1320 : vector<8x16xf32> to vector<8x16xbf16>
    %c8_833 = arith.constant 8 : index
    %c80_834 = arith.constant 80 : index
    %1322 = vector.load %arg26[%c8_833, %c80_834] : memref<16x192xf32, #tpu.memory_space<vmem>>, vector<8x16xf32>
    %1323 = arith.truncf %1322 : vector<8x16xf32> to vector<8x16xbf16>
    %c8_835 = arith.constant 8 : index
    %c144_836 = arith.constant 144 : index
    %1324 = vector.load %arg26[%c8_835, %c144_836] : memref<16x192xf32, #tpu.memory_space<vmem>>, vector<8x16xf32>
    %1325 = arith.truncf %1324 : vector<8x16xf32> to vector<8x16xbf16>
    "tpu.trace_start"() <{level = 10 : i32, message = "qd,kd->qk"}> : () -> ()
    %cst_837 = arith.constant dense<0.000000e+00> : vector<8x8xf32>
    %1326 = tpu.matmul %1321, %1323, %cst_837 {dimension_numbers = #tpu.dot_dimension_numbers<[1], [1], [0], [0], [0, 0, 1, 0], [], []>} : vector<8x16xbf16>, vector<8x16xbf16>, vector<8x8xf32> -> vector<8x8xf32>
    "tpu.trace_stop"() : () -> ()
    %c5_838 = arith.constant 5 : index
    %c0_839 = arith.constant 0 : index
    %c0_840 = arith.constant 0 : index
    %1327 = vector.load %arg3[%c5_838, %c0_839, %c0_840] : memref<8x8x8xf32, #tpu.memory_space<vmem>>, vector<1x8x8xf32>
    %1328 = vector.shape_cast %1327 : vector<1x8x8xf32> to vector<8x8xf32>
    %1329 = arith.addf %1326, %1328 : vector<8x8xf32>
    %cst_841 = arith.constant dense<0xFF800000> : vector<8xf32>
    %1330 = vector.multi_reduction <maximumf>, %1329, %cst_841 [1] : vector<8x8xf32> to vector<8xf32>
    %1331 = vector.shape_cast %1330 : vector<8xf32> to vector<8x1xf32>
    %1332 = vector.broadcast %1331 : vector<8x1xf32> to vector<8x8xf32>
    %1333 = arith.subf %1329, %1332 : vector<8x8xf32>
    %1334 = math.exp %1333 : vector<8x8xf32>
    %cst_842 = arith.constant dense<0.000000e+00> : vector<8xf32>
    %1335 = vector.multi_reduction <add>, %1334, %cst_842 [1] : vector<8x8xf32> to vector<8xf32>
    %1336 = vector.shape_cast %1335 : vector<8xf32> to vector<8x1xf32>
    %1337 = tpu.reciprocal %1336 {approx = true} : vector<8x1xf32> -> vector<8x1xf32>
    %1338 = vector.broadcast %1337 : vector<8x1xf32> to vector<8x8xf32>
    %1339 = arith.mulf %1334, %1338 : vector<8x8xf32>
    %1340 = arith.truncf %1339 : vector<8x8xf32> to vector<8x8xbf16>
    %cst_843 = arith.constant dense<0.000000e+00> : vector<8x16xf32>
    %1341 = tpu.matmul %1340, %1325, %cst_843 {dimension_numbers = #tpu.dot_dimension_numbers<[1], [0], [0], [1], [0, 0, 1, 1], [], []>} : vector<8x8xbf16>, vector<8x16xbf16>, vector<8x16xf32> -> vector<8x16xf32>
    %c8_844 = arith.constant 8 : index
    %c16_845 = arith.constant 16 : index
    %1342 = vector.load %arg27[%c8_844, %c16_845] : memref<16x64xf32, #tpu.memory_space<vmem>>, vector<8x16xf32>
    tpu.vector_store %arg27[%c8_844, %c16_845], %1341 {strides = array<i32>} : memref<16x64xf32, #tpu.memory_space<vmem>>, vector<8x16xf32>,
    %c8_846 = arith.constant 8 : index
    %c32_847 = arith.constant 32 : index
    %1343 = vector.load %arg26[%c8_846, %c32_847] : memref<16x192xf32, #tpu.memory_space<vmem>>, vector<8x16xf32>
    %1344 = arith.truncf %1343 : vector<8x16xf32> to vector<8x16xbf16>
    %c8_848 = arith.constant 8 : index
    %c96_849 = arith.constant 96 : index
    %1345 = vector.load %arg26[%c8_848, %c96_849] : memref<16x192xf32, #tpu.memory_space<vmem>>, vector<8x16xf32>
    %1346 = arith.truncf %1345 : vector<8x16xf32> to vector<8x16xbf16>
    %c8_850 = arith.constant 8 : index
    %c160_851 = arith.constant 160 : index
    %1347 = vector.load %arg26[%c8_850, %c160_851] : memref<16x192xf32, #tpu.memory_space<vmem>>, vector<8x16xf32>
    %1348 = arith.truncf %1347 : vector<8x16xf32> to vector<8x16xbf16>
    "tpu.trace_start"() <{level = 10 : i32, message = "qd,kd->qk"}> : () -> ()
    %cst_852 = arith.constant dense<0.000000e+00> : vector<8x8xf32>
    %1349 = tpu.matmul %1344, %1346, %cst_852 {dimension_numbers = #tpu.dot_dimension_numbers<[1], [1], [0], [0], [0, 0, 1, 0], [], []>} : vector<8x16xbf16>, vector<8x16xbf16>, vector<8x8xf32> -> vector<8x8xf32>
    "tpu.trace_stop"() : () -> ()
    %c6_853 = arith.constant 6 : index
    %c0_854 = arith.constant 0 : index
    %c0_855 = arith.constant 0 : index
    %1350 = vector.load %arg3[%c6_853, %c0_854, %c0_855] : memref<8x8x8xf32, #tpu.memory_space<vmem>>, vector<1x8x8xf32>
    %1351 = vector.shape_cast %1350 : vector<1x8x8xf32> to vector<8x8xf32>
    %1352 = arith.addf %1349, %1351 : vector<8x8xf32>
    %cst_856 = arith.constant dense<0xFF800000> : vector<8xf32>
    %1353 = vector.multi_reduction <maximumf>, %1352, %cst_856 [1] : vector<8x8xf32> to vector<8xf32>
    %1354 = vector.shape_cast %1353 : vector<8xf32> to vector<8x1xf32>
    %1355 = vector.broadcast %1354 : vector<8x1xf32> to vector<8x8xf32>
    %1356 = arith.subf %1352, %1355 : vector<8x8xf32>
    %1357 = math.exp %1356 : vector<8x8xf32>
    %cst_857 = arith.constant dense<0.000000e+00> : vector<8xf32>
    %1358 = vector.multi_reduction <add>, %1357, %cst_857 [1] : vector<8x8xf32> to vector<8xf32>
    %1359 = vector.shape_cast %1358 : vector<8xf32> to vector<8x1xf32>
    %1360 = tpu.reciprocal %1359 {approx = true} : vector<8x1xf32> -> vector<8x1xf32>
    %1361 = vector.broadcast %1360 : vector<8x1xf32> to vector<8x8xf32>
    %1362 = arith.mulf %1357, %1361 : vector<8x8xf32>
    %1363 = arith.truncf %1362 : vector<8x8xf32> to vector<8x8xbf16>
    %cst_858 = arith.constant dense<0.000000e+00> : vector<8x16xf32>
    %1364 = tpu.matmul %1363, %1348, %cst_858 {dimension_numbers = #tpu.dot_dimension_numbers<[1], [0], [0], [1], [0, 0, 1, 1], [], []>} : vector<8x8xbf16>, vector<8x16xbf16>, vector<8x16xf32> -> vector<8x16xf32>
    %c8_859 = arith.constant 8 : index
    %c32_860 = arith.constant 32 : index
    %1365 = vector.load %arg27[%c8_859, %c32_860] : memref<16x64xf32, #tpu.memory_space<vmem>>, vector<8x16xf32>
    tpu.vector_store %arg27[%c8_859, %c32_860], %1364 {strides = array<i32>} : memref<16x64xf32, #tpu.memory_space<vmem>>, vector<8x16xf32>,
    %c8_861 = arith.constant 8 : index
    %c48_862 = arith.constant 48 : index
    %1366 = vector.load %arg26[%c8_861, %c48_862] : memref<16x192xf32, #tpu.memory_space<vmem>>, vector<8x16xf32>
    %1367 = arith.truncf %1366 : vector<8x16xf32> to vector<8x16xbf16>
    %c8_863 = arith.constant 8 : index
    %c112_864 = arith.constant 112 : index
    %1368 = vector.load %arg26[%c8_863, %c112_864] : memref<16x192xf32, #tpu.memory_space<vmem>>, vector<8x16xf32>
    %1369 = arith.truncf %1368 : vector<8x16xf32> to vector<8x16xbf16>
    %c8_865 = arith.constant 8 : index
    %c176_866 = arith.constant 176 : index
    %1370 = vector.load %arg26[%c8_865, %c176_866] : memref<16x192xf32, #tpu.memory_space<vmem>>, vector<8x16xf32>
    %1371 = arith.truncf %1370 : vector<8x16xf32> to vector<8x16xbf16>
    "tpu.trace_start"() <{level = 10 : i32, message = "qd,kd->qk"}> : () -> ()
    %cst_867 = arith.constant dense<0.000000e+00> : vector<8x8xf32>
    %1372 = tpu.matmul %1367, %1369, %cst_867 {dimension_numbers = #tpu.dot_dimension_numbers<[1], [1], [0], [0], [0, 0, 1, 0], [], []>} : vector<8x16xbf16>, vector<8x16xbf16>, vector<8x8xf32> -> vector<8x8xf32>
    "tpu.trace_stop"() : () -> ()
    %c7_868 = arith.constant 7 : index
    %c0_869 = arith.constant 0 : index
    %c0_870 = arith.constant 0 : index
    %1373 = vector.load %arg3[%c7_868, %c0_869, %c0_870] : memref<8x8x8xf32, #tpu.memory_space<vmem>>, vector<1x8x8xf32>
    %1374 = vector.shape_cast %1373 : vector<1x8x8xf32> to vector<8x8xf32>
    %1375 = arith.addf %1372, %1374 : vector<8x8xf32>
    %cst_871 = arith.constant dense<0xFF800000> : vector<8xf32>
    %1376 = vector.multi_reduction <maximumf>, %1375, %cst_871 [1] : vector<8x8xf32> to vector<8xf32>
    %1377 = vector.shape_cast %1376 : vector<8xf32> to vector<8x1xf32>
    %1378 = vector.broadcast %1377 : vector<8x1xf32> to vector<8x8xf32>
    %1379 = arith.subf %1375, %1378 : vector<8x8xf32>
    %1380 = math.exp %1379 : vector<8x8xf32>
    %cst_872 = arith.constant dense<0.000000e+00> : vector<8xf32>
    %1381 = vector.multi_reduction <add>, %1380, %cst_872 [1] : vector<8x8xf32> to vector<8xf32>
    %1382 = vector.shape_cast %1381 : vector<8xf32> to vector<8x1xf32>
    %1383 = tpu.reciprocal %1382 {approx = true} : vector<8x1xf32> -> vector<8x1xf32>
    %1384 = vector.broadcast %1383 : vector<8x1xf32> to vector<8x8xf32>
    %1385 = arith.mulf %1380, %1384 : vector<8x8xf32>
    %1386 = arith.truncf %1385 : vector<8x8xf32> to vector<8x8xbf16>
    %cst_873 = arith.constant dense<0.000000e+00> : vector<8x16xf32>
    %1387 = tpu.matmul %1386, %1371, %cst_873 {dimension_numbers = #tpu.dot_dimension_numbers<[1], [0], [0], [1], [0, 0, 1, 1], [], []>} : vector<8x8xbf16>, vector<8x16xbf16>, vector<8x16xf32> -> vector<8x16xf32>
    %c8_874 = arith.constant 8 : index
    %c48_875 = arith.constant 48 : index
    %1388 = vector.load %arg27[%c8_874, %c48_875] : memref<16x64xf32, #tpu.memory_space<vmem>>, vector<8x16xf32>
    tpu.vector_store %arg27[%c8_874, %c48_875], %1387 {strides = array<i32>} : memref<16x64xf32, #tpu.memory_space<vmem>>, vector<8x16xf32>,
    %c0_876 = arith.constant 0 : index
    %c0_877 = arith.constant 0 : index
    %1389 = vector.load %arg27[%c0_876, %c0_877] : memref<16x64xf32, #tpu.memory_space<vmem>>, vector<16x64xf32>
    %1390 = arith.truncf %1389 : vector<16x64xf32> to vector<16x64xbf16>
    %c1_878 = arith.constant 1 : index
    %c0_879 = arith.constant 0 : index
    %c0_880 = arith.constant 0 : index
    %1391 = vector.load %arg16[%c1_878, %c0_879, %c0_880] : memref<2x64x64xbf16, #tpu.memory_space<vmem>>, vector<1x64x64xbf16>
    %1392 = vector.shape_cast %1391 : vector<1x64x64xbf16> to vector<64x64xbf16>
    %cst_881 = arith.constant dense<0.000000e+00> : vector<16x64xf32>
    %1393 = tpu.matmul %1390, %1392, %cst_881 {dimension_numbers = #tpu.dot_dimension_numbers<[1], [0], [0], [1], [0, 0, 1, 1], [], []>} : vector<16x64xbf16>, vector<64x64xbf16>, vector<16x64xf32> -> vector<16x64xf32>
    %1394 = arith.addf %1181, %1393 : vector<16x64xf32>
    %c1_882 = arith.constant 1 : index
    %c0_883 = arith.constant 0 : index
    %c0_884 = arith.constant 0 : index
    %1395 = vector.load %arg20[%c1_882, %c0_883, %c0_884] : memref<2x1x64xf32, #tpu.memory_space<vmem>>, vector<1x1x64xf32>
    %1396 = vector.shape_cast %1395 : vector<1x1x64xf32> to vector<1x64xf32>
    %1397 = arith.mulf %1394, %1394 : vector<16x64xf32>
    %cst_885 = arith.constant dense<0.000000e+00> : vector<16xf32>
    %1398 = vector.multi_reduction <add>, %1397, %cst_885 [1] : vector<16x64xf32> to vector<16xf32>
    %1399 = vector.shape_cast %1398 : vector<16xf32> to vector<16x1xf32>
    %cst_886 = arith.constant 6.400000e+01 : f32
    %1400 = vector.broadcast %cst_886 : f32 to vector<16x1xf32>
    %1401 = arith.divf %1399, %1400 : vector<16x1xf32>
    %cst_887 = arith.constant 9.99999997E-7 : f32
    %1402 = vector.broadcast %cst_887 : f32 to vector<16x1xf32>
    %1403 = arith.addf %1401, %1402 : vector<16x1xf32>
    %1404 = math.rsqrt %1403 : vector<16x1xf32>
    %1405 = vector.broadcast %1404 : vector<16x1xf32> to vector<16x64xf32>
    %1406 = arith.mulf %1394, %1405 : vector<16x64xf32>
    %1407 = vector.broadcast %1396 : vector<1x64xf32> to vector<16x64xf32>
    %1408 = arith.mulf %1406, %1407 : vector<16x64xf32>
    %1409 = arith.truncf %1408 : vector<16x64xf32> to vector<16x64xbf16>
    %c1_888 = arith.constant 1 : index
    %c0_889 = arith.constant 0 : index
    %c0_890 = arith.constant 0 : index
    %1410 = vector.load %arg18[%c1_888, %c0_889, %c0_890] : memref<2x64x256xbf16, #tpu.memory_space<vmem>>, vector<1x64x256xbf16>
    %1411 = vector.shape_cast %1410 : vector<1x64x256xbf16> to vector<64x256xbf16>
    %cst_891 = arith.constant dense<0.000000e+00> : vector<16x256xf32>
    %1412 = tpu.matmul %1409, %1411, %cst_891 {dimension_numbers = #tpu.dot_dimension_numbers<[1], [0], [0], [1], [0, 0, 1, 1], [], []>} : vector<16x64xbf16>, vector<64x256xbf16>, vector<16x256xf32> -> vector<16x256xf32>
    %1413 = vector.extract_strided_slice %1412 {offsets = [0, 0], sizes = [16, 128], strides = [1, 1]} : vector<16x256xf32> to vector<16x128xf32>
    %1414 = arith.mulf %1413, %1413 : vector<16x128xf32>
    %1415 = arith.mulf %1413, %1414 : vector<16x128xf32>
    %cst_892 = arith.constant 4.471500e-02 : f32
    %1416 = vector.broadcast %cst_892 : f32 to vector<16x128xf32>
    %1417 = arith.mulf %1416, %1415 : vector<16x128xf32>
    %1418 = arith.addf %1413, %1417 : vector<16x128xf32>
    %cst_893 = arith.constant 0.797884583 : f32
    %1419 = vector.broadcast %cst_893 : f32 to vector<16x128xf32>
    %1420 = arith.mulf %1419, %1418 : vector<16x128xf32>
    %1421 = math.tanh %1420 : vector<16x128xf32>
    %cst_894 = arith.constant 1.000000e+00 : f32
    %1422 = vector.broadcast %cst_894 : f32 to vector<16x128xf32>
    %1423 = arith.addf %1422, %1421 : vector<16x128xf32>
    %cst_895 = arith.constant 5.000000e-01 : f32
    %1424 = vector.broadcast %cst_895 : f32 to vector<16x128xf32>
    %1425 = arith.mulf %1424, %1423 : vector<16x128xf32>
    %1426 = arith.mulf %1413, %1425 : vector<16x128xf32>
    %1427 = vector.extract_strided_slice %1412 {offsets = [0, 128], sizes = [16, 128], strides = [1, 1]} : vector<16x256xf32> to vector<16x128xf32>
    %1428 = arith.mulf %1426, %1427 : vector<16x128xf32>
    %1429 = arith.truncf %1428 : vector<16x128xf32> to vector<16x128xbf16>
    %c1_896 = arith.constant 1 : index
    %c0_897 = arith.constant 0 : index
    %c0_898 = arith.constant 0 : index
    %1430 = vector.load %arg19[%c1_896, %c0_897, %c0_898] : memref<2x128x64xbf16, #tpu.memory_space<vmem>>, vector<1x128x64xbf16>
    %1431 = vector.shape_cast %1430 : vector<1x128x64xbf16> to vector<128x64xbf16>
    %cst_899 = arith.constant dense<0.000000e+00> : vector<16x64xf32>
    %1432 = tpu.matmul %1429, %1431, %cst_899 {dimension_numbers = #tpu.dot_dimension_numbers<[1], [0], [0], [1], [0, 0, 1, 1], [], []>} : vector<16x128xbf16>, vector<128x64xbf16>, vector<16x64xf32> -> vector<16x64xf32>
    %1433 = arith.addf %1394, %1432 : vector<16x64xf32>
    %c0_900 = arith.constant 0 : index
    %c0_901 = arith.constant 0 : index
    %1434 = vector.load %arg21[%c0_900, %c0_901] : memref<1x64xf32, #tpu.memory_space<vmem>>, vector<1x64xf32>
    %1435 = arith.mulf %1433, %1433 : vector<16x64xf32>
    %cst_902 = arith.constant dense<0.000000e+00> : vector<16xf32>
    %1436 = vector.multi_reduction <add>, %1435, %cst_902 [1] : vector<16x64xf32> to vector<16xf32>
    %1437 = vector.shape_cast %1436 : vector<16xf32> to vector<16x1xf32>
    %cst_903 = arith.constant 6.400000e+01 : f32
    %1438 = vector.broadcast %cst_903 : f32 to vector<16x1xf32>
    %1439 = arith.divf %1437, %1438 : vector<16x1xf32>
    %cst_904 = arith.constant 9.99999997E-7 : f32
    %1440 = vector.broadcast %cst_904 : f32 to vector<16x1xf32>
    %1441 = arith.addf %1439, %1440 : vector<16x1xf32>
    %1442 = math.rsqrt %1441 : vector<16x1xf32>
    %1443 = vector.broadcast %1442 : vector<16x1xf32> to vector<16x64xf32>
    %1444 = arith.mulf %1433, %1443 : vector<16x64xf32>
    %1445 = vector.broadcast %1434 : vector<1x64xf32> to vector<16x64xf32>
    %1446 = arith.mulf %1444, %1445 : vector<16x64xf32>
    %c0_905 = arith.constant 0 : index
    %c0_906 = arith.constant 0 : index
    %1447 = vector.load %arg22[%c0_905, %c0_906] : memref<2x16xf32, #tpu.memory_space<vmem>>, vector<2x16xf32>
    %cst_907 = arith.constant dense<0.000000e+00> : vector<2x64xf32>
    %1448 = tpu.matmul %1447, %1446, %cst_907 {dimension_numbers = #tpu.dot_dimension_numbers<[1], [0], [0], [1], [0, 0, 1, 1], [], []>} : vector<2x16xf32>, vector<16x64xf32>, vector<2x64xf32> -> vector<2x64xf32>
    %c0_908 = arith.constant 0 : index
    %c0_909 = arith.constant 0 : index
    %1449 = vector.load %arg23[%c0_908, %c0_909] : memref<64x7xf32, #tpu.memory_space<vmem>>, vector<64x7xf32>
    %cst_910 = arith.constant dense<0.000000e+00> : vector<2x7xf32>
    %1450 = tpu.matmul %1448, %1449, %cst_910 {dimension_numbers = #tpu.dot_dimension_numbers<[1], [0], [0], [1], [0, 0, 1, 1], [], []>} : vector<2x64xf32>, vector<64x7xf32>, vector<2x7xf32> -> vector<2x7xf32>
    %c0_911 = arith.constant 0 : index
    %c0_912 = arith.constant 0 : index
    %1451 = vector.load %arg24[%c0_911, %c0_912] : memref<1x7xf32, #tpu.memory_space<vmem>>, vector<1x7xf32>
    %1452 = vector.broadcast %1451 : vector<1x7xf32> to vector<2x7xf32>
    %1453 = arith.addf %1450, %1452 : vector<2x7xf32>
    %c0_913 = arith.constant 0 : index
    %c0_914 = arith.constant 0 : index
    %1454 = vector.load %arg25[%c0_913, %c0_914] : memref<2x7xf32, #tpu.memory_space<vmem>>, vector<2x7xf32>
    tpu.vector_store %arg25[%c0_913, %c0_914], %1453 {strides = array<i32>} : memref<2x7xf32, #tpu.memory_space<vmem>>, vector<2x7xf32>,
    return
  }
}

</mosaic_0001>

<bundles_post_ra>
// kernel: t5_classifier_forward.1
= control target key start
LH: loop header
LB: loop body
LE: loop exit
PB: predicated region body
PF: predicated region fallthrough
CT: control target
= control target key end

     0   :  { %s8642_s0 = inlined_call_operand.vmem [shape: f32[16,64], index: 0, kind: input, shape index: {}]   ;;  %s8643_s1 = inlined_call_operand.vmem [shape: f32[8,8,8], index: 1, kind: input, shape index: {}]   ;;  %s8644_s2 = inlined_call_operand.vmem [shape: f32[8,8,8], index: 2, kind: input, shape index: {}]   ;;  %s8645_s3 = inlined_call_operand.vmem [shape: f32[8,8,8], index: 3, kind: input, shape index: {}]   ;;  %s8646_s4 = inlined_call_operand.vmem [shape: bf16[2,64,192], index: 4, kind: input, shape index: {}]   ;;  %s8647_s5 = inlined_call_operand.vmem [shape: bf16[2,64,64], index: 5, kind: input, shape index: {}]   ;;  %s8648_s6 = inlined_call_operand.vmem [shape: f32[2,1,64], index: 6, kind: input, shape index: {}]   ;;  %s8649_s7 = inlined_call_operand.vmem [shape: bf16[2,64,256], index: 7, kind: input, shape index: {}]   ;;  %s8650_s8 = inlined_call_operand.vmem [shape: bf16[2,128,64], index: 8, kind: input, shape index: {}]   ;;  %s8651_s9 = inlined_call_operand.vmem [shape: f32[2,1,64], index: 9, kind: input, shape index: {}]   ;;  %s8652_s10 = inlined_call_operand.vmem [shape: f32[1,64], index: 10, kind: input, shape index: {}]   ;;  %s8653_s11 = inlined_call_operand.vmem [shape: bf16[2,64,192], index: 11, kind: input, shape index: {}]   ;;  %s8654_s12 = inlined_call_operand.vmem [shape: bf16[2,64,64], index: 12, kind: input, shape index: {}]   ;;  %s8655_s13 = inlined_call_operand.vmem [shape: f32[2,1,64], index: 13, kind: input, shape index: {}]   ;;  %s8656_s14 = inlined_call_operand.vmem [shape: bf16[2,64,64], index: 14, kind: input, shape index: {}]   ;;  %s8657_s15 = inlined_call_operand.vmem [shape: bf16[2,64,128], index: 15, kind: input, shape index: {}]   ;;  %s8658_s16 = inlined_call_operand.vmem [shape: bf16[2,64,64], index: 16, kind: input, shape index: {}]   ;;  %s8659_s17 = inlined_call_operand.vmem [shape: f32[2,1,64], index: 17, kind: input, shape index: {}]   ;;  %s8660_s18 = inlined_call_operand.vmem [shape: bf16[2,64,256], index: 18, kind: input, shape index: {}]   ;;  %s8661_s19 = inlined_call_operand.vmem [shape: bf16[2,128,64], index: 19, kind: input, shape index: {}]   ;;  %s8662_s20 = inlined_call_operand.vmem [shape: f32[2,1,64], index: 20, kind: input, shape index: {}]   ;;  %s8663_s21 = inlined_call_operand.vmem [shape: f32[1,64], index: 21, kind: input, shape index: {}]   ;;  %s8664_s22 = inlined_call_operand.vmem [shape: f32[2,16], index: 22, kind: input, shape index: {}]   ;;  %s8665_s23 = inlined_call_operand.vmem [shape: f32[64,7], index: 23, kind: input, shape index: {}]   ;;  %s8666_s24 = inlined_call_operand.vmem [shape: f32[1,7], index: 24, kind: input, shape index: {}]   ;;  %s8667_s25 = inlined_call_operand.hbm [shape: f32[2,7], index: 25, kind: output, shape index: {}]  }
   0x1   :  { %8695 = sst [smem:[#allocation7_spill]] %s8642_s0 }
   0x2   :  { %8696 = sst [smem:[#allocation8_spill]] %s8643_s1 }
   0x3   :  { %8697 = sst [smem:[#allocation9_spill]] %s8644_s2 }
   0x4   :  { %8698 = sst [smem:[#allocation10_spill]] %s8645_s3 }
   0x5   :  { %8699 = sst [smem:[#allocation11_spill]] %s8646_s4 }
   0x6   :  { %8700 = sst [smem:[#allocation12_spill]] %s8647_s5 }
   0x7   :  { %8701 = sst [smem:[#allocation13_spill]] %s8648_s6 }
   0x8   :  { %8702 = sst [smem:[#allocation14_spill]] %s8649_s7 }
   0x9   :  { %8703 = sst [smem:[#allocation15_spill]] %s8650_s8 }
   0xa   :  { %8704 = sst [smem:[#allocation16_spill]] %s8651_s9 }
   0xb   :  { %8705 = sst [smem:[#allocation17_spill]] %s8661_s19 }
   0xc   :  { %8706 = sst [smem:[#allocation18_spill]] %s8662_s20 }
   0xd   :  { %8707 = sst [smem:[#allocation19_spill]] %s8663_s21 }
   0xe   :  { %8708 = sst [smem:[#allocation20_spill]] %s8664_s22 }
   0xf   :  { %8709 = sst [smem:[#allocation21_spill]] %s8665_s23 }
  0x10   :  { %8710 = sst [smem:[#allocation22_spill]] %s8666_s24 }
  0x11   :  { %8711 = sst [smem:[#allocation23_spill]] %s8667_s25 }
  0x12   :  { %s8712_s6 = sld [smem:[#allocation7_spill]]  ;;  %vm87_vm0 = vcmask 523264  }
  0x18   :  { %v6864_v0 = vld [vmem:[%s8712_s6] sm:$0xff]  ;;  %v6869_v1 = vld [vmem:[%s8712_s6 + $0x8] sm:$0xff] }
  0x19   :  { %v85_v2 = vmul.f32 %v6864_v0, %v6864_v0  ;;  %v86_v4 = vmul.f32 %v6869_v1, %v6869_v1 }
  0x1b   :  { %v88_v3 = vsel %vm87_vm0, %v85_v2, 0.0 }
  0x1c   :  { %89 = vadd.xlane.f32.xlu0 %v88_v3 }
  0x1d   :  { %30 = vsyncpa [#allocation5], 0  ;;  %v91_v5 = vsel %vm87_vm0, %v86_v4, 0.0  ;;  %v6722_v6 = vmov 64.0   ;;  %s8713_s1 = sld [smem:[#allocation11_spill]]  ;;  %s8682_s29 = smov 80  }
  0x1e   :  { %6436 = vrcp.f32 %v6722_v6  ;;  %s8714_s0 = sld [smem:[#allocation13_spill]]  ;;  %s8690_s2 = smov 112   ;;  %vm260_vm8 = vcmask 1043456   ;;  %vm224_vm9 = vcmask 130048   ;;  %vm244_vm10 = vcmask 64512  }
  0x1f   :  { %s8680_s30 = smov 48   ;;  %s8688_s7 = smov 16   ;;  %vm346_vm11 = vcmask 261248   ;;  %vm416_vm12 = vcmask 392448   ;;  %vm486_vm13 = vcmask 523648  }
  0x20   :  { %s8678_s3 = smov 64   ;;  %s8684_s26 = smov 32  }
  0x21   :  { %s8686_s8 = smov 96   ;;  %s8715_s28 = sld [smem:[#allocation8_spill]] }
  0x22   :  { %s8717_s4 = sld [smem:[#allocation12_spill]]  ;;  %s8721_s5 = smov 112  }
  0x23   :  { %v5485_v10 = vld [vmem:[%s8713_s1 + $0x30] sm:$0xf]  ;;  %v6285_v11 = vld [vmem:[%s8713_s1 + $0x34] sm:$0xf0]  ;;  %v6284_v12 = vld [vmem:[%s8713_s1 + $0x34] sm:$0xf] }
  0x24   :  { %92 = vadd.xlane.f32.xlu0 %v91_v5  ;;  %v6437_v7 = vpop.eup %6436  ;;  %v5486_v13 = vor.u32 %v6285_v11, %v5485_v10  ;;  %v5487_v14 = vld [vmem:[%s8713_s1 + $0x38] sm:$0xf0]  ;;  %v5477_v17 = vld [vmem:[%s8713_s1 + $0x20] sm:$0xf]  ;;  %v6283_v18 = vld [vmem:[%s8713_s1 + $0x24] sm:$0xf0] }
  0x25   :  { %v95_v8 = vmul.f32 64.0, %v6437_v7  ;;  %v5490_v15 = vor.u32 %v6284_v12, %v5487_v14  ;;  %v6282_v19 = vld [vmem:[%s8713_s1 + $0x24] sm:$0xf]  ;;  %v5478_v20 = vor.u32 %v6283_v18, %v5477_v17  ;;  %v5479_v21 = vld [vmem:[%s8713_s1 + $0x28] sm:$0xf0]  ;;  %vm99_vm1 = vweird.f32 %v6437_v7  ;;  %s8719_s27 = sld [smem:[#allocation16_spill]] }
  0x26   :  { %188 = vmatpush.bf16.msra.mxu0 %v5486_v13  ;;  %v5482_v22 = vor.u32 %v6282_v19, %v5479_v21  ;;  %v5469_v24 = vld [vmem:[%s8713_s1 + $0x10] sm:$0xf]  ;;  %v6281_v25 = vld [vmem:[%s8713_s1 + $0x14] sm:$0xf0]  ;;  %v6280_v26 = vld [vmem:[%s8713_s1 + $0x14] sm:$0xf] }
  0x27   :  { %v96_v9 = vsub.f32 1.0, %v95_v8  ;;  %202 = vmatpush.bf16.msra.mxu1 %v5490_v15  ;;  %v5470_v27 = vor.u32 %v6281_v25, %v5469_v24  ;;  %v5471_v28 = vld [vmem:[%s8713_s1 + $0x18] sm:$0xf0]  ;;  %v5461_v29 = vld [vmem:[%s8713_s1] sm:$0xf]  ;;  %s8723_s9 = smov 16  }
  0x28   :  { %v6279_v30 = vld [vmem:[%s8713_s1 + $0x4] sm:$0xf0]  ;;  %v5474_v31 = vor.u32 %v6280_v26, %v5471_v28  ;;  %v6278_v32 = vld [vmem:[%s8713_s1 + $0x4] sm:$0xf]  ;;  %v5463_v33 = vld [vmem:[%s8713_s1 + $0x8] sm:$0xf0] }
  0x29   :  { %v97_v16 = vmul.f32 %v6437_v7, %v96_v9  ;;  %v5462_v35 = vor.u32 %v6279_v30, %v5461_v29  ;;  %v5466_v36 = vor.u32 %v6278_v32, %v5463_v33  ;;  %v6423_v57 = vld [vmem:[%s8714_s0] ss:$0 sm:$0xff]  ;;  %s8725_s24 = smov 32   ;;  %s8726_s25 = smov 80  }
  0x2a   :  { %189 = vmatpush.bf16.msra.mxu0 %v5478_v20  ;;  %v220_v33 = vld [vmem:[%s8715_s28] sm:$0xff]  ;;  %s8730_s20 = sld [smem:[#allocation17_spill]]  ;;  %s6730_s19 = smov [#allocation4]  }
  0x2b   :  { %v98_v23 = vadd.f32 %v6437_v7, %v97_v16  ;;  %203 = vmatpush.bf16.msra.mxu1 %v5482_v22  ;;  %s8735_s22 = sld [smem:[#allocation23_spill]] }
  0x2d   :  { %v6925_v34 = vsel %vm99_vm1, %v6437_v7, %v98_v23 }
  0x2e   :  { %190 = vmatpush.bf16.msra.mxu0 %v5470_v27 }
  0x2f   :  { %204 = vmatpush.bf16.msra.mxu1 %v5474_v31 }
  0x32   :  { %191 = vmatpush.bf16.msra.mxu0 %v5462_v35 }
  0x33   :  { %205 = vmatpush.bf16.msra.mxu1 %v5466_v36 }
  0x8f   :  { %v90_v37 = vpop.xlane.xlu0 %89 }
  0x90   :  { %v101_v38 = vmul.f32 %v6925_v34, %v90_v37  ;;  %v5498_v37 = vld [vmem:[%s8715_s28 + $0x10] sm:$0xff] }
  0x92   :  { %v103_v39 = vadd.f32 1e-06, %v101_v38 }
  0x94   :  { %6438 = vrsqrt.f32 %v103_v39  ;;  %vm111_vm3 = vweird.f32 %v103_v39 }
  0x97   :  { %v93_v40 = vpop.xlane.xlu0 %92 }
  0x98   :  { %v102_v41 = vmul.f32 %v6925_v34, %v93_v40 }
  0x9a   :  { %v6439_v42 = vpop.eup %6438  ;;  %v104_v43 = vadd.f32 1e-06, %v102_v41 }
  0x9b   :  { %v106_v44 = vmul.f32 %v6439_v42, %v103_v39  ;;  %vm112_vm2 = vweird.f32 %v6439_v42 }
  0x9c   :  { %6440 = vrsqrt.f32 %v104_v43  ;;  %vm113_vm4 = vmor %vm111_vm3, %vm112_vm2  ;;  %vm121_vm6 = vweird.f32 %v104_v43 }
  0x9d   :  { %v107_v45 = vmul.f32 %v6439_v42, %v106_v44  ;;  %v5501_v44 = vld [vmem:[%s8715_s28 + $0x18] sm:$0xff] }
  0x9f   :  { %v108_v46 = vmul.f32 0.5, %v107_v45 }
  0xa1   :  { %v109_v47 = vsub.f32 1.5, %v108_v46 }
  0xa2   :  { %v6441_v48 = vpop.eup %6440 }
  0xa3   :  { %v116_v49 = vmul.f32 %v6441_v48, %v104_v43  ;;  %v110_v50 = vmul.f32 %v6439_v42, %v109_v47  ;;  %vm122_vm5 = vweird.f32 %v6441_v48  ;;  %v5495_v43 = vld [vmem:[%s8715_s28 + $0x8] sm:$0xff] }
  0xa4   :  { %vm123_vm7 = vmor %vm121_vm6, %vm122_vm5 }
  0xa5   :  { %v117_v51 = vmul.f32 %v6441_v48, %v116_v49  ;;  %v114_v54 = vsel %vm113_vm4, %v6439_v42, %v110_v50 }
  0xa6   :  { %v125_v56 = vmul.f32 %v114_v54, %v6864_v0 }
  0xa7   :  { %v118_v52 = vmul.f32 0.5, %v117_v51 }
  0xa8   :  { %v130_v60 = vmul.f32 %v6423_v57, %v125_v56 }
  0xa9   :  { %v119_v53 = vsub.f32 1.5, %v118_v52 }
  0xab   :  { %v120_v55 = vmul.f32 %v6441_v48, %v119_v53  ;;  %v5504_v53 = vld [vmem:[%s8715_s28 + $0x20] sm:$0xff] }
  0xad   :  { %v124_v58 = vsel %vm123_vm7, %v6441_v48, %v120_v55 }
  0xae   :  { %v126_v59 = vmul.f32 %v124_v58, %v6869_v1 }
  0xb0   :  { %v131_v61 = vmul.f32 %v6423_v57, %v126_v59  ;;  %v5507_v57 = vld [vmem:[%s8715_s28 + $0x28] sm:$0xff] }
  0xb2   :  { %v132_v62 = vpack.c.bf16 %v131_v61, %v130_v60 }
  0xb4   :  { %5491 = vmatmul.msk.bf16.vlgmr.msra.gmra.mxu0 %vm87_vm0, %v132_v62  ;;  %5492 = vmatmul.msk.bf16.vlgmr.msra.gmra.mxu1 %vm87_vm0, %v132_v62 }
 0x131   :  { %v193_v63 = vpop.f32.mrf.mxu0  ;;  %v207_v2 = vpop.f32.mrf.mxu1 }
 0x132   :  { %213 = vst.msk [vmem:[#allocation2 + $0x8] sm:$0xff] %vm87_vm0, %v207_v2  ;;  %v419_v3 = vpack.c.bf16 %v193_v63, %v193_v63  ;;  %v5510_v63 = vld [vmem:[%s8715_s28 + $0x30] sm:$0xff] }
 0x134   :  { %425 = vrot.lane.b32.xlu0 %v419_v3, %s8682_s29  ;;  %285 = vrot.lane.b32.xlu2 %v419_v3, %s8690_s2 }
 0x135   :  { %287 = vrot.lane.b32.xlu1 %v419_v3, %s8680_s30 }
 0x139   :  { %v195_v4 = vpop.f32.mrf.mxu0  ;;  %v209_v5 = vpop.f32.mrf.mxu1  ;;  %v218_v6 = vld [vmem:[#allocation2 + $0x8] sm:$0xff] }
 0x13a   :  { %215 = vst.msk [vmem:[#allocation2 + $0x18] sm:$0xff] %vm87_vm0, %v209_v5  ;;  %v6941_v7 = vpack.c.bf16 %v218_v6, %v218_v6  ;;  %v687_v8 = vpack.c.bf16 %v195_v4, %v195_v4  ;;  %v5513_v5 = vld [vmem:[%s8715_s28 + $0x38] sm:$0xff] }
 0x13c   :  { %v262_v9 = vsel %vm260_vm8, %v6941_v7, 0  ;;  %427 = vrot.lane.b32.xlu2 %v419_v3, %s8688_s7  ;;  %693 = vrot.lane.b32.xlu0 %v687_v8, %s8682_s29 }
 0x13d   :  { %271 = vmatpush.bf16.msrb.mxu1 %v262_v9  ;;  %222 = vrot.lane.b32.xlu1 %v419_v3, %s8678_s3 }
 0x144   :  { %557 = vrot.lane.b32.xlu2 %v687_v8, %s8680_s30  ;;  %s8720_s30 = sld [smem:[#allocation15_spill]] }
 0x145   :  { %357 = vrot.lane.b32.xlu1 %v419_v3, %s8684_s26 }
 0x14c   :  { %555 = vrot.lane.b32.xlu2 %v687_v8, %s8690_s2 }
 0x14d   :  { %355 = vrot.lane.b32.xlu1 %v419_v3, %s8686_s8 }
 0x154   :  { %695 = vrot.lane.b32.xlu2 %v687_v8, %s8688_s7 }
 0x155   :  { %495 = vrot.lane.b32.xlu1 %v687_v8, %s8678_s3  ;;  %s8716_s3 = smov 48  }
 0x15c   :  { %624 = vrot.lane.b32.xlu2 %v687_v8, %s8686_s8 }
 0x15d   :  { %626 = vrot.lane.b32.xlu1 %v687_v8, %s8684_s26 }
 0x18e   :  { %v286_v10 = vpop.permute.xlu2 %285 }
 0x196   :  { %v428_v11 = vpop.permute.xlu2 %427 }
 0x197   :  { %v433_v15 = vsel %vm224_vm9, %v428_v11, 0 }
 0x19e   :  { %v558_v14 = vpop.permute.xlu2 %557 }
 0x19f   :  { %v563_v17 = vsel %vm224_vm9, %v558_v14, 0 }
 0x1a6   :  { %v556_v19 = vpop.permute.xlu2 %555  ;;  %v426_v23 = vpop.permute.xlu0 %425 }
 0x1a7   :  { %v288_v12 = vpop.permute.xlu1 %287 }
 0x1a8   :  { %v293_v13 = vsel %vm224_vm9, %v288_v12, 0 }
 0x1a9   :  { %302 = vmatpush.bf16.xpose.msra.mxu3 %v293_v13 }
 0x1ae   :  { %v696_v22 = vpop.permute.xlu2 %695  ;;  %v694_v30 = vpop.permute.xlu0 %693 }
 0x1af   :  { %v223_v16 = vpop.permute.xlu1 %222  ;;  %v701_v25 = vsel %vm224_vm9, %v696_v22, 0 }
 0x1b0   :  { %5496 = vmatmul.msk.bf16.vlgmr.msra.gmra.mxu3 %vm224_vm9, %v286_v10  ;;  %v229_v18 = vsel %vm224_vm9, %v223_v16, 0 }
 0x1b1   :  { %442 = vmatpush.bf16.xpose.msrb.mxu3 %v433_v15  ;;  %238 = vmatpush.bf16.xpose.msra.mxu2 %v229_v18 }
 0x1b6   :  { %v625_v31 = vpop.permute.xlu2 %624 }
 0x1b7   :  { %v358_v20 = vpop.permute.xlu1 %357 }
 0x1b8   :  { %5493 = vmatmul.msk.bf16.vlgmr.msra.gmra.mxu2 %vm224_vm9, %v419_v3  ;;  %v363_v21 = vsel %vm224_vm9, %v358_v20, 0 }
 0x1b9   :  { %572 = vmatpush.bf16.xpose.msra.mxu3 %v563_v17  ;;  %372 = vmatpush.bf16.xpose.msrb.mxu0 %v363_v21 }
 0x1bf   :  { %v356_v24 = vpop.permute.xlu1 %355 }
 0x1c0   :  { %5499 = vmatmul.msk.bf16.vlgmr.msrb.gmra.mxu0 %vm224_vm9, %v356_v24  ;;  %5502 = vmatmul.msk.bf16.vlgmr.msrb.gmra.mxu3 %vm224_vm9, %v426_v23 }
 0x1c1   :  { %710 = vmatpush.bf16.xpose.msrb.mxu3 %v701_v25 }
 0x1c7   :  { %v496_v26 = vpop.permute.xlu1 %495 }
 0x1c8   :  { %v501_v27 = vsel %vm224_vm9, %v496_v26, 0 }
 0x1c9   :  { %510 = vmatpush.bf16.xpose.msra.mxu0 %v501_v27 }
 0x1cf   :  { %v627_v28 = vpop.permute.xlu1 %626 }
 0x1d0   :  { %v632_v29 = vsel %vm224_vm9, %v627_v28, 0  ;;  %5505 = vmatmul.msk.bf16.vlgmr.msra.gmra.mxu0 %vm224_vm9, %v687_v8  ;;  %5508 = vmatmul.msk.bf16.vlgmr.msra.gmra.mxu3 %vm224_vm9, %v556_v19 }
 0x1d1   :  { %641 = vmatpush.bf16.xpose.msrb.mxu0 %v632_v29 }
 0x1e0   :  { %5511 = vmatmul.msk.bf16.vlgmr.msrb.gmra.mxu0 %vm224_vm9, %v625_v31  ;;  %5514 = vmatmul.msk.bf16.vlgmr.msrb.gmra.mxu3 %vm224_vm9, %v694_v30 }
 0x233   :  { %v304_v32 = vpop.f32.mrf.mxu3 }
 0x234   :  { %v305_v47 = vadd.f32 %v5495_v43, %v304_v32 }
 0x236   :  { %v308_v51 = vsel %vm244_vm10, %v305_v47, -inf }
 0x23b   :  { %v240_v35 = vpop.f32.mrf.mxu2  ;;  %v306_v36 = vpop.f32.mrf.mxu3 }
 0x23c   :  { %v241_v38 = vadd.f32 %v240_v35, %v220_v33 }
 0x23d   :  { %v374_v39 = vpop.f32.mrf.mxu0 }
 0x23e   :  { %v375_v40 = vadd.f32 %v5498_v37, %v374_v39  ;;  %v245_v41 = vsel %vm244_vm10, %v241_v38, -inf }
 0x23f   :  { %246 = vmax.xlane.f32.xlu1 %v245_v41 }
 0x240   :  { %v378_v42 = vsel %vm244_vm10, %v375_v40, -inf }
 0x241   :  { %379 = vmax.xlane.f32.xlu0 %v378_v42 }
 0x243   :  { %v242_v45 = vpop.f32.mrf.mxu2  ;;  %v444_v46 = vpop.f32.mrf.mxu3 }
 0x244   :  { %v445_v48 = vadd.f32 %v5501_v44, %v444_v46  ;;  %v550_v44 = vld [vmem:[#allocation2 + $0x18] sm:$0xff] }
 0x245   :  { %v376_v49 = vpop.f32.mrf.mxu0  ;;  %v551_v45 = vpack.c.bf16 %v550_v44, %v550_v44 }
 0x246   :  { %v448_v50 = vsel %vm244_vm10, %v445_v48, -inf }
 0x247   :  { %449 = vmax.xlane.f32.xlu2 %v448_v50 }
 0x249   :  { %309 = vmax.xlane.f32.xlu0 %v308_v51 }
 0x24b   :  { %v446_v52 = vpop.f32.mrf.mxu3 }
 0x24d   :  { %v512_v54 = vpop.f32.mrf.mxu0 }
 0x24e   :  { %v6991_v55 = vadd.f32 %v5504_v53, %v512_v54 }
 0x250   :  { %v516_v56 = vsel %vm244_vm10, %v6991_v55, -inf }
 0x251   :  { %517 = vmax.xlane.f32.xlu1 %v516_v56 }
 0x253   :  { %v574_v58 = vpop.f32.mrf.mxu3 }
 0x254   :  { %v575_v59 = vadd.f32 %v5507_v57, %v574_v58 }
 0x255   :  { %v514_v60 = vpop.f32.mrf.mxu0 }
 0x256   :  { %v578_v61 = vsel %vm244_vm10, %v575_v59, -inf }
 0x257   :  { %579 = vmax.xlane.f32.xlu2 %v578_v61 }
 0x25b   :  { %v576_v62 = vpop.f32.mrf.mxu3 }
 0x25d   :  { %v643_v2 = vpop.f32.mrf.mxu0 }
 0x25e   :  { %v644_v3 = vadd.f32 %v5510_v63, %v643_v2 }
 0x260   :  { %v647_v4 = vsel %vm244_vm10, %v644_v3, -inf }
 0x261   :  { %648 = vmax.xlane.f32.xlu1 %v647_v4 }
 0x263   :  { %v712_v6 = vpop.f32.mrf.mxu3 }
 0x264   :  { %v7006_v8 = vadd.f32 %v5513_v5, %v712_v6 }
 0x265   :  { %v645_v9 = vpop.f32.mrf.mxu0 }
 0x266   :  { %v716_v10 = vsel %vm244_vm10, %v7006_v8, -inf }
 0x267   :  { %717 = vmax.xlane.f32.xlu0 %v716_v10 }
 0x26b   :  { %v714_v11 = vpop.f32.mrf.mxu3 }
 0x26f   :  { %321 = vrot.lane.b32.xlu2 %v6941_v7, %s8690_s2 }
 0x27a   :  { %461 = vrot.lane.b32.xlu1 %v6941_v7, %s8682_s29 }
 0x2b2   :  { %v247_v12 = vpop.xlane.xlu1 %246 }
 0x2b3   :  { %v248_v15 = vsub.f32 %v241_v38, %v247_v12  ;;  %v532_v12 = vsel %vm260_vm8, %v551_v45, 0 }
 0x2b4   :  { %v380_v13 = vpop.xlane.xlu0 %379 }
 0x2b5   :  { %v381_v14 = vsub.f32 %v375_v40, %v380_v13  ;;  %v249_v17 = vmul.f32 1.442695, %v248_v15 }
 0x2b7   :  { %v382_v16 = vmul.f32 1.442695, %v381_v14 }
 0x2b9   :  { %6442 = vpow2.f32 %v382_v16 }
 0x2ba   :  { %v450_v18 = vpop.xlane.xlu2 %449  ;;  %6444 = vpow2.f32 %v249_v17 }
 0x2bb   :  { %v451_v19 = vsub.f32 %v445_v48, %v450_v18 }
 0x2bc   :  { %v310_v20 = vpop.xlane.xlu0 %309 }
 0x2bd   :  { %v452_v21 = vmul.f32 1.442695, %v451_v19  ;;  %v311_v22 = vsub.f32 %v305_v47, %v310_v20 }
 0x2bf   :  { %v7014_v23 = vpop.eup %6442  ;;  %6446 = vpow2.f32 %v452_v21  ;;  %v312_v24 = vmul.f32 1.442695, %v311_v22 }
 0x2c0   :  { %v384_v25 = vsel %vm244_vm10, %v7014_v23, 0.0  ;;  %v6445_v26 = vpop.eup %6444 }
 0x2c1   :  { %6448 = vpow2.f32 %v312_v24  ;;  %385 = vadd.xlane.f32.xlu0 %v384_v25  ;;  %v251_v31 = vsel %vm244_vm10, %v6445_v26, 0.0 }
 0x2c4   :  { %v518_v35 = vpop.xlane.xlu1 %517 }
 0x2c5   :  { %v7018_v27 = vpop.eup %6446  ;;  %v519_v50 = vsub.f32 %v6991_v55, %v518_v35 }
 0x2c6   :  { %v454_v28 = vsel %vm244_vm10, %v7018_v27, 0.0 }
 0x2c7   :  { %v6449_v29 = vpop.eup %6448  ;;  %455 = vadd.xlane.f32.xlu1 %v454_v28  ;;  %v520_v53 = vmul.f32 1.442695, %v519_v50 }
 0x2c8   :  { %v314_v30 = vsel %vm244_vm10, %v6449_v29, 0.0 }
 0x2c9   :  { %315 = vadd.xlane.f32.xlu2 %v314_v30  ;;  %252 = vadd.xlane.f32.xlu0 %v251_v31 }
 0x2ca   :  { %v580_v32 = vpop.xlane.xlu2 %579 }
 0x2cb   :  { %v581_v33 = vsub.f32 %v575_v59, %v580_v32 }
 0x2cd   :  { %v582_v36 = vmul.f32 1.442695, %v581_v33 }
 0x2cf   :  { %6450 = vpow2.f32 %v582_v36 }
 0x2d2   :  { %v322_v37 = vpop.permute.xlu2 %321 }
 0x2d3   :  { %v327_v38 = vsel %vm260_vm8, %v322_v37, 0 }
 0x2d4   :  { %336 = vmatpush.bf16.msrb.mxu2 %v327_v38  ;;  %v649_v39 = vpop.xlane.xlu1 %648 }
 0x2d5   :  { %v7025_v40 = vpop.eup %6450  ;;  %v650_v41 = vsub.f32 %v644_v3, %v649_v39 }
 0x2d6   :  { %v584_v42 = vsel %vm244_vm10, %v7025_v40, 0.0 }
 0x2d7   :  { %v651_v43 = vmul.f32 1.442695, %v650_v41  ;;  %585 = vadd.xlane.f32.xlu2 %v584_v42 }
 0x2d9   :  { %6452 = vpow2.f32 %v651_v43 }
 0x2da   :  { %v718_v51 = vpop.xlane.xlu0 %717  ;;  %6454 = vpow2.f32 %v520_v53 }
 0x2db   :  { %v719_v52 = vsub.f32 %v7006_v8, %v718_v51 }
 0x2dd   :  { %391 = vrot.lane.b32.xlu0 %v6941_v7, %s8686_s8  ;;  %v720_v7 = vmul.f32 1.442695, %v719_v52 }
 0x2df   :  { %v7031_v46 = vpop.eup %6452  ;;  %6456 = vpow2.f32 %v720_v7 }
 0x2e0   :  { %591 = vrot.lane.b32.xlu1 %v551_v45, %s8690_s2  ;;  %v653_v47 = vsel %vm244_vm10, %v7031_v46, 0.0  ;;  %v6455_v54 = vpop.eup %6454  ;;  %s8724_s2 = smov 96  }
 0x2e1   :  { %654 = vadd.xlane.f32.xlu2 %v653_v47  ;;  %v522_v57 = vsel %vm244_vm10, %v6455_v54, 0.0 }
 0x2e5   :  { %v6457_v56 = vpop.eup %6456 }
 0x2e6   :  { %v722_v58 = vsel %vm244_vm10, %v6457_v56, 0.0 }
 0x2ec   :  { %v462_v48 = vpop.permute.xlu1 %461 }
 0x2ed   :  { %v467_v49 = vsel %vm260_vm8, %v462_v48, 0 }
 0x2ee   :  { %476 = vmatpush.bf16.msra.mxu2 %v467_v49 }
 0x2f9   :  { %729 = vrot.lane.b32.xlu2 %v551_v45, %s8682_s29  ;;  %s8728_s29 = sld [smem:[#allocation10_spill]] }
 0x307   :  { %523 = vadd.xlane.f32.xlu0 %v522_v57 }
 0x30a   :  { %723 = vadd.xlane.f32.xlu1 %v722_v58 }
 0x31b   :  { %660 = vrot.lane.b32.xlu0 %v551_v45, %s8686_s8 }
 0x334   :  { %v386_v55 = vpop.xlane.xlu0 %385 }
 0x33a   :  { %v456_v3 = vpop.xlane.xlu1 %455 }
 0x33c   :  { %v316_v59 = vpop.xlane.xlu2 %315  ;;  %v253_v60 = vpop.xlane.xlu0 %252 }
 0x33d   :  { %6458 = vrcp.f32 %v316_v59  ;;  %v6288_v59 = vld [vmem:[%s8717_s4 + $0x10] sm:$0xff] }
 0x33e   :  { %6460 = vrcp.f32 %v253_v60  ;;  %v6287_v60 = vld [vmem:[%s8717_s4 + $0x8] sm:$0xff] }
 0x33f   :  { %6462 = vrcp.f32 %v456_v3 }
 0x340   :  { %6464 = vrcp.f32 %v386_v55  ;;  %v6289_v55 = vld [vmem:[%s8717_s4 + $0x18] sm:$0xff] }
 0x341   :  { %797 = vmatpush.bf16.msra.mxu0 %v6289_v55 }
 0x343   :  { %v6459_v61 = vpop.eup %6458 }
 0x344   :  { %v6461_v62 = vpop.eup %6460  ;;  %v318_v63 = vmul.f32 %v6459_v61, %v6449_v29  ;;  %v6286_v61 = vld [vmem:[%s8717_s4] sm:$0xff] }
 0x345   :  { %v255_v2 = vmul.f32 %v6461_v62, %v6445_v26  ;;  %v6463_v8 = vpop.eup %6462  ;;  %798 = vmatpush.bf16.msra.mxu0 %v6288_v59 }
 0x346   :  { %v319_v4 = vpack.c.bf16 %v318_v63, %v318_v63  ;;  %v6465_v10 = vpop.eup %6464  ;;  %v458_v13 = vmul.f32 %v6463_v8, %v7018_v27 }
 0x347   :  { %v256_v5 = vpack.c.bf16 %v255_v2, %v255_v2  ;;  %v388_v15 = vmul.f32 %v6465_v10, %v7014_v23 }
 0x348   :  { %5497 = vmatmul.msk.bf16.vlgmr.msrb.gmra.mxu2 %vm244_vm10, %v319_v4  ;;  %v459_v18 = vpack.c.bf16 %v458_v13, %v458_v13 }
 0x349   :  { %5494 = vmatmul.msk.bf16.vlgmr.msrb.gmra.mxu1 %vm244_vm10, %v256_v5  ;;  %v389_v19 = vpack.c.bf16 %v388_v15, %v388_v15  ;;  %799 = vmatpush.bf16.msra.mxu0 %v6287_v60 }
 0x34a   :  { %v586_v6 = vpop.xlane.xlu2 %585 }
 0x34b   :  { %6466 = vrcp.f32 %v586_v6 }
 0x34d   :  { %800 = vmatpush.bf16.msra.mxu0 %v6286_v61 }
 0x34f   :  { %v392_v9 = vpop.permute.xlu0 %391 }
 0x350   :  { %v397_v11 = vsel %vm260_vm8, %v392_v9, 0 }
 0x351   :  { %406 = vmatpush.bf16.msra.mxu1 %v397_v11  ;;  %v6467_v22 = vpop.eup %6466 }
 0x352   :  { %v592_v14 = vpop.permute.xlu1 %591  ;;  %v588_v24 = vmul.f32 %v6467_v22, %v7025_v40 }
 0x353   :  { %v597_v16 = vsel %vm260_vm8, %v592_v14, 0 }
 0x354   :  { %v655_v17 = vpop.xlane.xlu2 %654  ;;  %606 = vmatpush.bf16.msrb.mxu2 %v597_v16  ;;  %v589_v25 = vpack.c.bf16 %v588_v24, %v588_v24 }
 0x355   :  { %541 = vmatpush.bf16.msrb.mxu1 %v532_v12 }
 0x358   :  { %5503 = vmatmul.msk.bf16.vlgmr.msra.gmra.mxu2 %vm244_vm10, %v459_v18 }
 0x359   :  { %5500 = vmatmul.msk.bf16.vlgmr.msra.gmra.mxu1 %vm244_vm10, %v389_v19 }
 0x35c   :  { %v730_v20 = vpop.permute.xlu2 %729 }
 0x35d   :  { %v735_v21 = vsel %vm260_vm8, %v730_v20, 0 }
 0x35e   :  { %744 = vmatpush.bf16.msra.mxu2 %v735_v21 }
 0x368   :  { %5509 = vmatmul.msk.bf16.vlgmr.msrb.gmra.mxu2 %vm244_vm10, %v589_v25 }
 0x37a   :  { %v524_v23 = vpop.xlane.xlu0 %523 }
 0x37b   :  { %6468 = vrcp.f32 %v524_v23 }
 0x37d   :  { %v724_v26 = vpop.xlane.xlu1 %723 }
 0x37e   :  { %6470 = vrcp.f32 %v724_v26 }
 0x37f   :  { %6472 = vrcp.f32 %v655_v17 }
 0x381   :  { %v6469_v27 = vpop.eup %6468 }
 0x382   :  { %v526_v28 = vmul.f32 %v6469_v27, %v6455_v54 }
 0x384   :  { %v6471_v29 = vpop.eup %6470  ;;  %v527_v30 = vpack.c.bf16 %v526_v28, %v526_v28 }
 0x385   :  { %v726_v31 = vmul.f32 %v6471_v29, %v6457_v56  ;;  %v6473_v33 = vpop.eup %6472 }
 0x386   :  { %5506 = vmatmul.msk.bf16.vlgmr.msrb.gmra.mxu1 %vm244_vm10, %v527_v30  ;;  %v657_v37 = vmul.f32 %v6473_v33, %v7031_v46 }
 0x387   :  { %v727_v32 = vpack.c.bf16 %v726_v31, %v726_v31 }
 0x388   :  { %v658_v38 = vpack.c.bf16 %v657_v37, %v657_v37 }
 0x389   :  { %5515 = vmatmul.msk.bf16.vlgmr.msra.gmra.mxu2 %vm244_vm10, %v727_v32 }
 0x38d   :  { %v661_v35 = vpop.permute.xlu0 %660 }
 0x38e   :  { %v666_v36 = vsel %vm260_vm8, %v661_v35, 0 }
 0x38f   :  { %675 = vmatpush.bf16.msra.mxu1 %v666_v36 }
 0x396   :  { %5512 = vmatmul.msk.bf16.vlgmr.msra.gmra.mxu1 %vm244_vm10, %v658_v38 }
 0x3c6   :  { %v273_v39 = vpop.f32.mrf.mxu1 }
 0x3c7   :  { %277 = vst.msk [vmem:[#allocation3] sm:$0xff] %vm224_vm9, %v273_v39 }
 0x3cb   :  { %v338_v40 = vpop.f32.mrf.mxu2 }
 0x3cc   :  { %343 = vrot.lane.b32.xlu1 %v338_v40, %s8688_s7 }
 0x3ce   :  { %v275_v41 = vpop.f32.mrf.mxu1 }
 0x3d3   :  { %v340_v42 = vpop.f32.mrf.mxu2 }
 0x3d6   :  { %v408_v43 = vpop.f32.mrf.mxu1 }
 0x3d7   :  { %413 = vrot.lane.b32.xlu2 %v408_v43, %s8684_s26 }
 0x3db   :  { %v478_v44 = vpop.f32.mrf.mxu2 }
 0x3de   :  { %v410_v45 = vpop.f32.mrf.mxu1 }
 0x3df   :  { %483 = vrot.lane.b32.xlu2 %v478_v44, %s8716_s3 }
 0x3e3   :  { %v480_v47 = vpop.f32.mrf.mxu2 }
 0x3eb   :  { %v608_v46 = vpop.f32.mrf.mxu2 }
 0x3ec   :  { %613 = vrot.lane.b32.xlu0 %v608_v46, %s8688_s7 }
 0x3f3   :  { %v610_v48 = vpop.f32.mrf.mxu2 }
 0x403   :  { %v543_v49 = vpop.f32.mrf.mxu1 }
 0x404   :  { %547 = vst.msk [vmem:[#allocation3 + $0x8] sm:$0xff] %vm224_vm9, %v543_v49 }
 0x40b   :  { %v545_v50 = vpop.f32.mrf.mxu1 }
 0x40c   :  { %v746_v51 = vpop.f32.mrf.mxu2 }
 0x40d   :  { %751 = vrot.lane.b32.xlu1 %v746_v51, %s8716_s3 }
 0x413   :  { %v677_v52 = vpop.f32.mrf.mxu1 }
 0x414   :  { %682 = vrot.lane.b32.xlu0 %v677_v52, %s8684_s26  ;;  %v748_v53 = vpop.f32.mrf.mxu2  ;;  %s8718_s26 = sld [smem:[#allocation14_spill]] }
 0x41a   :  { %v6297_v14 = vld [vmem:[%s8718_s26 + $0x34] sm:$0xf0]  ;;  %v6296_v15 = vld [vmem:[%s8718_s26 + $0x34] sm:$0xf]  ;;  %v5561_v16 = vld [vmem:[%s8718_s26 + $0x38] sm:$0xf0] }
 0x41b   :  { %v679_v7 = vpop.f32.mrf.mxu1  ;;  %v5564_v17 = vor.u32 %v6296_v15, %v5561_v16  ;;  %v5551_v18 = vld [vmem:[%s8718_s26 + $0x20] sm:$0xf]  ;;  %v6295_v19 = vld [vmem:[%s8718_s26 + $0x24] sm:$0xf0]  ;;  %v6294_v20 = vld [vmem:[%s8718_s26 + $0x24] sm:$0xf] }
 0x41c   :  { %v5552_v21 = vor.u32 %v6295_v19, %v5551_v18  ;;  %v5553_v22 = vld [vmem:[%s8718_s26 + $0x28] sm:$0xf0]  ;;  %v5543_v25 = vld [vmem:[%s8718_s26 + $0x10] sm:$0xf]  ;;  %v6293_v23 = vld [vmem:[%s8718_s26 + $0x14] sm:$0xf0] }
 0x41d   :  { %919 = vmatpush.bf16.msra.mxu3 %v5564_v17  ;;  %v5556_v24 = vor.u32 %v6294_v20, %v5553_v22  ;;  %v6292_v26 = vld [vmem:[%s8718_s26 + $0x14] sm:$0xf]  ;;  %v5544_v27 = vor.u32 %v6293_v23, %v5543_v25  ;;  %v5545_v28 = vld [vmem:[%s8718_s26 + $0x18] sm:$0xf0]  ;;  %v5535_v31 = vld [vmem:[%s8718_s26] sm:$0xf] }
 0x41e   :  { %v5548_v29 = vor.u32 %v6292_v26, %v5545_v28  ;;  %v6291_v32 = vld [vmem:[%s8718_s26 + $0x4] sm:$0xf0]  ;;  %v6290_v33 = vld [vmem:[%s8718_s26 + $0x4] sm:$0xf]  ;;  %v5537_v37 = vld [vmem:[%s8718_s26 + $0x8] sm:$0xf0] }
 0x41f   :  { %v5536_v36 = vor.u32 %v6291_v32, %v5535_v31  ;;  %v5540_v38 = vor.u32 %v6290_v33, %v5537_v37 }
 0x421   :  { %920 = vmatpush.bf16.msra.mxu3 %v5556_v24 }
 0x425   :  { %921 = vmatpush.bf16.msra.mxu3 %v5548_v29 }
 0x429   :  { %922 = vmatpush.bf16.msra.mxu3 %v5540_v38 }
 0x431   :  { %v414_v54 = vpop.permute.xlu2 %413 }
 0x439   :  { %v484_v57 = vpop.permute.xlu2 %483 }
 0x43e   :  { %v344_v56 = vpop.permute.xlu1 %343 }
 0x43f   :  { %347 = vst.msk [vmem:[#allocation3] sm:$0xff] %vm346_vm11, %v344_v56  ;;  %v6424_v56 = vld [vmem:[%s8719_s27] ss:$0 sm:$0xff] }
 0x440   :  { %417 = vst.msk [vmem:[#allocation3] sm:$0xff] %vm416_vm12, %v414_v54 }
 0x441   :  { %487 = vst.msk [vmem:[#allocation3] sm:$0xff] %vm486_vm13, %v484_v57 }
 0x448   :  { %v755_v2 = vld [vmem:[#allocation3] sm:$0xff] }
 0x45e   :  { %v614_v58 = vpop.permute.xlu0 %613 }
 0x45f   :  { %616 = vst.msk [vmem:[#allocation3 + $0x8] sm:$0xff] %vm346_vm11, %v614_v58 }
 0x47f   :  { %v752_v63 = vpop.permute.xlu1 %751 }
 0x486   :  { %v683_v62 = vpop.permute.xlu0 %682 }
 0x487   :  { %685 = vst.msk [vmem:[#allocation3 + $0x8] sm:$0xff] %vm416_vm12, %v683_v62  ;;  %v6305_v62 = vld [vmem:[%s8720_s30 + $0x38] sm:$0xff] }
 0x488   :  { %754 = vst.msk [vmem:[#allocation3 + $0x8] sm:$0xff] %vm486_vm13, %v752_v63  ;;  %1014 = vmatpush.bf16.msrb.mxu2 %v6305_v62  ;;  %v6304_v63 = vld [vmem:[%s8720_s30 + $0x30] sm:$0xff] }
 0x48c   :  { %1015 = vmatpush.bf16.msrb.mxu2 %v6304_v63 }
 0x48f   :  { %v756_v3 = vld [vmem:[#allocation3 + $0x8] sm:$0xff] }
 0x490   :  { %v757_v4 = vpack.c.bf16 %v756_v3, %v755_v2  ;;  %v6303_v2 = vld [vmem:[%s8720_s30 + $0x28] sm:$0xff]  ;;  %v6302_v3 = vld [vmem:[%s8720_s30 + $0x20] sm:$0xff] }
 0x491   :  { %1016 = vmatpush.bf16.msrb.mxu2 %v6303_v2  ;;  %v5612_v2 = vld [vmem:[%s8713_s1 + $0x48] sm:$0xf0] }
 0x492   :  { %5532 = vmatmul.msk.bf16.vlgmr.msra.gmra.mxu0 %vm87_vm0, %v757_v4  ;;  %v6301_v4 = vld [vmem:[%s8720_s30 + $0x18] sm:$0xff] }
 0x495   :  { %1017 = vmatpush.bf16.msrb.mxu2 %v6302_v3 }
 0x499   :  { %1018 = vmatpush.bf16.msrb.mxu2 %v6301_v4 }
 0x50f   :  { %v802_v5 = vpop.f32.mrf.mxu0 }
 0x510   :  { %v7088_v6 = vadd.f32 %v802_v5, %v6864_v0  ;;  %v5559_v0 = vld [vmem:[%s8718_s26 + $0x30] sm:$0xf] }
 0x511   :  { %v6300_v5 = vld [vmem:[%s8720_s30 + $0x10] sm:$0xff] }
 0x512   :  { %v810_v8 = vmul.f32 %v7088_v6, %v7088_v6  ;;  %1019 = vmatpush.bf16.msrb.mxu2 %v6300_v5 }
 0x514   :  { %v812_v9 = vsel %vm87_vm0, %v810_v8, 0.0  ;;  %v6299_v8 = vld [vmem:[%s8720_s30 + $0x8] sm:$0xff] }
 0x515   :  { %813 = vadd.xlane.f32.xlu0 %v812_v9 }
 0x516   :  { %1020 = vmatpush.bf16.msrb.mxu2 %v6299_v8 }
 0x517   :  { %v804_v10 = vpop.f32.mrf.mxu0 }
 0x518   :  { %v7094_v11 = vadd.f32 %v804_v10, %v6869_v1  ;;  %v5560_v1 = vor.u32 %v6297_v14, %v5559_v0  ;;  %v6298_v10 = vld [vmem:[%s8720_s30] sm:$0xff] }
 0x51a   :  { %v811_v12 = vmul.f32 %v7094_v11, %v7094_v11  ;;  %905 = vmatpush.bf16.msrb.mxu1 %v5560_v1  ;;  %1021 = vmatpush.bf16.msrb.mxu2 %v6298_v10 }
 0x51c   :  { %v815_v13 = vsel %vm87_vm0, %v811_v12, 0.0 }
 0x51d   :  { %816 = vadd.xlane.f32.xlu2 %v815_v13 }
 0x51e   :  { %906 = vmatpush.bf16.msrb.mxu1 %v5552_v21 }
 0x522   :  { %907 = vmatpush.bf16.msrb.mxu1 %v5544_v27 }
 0x526   :  { %908 = vmatpush.bf16.msrb.mxu1 %v5536_v36 }
 0x588   :  { %v814_v30 = vpop.xlane.xlu0 %813 }
 0x589   :  { %v818_v35 = vmul.f32 %v814_v30, %v6925_v34 }
 0x58b   :  { %v820_v39 = vadd.f32 1e-06, %v818_v35 }
 0x58d   :  { %6474 = vrsqrt.f32 %v820_v39  ;;  %vm828_vm15 = vweird.f32 %v820_v39 }
 0x590   :  { %v817_v40 = vpop.xlane.xlu2 %816 }
 0x591   :  { %v819_v41 = vmul.f32 %v817_v40, %v6925_v34 }
 0x593   :  { %v6475_v42 = vpop.eup %6474  ;;  %v821_v43 = vadd.f32 1e-06, %v819_v41 }
 0x594   :  { %v823_v44 = vmul.f32 %v6475_v42, %v820_v39  ;;  %vm829_vm14 = vweird.f32 %v6475_v42 }
 0x595   :  { %6476 = vrsqrt.f32 %v821_v43  ;;  %vm830_vm1 = vmor %vm828_vm15, %vm829_vm14  ;;  %vm838_vm3 = vweird.f32 %v821_v43 }
 0x596   :  { %v824_v45 = vmul.f32 %v6475_v42, %v823_v44  ;;  %v6312_v44 = vld [vmem:[%s8713_s1 + $0x74] sm:$0xf] }
 0x598   :  { %v825_v47 = vmul.f32 0.5, %v824_v45  ;;  %v5636_v45 = vld [vmem:[%s8713_s1 + $0x78] sm:$0xf0] }
 0x59a   :  { %v826_v46 = vsub.f32 1.5, %v825_v47  ;;  %v5639_v47 = vor.u32 %v6312_v44, %v5636_v45 }
 0x59b   :  { %v6477_v48 = vpop.eup %6476 }
 0x59c   :  { %v833_v49 = vmul.f32 %v6477_v48, %v821_v43  ;;  %v827_v50 = vmul.f32 %v6475_v42, %v826_v46  ;;  %vm839_vm2 = vweird.f32 %v6477_v48  ;;  %v6313_v43 = vld [vmem:[%s8713_s1 + $0x74] sm:$0xf0]  ;;  %1142 = vmatpush.bf16.msra.mxu1 %v5639_v47  ;;  %v5626_v46 = vld [vmem:[%s8713_s1 + $0x60] sm:$0xf] }
 0x59d   :  { %vm840_vm4 = vmor %vm838_vm3, %vm839_vm2 }
 0x59e   :  { %v834_v51 = vmul.f32 %v6477_v48, %v833_v49  ;;  %v831_v53 = vsel %vm830_vm1, %v6475_v42, %v827_v50  ;;  %v6310_v49 = vld [vmem:[%s8713_s1 + $0x64] sm:$0xf] }
 0x59f   :  { %v842_v57 = vmul.f32 %v831_v53, %v7088_v6  ;;  %v5618_v53 = vld [vmem:[%s8713_s1 + $0x50] sm:$0xf] }
 0x5a0   :  { %v835_v52 = vmul.f32 0.5, %v834_v51  ;;  %v5628_v51 = vld [vmem:[%s8713_s1 + $0x68] sm:$0xf0] }
 0x5a1   :  { %v847_v59 = vmul.f32 %v6424_v56, %v842_v57  ;;  %v5620_v57 = vld [vmem:[%s8713_s1 + $0x58] sm:$0xf0] }
 0x5a2   :  { %v836_v7 = vsub.f32 1.5, %v835_v52  ;;  %v5631_v52 = vor.u32 %v6310_v49, %v5628_v51 }
 0x5a4   :  { %v837_v54 = vmul.f32 %v6477_v48, %v836_v7  ;;  %1143 = vmatpush.bf16.msra.mxu1 %v5631_v52  ;;  %v6309_v7 = vld [vmem:[%s8713_s1 + $0x54] sm:$0xf0] }
 0x5a6   :  { %v841_v58 = vsel %vm840_vm4, %v6477_v48, %v837_v54  ;;  %v6311_v48 = vld [vmem:[%s8713_s1 + $0x64] sm:$0xf0]  ;;  %v6308_v54 = vld [vmem:[%s8713_s1 + $0x54] sm:$0xf] }
 0x5a7   :  { %v843_v55 = vmul.f32 %v841_v58, %v7094_v11  ;;  %v5627_v50 = vor.u32 %v6311_v48, %v5626_v46  ;;  %v5623_v58 = vor.u32 %v6308_v54, %v5620_v57 }
 0x5a9   :  { %v848_v60 = vmul.f32 %v6424_v56, %v843_v55  ;;  %v5619_v56 = vor.u32 %v6309_v7, %v5618_v53  ;;  %1144 = vmatpush.bf16.msra.mxu1 %v5623_v58 }
 0x5ab   :  { %v849_v61 = vpack.c.bf16 %v848_v60, %v847_v59  ;;  %v5610_v59 = vld [vmem:[%s8713_s1 + $0x40] sm:$0xf]  ;;  %v6307_v60 = vld [vmem:[%s8713_s1 + $0x44] sm:$0xf0] }
 0x5ac   :  { %v5611_v63 = vor.u32 %v6307_v60, %v5610_v59  ;;  %v1160_v60 = vld [vmem:[%s8715_s28] sm:$0xff] }
 0x5ad   :  { %5565 = vmatmul.msk.bf16.vlgmr.msrb.gmra.mxu1 %vm87_vm0, %v849_v61  ;;  %5566 = vmatmul.msk.bf16.vlgmr.msra.gmra.mxu3 %vm87_vm0, %v849_v61  ;;  %v6306_v61 = vld [vmem:[%s8713_s1 + $0x44] sm:$0xf] }
 0x5ae   :  { %v5615_v3 = vor.u32 %v6306_v61, %v5612_v2 }
 0x5b0   :  { %1145 = vmatpush.bf16.msra.mxu1 %v5615_v3  ;;  %v5644_v3 = vld [vmem:[%s8715_s28 + $0x8] sm:$0xff] }
 0x62a   :  { %v910_v9 = vpop.f32.mrf.mxu1 }
 0x62b   :  { %v929_v12 = vmul.f32 %v910_v9, %v910_v9 }
 0x62d   :  { %v931_v13 = vmul.f32 %v929_v12, %v910_v9 }
 0x62f   :  { %v933_v0 = vmul.f32 0.044715, %v931_v13 }
 0x630   :  { %v924_v24 = vpop.f32.mrf.mxu3 }
 0x631   :  { %v935_v14 = vadd.f32 %v933_v0, %v910_v9 }
 0x632   :  { %v912_v15 = vpop.f32.mrf.mxu1 }
 0x633   :  { %v937_v1 = vmul.f32 0.7978846, %v935_v14  ;;  %v930_v16 = vmul.f32 %v912_v15, %v912_v15 }
 0x635   :  { %6478 = vtanh.f32 %v937_v1  ;;  %v932_v17 = vmul.f32 %v930_v16, %v912_v15 }
 0x637   :  { %v934_v18 = vmul.f32 0.044715, %v932_v17 }
 0x638   :  { %v926_v30 = vpop.f32.mrf.mxu3 }
 0x639   :  { %v936_v19 = vadd.f32 %v934_v18, %v912_v15 }
 0x63b   :  { %v6479_v20 = vpop.eup %6478  ;;  %v938_v21 = vmul.f32 0.7978846, %v936_v19 }
 0x63c   :  { %v941_v22 = vadd.f32 1.0, %v6479_v20 }
 0x63d   :  { %6480 = vtanh.f32 %v938_v21 }
 0x63e   :  { %v943_v25 = vmul.f32 0.5, %v941_v22  ;;  %v6425_v22 = vld [vmem:[%s8714_s0 + $0x1] ss:$0 sm:$0xff]  ;;  %s8722_s0 = smov 64  }
 0x640   :  { %v945_v27 = vmul.f32 %v943_v25, %v910_v9 }
 0x642   :  { %v947_v31 = vmul.f32 %v945_v27, %v924_v24 }
 0x643   :  { %v6481_v23 = vpop.eup %6480 }
 0x644   :  { %v942_v26 = vadd.f32 1.0, %v6481_v23 }
 0x646   :  { %v944_v28 = vmul.f32 0.5, %v942_v26 }
 0x648   :  { %v946_v29 = vmul.f32 %v944_v28, %v912_v15 }
 0x64a   :  { %v948_v32 = vmul.f32 %v946_v29, %v926_v30 }
 0x64c   :  { %v949_v33 = vpack.c.bf16 %v948_v32, %v947_v31 }
 0x64e   :  { %1022 = vmatmul.bf16.vlgmr.msrb.gmra.mxu2 %v949_v33 }
 0x6d1   :  { %v1023_v35 = vpop.f32.mrf.mxu2 }
 0x6d2   :  { %v7181_v36 = vadd.f32 %v1023_v35, %v7088_v6  ;;  %v5634_v6 = vld [vmem:[%s8713_s1 + $0x70] sm:$0xf] }
 0x6d4   :  { %v1032_v37 = vmul.f32 %v7181_v36, %v7181_v36 }
 0x6d6   :  { %v1034_v38 = vsel %vm87_vm0, %v1032_v37, 0.0 }
 0x6d7   :  { %1035 = vadd.xlane.f32.xlu1 %v1034_v38 }
 0x6d9   :  { %v1025_v39 = vpop.f32.mrf.mxu2 }
 0x6da   :  { %v7187_v40 = vadd.f32 %v1025_v39, %v7094_v11  ;;  %v5635_v11 = vor.u32 %v6313_v43, %v5634_v6 }
 0x6dc   :  { %v1033_v41 = vmul.f32 %v7187_v40, %v7187_v40  ;;  %1128 = vmatpush.bf16.msrb.mxu0 %v5635_v11 }
 0x6de   :  { %v1037_v42 = vsel %vm87_vm0, %v1033_v41, 0.0 }
 0x6df   :  { %1038 = vadd.xlane.f32.xlu0 %v1037_v42 }
 0x6e0   :  { %1129 = vmatpush.bf16.msrb.mxu0 %v5627_v50 }
 0x6e4   :  { %1130 = vmatpush.bf16.msrb.mxu0 %v5619_v56 }
 0x6e8   :  { %1131 = vmatpush.bf16.msrb.mxu0 %v5611_v63 }
 0x74a   :  { %v1036_v55 = vpop.xlane.xlu1 %1035 }
 0x74b   :  { %v1040_v62 = vmul.f32 %v1036_v55, %v6925_v34 }
 0x74d   :  { %v1042_v4 = vadd.f32 1e-06, %v1040_v62 }
 0x74f   :  { %6482 = vrsqrt.f32 %v1042_v4  ;;  %vm1050_vm6 = vweird.f32 %v1042_v4 }
 0x752   :  { %v1039_v5 = vpop.xlane.xlu0 %1038 }
 0x753   :  { %v1041_v8 = vmul.f32 %v1039_v5, %v6925_v34 }
 0x755   :  { %v6483_v9 = vpop.eup %6482  ;;  %v1043_v10 = vadd.f32 1e-06, %v1041_v8 }
 0x756   :  { %v1045_v12 = vmul.f32 %v6483_v9, %v1042_v4  ;;  %vm1051_vm5 = vweird.f32 %v6483_v9 }
 0x757   :  { %6484 = vrsqrt.f32 %v1043_v10  ;;  %vm1052_vm7 = vmor %vm1050_vm6, %vm1051_vm5  ;;  %vm1060_vm15 = vweird.f32 %v1043_v10 }
 0x758   :  { %v1046_v13 = vmul.f32 %v6483_v9, %v1045_v12 }
 0x75a   :  { %v1047_v0 = vmul.f32 0.5, %v1046_v13 }
 0x75c   :  { %v1048_v14 = vsub.f32 1.5, %v1047_v0 }
 0x75d   :  { %v6485_v15 = vpop.eup %6484 }
 0x75e   :  { %v1055_v1 = vmul.f32 %v6485_v15, %v1043_v10  ;;  %v1049_v16 = vmul.f32 %v6483_v9, %v1048_v14  ;;  %vm1061_vm14 = vweird.f32 %v6485_v15 }
 0x75f   :  { %vm1062_vm1 = vmor %vm1060_vm15, %vm1061_vm14 }
 0x760   :  { %v1056_v17 = vmul.f32 %v6485_v15, %v1055_v1  ;;  %v1053_v19 = vsel %vm1052_vm7, %v6483_v9, %v1049_v16  ;;  %v5647_v9 = vld [vmem:[%s8715_s28 + $0x10] sm:$0xff] }
 0x761   :  { %v1064_v24 = vmul.f32 %v1053_v19, %v7181_v36 }
 0x762   :  { %v1057_v18 = vmul.f32 0.5, %v1056_v17 }
 0x763   :  { %v1069_v26 = vmul.f32 %v6425_v22, %v1064_v24 }
 0x764   :  { %v1058_v20 = vsub.f32 1.5, %v1057_v18  ;;  %v5653_v18 = vld [vmem:[%s8715_s28 + $0x20] sm:$0xff] }
 0x766   :  { %v1059_v21 = vmul.f32 %v6485_v15, %v1058_v20 }
 0x768   :  { %v1063_v25 = vsel %vm1062_vm1, %v6485_v15, %v1059_v21  ;;  %v5650_v15 = vld [vmem:[%s8715_s28 + $0x18] sm:$0xff] }
 0x769   :  { %v1065_v23 = vmul.f32 %v1063_v25, %v7187_v40  ;;  %v5656_v25 = vld [vmem:[%s8715_s28 + $0x28] sm:$0xff] }
 0x76b   :  { %v1070_v27 = vmul.f32 %v6425_v22, %v1065_v23 }
 0x76d   :  { %v1071_v28 = vpack.c.bf16 %v1070_v27, %v1069_v26 }
 0x76f   :  { %5640 = vmatmul.msk.bf16.vlgmr.msrb.gmra.mxu0 %vm87_vm0, %v1071_v28  ;;  %5641 = vmatmul.msk.bf16.vlgmr.msra.gmra.mxu1 %vm87_vm0, %v1071_v28  ;;  %v5659_v28 = vld [vmem:[%s8715_s28 + $0x30] sm:$0xff] }
 0x7ec   :  { %v1133_v29 = vpop.f32.mrf.mxu0  ;;  %v1147_v30 = vpop.f32.mrf.mxu1 }
 0x7ed   :  { %1153 = vst.msk [vmem:[#allocation2 + $0x8] sm:$0xff] %vm87_vm0, %v1147_v30  ;;  %v1216_v31 = vpack.c.bf16 %v1133_v29, %v1133_v29 }
 0x7ef   :  { %1221 = vrot.lane.b32.xlu0 %v1216_v31, %s8721_s5  ;;  %1223 = vrot.lane.b32.xlu1 %v1216_v31, %s8716_s3 }
 0x7f0   :  { %1162 = vrot.lane.b32.xlu2 %v1216_v31, %s8722_s0 }
 0x7f4   :  { %v1149_v32 = vpop.f32.mrf.mxu1  ;;  %v1158_v33 = vld [vmem:[#allocation2 + $0x8] sm:$0xff]  ;;  %v1135_v38 = vpop.f32.mrf.mxu0 }
 0x7f5   :  { %1155 = vst.msk [vmem:[#allocation2 + $0x18] sm:$0xff] %vm87_vm0, %v1149_v32  ;;  %v7254_v35 = vpack.c.bf16 %v1158_v33, %v1158_v33  ;;  %v1479_v39 = vpack.c.bf16 %v1135_v38, %v1135_v38 }
 0x7f7   :  { %v1199_v37 = vsel %vm260_vm8, %v7254_v35, 0  ;;  %1359 = vrot.lane.b32.xlu0 %v1216_v31, %s8723_s9  ;;  %1289 = vrot.lane.b32.xlu1 %v1216_v31, %s8724_s2 }
 0x7f8   :  { %1208 = vmatpush.bf16.msra.mxu0 %v1199_v37  ;;  %1291 = vrot.lane.b32.xlu2 %v1216_v31, %s8725_s24 }
 0x7ff   :  { %1486 = vrot.lane.b32.xlu1 %v1479_v39, %s8716_s3  ;;  %1425 = vrot.lane.b32.xlu0 %v1479_v39, %s8722_s0 }
 0x800   :  { %1357 = vrot.lane.b32.xlu2 %v1216_v31, %s8726_s25 }
 0x807   :  { %1622 = vrot.lane.b32.xlu1 %v1479_v39, %s8723_s9  ;;  %1554 = vrot.lane.b32.xlu0 %v1479_v39, %s8725_s24 }
 0x808   :  { %1484 = vrot.lane.b32.xlu2 %v1479_v39, %s8721_s5 }
 0x80f   :  { %1620 = vrot.lane.b32.xlu0 %v1479_v39, %s8726_s25 }
 0x810   :  { %1552 = vrot.lane.b32.xlu2 %v1479_v39, %s8724_s2 }
 0x84a   :  { %v1163_v41 = vpop.permute.xlu2 %1162 }
 0x84b   :  { %v1168_v42 = vsel %vm224_vm9, %v1163_v41, 0 }
 0x84c   :  { %1177 = vmatpush.bf16.xpose.msrb.mxu3 %v1168_v42 }
 0x852   :  { %v1292_v6 = vpop.permute.xlu2 %1291 }
 0x853   :  { %v1297_v43 = vsel %vm224_vm9, %v1292_v6, 0  ;;  %5642 = vmatmul.msk.bf16.vlgmr.msrb.gmra.mxu3 %vm224_vm9, %v1216_v31 }
 0x854   :  { %1306 = vmatpush.bf16.xpose.msra.mxu2 %v1297_v43 }
 0x85a   :  { %v1358_v53 = vpop.permute.xlu2 %1357 }
 0x861   :  { %v1222_v44 = vpop.permute.xlu0 %1221  ;;  %v1224_v11 = vpop.permute.xlu1 %1223 }
 0x862   :  { %v1229_v45 = vsel %vm224_vm9, %v1224_v11, 0  ;;  %v1485_v58 = vpop.permute.xlu2 %1484 }
 0x863   :  { %1238 = vmatpush.bf16.xpose.msrb.mxu1 %v1229_v45 }
 0x869   :  { %v1360_v47 = vpop.permute.xlu0 %1359  ;;  %v1290_v46 = vpop.permute.xlu1 %1289 }
 0x86a   :  { %v1365_v48 = vsel %vm224_vm9, %v1360_v47, 0  ;;  %5645 = vmatmul.msk.bf16.vlgmr.msrb.gmra.mxu1 %vm224_vm9, %v1222_v44  ;;  %5648 = vmatmul.msk.bf16.vlgmr.msra.gmra.mxu2 %vm224_vm9, %v1290_v46  ;;  %v1553_v55 = vpop.permute.xlu2 %1552 }
 0x86b   :  { %1374 = vmatpush.bf16.xpose.msra.mxu1 %v1365_v48 }
 0x871   :  { %v1487_v49 = vpop.permute.xlu1 %1486  ;;  %v1426_v50 = vpop.permute.xlu0 %1425 }
 0x872   :  { %v1492_v51 = vsel %vm224_vm9, %v1487_v49, 0  ;;  %v1431_v52 = vsel %vm224_vm9, %v1426_v50, 0 }
 0x873   :  { %1440 = vmatpush.bf16.xpose.msrb.mxu2 %v1431_v52  ;;  %1501 = vmatpush.bf16.xpose.msrb.mxu1 %v1492_v51 }
 0x879   :  { %v1623_v7 = vpop.permute.xlu1 %1622  ;;  %v1555_v54 = vpop.permute.xlu0 %1554 }
 0x87a   :  { %v1628_v56 = vsel %vm224_vm9, %v1623_v7, 0  ;;  %v1560_v57 = vsel %vm224_vm9, %v1555_v54, 0  ;;  %5651 = vmatmul.msk.bf16.vlgmr.msra.gmra.mxu1 %vm224_vm9, %v1358_v53  ;;  %5654 = vmatmul.msk.bf16.vlgmr.msrb.gmra.mxu2 %vm224_vm9, %v1479_v39  ;;  %v5662_v39 = vld [vmem:[%s8715_s28 + $0x38] sm:$0xff] }
 0x87b   :  { %1569 = vmatpush.bf16.xpose.msra.mxu2 %v1560_v57  ;;  %1637 = vmatpush.bf16.xpose.msra.mxu1 %v1628_v56 }
 0x881   :  { %v1621_v59 = vpop.permute.xlu0 %1620 }
 0x88a   :  { %5657 = vmatmul.msk.bf16.vlgmr.msrb.gmra.mxu1 %vm224_vm9, %v1485_v58  ;;  %5660 = vmatmul.msk.bf16.vlgmr.msra.gmra.mxu2 %vm224_vm9, %v1553_v55 }
 0x89a   :  { %5663 = vmatmul.msk.bf16.vlgmr.msra.gmra.mxu1 %vm224_vm9, %v1621_v59 }
 0x8d6   :  { %v1179_v61 = vpop.f32.mrf.mxu3 }
 0x8d7   :  { %v1180_v62 = vadd.f32 %v1179_v61, %v1160_v60 }
 0x8d9   :  { %v1183_v63 = vsel %vm244_vm10, %v1180_v62, -inf }
 0x8da   :  { %1184 = vmax.xlane.f32.xlu2 %v1183_v63 }
 0x8de   :  { %v1181_v2 = vpop.f32.mrf.mxu3 }
 0x8e7   :  { %v1240_v4 = vpop.f32.mrf.mxu1 }
 0x8e8   :  { %v1241_v5 = vadd.f32 %v5644_v3, %v1240_v4 }
 0x8ea   :  { %v1244_v8 = vsel %vm244_vm10, %v1241_v5, -inf }
 0x8eb   :  { %1245 = vmax.xlane.f32.xlu1 %v1244_v8 }
 0x8ed   :  { %v1308_v10 = vpop.f32.mrf.mxu2 }
 0x8ee   :  { %v1309_v12 = vadd.f32 %v5647_v9, %v1308_v10 }
 0x8ef   :  { %v1242_v13 = vpop.f32.mrf.mxu1 }
 0x8f0   :  { %v1312_v0 = vsel %vm244_vm10, %v1309_v12, -inf }
 0x8f3   :  { %1313 = vmax.xlane.f32.xlu1 %v1312_v0 }
 0x8f5   :  { %v1310_v14 = vpop.f32.mrf.mxu2 }
 0x8f6   :  { %v1480_v14 = vld [vmem:[#allocation2 + $0x18] sm:$0xff] }
 0x8f7   :  { %v1376_v1 = vpop.f32.mrf.mxu1 }
 0x8f8   :  { %v1377_v16 = vadd.f32 %v5650_v15, %v1376_v1 }
 0x8fa   :  { %v1380_v17 = vsel %vm244_vm10, %v1377_v16, -inf }
 0x8fb   :  { %1381 = vmax.xlane.f32.xlu0 %v1380_v17 }
 0x8fd   :  { %v1442_v19 = vpop.f32.mrf.mxu2 }
 0x8fe   :  { %v1443_v20 = vadd.f32 %v5653_v18, %v1442_v19 }
 0x8ff   :  { %v1378_v21 = vpop.f32.mrf.mxu1 }
 0x900   :  { %v1446_v22 = vsel %vm244_vm10, %v1443_v20, -inf }
 0x903   :  { %1447 = vmax.xlane.f32.xlu0 %v1446_v22 }
 0x905   :  { %v1444_v24 = vpop.f32.mrf.mxu2 }
 0x907   :  { %v1503_v23 = vpop.f32.mrf.mxu1 }
 0x908   :  { %v1504_v26 = vadd.f32 %v5656_v25, %v1503_v23 }
 0x90a   :  { %v1507_v27 = vsel %vm244_vm10, %v1504_v26, -inf }
 0x90b   :  { %1508 = vmax.xlane.f32.xlu2 %v1507_v27 }
 0x90c   :  { %1325 = vrot.lane.b32.xlu1 %v7254_v35, %s8724_s2 }
 0x90d   :  { %v1571_v29 = vpop.f32.mrf.mxu2 }
 0x90e   :  { %v1572_v30 = vadd.f32 %v5659_v28, %v1571_v29 }
 0x90f   :  { %v1505_v31 = vpop.f32.mrf.mxu1 }
 0x910   :  { %v1575_v32 = vsel %vm244_vm10, %v1572_v30, -inf }
 0x911   :  { %1576 = vmax.xlane.f32.xlu0 %v1575_v32 }
 0x915   :  { %v1573_v33 = vpop.f32.mrf.mxu2 }
 0x917   :  { %v1639_v37 = vpop.f32.mrf.mxu1 }
 0x918   :  { %v7322_v41 = vadd.f32 %v5662_v39, %v1639_v37 }
 0x91a   :  { %v1643_v42 = vsel %vm244_vm10, %v7322_v41, -inf }
 0x91f   :  { %v1641_v38 = vpop.f32.mrf.mxu1 }
 0x923   :  { %1257 = vrot.lane.b32.xlu2 %v7254_v35, %s8721_s5 }
 0x925   :  { %1393 = vrot.lane.b32.xlu0 %v7254_v35, %s8726_s25 }
 0x936   :  { %1644 = vmax.xlane.f32.xlu1 %v1643_v42 }
 0x94d   :  { %v1185_v6 = vpop.xlane.xlu2 %1184 }
 0x94e   :  { %v1186_v43 = vsub.f32 %v1180_v62, %v1185_v6 }
 0x950   :  { %v1187_v44 = vmul.f32 1.442695, %v1186_v43 }
 0x952   :  { %6486 = vpow2.f32 %v1187_v44 }
 0x958   :  { %v7326_v11 = vpop.eup %6486 }
 0x959   :  { %v1189_v45 = vsel %vm244_vm10, %v7326_v11, 0.0 }
 0x95a   :  { %1190 = vadd.xlane.f32.xlu1 %v1189_v45 }
 0x95e   :  { %v1246_v35 = vpop.xlane.xlu1 %1245 }
 0x95f   :  { %v1247_v47 = vsub.f32 %v1241_v5, %v1246_v35 }
 0x961   :  { %v1248_v46 = vmul.f32 1.442695, %v1247_v47 }
 0x963   :  { %6488 = vpow2.f32 %v1248_v46 }
 0x966   :  { %v1314_v48 = vpop.xlane.xlu1 %1313 }
 0x967   :  { %v1315_v49 = vsub.f32 %v1309_v12, %v1314_v48 }
 0x969   :  { %v7330_v50 = vpop.eup %6488  ;;  %v1316_v51 = vmul.f32 1.442695, %v1315_v49 }
 0x96a   :  { %v1250_v52 = vsel %vm244_vm10, %v7330_v50, 0.0 }
 0x96b   :  { %6490 = vpow2.f32 %v1316_v51  ;;  %1251 = vadd.xlane.f32.xlu2 %v1250_v52 }
 0x96e   :  { %v1382_v53 = vpop.xlane.xlu0 %1381 }
 0x96f   :  { %v1383_v7 = vsub.f32 %v1377_v16, %v1382_v53  ;;  %v1481_v16 = vpack.c.bf16 %v1480_v14, %v1480_v14 }
 0x971   :  { %v7334_v54 = vpop.eup %6490  ;;  %v1384_v56 = vmul.f32 1.442695, %v1383_v7 }
 0x972   :  { %v1318_v57 = vsel %vm244_vm10, %v7334_v54, 0.0 }
 0x973   :  { %6492 = vpow2.f32 %v1384_v56  ;;  %1319 = vadd.xlane.f32.xlu1 %v1318_v57 }
 0x976   :  { %v1448_v58 = vpop.xlane.xlu0 %1447 }
 0x977   :  { %v1449_v55 = vsub.f32 %v1443_v20, %v1448_v58 }
 0x979   :  { %v7338_v59 = vpop.eup %6492  ;;  %v1450_v60 = vmul.f32 1.442695, %v1449_v55 }
 0x97a   :  { %v1386_v61 = vsel %vm244_vm10, %v7338_v59, 0.0 }
 0x97b   :  { %6494 = vpow2.f32 %v1450_v60  ;;  %1387 = vadd.xlane.f32.xlu0 %v1386_v61 }
 0x97e   :  { %v1509_v62 = vpop.xlane.xlu2 %1508  ;;  %v1326_v63 = vpop.permute.xlu1 %1325 }
 0x97f   :  { %v1510_v2 = vsub.f32 %v1504_v26, %v1509_v62  ;;  %v1331_v3 = vsel %vm260_vm8, %v1326_v63, 0 }
 0x980   :  { %1340 = vmatpush.bf16.msrb.mxu0 %v1331_v3 }
 0x981   :  { %v6495_v4 = vpop.eup %6494  ;;  %v1511_v5 = vmul.f32 1.442695, %v1510_v2 }
 0x982   :  { %v1452_v8 = vsel %vm244_vm10, %v6495_v4, 0.0 }
 0x983   :  { %6496 = vpow2.f32 %v1511_v5  ;;  %1453 = vadd.xlane.f32.xlu0 %v1452_v8 }
 0x984   :  { %v1577_v9 = vpop.xlane.xlu0 %1576 }
 0x985   :  { %v1578_v10 = vsub.f32 %v1572_v30, %v1577_v9  ;;  %v1462_v30 = vsel %vm260_vm8, %v1481_v16, 0 }
 0x986   :  { %v1258_v12 = vpop.permute.xlu2 %1257 }
 0x987   :  { %v1579_v13 = vmul.f32 1.442695, %v1578_v10  ;;  %v1263_v0 = vsel %vm260_vm8, %v1258_v12, 0 }
 0x988   :  { %1272 = vmatpush.bf16.msra.mxu3 %v1263_v0 }
 0x989   :  { %v6497_v15 = vpop.eup %6496  ;;  %6498 = vpow2.f32 %v1579_v13 }
 0x98a   :  { %v1513_v1 = vsel %vm244_vm10, %v6497_v15, 0.0 }
 0x98b   :  { %1514 = vadd.xlane.f32.xlu2 %v1513_v1  ;;  %v7378_v1 = vld [vmem:[%s8712_s6 + $0x8] sm:$0xff] }
 0x98c   :  { %1520 = vrot.lane.b32.xlu1 %v1481_v16, %s8721_s5 }
 0x98f   :  { %v6499_v17 = vpop.eup %6498 }
 0x990   :  { %v1581_v18 = vsel %vm244_vm10, %v6499_v17, 0.0 }
 0x993   :  { %1582 = vadd.xlane.f32.xlu2 %v1581_v18 }
 0x997   :  { %1588 = vrot.lane.b32.xlu0 %v1481_v16, %s8724_s2  ;;  %v1394_v19 = vpop.permute.xlu0 %1393 }
 0x998   :  { %v1399_v20 = vsel %vm260_vm8, %v1394_v19, 0 }
 0x999   :  { %1408 = vmatpush.bf16.msrb.mxu3 %v1399_v20 }
 0x9a9   :  { %v1645_v21 = vpop.xlane.xlu1 %1644 }
 0x9aa   :  { %v1646_v22 = vsub.f32 %v7322_v41, %v1645_v21  ;;  %v7387_v21 = vld [vmem:[%s8712_s6] sm:$0xff] }
 0x9ab   :  { %1656 = vrot.lane.b32.xlu2 %v1481_v16, %s8726_s25 }
 0x9ac   :  { %v1647_v24 = vmul.f32 1.442695, %v1646_v22  ;;  %v2005_v22 = vmul.f32 %v7387_v21, %v7387_v21 }
 0x9ae   :  { %6500 = vpow2.f32 %v1647_v24  ;;  %v2007_v24 = vsel %vm87_vm0, %v2005_v22, 0.0 }
 0x9b4   :  { %v6501_v25 = vpop.eup %6500 }
 0x9b5   :  { %v1649_v23 = vsel %vm244_vm10, %v6501_v25, 0.0 }
 0x9b6   :  { %1650 = vadd.xlane.f32.xlu1 %v1649_v23 }
 0x9cd   :  { %v1191_v26 = vpop.xlane.xlu1 %1190 }
 0x9ce   :  { %6502 = vrcp.f32 %v1191_v26 }
 0x9d4   :  { %v6503_v27 = vpop.eup %6502 }
 0x9d5   :  { %v1193_v28 = vmul.f32 %v6503_v27, %v7326_v11 }
 0x9d7   :  { %v1194_v29 = vpack.c.bf16 %v1193_v28, %v1193_v28 }
 0x9d9   :  { %5643 = vmatmul.msk.bf16.vlgmr.msra.gmra.mxu0 %vm244_vm10, %v1194_v29  ;;  %v6317_v29 = vld [vmem:[%s8717_s4 + $0x38] sm:$0xff] }
 0x9da   :  { %1471 = vmatpush.bf16.msra.mxu0 %v1462_v30  ;;  %1725 = vmatpush.bf16.msrb.mxu2 %v6317_v29  ;;  %v6330_v29 = vld [vmem:[%s8720_s30 + $0x60] sm:$0xff] }
 0x9de   :  { %v1252_v31 = vpop.xlane.xlu2 %1251 }
 0x9df   :  { %6504 = vrcp.f32 %v1252_v31 }
 0x9e5   :  { %v6505_v32 = vpop.eup %6504 }
 0x9e6   :  { %v1254_v33 = vmul.f32 %v6505_v32, %v7330_v50  ;;  %v1320_v37 = vpop.xlane.xlu1 %1319  ;;  %v6316_v32 = vld [vmem:[%s8717_s4 + $0x30] sm:$0xff] }
 0x9e7   :  { %6506 = vrcp.f32 %v1320_v37  ;;  %1726 = vmatpush.bf16.msrb.mxu2 %v6316_v32  ;;  %v6315_v37 = vld [vmem:[%s8717_s4 + $0x28] sm:$0xff] }
 0x9e8   :  { %v1255_v38 = vpack.c.bf16 %v1254_v33, %v1254_v33  ;;  %v6327_v32 = vld [vmem:[%s8720_s30 + $0x48] sm:$0xff] }
 0x9ea   :  { %5646 = vmatmul.msk.bf16.vlgmr.msra.gmra.mxu3 %vm244_vm10, %v1255_v38 }
 0x9eb   :  { %1727 = vmatpush.bf16.msrb.mxu2 %v6315_v37  ;;  %v6325_v37 = vld [vmem:[%s8718_s26 + $0x74] sm:$0xf0] }
 0x9ed   :  { %v6507_v39 = vpop.eup %6506 }
 0x9ee   :  { %v1322_v41 = vmul.f32 %v6507_v39, %v7334_v54  ;;  %v1388_v42 = vpop.xlane.xlu0 %1387  ;;  %v6314_v39 = vld [vmem:[%s8717_s4 + $0x20] sm:$0xff] }
 0x9ef   :  { %6508 = vrcp.f32 %v1388_v42  ;;  %1728 = vmatpush.bf16.msrb.mxu2 %v6314_v39  ;;  %v5807_v42 = vld [vmem:[%s8653_s11 + $0x30] sm:$0xf]  ;;  %v6324_v39 = vld [vmem:[%s8718_s26 + $0x74] sm:$0xf] }
 0x9f0   :  { %v1323_v6 = vpack.c.bf16 %v1322_v41, %v1322_v41 }
 0x9f2   :  { %5649 = vmatmul.msk.bf16.vlgmr.msrb.gmra.mxu0 %vm244_vm10, %v1323_v6  ;;  %v6341_v6 = vld [vmem:[%s8653_s11 + $0x34] sm:$0xf0] }
 0x9f5   :  { %v6509_v43 = vpop.eup %6508 }
 0x9f6   :  { %v1390_v44 = vmul.f32 %v6509_v43, %v7338_v59  ;;  %v1454_v11 = vpop.xlane.xlu0 %1453  ;;  %v5799_v43 = vld [vmem:[%s8653_s11 + $0x20] sm:$0xf] }
 0x9f7   :  { %6510 = vrcp.f32 %v1454_v11  ;;  %v6339_v11 = vld [vmem:[%s8653_s11 + $0x24] sm:$0xf0] }
 0x9f8   :  { %v1391_v45 = vpack.c.bf16 %v1390_v44, %v1390_v44  ;;  %v5808_v44 = vor.u32 %v6341_v6, %v5807_v42  ;;  %v6326_v6 = vld [vmem:[%s8720_s30 + $0x40] sm:$0xff] }
 0x9fa   :  { %5652 = vmatmul.msk.bf16.vlgmr.msrb.gmra.mxu3 %vm244_vm10, %v1391_v45  ;;  %2100 = vmatpush.bf16.msra.mxu2 %v5808_v44  ;;  %v5800_v45 = vor.u32 %v6339_v11, %v5799_v43  ;;  %v5717_v43 = vld [vmem:[%s8718_s26 + $0x60] sm:$0xf]  ;;  %v6323_v44 = vld [vmem:[%s8718_s26 + $0x64] sm:$0xf0] }
 0x9fb   :  { %v5718_v11 = vor.u32 %v6323_v44, %v5717_v43 }
 0x9fd   :  { %v6511_v35 = vpop.eup %6510 }
 0x9fe   :  { %v1456_v47 = vmul.f32 %v6511_v35, %v6495_v4  ;;  %v1515_v46 = vpop.xlane.xlu2 %1514  ;;  %v1521_v48 = vpop.permute.xlu1 %1520  ;;  %2101 = vmatpush.bf16.msra.mxu2 %v5800_v45  ;;  %v6322_v45 = vld [vmem:[%s8718_s26 + $0x64] sm:$0xf] }
 0x9ff   :  { %6512 = vrcp.f32 %v1515_v46  ;;  %v1526_v49 = vsel %vm260_vm8, %v1521_v48, 0  ;;  %v6337_v46 = vld [vmem:[%s8653_s11 + $0x14] sm:$0xf0] }
 0xa00   :  { %v1457_v50 = vpack.c.bf16 %v1456_v47, %v1456_v47  ;;  %1535 = vmatpush.bf16.msra.mxu3 %v1526_v49  ;;  %v5791_v47 = vld [vmem:[%s8653_s11 + $0x10] sm:$0xf] }
 0xa02   :  { %5655 = vmatmul.msk.bf16.vlgmr.msra.gmra.mxu0 %vm244_vm10, %v1457_v50  ;;  %v5792_v50 = vor.u32 %v6337_v46, %v5791_v47  ;;  %v5709_v46 = vld [vmem:[%s8718_s26 + $0x50] sm:$0xf] }
 0xa04   :  { %2102 = vmatpush.bf16.msra.mxu2 %v5792_v50  ;;  %v6320_v50 = vld [vmem:[%s8718_s26 + $0x54] sm:$0xf] }
 0xa05   :  { %v6513_v51 = vpop.eup %6512 }
 0xa06   :  { %v1517_v52 = vmul.f32 %v6513_v51, %v6497_v15  ;;  %v1583_v53 = vpop.xlane.xlu2 %1582  ;;  %v5783_v51 = vld [vmem:[%s8653_s11] sm:$0xf] }
 0xa07   :  { %6514 = vrcp.f32 %v1583_v53 }
 0xa08   :  { %v1518_v7 = vpack.c.bf16 %v1517_v52, %v1517_v52  ;;  %v6335_v52 = vld [vmem:[%s8653_s11 + $0x4] sm:$0xf0] }
 0xa09   :  { %v1589_v54 = vpop.permute.xlu0 %1588 }
 0xa0a   :  { %v1594_v56 = vsel %vm260_vm8, %v1589_v54, 0  ;;  %5658 = vmatmul.msk.bf16.vlgmr.msra.gmra.mxu3 %vm244_vm10, %v1518_v7  ;;  %v5784_v7 = vor.u32 %v6335_v52, %v5783_v51  ;;  %v5711_v51 = vld [vmem:[%s8718_s26 + $0x58] sm:$0xf0] }
 0xa0b   :  { %1603 = vmatpush.bf16.msrb.mxu0 %v1594_v56  ;;  %v5714_v52 = vor.u32 %v6320_v50, %v5711_v51 }
 0xa0c   :  { %2103 = vmatpush.bf16.msra.mxu2 %v5784_v7  ;;  %v5701_v7 = vld [vmem:[%s8718_s26 + $0x40] sm:$0xf] }
 0xa0d   :  { %v6515_v57 = vpop.eup %6514 }
 0xa0e   :  { %v1585_v58 = vmul.f32 %v6515_v57, %v6499_v17  ;;  %v1657_v55 = vpop.permute.xlu2 %1656  ;;  %v2006_v17 = vmul.f32 %v7378_v1, %v7378_v1 }
 0xa0f   :  { %v1662_v59 = vsel %vm260_vm8, %v1657_v55, 0 }
 0xa10   :  { %v1586_v60 = vpack.c.bf16 %v1585_v58, %v1585_v58  ;;  %1671 = vmatpush.bf16.msrb.mxu3 %v1662_v59  ;;  %v2010_v19 = vsel %vm87_vm0, %v2006_v17, 0.0 }
 0xa12   :  { %5661 = vmatmul.msk.bf16.vlgmr.msrb.gmra.mxu0 %vm244_vm10, %v1586_v60 }
 0xa29   :  { %v1651_v61 = vpop.xlane.xlu1 %1650 }
 0xa2a   :  { %6516 = vrcp.f32 %v1651_v61 }
 0xa30   :  { %v6517_v62 = vpop.eup %6516 }
 0xa31   :  { %v1653_v63 = vmul.f32 %v6517_v62, %v6501_v25 }
 0xa33   :  { %v1654_v2 = vpack.c.bf16 %v1653_v63, %v1653_v63 }
 0xa35   :  { %5664 = vmatmul.msk.bf16.vlgmr.msrb.gmra.mxu3 %vm244_vm10, %v1654_v2 }
 0xa56   :  { %v1210_v3 = vpop.f32.mrf.mxu0 }
 0xa57   :  { %1214 = vst.msk [vmem:[#allocation3] sm:$0xff] %vm224_vm9, %v1210_v3 }
 0xa5e   :  { %v1212_v4 = vpop.f32.mrf.mxu0 }
 0xa6d   :  { %v1274_v5 = vpop.f32.mrf.mxu3 }
 0xa6e   :  { %1279 = vrot.lane.b32.xlu1 %v1274_v5, %s8723_s9 }
 0xa6f   :  { %v1342_v8 = vpop.f32.mrf.mxu0 }
 0xa70   :  { %1347 = vrot.lane.b32.xlu2 %v1342_v8, %s8725_s24 }
 0xa75   :  { %v1276_v9 = vpop.f32.mrf.mxu3 }
 0xa77   :  { %v1344_v10 = vpop.f32.mrf.mxu0 }
 0xa7d   :  { %v1410_v12 = vpop.f32.mrf.mxu3 }
 0xa7e   :  { %1415 = vrot.lane.b32.xlu2 %v1410_v12, %s8716_s3  ;;  %v6426_v12 = vld [vmem:[%s8655_s13] ss:$0 sm:$0xff] }
 0xa7f   :  { %v1473_v13 = vpop.f32.mrf.mxu0 }
 0xa80   :  { %1477 = vst.msk [vmem:[#allocation3 + $0x8] sm:$0xff] %vm224_vm9, %v1473_v13 }
 0xa85   :  { %v1412_v0 = vpop.f32.mrf.mxu3 }
 0xa87   :  { %v1475_v14 = vpop.f32.mrf.mxu0 }
 0xa8d   :  { %v1537_v15 = vpop.f32.mrf.mxu3 }
 0xa8e   :  { %1542 = vrot.lane.b32.xlu0 %v1537_v15, %s8723_s9 }
 0xa8f   :  { %v1605_v16 = vpop.f32.mrf.mxu0 }
 0xa95   :  { %v1539_v18 = vpop.f32.mrf.mxu3 }
 0xa96   :  { %1610 = vrot.lane.b32.xlu0 %v1605_v16, %s8725_s24 }
 0xa97   :  { %v1607_v20 = vpop.f32.mrf.mxu0 }
 0xa98   :  { %2011 = vadd.xlane.f32.xlu1 %v2010_v19 }
 0xaa7   :  { %2008 = vadd.xlane.f32.xlu2 %v2007_v24 }
 0xab8   :  { %v1673_v25 = vpop.f32.mrf.mxu3 }
 0xab9   :  { %1678 = vrot.lane.b32.xlu0 %v1673_v25, %s8716_s3 }
 0xac0   :  { %v1675_v23 = vpop.f32.mrf.mxu3 }
 0xaca   :  { %v1348_v26 = vpop.permute.xlu2 %1347 }
 0xad8   :  { %v1416_v28 = vpop.permute.xlu2 %1415 }
 0xae0   :  { %v1280_v27 = vpop.permute.xlu1 %1279 }
 0xae1   :  { %1282 = vst.msk [vmem:[#allocation3] sm:$0xff] %vm346_vm11, %v1280_v27 }
 0xae2   :  { %1350 = vst.msk [vmem:[#allocation3] sm:$0xff] %vm416_vm12, %v1348_v26  ;;  %v6332_v26 = vld [vmem:[%s8720_s30 + $0x70] sm:$0xff] }
 0xae3   :  { %1418 = vst.msk [vmem:[#allocation3] sm:$0xff] %vm486_vm13, %v1416_v28  ;;  %v6331_v28 = vld [vmem:[%s8720_s30 + $0x68] sm:$0xff] }
 0xaea   :  { %v1682_v4 = vld [vmem:[#allocation3] sm:$0xff] }
 0xb00   :  { %v1543_v30 = vpop.permute.xlu0 %1542 }
 0xb01   :  { %1545 = vst.msk [vmem:[#allocation3 + $0x8] sm:$0xff] %vm346_vm11, %v1543_v30  ;;  %v6329_v30 = vld [vmem:[%s8720_s30 + $0x58] sm:$0xff] }
 0xb08   :  { %v1611_v31 = vpop.permute.xlu0 %1610 }
 0xb09   :  { %1613 = vst.msk [vmem:[#allocation3 + $0x8] sm:$0xff] %vm416_vm12, %v1611_v31  ;;  %v6328_v31 = vld [vmem:[%s8720_s30 + $0x50] sm:$0xff] }
 0xb0b   :  { %v2012_v33 = vpop.xlane.xlu1 %2011 }
 0xb0c   :  { %v2014_v38 = vmul.f32 %v2012_v33, %v6925_v34  ;;  %v5725_v33 = vld [vmem:[%s8718_s26 + $0x70] sm:$0xf] }
 0xb0e   :  { %v2016_v41 = vadd.f32 1e-06, %v2014_v38  ;;  %v5726_v38 = vor.u32 %v6325_v37, %v5725_v33 }
 0xb10   :  { %6518 = vrsqrt.f32 %v2016_v41  ;;  %vm2033_vm2 = vweird.f32 %v2016_v41  ;;  %1835 = vmatpush.bf16.msra.mxu0 %v5726_v38  ;;  %v6427_v38 = vld [vmem:[%s8719_s27 + $0x1] ss:$0 sm:$0xff]  ;;  %s5448_s27 = sshll.u32 %s6730_s19, 4  ;;  %s5449_s27 = int_to_ptr.vmem [resolvable:$true] %s5448_s27 }
 0xb14   :  { %1836 = vmatpush.bf16.msra.mxu0 %v5718_v11 }
 0xb16   :  { %v6519_v53 = vpop.eup %6518 }
 0xb17   :  { %v2028_v54 = vmul.f32 %v6519_v53, %v2016_v41  ;;  %vm2034_vm3 = vweird.f32 %v6519_v53  ;;  %v5727_v41 = vld [vmem:[%s8718_s26 + $0x78] sm:$0xf0] }
 0xb18   :  { %vm2035_vm6 = vmor %vm2033_vm2, %vm2034_vm3  ;;  %v5730_v42 = vor.u32 %v6324_v39, %v5727_v41 }
 0xb19   :  { %v2029_v58 = vmul.f32 %v6519_v53, %v2028_v54  ;;  %v6319_v54 = vld [vmem:[%s8718_s26 + $0x44] sm:$0xf0] }
 0xb1a   :  { %v2009_v35 = vpop.xlane.xlu2 %2008  ;;  %1849 = vmatpush.bf16.msrb.mxu1 %v5730_v42 }
 0xb1b   :  { %v2013_v48 = vmul.f32 %v2009_v35, %v6925_v34  ;;  %v2030_v59 = vmul.f32 0.5, %v2029_v58  ;;  %v5719_v35 = vld [vmem:[%s8718_s26 + $0x68] sm:$0xf0]  ;;  %v6318_v58 = vld [vmem:[%s8718_s26 + $0x44] sm:$0xf] }
 0xb1c   :  { %v5722_v47 = vor.u32 %v6322_v45, %v5719_v35 }
 0xb1d   :  { %v2015_v49 = vadd.f32 1e-06, %v2013_v48  ;;  %v2031_v62 = vsub.f32 1.5, %v2030_v59  ;;  %v6321_v48 = vld [vmem:[%s8718_s26 + $0x54] sm:$0xf0] }
 0xb1e   :  { %1850 = vmatpush.bf16.msrb.mxu1 %v5722_v47  ;;  %v6340_v59 = vld [vmem:[%s8653_s11 + $0x34] sm:$0xf] }
 0xb1f   :  { %6520 = vrsqrt.f32 %v2015_v49  ;;  %vm2023_vm4 = vweird.f32 %v2015_v49  ;;  %v2032_v2 = vmul.f32 %v6519_v53, %v2031_v62 }
 0xb21   :  { %v2036_v9 = vsel %vm2035_vm6, %v6519_v53, %v2032_v2  ;;  %v6338_v2 = vld [vmem:[%s8653_s11 + $0x24] sm:$0xf] }
 0xb22   :  { %v2038_v13 = vmul.f32 %v2036_v9, %v7378_v1  ;;  %1851 = vmatpush.bf16.msrb.mxu1 %v5714_v52  ;;  %v5793_v9 = vld [vmem:[%s8653_s11 + $0x18] sm:$0xf0] }
 0xb24   :  { %v2043_v14 = vmul.f32 %v6426_v12, %v2038_v13 }
 0xb25   :  { %v6521_v56 = vpop.eup %6520 }
 0xb26   :  { %v2018_v57 = vmul.f32 %v6521_v56, %v2015_v49  ;;  %vm2024_vm5 = vweird.f32 %v6521_v56  ;;  %v5710_v49 = vor.u32 %v6321_v48, %v5709_v46 }
 0xb27   :  { %vm2025_vm7 = vmor %vm2023_vm4, %vm2024_vm5 }
 0xb28   :  { %v2019_v55 = vmul.f32 %v6521_v56, %v2018_v57  ;;  %1837 = vmatpush.bf16.msra.mxu0 %v5710_v49  ;;  %v5702_v57 = vor.u32 %v6319_v54, %v5701_v7 }
 0xb2a   :  { %v2020_v60 = vmul.f32 0.5, %v2019_v55  ;;  %v5703_v55 = vld [vmem:[%s8718_s26 + $0x48] sm:$0xf0]  ;;  %s8727_s26 = sld [smem:[#allocation9_spill]] }
 0xb2b   :  { %v1679_v61 = vpop.permute.xlu0 %1678 }
 0xb2c   :  { %1681 = vst.msk [vmem:[#allocation3 + $0x8] sm:$0xff] %vm486_vm13, %v1679_v61  ;;  %v2021_v63 = vsub.f32 1.5, %v2020_v60  ;;  %v5706_v60 = vor.u32 %v6318_v58, %v5703_v55  ;;  %v5809_v61 = vld [vmem:[%s8653_s11 + $0x38] sm:$0xf0]  ;;  %1838 = vmatpush.bf16.msra.mxu0 %v5702_v57 }
 0xb2e   :  { %v2022_v3 = vmul.f32 %v6521_v56, %v2021_v63  ;;  %v5812_v63 = vor.u32 %v6340_v59, %v5809_v61  ;;  %1852 = vmatpush.bf16.msrb.mxu1 %v5706_v60 }
 0xb30   :  { %v2026_v10 = vsel %vm2025_vm7, %v6521_v56, %v2022_v3  ;;  %2114 = vmatpush.bf16.msrb.mxu0 %v5812_v63  ;;  %v5801_v3 = vld [vmem:[%s8653_s11 + $0x28] sm:$0xf0] }
 0xb31   :  { %v2037_v0 = vmul.f32 %v2026_v10, %v7387_v21 }
 0xb33   :  { %v1683_v5 = vld [vmem:[#allocation3 + $0x8] sm:$0xff]  ;;  %v2042_v15 = vmul.f32 %v6426_v12, %v2037_v0 }
 0xb34   :  { %v1684_v8 = vpack.c.bf16 %v1683_v5, %v1682_v4  ;;  %v5804_v4 = vor.u32 %v6338_v2, %v5801_v3 }
 0xb35   :  { %v7443_v16 = vpack.c.bf16 %v2043_v14, %v2042_v15 }
 0xb36   :  { %5689 = vmatmul.msk.bf16.vlgmr.msrb.gmra.mxu2 %vm87_vm0, %v1684_v8  ;;  %v6336_v8 = vld [vmem:[%s8653_s11 + $0x14] sm:$0xf]  ;;  %2115 = vmatpush.bf16.msrb.mxu0 %v5804_v4 }
 0xb37   :  { %v5796_v12 = vor.u32 %v6336_v8, %v5793_v9 }
 0xb3a   :  { %2116 = vmatpush.bf16.msrb.mxu0 %v5796_v12 }
 0xb46   :  { %5813 = vmatmul.msk.bf16.vlgmr.msra.gmra.mxu2 %vm87_vm0, %v7443_v16 }
 0xbb9   :  { %v1730_v17 = vpop.f32.mrf.mxu2 }
 0xbba   :  { %v7448_v18 = vadd.f32 %v1730_v17, %v7181_v36  ;;  %v6334_v17 = vld [vmem:[%s8653_s11 + $0x4] sm:$0xf] }
 0xbbc   :  { %v1739_v19 = vmul.f32 %v7448_v18, %v7448_v18 }
 0xbbe   :  { %v1741_v20 = vsel %vm87_vm0, %v1739_v19, 0.0  ;;  %v5785_v19 = vld [vmem:[%s8653_s11 + $0x8] sm:$0xf0] }
 0xbbf   :  { %1742 = vadd.xlane.f32.xlu0 %v1741_v20 }
 0xbc1   :  { %v1732_v1 = vpop.f32.mrf.mxu2 }
 0xbc2   :  { %v7454_v21 = vadd.f32 %v1732_v1, %v7187_v40  ;;  %v6333_v40 = vld [vmem:[%s8720_s30 + $0x78] sm:$0xff]  ;;  %v5788_v1 = vor.u32 %v6334_v17, %v5785_v19 }
 0xbc3   :  { %1945 = vmatpush.bf16.msra.mxu3 %v6333_v40 }
 0xbc4   :  { %v1740_v22 = vmul.f32 %v7454_v21, %v7454_v21  ;;  %2117 = vmatpush.bf16.msrb.mxu0 %v5788_v1 }
 0xbc6   :  { %v1744_v24 = vsel %vm87_vm0, %v1740_v22, 0.0 }
 0xbc7   :  { %1745 = vadd.xlane.f32.xlu2 %v1744_v24  ;;  %1946 = vmatpush.bf16.msra.mxu3 %v6332_v26 }
 0xbc9   :  { %v2105_v25 = vpop.f32.mrf.mxu2 }
 0xbca   :  { %2124 = vst [vmem:[#allocation2] sm:$0xff] %v2105_v25  ;;  %v7459_v36 = vpack.c.bf16 %v2105_v25, %v2105_v25 }
 0xbcb   :  { %1947 = vmatpush.bf16.msra.mxu3 %v6331_v28 }
 0xbcc   :  { %2134 = vrot.lane.b32.xlu1 %v7459_v36, %s8722_s0 }
 0xbcf   :  { %1948 = vmatpush.bf16.msra.mxu3 %v6330_v29 }
 0xbd1   :  { %v2107_v23 = vpop.f32.mrf.mxu2 }
 0xbd2   :  { %2126 = vst [vmem:[#allocation2 + $0x10] sm:$0xff] %v2107_v23  ;;  %v7479_v27 = vpack.c.bf16 %v2107_v23, %v2107_v23 }
 0xbd3   :  { %2196 = vrot.lane.b32.xlu0 %v7459_v36, %s8716_s3  ;;  %1949 = vmatpush.bf16.msra.mxu3 %v6329_v30 }
 0xbd4   :  { %2263 = vrot.lane.b32.xlu1 %v7459_v36, %s8724_s2 }
 0xbd7   :  { %1950 = vmatpush.bf16.msra.mxu3 %v6328_v31 }
 0xbdb   :  { %2194 = vrot.lane.b32.xlu0 %v7459_v36, %s8721_s5  ;;  %1951 = vmatpush.bf16.msra.mxu3 %v6327_v32 }
 0xbdc   :  { %2332 = vrot.lane.b32.xlu1 %v7459_v36, %s8726_s25 }
 0xbdf   :  { %2265 = vrot.lane.b32.xlu2 %v7459_v36, %s8725_s24  ;;  %1952 = vmatpush.bf16.msra.mxu3 %v6326_v6 }
 0xbe3   :  { %2401 = vrot.lane.b32.xlu0 %v7479_v27, %s8722_s0 }
 0xbe4   :  { %2461 = vrot.lane.b32.xlu1 %v7479_v27, %s8721_s5 }
 0xbe7   :  { %2334 = vrot.lane.b32.xlu2 %v7459_v36, %s8723_s9 }
 0xbeb   :  { %2532 = vrot.lane.b32.xlu0 %v7479_v27, %s8725_s24 }
 0xbec   :  { %2599 = vrot.lane.b32.xlu1 %v7479_v27, %s8726_s25 }
 0xbef   :  { %2463 = vrot.lane.b32.xlu2 %v7479_v27, %s8716_s3 }
 0xbf3   :  { %2601 = vrot.lane.b32.xlu0 %v7479_v27, %s8723_s9 }
 0xbf7   :  { %2530 = vrot.lane.b32.xlu2 %v7479_v27, %s8724_s2 }
 0xc32   :  { %v1743_v53 = vpop.xlane.xlu0 %1742 }
 0xc33   :  { %v1747_v56 = vmul.f32 %v1743_v53, %v6925_v34 }
 0xc35   :  { %v1749_v62 = vadd.f32 1e-06, %v1747_v56 }
 0xc37   :  { %6522 = vrsqrt.f32 %v1749_v62  ;;  %vm1757_vm15 = vweird.f32 %v1749_v62 }
 0xc3a   :  { %v1746_v5 = vpop.xlane.xlu2 %1745 }
 0xc3b   :  { %v1748_v10 = vmul.f32 %v1746_v5, %v6925_v34  ;;  %v2132_v5 = vld [vmem:[%s8727_s26] sm:$0xff] }
 0xc3d   :  { %v6523_v13 = vpop.eup %6522  ;;  %v1750_v0 = vadd.f32 1e-06, %v1748_v10 }
 0xc3e   :  { %v1752_v14 = vmul.f32 %v6523_v13, %v1749_v62  ;;  %v2135_v15 = vpop.permute.xlu1 %2134  ;;  %vm1758_vm14 = vweird.f32 %v6523_v13 }
 0xc3f   :  { %6524 = vrsqrt.f32 %v1750_v0  ;;  %v2140_v20 = vsel %vm224_vm9, %v2135_v15, 0  ;;  %vm1759_vm1 = vmor %vm1757_vm15, %vm1758_vm14  ;;  %vm1767_vm3 = vweird.f32 %v1750_v0 }
 0xc40   :  { %v1753_v22 = vmul.f32 %v6523_v13, %v1752_v14  ;;  %2149 = vmatpush.bf16.xpose.msra.mxu1 %v2140_v20 }
 0xc42   :  { %v1754_v24 = vmul.f32 0.5, %v1753_v22  ;;  %v2266_v25 = vpop.permute.xlu2 %2265 }
 0xc43   :  { %v2271_v23 = vsel %vm224_vm9, %v2266_v25, 0 }
 0xc44   :  { %v1755_v40 = vsub.f32 1.5, %v1754_v24  ;;  %2280 = vmatpush.bf16.xpose.msrb.mxu3 %v2271_v23 }
 0xc45   :  { %v6525_v26 = vpop.eup %6524  ;;  %v2197_v44 = vpop.permute.xlu0 %2196 }
 0xc46   :  { %v1762_v28 = vmul.f32 %v6525_v26, %v1750_v0  ;;  %v1756_v29 = vmul.f32 %v6523_v13, %v1755_v40  ;;  %vm1768_vm2 = vweird.f32 %v6525_v26  ;;  %v2202_v11 = vsel %vm224_vm9, %v2197_v44, 0  ;;  %v7608_v52 = vpop.permute.xlu1 %2263 }
 0xc47   :  { %vm1769_vm4 = vmor %vm1767_vm3, %vm1768_vm2 }
 0xc48   :  { %v1763_v30 = vmul.f32 %v6525_v26, %v1762_v28  ;;  %v1760_v32 = vsel %vm1759_vm1, %v6523_v13, %v1756_v29  ;;  %v5817_v29 = vld [vmem:[%s8727_s26 + $0x8] sm:$0xff] }
 0xc49   :  { %v1771_v39 = vmul.f32 %v1760_v32, %v7448_v18 }
 0xc4a   :  { %v1764_v31 = vmul.f32 0.5, %v1763_v30  ;;  %v2335_v35 = vpop.permute.xlu2 %2334 }
 0xc4b   :  { %v1776_v6 = vmul.f32 %v6427_v38, %v1771_v39  ;;  %v2340_v46 = vsel %vm224_vm9, %v2335_v35, 0  ;;  %v5829_v35 = vld [vmem:[%s8727_s26 + $0x28] sm:$0xff] }
 0xc4c   :  { %v1765_v33 = vsub.f32 1.5, %v1764_v31 }
 0xc4d   :  { %v2195_v47 = vpop.permute.xlu0 %2194 }
 0xc4e   :  { %v1766_v37 = vmul.f32 %v6525_v26, %v1765_v33  ;;  %v2333_v7 = vpop.permute.xlu1 %2332 }
 0xc50   :  { %v1770_v41 = vsel %vm1769_vm4, %v6525_v26, %v1766_v37 }
 0xc51   :  { %v1772_v42 = vmul.f32 %v1770_v41, %v7454_v21 }
 0xc52   :  { %v2464_v49 = vpop.permute.xlu2 %2463 }
 0xc53   :  { %v1777_v43 = vmul.f32 %v6427_v38, %v1772_v42  ;;  %v2469_v50 = vsel %vm224_vm9, %v2464_v49, 0  ;;  %v5823_v42 = vld [vmem:[%s8727_s26 + $0x18] sm:$0xff] }
 0xc55   :  { %v1778_v45 = vpack.c.bf16 %v1777_v43, %v1776_v6  ;;  %v2402_v48 = vpop.permute.xlu0 %2401 }
 0xc56   :  { %v2407_v39 = vsel %vm224_vm9, %v2402_v48, 0 }
 0xc57   :  { %5731 = vmatmul.msk.bf16.vlgmr.msra.gmra.mxu0 %vm87_vm0, %v1778_v45  ;;  %5732 = vmatmul.msk.bf16.vlgmr.msrb.gmra.mxu1 %vm87_vm0, %v1778_v45 }
 0xc58   :  { %2211 = vmatpush.bf16.xpose.msra.mxu0 %v2202_v11 }
 0xc5d   :  { %v7606_v51 = vpop.permute.xlu0 %2532 }
 0xc5e   :  { %v2538_v11 = vsel %vm224_vm9, %v7606_v51, 0 }
 0xc65   :  { %v2602_v53 = vpop.permute.xlu0 %2601 }
 0xc66   :  { %v2607_v54 = vsel %vm224_vm9, %v2602_v53, 0  ;;  %v2531_v53 = vpop.permute.xlu2 %2530 }
 0xc67   :  { %5814 = vmatmul.msk.bf16.vlgmr.msrb.gmra.mxu0 %vm87_vm0, %v7443_v16  ;;  %5815 = vmatmul.msk.bf16.vlgmr.msra.gmra.mxu1 %vm224_vm9, %v7459_v36  ;;  %v2462_v16 = vpop.permute.xlu1 %2461 }
 0xc68   :  { %2349 = vmatpush.bf16.xpose.msrb.mxu0 %v2340_v46 }
 0xc6f   :  { %v2600_v36 = vpop.permute.xlu1 %2599 }
 0xc77   :  { %5818 = vmatmul.msk.bf16.vlgmr.msra.gmra.mxu0 %vm224_vm9, %v2195_v47 }
 0xc78   :  { %2478 = vmatpush.bf16.xpose.msra.mxu0 %v2469_v50  ;;  %v5835_v50 = vld [vmem:[%s8727_s26 + $0x38] sm:$0xff] }
 0xc87   :  { %5824 = vmatmul.msk.bf16.vlgmr.msrb.gmra.mxu0 %vm224_vm9, %v2333_v7 }
 0xc88   :  { %2616 = vmatpush.bf16.xpose.msrb.mxu0 %v2607_v54 }
 0xc97   :  { %5830 = vmatmul.msk.bf16.vlgmr.msra.gmra.mxu0 %vm224_vm9, %v2462_v16 }
 0xca7   :  { %5836 = vmatmul.msk.bf16.vlgmr.msrb.gmra.mxu0 %vm224_vm9, %v2600_v36 }
 0xcd4   :  { %v1840_v56 = vpop.f32.mrf.mxu0  ;;  %v1854_v57 = vpop.f32.mrf.mxu1 }
 0xcd5   :  { %v1859_v58 = vmul.f32 %v1840_v56, %v1840_v56 }
 0xcd7   :  { %v1861_v55 = vmul.f32 %v1859_v58, %v1840_v56 }
 0xcd9   :  { %v1863_v59 = vmul.f32 0.044715, %v1861_v55 }
 0xcdb   :  { %v1865_v60 = vadd.f32 %v1863_v59, %v1840_v56 }
 0xcdc   :  { %v1842_v61 = vpop.f32.mrf.mxu0  ;;  %v1856_v62 = vpop.f32.mrf.mxu1 }
 0xcdd   :  { %v1867_v63 = vmul.f32 0.7978846, %v1865_v60  ;;  %v1860_v2 = vmul.f32 %v1842_v61, %v1842_v61 }
 0xcdf   :  { %6526 = vtanh.f32 %v1867_v63  ;;  %v1862_v3 = vmul.f32 %v1860_v2, %v1842_v61 }
 0xce1   :  { %v1864_v4 = vmul.f32 0.044715, %v1862_v3 }
 0xce3   :  { %v1866_v8 = vadd.f32 %v1864_v4, %v1842_v61 }
 0xce4   :  { %v2119_v9 = vpop.f32.mrf.mxu0  ;;  %v2151_v10 = vpop.f32.mrf.mxu1 }
 0xce5   :  { %v6527_v12 = vpop.eup %6526  ;;  %v1868_v13 = vmul.f32 0.7978846, %v1866_v8  ;;  %2125 = vst.msk [vmem:[#allocation2 + $0x8] sm:$0xff] %vm87_vm0, %v2119_v9  ;;  %v2152_v0 = vadd.f32 %v2151_v10, %v2132_v5  ;;  %v5820_v9 = vld [vmem:[%s8727_s26 + $0x10] sm:$0xff] }
 0xce6   :  { %v1871_v15 = vadd.f32 1.0, %v6527_v12 }
 0xce7   :  { %6528 = vtanh.f32 %v1868_v13  ;;  %v2155_v14 = vsel %vm244_vm10, %v2152_v0, -inf }
 0xce8   :  { %2156 = vmax.xlane.f32.xlu2 %v2155_v14  ;;  %v1873_v17 = vmul.f32 0.5, %v1871_v15  ;;  %v5826_v14 = vld [vmem:[%s8727_s26 + $0x20] sm:$0xff] }
 0xcea   :  { %v1875_v40 = vmul.f32 %v1873_v17, %v1840_v56 }
 0xcec   :  { %v2121_v19 = vpop.f32.mrf.mxu0  ;;  %v2153_v20 = vpop.f32.mrf.mxu1  ;;  %v2130_v1 = vld [vmem:[#allocation2 + $0x8] sm:$0xff]  ;;  %v1877_v30 = vmul.f32 %v1875_v40, %v1854_v57 }
 0xced   :  { %v6529_v22 = vpop.eup %6528  ;;  %2127 = vst.msk [vmem:[#allocation2 + $0x18] sm:$0xff] %vm87_vm0, %v2121_v19  ;;  %v7620_v24 = vpack.c.bf16 %v2130_v1, %v2130_v1 }
 0xcee   :  { %v1872_v25 = vadd.f32 1.0, %v6529_v22 }
 0xcef   :  { %v2171_v23 = vsel %vm260_vm8, %v7620_v24, 0 }
 0xcf0   :  { %v1874_v26 = vmul.f32 0.5, %v1872_v25  ;;  %2180 = vmatpush.bf16.msrb.mxu2 %v2171_v23  ;;  %v5832_v25 = vld [vmem:[%s8727_s26 + $0x30] sm:$0xff] }
 0xcf2   :  { %v1876_v28 = vmul.f32 %v1874_v26, %v1842_v61 }
 0xcf4   :  { %v1878_v31 = vmul.f32 %v1876_v28, %v1856_v62  ;;  %v2213_v32 = vpop.f32.mrf.mxu0  ;;  %v2456_v28 = vld [vmem:[#allocation2 + $0x18] sm:$0xff] }
 0xcf5   :  { %v2214_v33 = vadd.f32 %v5817_v29, %v2213_v32  ;;  %v2457_v29 = vpack.c.bf16 %v2456_v28, %v2456_v28 }
 0xcf6   :  { %v1879_v37 = vpack.c.bf16 %v1878_v31, %v1877_v30 }
 0xcf7   :  { %v2217_v38 = vsel %vm244_vm10, %v2214_v33, -inf }
 0xcf8   :  { %2218 = vmax.xlane.f32.xlu0 %v2217_v38  ;;  %1953 = vmatmul.bf16.vlgmr.msra.gmra.mxu3 %v1879_v37 }
 0xcf9   :  { %2416 = vmatpush.bf16.xpose.msra.mxu3 %v2407_v39 }
 0xcfc   :  { %v2215_v41 = vpop.f32.mrf.mxu0 }
 0xd04   :  { %v2351_v6 = vpop.f32.mrf.mxu0 }
 0xd05   :  { %v2352_v43 = vadd.f32 %v5823_v42, %v2351_v6 }
 0xd07   :  { %v2355_v44 = vsel %vm244_vm10, %v2352_v43, -inf }
 0xd08   :  { %5821 = vmatmul.msk.bf16.vlgmr.msrb.gmra.mxu3 %vm224_vm9, %v7608_v52  ;;  %2356 = vmax.xlane.f32.xlu2 %v2355_v44 }
 0xd09   :  { %2547 = vmatpush.bf16.xpose.msrb.mxu3 %v2538_v11 }
 0xd0c   :  { %v2353_v45 = vpop.f32.mrf.mxu0 }
 0xd14   :  { %v2480_v47 = vpop.f32.mrf.mxu0 }
 0xd15   :  { %v7640_v46 = vadd.f32 %v5829_v35, %v2480_v47 }
 0xd17   :  { %v2484_v48 = vsel %vm244_vm10, %v7640_v46, -inf }
 0xd18   :  { %5827 = vmatmul.msk.bf16.vlgmr.msra.gmra.mxu3 %vm224_vm9, %v7479_v27  ;;  %2485 = vmax.xlane.f32.xlu1 %v2484_v48 }
 0xd1c   :  { %v2482_v49 = vpop.f32.mrf.mxu0 }
 0xd24   :  { %v2618_v51 = vpop.f32.mrf.mxu0 }
 0xd25   :  { %v7649_v52 = vadd.f32 %v5835_v50, %v2618_v51 }
 0xd27   :  { %v2622_v7 = vsel %vm244_vm10, %v7649_v52, -inf }
 0xd28   :  { %2623 = vmax.xlane.f32.xlu1 %v2622_v7  ;;  %5833 = vmatmul.msk.bf16.vlgmr.msrb.gmra.mxu3 %vm224_vm9, %v2531_v53  ;;  %v2438_v7 = vsel %vm260_vm8, %v2457_v29, 0 }
 0xd2c   :  { %v2620_v54 = vpop.f32.mrf.mxu0 }
 0xd5b   :  { %v2157_v16 = vpop.xlane.xlu2 %2156 }
 0xd5c   :  { %v2158_v36 = vsub.f32 %v2152_v0, %v2157_v16 }
 0xd5e   :  { %v2159_v27 = vmul.f32 1.442695, %v2158_v36 }
 0xd60   :  { %6530 = vpow2.f32 %v2159_v27 }
 0xd66   :  { %v6531_v56 = vpop.eup %6530 }
 0xd67   :  { %v2161_v57 = vsel %vm244_vm10, %v6531_v56, 0.0 }
 0xd68   :  { %2162 = vadd.xlane.f32.xlu0 %v2161_v57 }
 0xd6b   :  { %v2219_v58 = vpop.xlane.xlu0 %2218 }
 0xd6c   :  { %v2220_v55 = vsub.f32 %v2214_v33, %v2219_v58 }
 0xd6e   :  { %v2221_v59 = vmul.f32 1.442695, %v2220_v55 }
 0xd70   :  { %6532 = vpow2.f32 %v2221_v59 }
 0xd76   :  { %v7655_v60 = vpop.eup %6532 }
 0xd77   :  { %v2223_v61 = vsel %vm244_vm10, %v7655_v60, 0.0 }
 0xd78   :  { %2224 = vadd.xlane.f32.xlu2 %v2223_v61 }
 0xd7b   :  { %v7659_v62 = vpop.f32.mrf.mxu3  ;;  %v2357_v63 = vpop.xlane.xlu2 %2356 }
 0xd7c   :  { %v2358_v2 = vsub.f32 %v2352_v43, %v2357_v63 }
 0xd7e   :  { %v2359_v3 = vmul.f32 1.442695, %v2358_v2 }
 0xd80   :  { %6534 = vpow2.f32 %v2359_v3 }
 0xd83   :  { %v7661_v4 = vpop.f32.mrf.mxu3 }
 0xd86   :  { %v7663_v5 = vpop.eup %6534 }
 0xd87   :  { %v2361_v8 = vsel %vm244_vm10, %v7663_v5, 0.0 }
 0xd88   :  { %2362 = vadd.xlane.f32.xlu2 %v2361_v8 }
 0xd8b   :  { %v2282_v10 = vpop.f32.mrf.mxu3 }
 0xd8c   :  { %v2283_v12 = vadd.f32 %v5820_v9, %v2282_v10 }
 0xd8e   :  { %v2286_v13 = vsel %vm244_vm10, %v2283_v12, -inf }
 0xd8f   :  { %2287 = vmax.xlane.f32.xlu1 %v2286_v13 }
 0xd93   :  { %v2284_v0 = vpop.f32.mrf.mxu3 }
 0xd9b   :  { %v2418_v15 = vpop.f32.mrf.mxu3 }
 0xd9c   :  { %v2419_v17 = vadd.f32 %v5826_v14, %v2418_v15 }
 0xd9e   :  { %v2422_v19 = vsel %vm244_vm10, %v2419_v17, -inf }
 0xd9f   :  { %2423 = vmax.xlane.f32.xlu0 %v2422_v19 }
 0xda0   :  { %2368 = vrot.lane.b32.xlu2 %v7620_v24, %s8726_s25 }
 0xda3   :  { %v2420_v20 = vpop.f32.mrf.mxu3 }
 0xda8   :  { %2299 = vrot.lane.b32.xlu1 %v7620_v24, %s8724_s2 }
 0xdab   :  { %v2549_v1 = vpop.f32.mrf.mxu3 }
 0xdac   :  { %v7684_v23 = vadd.f32 %v5832_v25, %v2549_v1 }
 0xdae   :  { %v2553_v40 = vsel %vm244_vm10, %v7684_v23, -inf }
 0xdb3   :  { %v2551_v22 = vpop.f32.mrf.mxu3  ;;  %2230 = vrot.lane.b32.xlu0 %v7620_v24, %s8721_s5  ;;  %v2486_v24 = vpop.xlane.xlu1 %2485 }
 0xdb4   :  { %v2487_v39 = vsub.f32 %v7640_v46, %v2486_v24 }
 0xdb6   :  { %v2488_v42 = vmul.f32 1.442695, %v2487_v39 }
 0xdbb   :  { %v2624_v33 = vpop.xlane.xlu1 %2623 }
 0xdbc   :  { %v2625_v47 = vsub.f32 %v7649_v52, %v2624_v33 }
 0xdbe   :  { %v2626_v46 = vmul.f32 1.442695, %v2625_v47  ;;  %v7719_v47 = vadd.f32 %v7659_v62, %v7448_v18 }
 0xdc9   :  { %2554 = vmax.xlane.f32.xlu2 %v2553_v40 }
 0xddb   :  { %v2163_v26 = vpop.xlane.xlu0 %2162 }
 0xddc   :  { %6536 = vrcp.f32 %v2163_v26 }
 0xde1   :  { %2497 = vrot.lane.b32.xlu2 %v2457_v29, %s8721_s5 }
 0xde2   :  { %v6537_v30 = vpop.eup %6536 }
 0xde3   :  { %v2165_v31 = vmul.f32 %v6537_v30, %v6531_v56 }
 0xde5   :  { %v2166_v32 = vpack.c.bf16 %v2165_v31, %v2165_v31 }
 0xde7   :  { %5816 = vmatmul.msk.bf16.vlgmr.msrb.gmra.mxu2 %vm244_vm10, %v2166_v32 }
 0xdeb   :  { %v2225_v44 = vpop.xlane.xlu2 %2224 }
 0xdfb   :  { %v2363_v50 = vpop.xlane.xlu2 %2362 }
 0xe02   :  { %v2288_v37 = vpop.xlane.xlu1 %2287 }
 0xe03   :  { %v2289_v38 = vsub.f32 %v2283_v12, %v2288_v37  ;;  %v2369_v56 = vpop.permute.xlu2 %2368 }
 0xe04   :  { %v2374_v59 = vsel %vm260_vm8, %v2369_v56, 0 }
 0xe05   :  { %v2290_v41 = vmul.f32 1.442695, %v2289_v38 }
 0xe07   :  { %6538 = vpow2.f32 %v2290_v41 }
 0xe08   :  { %6540 = vpow2.f32 %v2488_v42 }
 0xe0d   :  { %v6539_v6 = vpop.eup %6538 }
 0xe0e   :  { %v2292_v43 = vsel %vm244_vm10, %v6539_v6, 0.0  ;;  %v6541_v45 = vpop.eup %6540 }
 0xe0f   :  { %2293 = vadd.xlane.f32.xlu1 %v2292_v43  ;;  %v2490_v49 = vsel %vm244_vm10, %v6541_v45, 0.0 }
 0xe12   :  { %v2424_v11 = vpop.xlane.xlu0 %2423 }
 0xe13   :  { %v2425_v35 = vsub.f32 %v2419_v17, %v2424_v11 }
 0xe15   :  { %v2426_v48 = vmul.f32 1.442695, %v2425_v35 }
 0xe17   :  { %6542 = vpow2.f32 %v2426_v48  ;;  %2491 = vadd.xlane.f32.xlu1 %v2490_v49  ;;  %v1962_v48 = vmul.f32 %v7719_v47, %v7719_v47 }
 0xe18   :  { %6544 = vrcp.f32 %v2225_v44 }
 0xe19   :  { %6546 = vpow2.f32 %v2626_v46  ;;  %v1964_v49 = vsel %vm87_vm0, %v1962_v48, 0.0 }
 0xe1a   :  { %v2300_v51 = vpop.permute.xlu1 %2299  ;;  %6548 = vrcp.f32 %v2363_v50 }
 0xe1b   :  { %v2305_v53 = vsel %vm260_vm8, %v2300_v51, 0 }
 0xe1c   :  { %2314 = vmatpush.bf16.msra.mxu2 %v2305_v53 }
 0xe1d   :  { %v6543_v54 = vpop.eup %6542 }
 0xe1e   :  { %v2428_v16 = vsel %vm244_vm10, %v6543_v54, 0.0  ;;  %v6545_v52 = vpop.eup %6544 }
 0xe1f   :  { %2429 = vadd.xlane.f32.xlu0 %v2428_v16  ;;  %v6547_v36 = vpop.eup %6546  ;;  %v2227_v27 = vmul.f32 %v6545_v52, %v7655_v60  ;;  %v7732_v52 = vadd.f32 %v7661_v4, %v7454_v21  ;;  %v6345_v4 = vld [vmem:[%s8654_s12 + $0x18] sm:$0xff] }
 0xe20   :  { %2447 = vmatpush.bf16.msrb.mxu2 %v2438_v7  ;;  %v2628_v55 = vsel %vm244_vm10, %v6547_v36, 0.0  ;;  %v6549_v63 = vpop.eup %6548  ;;  %2703 = vmatpush.bf16.msra.mxu3 %v6345_v4 }
 0xe21   :  { %v2228_v61 = vpack.c.bf16 %v2227_v27, %v2227_v27  ;;  %v2365_v60 = vmul.f32 %v6549_v63, %v7663_v5 }
 0xe23   :  { %v2366_v2 = vpack.c.bf16 %v2365_v60, %v2365_v60 }
 0xe25   :  { %v2231_v57 = vpop.permute.xlu0 %2230 }
 0xe26   :  { %v2236_v58 = vsel %vm260_vm8, %v2231_v57, 0 }
 0xe27   :  { %2629 = vadd.xlane.f32.xlu0 %v2628_v55  ;;  %2245 = vmatpush.bf16.msrb.mxu1 %v2236_v58 }
 0xe2a   :  { %5819 = vmatmul.msk.bf16.vlgmr.msrb.gmra.mxu1 %vm244_vm10, %v2228_v61  ;;  %v6343_v61 = vld [vmem:[%s8654_s12 + $0x8] sm:$0xff] }
 0xe2b   :  { %2383 = vmatpush.bf16.msra.mxu1 %v2374_v59  ;;  %v6344_v59 = vld [vmem:[%s8654_s12 + $0x10] sm:$0xff] }
 0xe2c   :  { %2704 = vmatpush.bf16.msra.mxu3 %v6344_v59 }
 0xe30   :  { %2635 = vrot.lane.b32.xlu1 %v2457_v29, %s8726_s25  ;;  %2705 = vmatpush.bf16.msra.mxu3 %v6343_v61 }
 0xe3a   :  { %5825 = vmatmul.msk.bf16.vlgmr.msra.gmra.mxu1 %vm244_vm10, %v2366_v2  ;;  %v6342_v2 = vld [vmem:[%s8654_s12] sm:$0xff] }
 0xe3b   :  { %2566 = vrot.lane.b32.xlu0 %v2457_v29, %s8724_s2  ;;  %2706 = vmatpush.bf16.msra.mxu3 %v6342_v2 }
 0xe3c   :  { %v2555_v3 = vpop.xlane.xlu2 %2554 }
 0xe3d   :  { %v2556_v8 = vsub.f32 %v7684_v23, %v2555_v3  ;;  %v6353_v3 = vld [vmem:[%s8657_s15 + $0x18] sm:$0xff] }
 0xe3e   :  { %2846 = vmatpush.bf16.msra.mxu0 %v6353_v3 }
 0xe3f   :  { %v2557_v9 = vmul.f32 1.442695, %v2556_v8 }
 0xe41   :  { %6550 = vpow2.f32 %v2557_v9  ;;  %v6352_v9 = vld [vmem:[%s8657_s15 + $0x10] sm:$0xff] }
 0xe42   :  { %2847 = vmatpush.bf16.msra.mxu0 %v6352_v9 }
 0xe44   :  { %v2498_v10 = vpop.permute.xlu2 %2497 }
 0xe45   :  { %v2503_v12 = vsel %vm260_vm8, %v2498_v10, 0  ;;  %v6351_v10 = vld [vmem:[%s8657_s15 + $0x8] sm:$0xff] }
 0xe46   :  { %2512 = vmatpush.bf16.msrb.mxu1 %v2503_v12  ;;  %2848 = vmatpush.bf16.msra.mxu0 %v6351_v10  ;;  %v6350_v12 = vld [vmem:[%s8657_s15] sm:$0xff] }
 0xe47   :  { %v6551_v13 = vpop.eup %6550 }
 0xe48   :  { %v2559_v0 = vsel %vm244_vm10, %v6551_v13, 0.0 }
 0xe49   :  { %2560 = vadd.xlane.f32.xlu2 %v2559_v0 }
 0xe4a   :  { %2849 = vmatpush.bf16.msra.mxu0 %v6350_v12 }
 0xe6a   :  { %v2182_v14 = vpop.f32.mrf.mxu2 }
 0xe6b   :  { %2186 = vst.msk [vmem:[#allocation3] sm:$0xff] %vm224_vm9, %v2182_v14 }
 0xe72   :  { %v2184_v5 = vpop.f32.mrf.mxu2 }
 0xe82   :  { %v2294_v15 = vpop.xlane.xlu1 %2293 }
 0xe83   :  { %6552 = vrcp.f32 %v2294_v15 }
 0xe89   :  { %v6553_v17 = vpop.eup %6552 }
 0xe8a   :  { %v2296_v19 = vmul.f32 %v6553_v17, %v6539_v6  ;;  %v2492_v20 = vpop.xlane.xlu1 %2491 }
 0xe8b   :  { %6554 = vrcp.f32 %v2492_v20 }
 0xe8c   :  { %v2297_v1 = vpack.c.bf16 %v2296_v19, %v2296_v19 }
 0xe8e   :  { %5822 = vmatmul.msk.bf16.vlgmr.msra.gmra.mxu2 %vm244_vm10, %v2297_v1 }
 0xe91   :  { %v6555_v22 = vpop.eup %6554 }
 0xe92   :  { %v2494_v25 = vmul.f32 %v6555_v22, %v6541_v45  ;;  %v2430_v23 = vpop.xlane.xlu0 %2429 }
 0xe93   :  { %6556 = vrcp.f32 %v2430_v23 }
 0xe94   :  { %v2495_v40 = vpack.c.bf16 %v2494_v25, %v2494_v25 }
 0xe96   :  { %5831 = vmatmul.msk.bf16.vlgmr.msrb.gmra.mxu1 %vm244_vm10, %v2495_v40 }
 0xe99   :  { %v6557_v26 = vpop.eup %6556 }
 0xe9a   :  { %v2432_v28 = vmul.f32 %v6557_v26, %v6543_v54  ;;  %v2630_v29 = vpop.xlane.xlu0 %2629 }
 0xe9b   :  { %6558 = vrcp.f32 %v2630_v29 }
 0xe9c   :  { %v2433_v30 = vpack.c.bf16 %v2432_v28, %v2432_v28 }
 0xe9e   :  { %5828 = vmatmul.msk.bf16.vlgmr.msrb.gmra.mxu2 %vm244_vm10, %v2433_v30 }
 0xea1   :  { %v6559_v31 = vpop.eup %6558 }
 0xea2   :  { %v2632_v32 = vmul.f32 %v6559_v31, %v6547_v36  ;;  %v2636_v24 = vpop.permute.xlu1 %2635  ;;  %v1963_v36 = vmul.f32 %v7732_v52, %v7732_v52 }
 0xea3   :  { %v2641_v33 = vsel %vm260_vm8, %v2636_v24, 0 }
 0xea4   :  { %v2633_v37 = vpack.c.bf16 %v2632_v32, %v2632_v32  ;;  %2650 = vmatpush.bf16.msra.mxu1 %v2641_v33  ;;  %v1967_v56 = vsel %vm87_vm0, %v1963_v36, 0.0 }
 0xea7   :  { %v2247_v38 = vpop.f32.mrf.mxu1  ;;  %5837 = vmatmul.msk.bf16.vlgmr.msra.gmra.mxu1 %vm244_vm10, %v2633_v37  ;;  %v6428_v37 = vld [vmem:[%s8652_s10] ss:$0 sm:$0xff]  ;;  %s8729_s10 = sld [smem:[#allocation18_spill]] }
 0xea8   :  { %2252 = vrot.lane.b32.xlu2 %v2247_v38, %s8723_s9 }
 0xead   :  { %v2567_v39 = vpop.permute.xlu0 %2566 }
 0xeae   :  { %v2572_v41 = vsel %vm260_vm8, %v2567_v39, 0 }
 0xeaf   :  { %v2249_v42 = vpop.f32.mrf.mxu1  ;;  %2581 = vmatpush.bf16.msra.mxu2 %v2572_v41 }
 0xeb7   :  { %v2385_v6 = vpop.f32.mrf.mxu1 }
 0xebc   :  { %v2561_v43 = vpop.xlane.xlu2 %2560 }
 0xebd   :  { %6560 = vrcp.f32 %v2561_v43 }
 0xebf   :  { %v2387_v44 = vpop.f32.mrf.mxu1 }
 0xec3   :  { %v6561_v11 = vpop.eup %6560 }
 0xec4   :  { %v2563_v45 = vmul.f32 %v6561_v11, %v6551_v13  ;;  %v6694_v11 = vld [vmem:[%s8712_s6] sm:$0xff] }
 0xec6   :  { %v2564_v35 = vpack.c.bf16 %v2563_v45, %v2563_v45 }
 0xec8   :  { %5834 = vmatmul.msk.bf16.vlgmr.msra.gmra.mxu2 %vm244_vm10, %v2564_v35 }
 0xed1   :  { %1965 = vadd.xlane.f32.xlu2 %v1964_v49 }
 0xf02   :  { %v2253_v46 = vpop.permute.xlu2 %2252 }
 0xf03   :  { %2255 = vst.msk [vmem:[#allocation3] sm:$0xff] %vm346_vm11, %v2253_v46  ;;  %v6695_v46 = vld [vmem:[%s8712_s6 + $0x8] sm:$0xff] }
 0xf11   :  { %v2316_v50 = vpop.f32.mrf.mxu2 }
 0xf13   :  { %v2514_v51 = vpop.f32.mrf.mxu1 }
 0xf14   :  { %2519 = vrot.lane.b32.xlu0 %v2514_v51, %s8723_s9 }
 0xf19   :  { %v2318_v53 = vpop.f32.mrf.mxu2 }
 0xf1b   :  { %v2516_v7 = vpop.f32.mrf.mxu1 }
 0xf1c   :  { %2321 = vrot.lane.b32.xlu0 %v2316_v50, %s8725_s24 }
 0xf21   :  { %v2449_v18 = vpop.f32.mrf.mxu2 }
 0xf22   :  { %2453 = vst.msk [vmem:[#allocation3 + $0x8] sm:$0xff] %vm224_vm9, %v2449_v18  ;;  %v6349_v18 = vld [vmem:[%s8656_s14 + $0x18] sm:$0xff] }
 0xf23   :  { %2795 = vmatpush.bf16.msrb.mxu2 %v6349_v18 }
 0xf24   :  { %2390 = vrot.lane.b32.xlu0 %v2385_v6, %s8716_s3  ;;  %v2652_v62 = vpop.f32.mrf.mxu1 }
 0xf29   :  { %v2451_v54 = vpop.f32.mrf.mxu2 }
 0xf2a   :  { %v6347_v54 = vld [vmem:[%s8656_s14 + $0x8] sm:$0xff] }
 0xf2c   :  { %v2654_v16 = vpop.f32.mrf.mxu1 }
 0xf44   :  { %v1966_v63 = vpop.xlane.xlu2 %1965 }
 0xf45   :  { %v1970_v60 = vmul.f32 %v1966_v63, %v6925_v34 }
 0xf47   :  { %v1972_v8 = vadd.f32 1e-06, %v1970_v60 }
 0xf49   :  { %6562 = vrsqrt.f32 %v1972_v8  ;;  %vm1980_vm6 = vweird.f32 %v1972_v8 }
 0xf4b   :  { %v2583_v27 = vpop.f32.mrf.mxu2 }
 0xf4c   :  { %2588 = vrot.lane.b32.xlu1 %v2583_v27, %s8725_s24  ;;  %v6346_v27 = vld [vmem:[%s8656_s14] sm:$0xff] }
 0xf4e   :  { %1968 = vadd.xlane.f32.xlu0 %v1967_v56 }
 0xf4f   :  { %v6563_v13 = vpop.eup %6562 }
 0xf50   :  { %v1975_v14 = vmul.f32 %v6563_v13, %v1972_v8  ;;  %vm1981_vm5 = vweird.f32 %v6563_v13 }
 0xf51   :  { %vm1982_vm7 = vmor %vm1980_vm6, %vm1981_vm5 }
 0xf52   :  { %v1976_v17 = vmul.f32 %v6563_v13, %v1975_v14 }
 0xf53   :  { %v2585_v57 = vpop.f32.mrf.mxu2 }
 0xf54   :  { %2657 = vrot.lane.b32.xlu1 %v2652_v62, %s8716_s3  ;;  %v1977_v1 = vmul.f32 0.5, %v1976_v17  ;;  %v6348_v62 = vld [vmem:[%s8656_s14 + $0x10] sm:$0xff]  ;;  %v6429_v17 = vld [vmem:[%s8659_s17] ss:$0 sm:$0xff] }
 0xf55   :  { %2796 = vmatpush.bf16.msrb.mxu2 %v6348_v62 }
 0xf56   :  { %v1978_v22 = vsub.f32 1.5, %v1977_v1 }
 0xf58   :  { %v1979_v28 = vmul.f32 %v6563_v13, %v1978_v22 }
 0xf59   :  { %2797 = vmatpush.bf16.msrb.mxu2 %v6347_v54 }
 0xf5a   :  { %v1983_v32 = vsel %vm1982_vm7, %v6563_v13, %v1979_v28 }
 0xf5b   :  { %v1994_v38 = vmul.f32 %v1983_v32, %v7719_v47 }
 0xf5d   :  { %v1999_v42 = vmul.f32 %v6428_v37, %v1994_v38  ;;  %2798 = vmatpush.bf16.msrb.mxu2 %v6346_v27 }
 0xf86   :  { %v2520_v58 = vpop.permute.xlu0 %2519 }
 0xf87   :  { %2522 = vst.msk [vmem:[#allocation3 + $0x8] sm:$0xff] %vm346_vm11, %v2520_v58 }
 0xf8e   :  { %v2322_v55 = vpop.permute.xlu0 %2321 }
 0xf8f   :  { %2324 = vst.msk [vmem:[#allocation3] sm:$0xff] %vm416_vm12, %v2322_v55 }
 0xf96   :  { %v2391_v21 = vpop.permute.xlu0 %2390 }
 0xf97   :  { %2393 = vst.msk [vmem:[#allocation3] sm:$0xff] %vm486_vm13, %v2391_v21 }
 0xf9e   :  { %v2661_v40 = vld [vmem:[#allocation3] sm:$0xff] }
 0xfbe   :  { %v2589_v0 = vpop.permute.xlu1 %2588 }
 0xfbf   :  { %2591 = vst.msk [vmem:[#allocation3 + $0x8] sm:$0xff] %vm416_vm12, %v2589_v0 }
 0xfc1   :  { %v1969_v5 = vpop.xlane.xlu0 %1968 }
 0xfc2   :  { %v1971_v15 = vmul.f32 %v1969_v5, %v6925_v34 }
 0xfc4   :  { %v1973_v19 = vadd.f32 1e-06, %v1971_v15 }
 0xfc6   :  { %6564 = vrsqrt.f32 %v1973_v19  ;;  %v2658_v20 = vpop.permute.xlu1 %2657  ;;  %vm1990_vm15 = vweird.f32 %v1973_v19 }
 0xfc7   :  { %2660 = vst.msk [vmem:[#allocation3 + $0x8] sm:$0xff] %vm486_vm13, %v2658_v20 }
 0xfcc   :  { %v6565_v25 = vpop.eup %6564 }
 0xfcd   :  { %v1985_v23 = vmul.f32 %v6565_v25, %v1973_v19  ;;  %vm1991_vm14 = vweird.f32 %v6565_v25 }
 0xfce   :  { %v2662_v26 = vld [vmem:[#allocation3 + $0x8] sm:$0xff]  ;;  %vm1992_vm1 = vmor %vm1990_vm15, %vm1991_vm14  ;;  %vm2864_vm14 = vcmask 1048064  }
 0xfcf   :  { %v1986_v29 = vmul.f32 %v6565_v25, %v1985_v23  ;;  %v2663_v30 = vpack.c.bf16 %v2662_v26, %v2661_v40 }
 0xfd1   :  { %v1987_v31 = vmul.f32 0.5, %v1986_v29  ;;  %5854 = vmatmul.msk.bf16.vlgmr.msra.gmra.mxu3 %vm87_vm0, %v2663_v30 }
 0xfd3   :  { %v1988_v24 = vsub.f32 1.5, %v1987_v31 }
 0xfd5   :  { %v1989_v33 = vmul.f32 %v6565_v25, %v1988_v24 }
 0xfd7   :  { %v1993_v39 = vsel %vm1992_vm1, %v6565_v25, %v1989_v33 }
 0xfd8   :  { %v1995_v41 = vmul.f32 %v1993_v39, %v7732_v52 }
 0xfda   :  { %v2000_v6 = vmul.f32 %v6428_v37, %v1995_v41 }
 0xfdc   :  { %v7776_v43 = vpack.c.bf16 %v2000_v6, %v1999_v42 }
 0xfde   :  { %5888 = vmatmul.msk.bf16.vlgmr.msra.gmra.mxu0 %vm87_vm0, %v7776_v43 }
0x1054   :  { %v2708_v44 = vpop.f32.mrf.mxu3 }
0x1055   :  { %v7783_v45 = vadd.f32 %v6694_v11, %v2708_v44 }
0x1057   :  { %v2716_v35 = vmul.f32 %v7783_v45, %v7783_v45 }
0x1059   :  { %v2718_v47 = vsel %vm87_vm0, %v2716_v35, 0.0 }
0x105a   :  { %2719 = vadd.xlane.f32.xlu1 %v2718_v47 }
0x105b   :  { %v2851_v48 = vpop.f32.mrf.mxu0 }
0x105c   :  { %v2710_v49 = vpop.f32.mrf.mxu3  ;;  %2858 = vrot.lane.b32.xlu0 %v2851_v48, %s8722_s0 }
0x105d   :  { %v7792_v50 = vadd.f32 %v6695_v46, %v2710_v49 }
0x105f   :  { %v2717_v51 = vmul.f32 %v7792_v50, %v7792_v50 }
0x1061   :  { %v2721_v53 = vsel %vm87_vm0, %v2717_v51, 0.0 }
0x1062   :  { %2722 = vadd.xlane.f32.xlu2 %v2721_v53 }
0x1063   :  { %v2853_v7 = vpop.f32.mrf.mxu0 }
0x107a   :  { %2860 = vrot.lane.b32.xlu2 %v2853_v7, %s8722_s0 }
0x10cd   :  { %v2720_v16 = vpop.xlane.xlu1 %2719 }
0x10ce   :  { %v2724_v52 = vmul.f32 %v2720_v16, %v6925_v34  ;;  %v2859_v36 = vpop.permute.xlu0 %2858  ;;  %v2873_v16 = vld [vmem:[%s8728_s29] sm:$0xff] }
0x10cf   :  { %2866 = vst.msk [vmem:[#allocation2 + $0x8] sm:$0xff] %vm87_vm0, %v2859_v36 }
0x10d0   :  { %v2726_v56 = vadd.f32 1e-06, %v2724_v52 }
0x10d2   :  { %6566 = vrsqrt.f32 %v2726_v56  ;;  %vm2734_vm3 = vweird.f32 %v2726_v56 }
0x10d5   :  { %v2723_v57 = vpop.xlane.xlu2 %2722 }
0x10d6   :  { %v2725_v58 = vmul.f32 %v2723_v57, %v6925_v34  ;;  %v2871_v55 = vld [vmem:[#allocation2 + $0x8] sm:$0xff] }
0x10d7   :  { %v7813_v21 = vpack.c.bf16 %v2871_v55, %v2871_v55 }
0x10d8   :  { %v6567_v4 = vpop.eup %6566  ;;  %v2727_v59 = vadd.f32 1e-06, %v2725_v58 }
0x10d9   :  { %v2729_v61 = vmul.f32 %v6567_v4, %v2726_v56  ;;  %v2912_v63 = vsel %vm260_vm8, %v7813_v21, 0  ;;  %vm2735_vm2 = vweird.f32 %v6567_v4  ;;  %v5891_v56 = vld [vmem:[%s8728_s29 + $0x8] sm:$0xff] }
0x10da   :  { %6568 = vrsqrt.f32 %v2727_v59  ;;  %2921 = vmatpush.bf16.msrb.mxu3 %v2912_v63  ;;  %vm2736_vm4 = vmor %vm2734_vm3, %vm2735_vm2  ;;  %vm2744_vm6 = vweird.f32 %v2727_v59 }
0x10db   :  { %v2730_v60 = vmul.f32 %v6567_v4, %v2729_v61  ;;  %v5894_v61 = vld [vmem:[%s8728_s29 + $0x10] sm:$0xff] }
0x10dd   :  { %v2731_v2 = vmul.f32 0.5, %v2730_v60  ;;  %v2861_v3 = vpop.permute.xlu2 %2860 }
0x10de   :  { %2868 = vst.msk [vmem:[#allocation2 + $0x18] sm:$0xff] %vm87_vm0, %v2861_v3 }
0x10df   :  { %v2732_v8 = vsub.f32 1.5, %v2731_v2 }
0x10e0   :  { %v6569_v9 = vpop.eup %6568 }
0x10e1   :  { %v2739_v10 = vmul.f32 %v6569_v9, %v2727_v59  ;;  %v2733_v12 = vmul.f32 %v6567_v4, %v2732_v8  ;;  %vm2745_vm5 = vweird.f32 %v6569_v9 }
0x10e2   :  { %vm2746_vm7 = vmor %vm2744_vm6, %vm2745_vm5 }
0x10e3   :  { %v2740_v13 = vmul.f32 %v6569_v9, %v2739_v10  ;;  %v2737_v14 = vsel %vm2736_vm4, %v6567_v4, %v2733_v12 }
0x10e4   :  { %v2748_v19 = vmul.f32 %v2737_v14, %v7783_v45 }
0x10e5   :  { %v2741_v0 = vmul.f32 0.5, %v2740_v13 }
0x10e6   :  { %v2753_v22 = vmul.f32 %v6429_v17, %v2748_v19 }
0x10e7   :  { %v2742_v5 = vsub.f32 1.5, %v2741_v0  ;;  %v5900_v0 = vld [vmem:[%s8728_s29 + $0x20] sm:$0xff] }
0x10e9   :  { %v2743_v15 = vmul.f32 %v6569_v9, %v2742_v5 }
0x10eb   :  { %v2747_v20 = vsel %vm2746_vm7, %v6569_v9, %v2743_v15 }
0x10ec   :  { %v2749_v1 = vmul.f32 %v2747_v20, %v7792_v50 }
0x10ee   :  { %v2754_v25 = vmul.f32 %v6429_v17, %v2749_v1  ;;  %v5903_v17 = vld [vmem:[%s8728_s29 + $0x28] sm:$0xff] }
0x10f0   :  { %v2755_v23 = vpack.c.bf16 %v2754_v25, %v2753_v22 }
0x10f2   :  { %5871 = vmatmul.msk.bf16.vlgmr.msrb.gmra.mxu2 %vm87_vm0, %v2755_v23  ;;  %v5906_v23 = vld [vmem:[%s8728_s29 + $0x30] sm:$0xff] }
0x1175   :  { %v2800_v40 = vpop.f32.mrf.mxu2 }
0x1176   :  { %2805 = vst.msk [vmem:[#allocation2] sm:$0xff] %vm87_vm0, %v2800_v40 }
0x1177   :  { %2865 = vst.msk [vmem:[#allocation2] sm:$0xff] %vm2864_vm14, %v2859_v36 }
0x117d   :  { %v2802_v26 = vpop.f32.mrf.mxu2 }
0x117e   :  { %2806 = vst.msk [vmem:[#allocation2 + $0x10] sm:$0xff] %vm87_vm0, %v2802_v26  ;;  %v2928_v28 = vld [vmem:[#allocation2] sm:$0xff] }
0x117f   :  { %2867 = vst.msk [vmem:[#allocation2 + $0x10] sm:$0xff] %vm2864_vm14, %v2861_v3  ;;  %v2929_v29 = vpack.c.bf16 %v2928_v28, %v2928_v28  ;;  %v5897_v3 = vld [vmem:[%s8728_s29 + $0x18] sm:$0xff] }
0x1181   :  { %2935 = vrot.lane.b32.xlu2 %v2929_v29, %s8721_s5  ;;  %2937 = vrot.lane.b32.xlu0 %v2929_v29, %s8716_s3 }
0x1182   :  { %2875 = vrot.lane.b32.xlu1 %v2929_v29, %s8722_s0 }
0x1186   :  { %v3195_v30 = vld [vmem:[#allocation2 + $0x10] sm:$0xff] }
0x1187   :  { %v3196_v31 = vpack.c.bf16 %v3195_v30, %v3195_v30 }
0x1189   :  { %3004 = vrot.lane.b32.xlu2 %v2929_v29, %s8724_s2  ;;  %3006 = vrot.lane.b32.xlu0 %v2929_v29, %s8725_s24 }
0x118a   :  { %3075 = vrot.lane.b32.xlu1 %v2929_v29, %s8723_s9 }
0x1191   :  { %3073 = vrot.lane.b32.xlu0 %v2929_v29, %s8726_s25  ;;  %3204 = vrot.lane.b32.xlu2 %v3196_v31, %s8716_s3 }
0x1192   :  { %3142 = vrot.lane.b32.xlu1 %v3196_v31, %s8722_s0 }
0x1199   :  { %3202 = vrot.lane.b32.xlu0 %v3196_v31, %s8721_s5  ;;  %3342 = vrot.lane.b32.xlu2 %v3196_v31, %s8723_s9 }
0x119a   :  { %3273 = vrot.lane.b32.xlu1 %v3196_v31, %s8725_s24 }
0x11a1   :  { %3271 = vrot.lane.b32.xlu0 %v3196_v31, %s8724_s2 }
0x11a2   :  { %3340 = vrot.lane.b32.xlu1 %v3196_v31, %s8726_s25 }
0x11db   :  { %v2936_v32 = vpop.permute.xlu2 %2935 }
0x11e3   :  { %v3005_v24 = vpop.permute.xlu2 %3004 }
0x11eb   :  { %v3205_v41 = vpop.permute.xlu2 %3204 }
0x11ec   :  { %v3210_v35 = vsel %vm224_vm9, %v3205_v41, 0 }
0x11f3   :  { %v2938_v33 = vpop.permute.xlu0 %2937  ;;  %v3343_v49 = vpop.permute.xlu2 %3342 }
0x11f4   :  { %v2943_v37 = vsel %vm224_vm9, %v2938_v33, 0  ;;  %v2876_v38 = vpop.permute.xlu1 %2875  ;;  %v3348_v51 = vsel %vm224_vm9, %v3343_v49, 0 }
0x11f5   :  { %v2881_v39 = vsel %vm224_vm9, %v2876_v38, 0  ;;  %2952 = vmatpush.bf16.xpose.msra.mxu2 %v2943_v37 }
0x11f6   :  { %2890 = vmatpush.bf16.xpose.msrb.mxu1 %v2881_v39 }
0x11fb   :  { %v3007_v42 = vpop.permute.xlu0 %3006 }
0x11fc   :  { %v3012_v6 = vsel %vm224_vm9, %v3007_v42, 0  ;;  %v3076_v44 = vpop.permute.xlu1 %3075  ;;  %5892 = vmatmul.msk.bf16.vlgmr.msra.gmra.mxu2 %vm224_vm9, %v2936_v32 }
0x11fd   :  { %v3081_v11 = vsel %vm224_vm9, %v3076_v44, 0  ;;  %5889 = vmatmul.msk.bf16.vlgmr.msrb.gmra.mxu1 %vm224_vm9, %v2929_v29  ;;  %v5909_v29 = vld [vmem:[%s8728_s29 + $0x38] sm:$0xff] }
0x11fe   :  { %3021 = vmatpush.bf16.xpose.msra.mxu1 %v3012_v6  ;;  %3090 = vmatpush.bf16.xpose.msrb.mxu2 %v3081_v11 }
0x1203   :  { %v3074_v46 = vpop.permute.xlu0 %3073 }
0x1204   :  { %v3143_v47 = vpop.permute.xlu1 %3142 }
0x1205   :  { %v3148_v48 = vsel %vm224_vm9, %v3143_v47, 0 }
0x1206   :  { %3219 = vmatpush.bf16.xpose.msra.mxu2 %v3210_v35  ;;  %3157 = vmatpush.bf16.xpose.msrb.mxu1 %v3148_v48 }
0x120b   :  { %v3203_v18 = vpop.permute.xlu0 %3202 }
0x120c   :  { %v3274_v53 = vpop.permute.xlu1 %3273  ;;  %5898 = vmatmul.msk.bf16.vlgmr.msrb.gmra.mxu2 %vm224_vm9, %v3074_v46 }
0x120d   :  { %v3279_v7 = vsel %vm224_vm9, %v3274_v53, 0  ;;  %5895 = vmatmul.msk.bf16.vlgmr.msra.gmra.mxu1 %vm224_vm9, %v3005_v24 }
0x120e   :  { %3357 = vmatpush.bf16.xpose.msrb.mxu2 %v3348_v51  ;;  %3288 = vmatpush.bf16.xpose.msra.mxu1 %v3279_v7 }
0x1213   :  { %v3272_v54 = vpop.permute.xlu0 %3271 }
0x1214   :  { %v3341_v62 = vpop.permute.xlu1 %3340 }
0x121c   :  { %5904 = vmatmul.msk.bf16.vlgmr.msra.gmra.mxu2 %vm224_vm9, %v3203_v18 }
0x121d   :  { %5901 = vmatmul.msk.bf16.vlgmr.msrb.gmra.mxu1 %vm224_vm9, %v3196_v31 }
0x122c   :  { %5910 = vmatmul.msk.bf16.vlgmr.msrb.gmra.mxu2 %vm224_vm9, %v3341_v62 }
0x122d   :  { %5907 = vmatmul.msk.bf16.vlgmr.msra.gmra.mxu1 %vm224_vm9, %v3272_v54 }
0x127a   :  { %v2892_v52 = vpop.f32.mrf.mxu1 }
0x127b   :  { %v2893_v36 = vadd.f32 %v2892_v52, %v2873_v16 }
0x127d   :  { %v2896_v27 = vsel %vm244_vm10, %v2893_v36, -inf }
0x127e   :  { %2897 = vmax.xlane.f32.xlu2 %v2896_v27 }
0x127f   :  { %v2954_v57 = vpop.f32.mrf.mxu2 }
0x1280   :  { %v2955_v58 = vadd.f32 %v5891_v56, %v2954_v57 }
0x1282   :  { %v2894_v55 = vpop.f32.mrf.mxu1  ;;  %v2958_v4 = vsel %vm244_vm10, %v2955_v58, -inf }
0x1283   :  { %2959 = vmax.xlane.f32.xlu0 %v2958_v4 }
0x1287   :  { %v2956_v59 = vpop.f32.mrf.mxu2 }
0x128a   :  { %v3023_v63 = vpop.f32.mrf.mxu1 }
0x128b   :  { %v3024_v60 = vadd.f32 %v5894_v61, %v3023_v63 }
0x128d   :  { %v3027_v2 = vsel %vm244_vm10, %v3024_v60, -inf }
0x128e   :  { %3028 = vmax.xlane.f32.xlu1 %v3027_v2 }
0x128f   :  { %v3092_v8 = vpop.f32.mrf.mxu2 }
0x1290   :  { %v3093_v9 = vadd.f32 %v5897_v3, %v3092_v8  ;;  %v3197_v3 = vld [vmem:[#allocation2 + $0x18] sm:$0xff] }
0x1292   :  { %v3025_v10 = vpop.f32.mrf.mxu1  ;;  %v3096_v12 = vsel %vm244_vm10, %v3093_v9, -inf }
0x1293   :  { %3097 = vmax.xlane.f32.xlu2 %v3096_v12  ;;  %v3198_v12 = vpack.c.bf16 %v3197_v3, %v3197_v3 }
0x1297   :  { %v3094_v13 = vpop.f32.mrf.mxu2 }
0x129a   :  { %v3159_v14 = vpop.f32.mrf.mxu1 }
0x129b   :  { %v3160_v5 = vadd.f32 %v5900_v0, %v3159_v14 }
0x129d   :  { %v3163_v15 = vsel %vm244_vm10, %v3160_v5, -inf }
0x129e   :  { %3164 = vmax.xlane.f32.xlu0 %v3163_v15 }
0x129f   :  { %v3221_v19 = vpop.f32.mrf.mxu2 }
0x12a0   :  { %v3222_v20 = vadd.f32 %v5903_v17, %v3221_v19 }
0x12a2   :  { %v3161_v1 = vpop.f32.mrf.mxu1  ;;  %v3225_v22 = vsel %vm244_vm10, %v3222_v20, -inf }
0x12a3   :  { %3226 = vmax.xlane.f32.xlu1 %v3225_v22 }
0x12a7   :  { %v3223_v25 = vpop.f32.mrf.mxu2 }
0x12aa   :  { %v3290_v40 = vpop.f32.mrf.mxu1 }
0x12ab   :  { %v7885_v26 = vadd.f32 %v5906_v23, %v3290_v40 }
0x12ad   :  { %v3294_v28 = vsel %vm244_vm10, %v7885_v26, -inf }
0x12ae   :  { %3295 = vmax.xlane.f32.xlu2 %v3294_v28 }
0x12af   :  { %v3359_v30 = vpop.f32.mrf.mxu2 }
0x12b0   :  { %v3360_v31 = vadd.f32 %v5909_v29, %v3359_v30 }
0x12b2   :  { %v3292_v32 = vpop.f32.mrf.mxu1  ;;  %2971 = vrot.lane.b32.xlu0 %v7813_v21, %s8721_s5  ;;  %v3363_v24 = vsel %vm244_vm10, %v3360_v31, -inf }
0x12b3   :  { %3364 = vmax.xlane.f32.xlu1 %v3363_v24 }
0x12b7   :  { %v3361_v33 = vpop.f32.mrf.mxu2 }
0x12c6   :  { %3109 = vrot.lane.b32.xlu2 %v7813_v21, %s8726_s25 }
0x12cc   :  { %3040 = vrot.lane.b32.xlu1 %v7813_v21, %s8724_s2 }
0x12f1   :  { %v2898_v37 = vpop.xlane.xlu2 %2897 }
0x12f2   :  { %v2899_v38 = vsub.f32 %v2893_v36, %v2898_v37 }
0x12f4   :  { %v2900_v39 = vmul.f32 1.442695, %v2899_v38 }
0x12f6   :  { %6570 = vpow2.f32 %v2900_v39  ;;  %v2960_v41 = vpop.xlane.xlu0 %2959 }
0x12f7   :  { %v2961_v42 = vsub.f32 %v2955_v58, %v2960_v41 }
0x12f9   :  { %v2962_v6 = vmul.f32 1.442695, %v2961_v42 }
0x12fb   :  { %6572 = vpow2.f32 %v2962_v6 }
0x12fc   :  { %v7899_v44 = vpop.eup %6570 }
0x12fd   :  { %v2902_v11 = vsel %vm244_vm10, %v7899_v44, 0.0 }
0x12fe   :  { %2903 = vadd.xlane.f32.xlu0 %v2902_v11 }
0x1301   :  { %v7903_v35 = vpop.eup %6572  ;;  %v3029_v47 = vpop.xlane.xlu1 %3028 }
0x1302   :  { %v3030_v48 = vsub.f32 %v3024_v60, %v3029_v47  ;;  %v2964_v21 = vsel %vm244_vm10, %v7903_v35, 0.0 }
0x1303   :  { %2965 = vadd.xlane.f32.xlu2 %v2964_v21 }
0x1304   :  { %v3031_v49 = vmul.f32 1.442695, %v3030_v48 }
0x1306   :  { %6574 = vpow2.f32 %v3031_v49  ;;  %v3098_v46 = vpop.xlane.xlu2 %3097 }
0x1307   :  { %v3099_v51 = vsub.f32 %v3093_v9, %v3098_v46 }
0x1309   :  { %v3100_v53 = vmul.f32 1.442695, %v3099_v51 }
0x130b   :  { %6576 = vpow2.f32 %v3100_v53 }
0x130c   :  { %v7907_v7 = vpop.eup %6574 }
0x130d   :  { %v3033_v18 = vsel %vm244_vm10, %v7907_v7, 0.0 }
0x130e   :  { %3034 = vadd.xlane.f32.xlu1 %v3033_v18 }
0x1311   :  { %v7911_v62 = vpop.eup %6576  ;;  %v3165_v54 = vpop.xlane.xlu0 %3164 }
0x1312   :  { %v3166_v16 = vsub.f32 %v3160_v5, %v3165_v54  ;;  %v3102_v52 = vsel %vm244_vm10, %v7911_v62, 0.0 }
0x1313   :  { %3103 = vadd.xlane.f32.xlu2 %v3102_v52 }
0x1314   :  { %v3167_v36 = vmul.f32 1.442695, %v3166_v16 }
0x1316   :  { %6578 = vpow2.f32 %v3167_v36  ;;  %v3227_v27 = vpop.xlane.xlu1 %3226 }
0x1317   :  { %v3228_v56 = vsub.f32 %v3222_v20, %v3227_v27 }
0x1319   :  { %v3229_v57 = vmul.f32 1.442695, %v3228_v56 }
0x131b   :  { %6580 = vpow2.f32 %v3229_v57 }
0x131c   :  { %v7915_v58 = vpop.eup %6578 }
0x131d   :  { %v3169_v55 = vsel %vm244_vm10, %v7915_v58, 0.0 }
0x131e   :  { %3170 = vadd.xlane.f32.xlu0 %v3169_v55 }
0x1321   :  { %v7919_v4 = vpop.eup %6580  ;;  %v3296_v59 = vpop.xlane.xlu2 %3295 }
0x1322   :  { %v3231_v61 = vsel %vm244_vm10, %v7919_v4, 0.0  ;;  %v3297_v17 = vsub.f32 %v7885_v26, %v3296_v59  ;;  %v3179_v26 = vsel %vm260_vm8, %v3198_v12, 0 }
0x1323   :  { %3232 = vadd.xlane.f32.xlu1 %v3231_v61 }
0x1324   :  { %v2972_v63 = vpop.permute.xlu0 %2971  ;;  %v3298_v19 = vmul.f32 1.442695, %v3297_v17 }
0x1325   :  { %v2977_v60 = vsel %vm260_vm8, %v2972_v63, 0 }
0x1326   :  { %2986 = vmatpush.bf16.msrb.mxu0 %v2977_v60  ;;  %v3365_v2 = vpop.xlane.xlu1 %3364 }
0x1327   :  { %v3366_v8 = vsub.f32 %v3360_v31, %v3365_v2 }
0x1329   :  { %v3367_v9 = vmul.f32 1.442695, %v3366_v8  ;;  %v3110_v10 = vpop.permute.xlu2 %3109 }
0x132a   :  { %v3115_v13 = vsel %vm260_vm8, %v3110_v10, 0 }
0x132b   :  { %6582 = vpow2.f32 %v3367_v9  ;;  %3124 = vmatpush.bf16.msra.mxu0 %v3115_v13  ;;  %3238 = vrot.lane.b32.xlu2 %v3198_v12, %s8721_s5 }
0x132c   :  { %6584 = vpow2.f32 %v3298_v19 }
0x1331   :  { %v6583_v0 = vpop.eup %6582 }
0x1332   :  { %v3369_v14 = vsel %vm244_vm10, %v6583_v0, 0.0  ;;  %v6585_v20 = vpop.eup %6584 }
0x1333   :  { %3370 = vadd.xlane.f32.xlu0 %v3369_v14  ;;  %v3300_v1 = vsel %vm244_vm10, %v6585_v20, 0.0 }
0x133c   :  { %3376 = vrot.lane.b32.xlu1 %v3198_v12, %s8726_s25 }
0x133e   :  { %v3041_v5 = vpop.permute.xlu1 %3040 }
0x133f   :  { %v3046_v15 = vsel %vm260_vm8, %v3041_v5, 0 }
0x1340   :  { %3055 = vmatpush.bf16.msra.mxu3 %v3046_v15 }
0x1347   :  { %3307 = vrot.lane.b32.xlu0 %v3198_v12, %s8724_s2 }
0x1354   :  { %3301 = vadd.xlane.f32.xlu2 %v3300_v1  ;;  %v6357_v1 = vld [vmem:[%s8658_s16 + $0x18] sm:$0xff] }
0x1355   :  { %3444 = vmatpush.bf16.msrb.mxu1 %v6357_v1 }
0x1371   :  { %v2904_v22 = vpop.xlane.xlu0 %2903 }
0x1372   :  { %6586 = vrcp.f32 %v2904_v22  ;;  %v6356_v22 = vld [vmem:[%s8658_s16 + $0x10] sm:$0xff] }
0x1373   :  { %3445 = vmatpush.bf16.msrb.mxu1 %v6356_v22 }
0x1376   :  { %v2966_v25 = vpop.xlane.xlu2 %2965 }
0x1377   :  { %6588 = vrcp.f32 %v2966_v25  ;;  %v6355_v25 = vld [vmem:[%s8658_s16 + $0x8] sm:$0xff] }
0x1378   :  { %v6587_v23 = vpop.eup %6586  ;;  %3446 = vmatpush.bf16.msrb.mxu1 %v6355_v25 }
0x1379   :  { %v2906_v40 = vmul.f32 %v6587_v23, %v7899_v44  ;;  %v6354_v23 = vld [vmem:[%s8658_s16] sm:$0xff] }
0x137b   :  { %v2907_v28 = vpack.c.bf16 %v2906_v40, %v2906_v40 }
0x137c   :  { %3447 = vmatpush.bf16.msrb.mxu1 %v6354_v23 }
0x137d   :  { %v6589_v29 = vpop.eup %6588  ;;  %5890 = vmatmul.msk.bf16.vlgmr.msrb.gmra.mxu3 %vm244_vm10, %v2907_v28 }
0x137e   :  { %v2968_v30 = vmul.f32 %v6589_v29, %v7903_v35  ;;  %3188 = vmatpush.bf16.msrb.mxu3 %v3179_v26 }
0x1380   :  { %v2969_v31 = vpack.c.bf16 %v2968_v30, %v2968_v30 }
0x1381   :  { %v3035_v32 = vpop.xlane.xlu1 %3034 }
0x1382   :  { %6590 = vrcp.f32 %v3035_v32  ;;  %5893 = vmatmul.msk.bf16.vlgmr.msrb.gmra.mxu0 %vm244_vm10, %v2969_v31 }
0x1386   :  { %v3104_v24 = vpop.xlane.xlu2 %3103 }
0x1387   :  { %6592 = vrcp.f32 %v3104_v24 }
0x1388   :  { %v6591_v33 = vpop.eup %6590 }
0x1389   :  { %v3037_v37 = vmul.f32 %v6591_v33, %v7907_v7 }
0x138b   :  { %v3038_v38 = vpack.c.bf16 %v3037_v37, %v3037_v37 }
0x138d   :  { %v6593_v39 = vpop.eup %6592  ;;  %5896 = vmatmul.msk.bf16.vlgmr.msra.gmra.mxu3 %vm244_vm10, %v3038_v38 }
0x138e   :  { %v3106_v41 = vmul.f32 %v6593_v39, %v7911_v62  ;;  %v3239_v42 = vpop.permute.xlu2 %3238 }
0x138f   :  { %v3244_v6 = vsel %vm260_vm8, %v3239_v42, 0  ;;  %v6365_v42 = vld [vmem:[%s8660_s18 + $0x34] sm:$0xf0] }
0x1390   :  { %v3107_v44 = vpack.c.bf16 %v3106_v41, %v3106_v41  ;;  %3253 = vmatpush.bf16.msrb.mxu0 %v3244_v6  ;;  %v6364_v6 = vld [vmem:[%s8660_s18 + $0x34] sm:$0xf] }
0x1391   :  { %v3171_v11 = vpop.xlane.xlu0 %3170 }
0x1392   :  { %6594 = vrcp.f32 %v3171_v11  ;;  %5899 = vmatmul.msk.bf16.vlgmr.msra.gmra.mxu0 %vm244_vm10, %v3107_v44  ;;  %v5957_v44 = vld [vmem:[%s8660_s18 + $0x38] sm:$0xf0] }
0x1393   :  { %v5960_v11 = vor.u32 %v6364_v6, %v5957_v44 }
0x1395   :  { %3566 = vmatpush.bf16.msra.mxu2 %v5960_v11 }
0x1396   :  { %v3233_v35 = vpop.xlane.xlu1 %3232 }
0x1397   :  { %6596 = vrcp.f32 %v3233_v35  ;;  %v5947_v35 = vld [vmem:[%s8660_s18 + $0x20] sm:$0xf] }
0x1398   :  { %v6595_v47 = vpop.eup %6594 }
0x1399   :  { %v3173_v48 = vmul.f32 %v6595_v47, %v7915_v58  ;;  %v6363_v47 = vld [vmem:[%s8660_s18 + $0x24] sm:$0xf0] }
0x139b   :  { %v3174_v21 = vpack.c.bf16 %v3173_v48, %v3173_v48  ;;  %v6362_v48 = vld [vmem:[%s8660_s18 + $0x24] sm:$0xf] }
0x139d   :  { %v6597_v49 = vpop.eup %6596  ;;  %5902 = vmatmul.msk.bf16.vlgmr.msrb.gmra.mxu3 %vm244_vm10, %v3174_v21  ;;  %v5948_v21 = vor.u32 %v6363_v47, %v5947_v35 }
0x139e   :  { %v3235_v46 = vmul.f32 %v6597_v49, %v7919_v4  ;;  %v5949_v49 = vld [vmem:[%s8660_s18 + $0x28] sm:$0xf0] }
0x13a0   :  { %v3236_v51 = vpack.c.bf16 %v3235_v46, %v3235_v46  ;;  %v5952_v46 = vor.u32 %v6362_v48, %v5949_v49 }
0x13a2   :  { %5905 = vmatmul.msk.bf16.vlgmr.msrb.gmra.mxu0 %vm244_vm10, %v3236_v51  ;;  %3567 = vmatpush.bf16.msra.mxu2 %v5952_v46  ;;  %v5939_v51 = vld [vmem:[%s8660_s18 + $0x10] sm:$0xf] }
0x13a6   :  { %v3371_v53 = vpop.xlane.xlu0 %3370 }
0x13a7   :  { %6598 = vrcp.f32 %v3371_v53  ;;  %v6361_v53 = vld [vmem:[%s8660_s18 + $0x14] sm:$0xf0] }
0x13ad   :  { %v6599_v7 = vpop.eup %6598 }
0x13ae   :  { %v3373_v18 = vmul.f32 %v6599_v7, %v6583_v0  ;;  %v3377_v62 = vpop.permute.xlu1 %3376  ;;  %v6360_v7 = vld [vmem:[%s8660_s18 + $0x14] sm:$0xf] }
0x13af   :  { %v3382_v54 = vsel %vm260_vm8, %v3377_v62, 0  ;;  %v5941_v62 = vld [vmem:[%s8660_s18 + $0x18] sm:$0xf0] }
0x13b0   :  { %v3374_v16 = vpack.c.bf16 %v3373_v18, %v3373_v18  ;;  %3391 = vmatpush.bf16.msra.mxu0 %v3382_v54  ;;  %v5940_v18 = vor.u32 %v6361_v53, %v5939_v51  ;;  %v5944_v54 = vor.u32 %v6360_v7, %v5941_v62 }
0x13b2   :  { %3568 = vmatpush.bf16.msra.mxu2 %v5944_v54 }
0x13b3   :  { %5911 = vmatmul.msk.bf16.vlgmr.msra.gmra.mxu0 %vm244_vm10, %v3374_v16 }
0x13b9   :  { %v3308_v52 = vpop.permute.xlu0 %3307 }
0x13ba   :  { %v3313_v36 = vsel %vm260_vm8, %v3308_v52, 0 }
0x13bb   :  { %3322 = vmatpush.bf16.msra.mxu3 %v3313_v36  ;;  %v5931_v36 = vld [vmem:[%s8660_s18] sm:$0xf] }
0x13c7   :  { %v3302_v27 = vpop.xlane.xlu2 %3301 }
0x13c8   :  { %6600 = vrcp.f32 %v3302_v27  ;;  %v6359_v27 = vld [vmem:[%s8660_s18 + $0x4] sm:$0xf0] }
0x13ce   :  { %v6601_v56 = vpop.eup %6600 }
0x13cf   :  { %v3304_v57 = vmul.f32 %v6601_v56, %v6585_v20  ;;  %v6358_v56 = vld [vmem:[%s8660_s18 + $0x4] sm:$0xf] }
0x13d1   :  { %v3305_v58 = vpack.c.bf16 %v3304_v57, %v3304_v57  ;;  %v5932_v57 = vor.u32 %v6359_v27, %v5931_v36 }
0x13d3   :  { %5908 = vmatmul.msk.bf16.vlgmr.msra.gmra.mxu3 %vm244_vm10, %v3305_v58  ;;  %v5933_v58 = vld [vmem:[%s8660_s18 + $0x8] sm:$0xf0] }
0x13ff   :  { %v2988_v55 = vpop.f32.mrf.mxu0 }
0x1400   :  { %v2923_v4 = vpop.f32.mrf.mxu3  ;;  %2993 = vrot.lane.b32.xlu2 %v2988_v55, %s8723_s9 }
0x1401   :  { %2927 = vst.msk [vmem:[#allocation3] sm:$0xff] %vm224_vm9, %v2923_v4  ;;  %v5936_v4 = vor.u32 %v6358_v56, %v5933_v58 }
0x1403   :  { %3569 = vmatpush.bf16.msra.mxu2 %v5936_v4 }
0x1407   :  { %v2990_v59 = vpop.f32.mrf.mxu0 }
0x1408   :  { %v2925_v61 = vpop.f32.mrf.mxu3 }
0x140f   :  { %v3126_v63 = vpop.f32.mrf.mxu0 }
0x1410   :  { %v3057_v60 = vpop.f32.mrf.mxu3 }
0x1411   :  { %3062 = vrot.lane.b32.xlu0 %v3057_v60, %s8725_s24 }
0x1417   :  { %v3128_v2 = vpop.f32.mrf.mxu0 }
0x1418   :  { %v3059_v3 = vpop.f32.mrf.mxu3 }
0x141f   :  { %v3255_v8 = vpop.f32.mrf.mxu0 }
0x1420   :  { %v3190_v9 = vpop.f32.mrf.mxu3  ;;  %3260 = vrot.lane.b32.xlu0 %v3255_v8, %s8723_s9 }
0x1421   :  { %3194 = vst.msk [vmem:[#allocation3 + $0x8] sm:$0xff] %vm224_vm9, %v3190_v9 }
0x1427   :  { %v3257_v10 = vpop.f32.mrf.mxu0 }
0x1428   :  { %v3192_v12 = vpop.f32.mrf.mxu3  ;;  %3131 = vrot.lane.b32.xlu0 %v3126_v63, %s8716_s3 }
0x1430   :  { %v3393_v13 = vpop.f32.mrf.mxu0 }
0x1438   :  { %v3395_v0 = vpop.f32.mrf.mxu0 }
0x1456   :  { %v3324_v14 = vpop.f32.mrf.mxu3 }
0x1457   :  { %3329 = vrot.lane.b32.xlu1 %v3324_v14, %s8725_s24 }
0x145a   :  { %v2994_v5 = vpop.permute.xlu2 %2993 }
0x145b   :  { %2996 = vst.msk [vmem:[#allocation3] sm:$0xff] %vm346_vm11, %v2994_v5 }
0x145e   :  { %v3326_v15 = vpop.f32.mrf.mxu3 }
0x145f   :  { %3398 = vrot.lane.b32.xlu1 %v3393_v13, %s8716_s3 }
0x1483   :  { %v3063_v17 = vpop.permute.xlu0 %3062 }
0x1484   :  { %3065 = vst.msk [vmem:[#allocation3] sm:$0xff] %vm416_vm12, %v3063_v17 }
0x1492   :  { %v3261_v19 = vpop.permute.xlu0 %3260 }
0x1493   :  { %3263 = vst.msk [vmem:[#allocation3 + $0x8] sm:$0xff] %vm346_vm11, %v3261_v19  ;;  %v6430_v19 = vld [vmem:[%s8729_s10] ss:$0 sm:$0xff] }
0x149a   :  { %v3132_v20 = vpop.permute.xlu0 %3131 }
0x149b   :  { %3134 = vst.msk [vmem:[#allocation3] sm:$0xff] %vm486_vm13, %v3132_v20 }
0x14a2   :  { %v3402_v29 = vld [vmem:[#allocation3] sm:$0xff] }
0x14c9   :  { %v3330_v40 = vpop.permute.xlu1 %3329 }
0x14ca   :  { %3332 = vst.msk [vmem:[#allocation3 + $0x8] sm:$0xff] %vm416_vm12, %v3330_v40 }
0x14d1   :  { %v3399_v28 = vpop.permute.xlu1 %3398 }
0x14d2   :  { %3401 = vst.msk [vmem:[#allocation3 + $0x8] sm:$0xff] %vm486_vm13, %v3399_v28  ;;  %v6373_v28 = vld [vmem:[%s8730_s20 + $0x38] sm:$0xff] }
0x14d3   :  { %3661 = vmatpush.bf16.msrb.mxu0 %v6373_v28  ;;  %v6375_v28 = vld [vmem:[%s8653_s11 + $0x44] sm:$0xf0] }
0x14d9   :  { %v3403_v26 = vld [vmem:[#allocation3 + $0x8] sm:$0xff] }
0x14da   :  { %v3404_v30 = vpack.c.bf16 %v3403_v26, %v3402_v29  ;;  %v6372_v29 = vld [vmem:[%s8730_s20 + $0x30] sm:$0xff]  ;;  %v6371_v26 = vld [vmem:[%s8730_s20 + $0x28] sm:$0xff] }
0x14db   :  { %3662 = vmatpush.bf16.msrb.mxu0 %v6372_v29  ;;  %v6374_v29 = vld [vmem:[%s8653_s11 + $0x44] sm:$0xf] }
0x14dc   :  { %5928 = vmatmul.msk.bf16.vlgmr.msrb.gmra.mxu1 %vm87_vm0, %v3404_v30  ;;  %v6370_v30 = vld [vmem:[%s8730_s20 + $0x20] sm:$0xff] }
0x14df   :  { %3663 = vmatpush.bf16.msrb.mxu0 %v6371_v26 }
0x14e3   :  { %3664 = vmatpush.bf16.msrb.mxu0 %v6370_v30  ;;  %v6008_v30 = vld [vmem:[%s8653_s11 + $0x48] sm:$0xf0] }
0x1559   :  { %v3449_v31 = vpop.f32.mrf.mxu1 }
0x155a   :  { %v7978_v32 = vadd.f32 %v3449_v31, %v7783_v45  ;;  %v5955_v45 = vld [vmem:[%s8660_s18 + $0x30] sm:$0xf]  ;;  %v6369_v31 = vld [vmem:[%s8730_s20 + $0x18] sm:$0xff] }
0x155b   :  { %3665 = vmatpush.bf16.msrb.mxu0 %v6369_v31 }
0x155c   :  { %v3457_v24 = vmul.f32 %v7978_v32, %v7978_v32 }
0x155e   :  { %v3459_v33 = vsel %vm87_vm0, %v3457_v24, 0.0  ;;  %v6368_v24 = vld [vmem:[%s8730_s20 + $0x10] sm:$0xff] }
0x155f   :  { %3460 = vadd.xlane.f32.xlu2 %v3459_v33  ;;  %3666 = vmatpush.bf16.msrb.mxu0 %v6368_v24  ;;  %v6367_v33 = vld [vmem:[%s8730_s20 + $0x8] sm:$0xff]  ;;  %v6011_v24 = vor.u32 %v6374_v29, %v6008_v30  ;;  %v6390_v29 = vld [vmem:[%s8657_s15 + $0x20] sm:$0xff] }
0x1561   :  { %v3451_v37 = vpop.f32.mrf.mxu1 }
0x1562   :  { %v7984_v38 = vadd.f32 %v3451_v37, %v7792_v50  ;;  %v5956_v50 = vor.u32 %v6365_v42, %v5955_v45 }
0x1563   :  { %3667 = vmatpush.bf16.msrb.mxu0 %v6367_v33 }
0x1564   :  { %v3458_v39 = vmul.f32 %v7984_v38, %v7984_v38  ;;  %3552 = vmatpush.bf16.msrb.mxu3 %v5956_v50 }
0x1566   :  { %v3462_v41 = vsel %vm87_vm0, %v3458_v39, 0.0 }
0x1567   :  { %3463 = vadd.xlane.f32.xlu0 %v3462_v41  ;;  %v6366_v41 = vld [vmem:[%s8730_s20] sm:$0xff] }
0x1568   :  { %3553 = vmatpush.bf16.msrb.mxu3 %v5948_v21  ;;  %3668 = vmatpush.bf16.msrb.mxu0 %v6366_v41 }
0x156c   :  { %3554 = vmatpush.bf16.msrb.mxu3 %v5940_v18 }
0x1570   :  { %3555 = vmatpush.bf16.msrb.mxu3 %v5932_v57 }
0x15d2   :  { %v3461_v16 = vpop.xlane.xlu2 %3460 }
0x15d3   :  { %v3465_v52 = vmul.f32 %v3461_v16, %v6925_v34 }
0x15d5   :  { %v3467_v55 = vadd.f32 1e-06, %v3465_v52 }
0x15d7   :  { %6602 = vrsqrt.f32 %v3467_v55  ;;  %vm3475_vm1 = vweird.f32 %v3467_v55 }
0x15da   :  { %v3464_v59 = vpop.xlane.xlu0 %3463 }
0x15db   :  { %v3466_v61 = vmul.f32 %v3464_v59, %v6925_v34 }
0x15dd   :  { %v6603_v63 = vpop.eup %6602  ;;  %v3468_v60 = vadd.f32 1e-06, %v3466_v61 }
0x15de   :  { %v3470_v2 = vmul.f32 %v6603_v63, %v3467_v55  ;;  %vm3476_vm15 = vweird.f32 %v6603_v63 }
0x15df   :  { %6604 = vrsqrt.f32 %v3468_v60  ;;  %vm3477_vm2 = vmor %vm3475_vm1, %vm3476_vm15  ;;  %vm3485_vm4 = vweird.f32 %v3468_v60 }
0x15e0   :  { %v3471_v3 = vmul.f32 %v6603_v63, %v3470_v2  ;;  %v6381_v2 = vld [vmem:[%s8653_s11 + $0x74] sm:$0xf0] }
0x15e2   :  { %v3472_v8 = vmul.f32 0.5, %v3471_v3  ;;  %v6380_v3 = vld [vmem:[%s8653_s11 + $0x74] sm:$0xf] }
0x15e4   :  { %v3473_v9 = vsub.f32 1.5, %v3472_v8  ;;  %v6032_v8 = vld [vmem:[%s8653_s11 + $0x78] sm:$0xf0] }
0x15e5   :  { %v6605_v10 = vpop.eup %6604 }
0x15e6   :  { %v3480_v12 = vmul.f32 %v6605_v10, %v3468_v60  ;;  %v3474_v13 = vmul.f32 %v6603_v63, %v3473_v9  ;;  %vm3486_vm3 = vweird.f32 %v6605_v10  ;;  %v6035_v9 = vor.u32 %v6380_v3, %v6032_v8 }
0x15e7   :  { %vm3487_vm5 = vmor %vm3485_vm4, %vm3486_vm3 }
0x15e8   :  { %v3481_v0 = vmul.f32 %v6605_v10, %v3480_v12  ;;  %v3478_v5 = vsel %vm3477_vm2, %v6603_v63, %v3474_v13  ;;  %3789 = vmatpush.bf16.msra.mxu3 %v6035_v9  ;;  %v6379_v12 = vld [vmem:[%s8653_s11 + $0x64] sm:$0xf0]  ;;  %v6378_v13 = vld [vmem:[%s8653_s11 + $0x64] sm:$0xf] }
0x15e9   :  { %v3489_v20 = vmul.f32 %v3478_v5, %v7978_v32 }
0x15ea   :  { %v3482_v14 = vmul.f32 0.5, %v3481_v0 }
0x15eb   :  { %v3494_v25 = vmul.f32 %v6430_v19, %v3489_v20 }
0x15ec   :  { %v3483_v15 = vsub.f32 1.5, %v3482_v14  ;;  %v6024_v14 = vld [vmem:[%s8653_s11 + $0x68] sm:$0xf0] }
0x15ed   :  { %v6027_v5 = vor.u32 %v6378_v13, %v6024_v14 }
0x15ee   :  { %v3484_v17 = vmul.f32 %v6605_v10, %v3483_v15  ;;  %v6014_v15 = vld [vmem:[%s8653_s11 + $0x50] sm:$0xf] }
0x15ef   :  { %3790 = vmatpush.bf16.msra.mxu3 %v6027_v5 }
0x15f0   :  { %v3488_v1 = vsel %vm3487_vm5, %v6605_v10, %v3484_v17  ;;  %v6022_v10 = vld [vmem:[%s8653_s11 + $0x60] sm:$0xf]  ;;  %v6377_v17 = vld [vmem:[%s8653_s11 + $0x54] sm:$0xf0] }
0x15f1   :  { %v3490_v22 = vmul.f32 %v3488_v1, %v7984_v38  ;;  %v6023_v0 = vor.u32 %v6379_v12, %v6022_v10  ;;  %v6015_v20 = vor.u32 %v6377_v17, %v6014_v15  ;;  %v6016_v1 = vld [vmem:[%s8653_s11 + $0x58] sm:$0xf0] }
0x15f3   :  { %v3495_v23 = vmul.f32 %v6430_v19, %v3490_v22  ;;  %v6376_v19 = vld [vmem:[%s8653_s11 + $0x54] sm:$0xf] }
0x15f4   :  { %v6019_v22 = vor.u32 %v6376_v19, %v6016_v1 }
0x15f5   :  { %v3496_v40 = vpack.c.bf16 %v3495_v23, %v3494_v25 }
0x15f6   :  { %3791 = vmatpush.bf16.msra.mxu3 %v6019_v22 }
0x15f7   :  { %5961 = vmatmul.msk.bf16.vlgmr.msrb.gmra.mxu3 %vm87_vm0, %v3496_v40  ;;  %5962 = vmatmul.msk.bf16.vlgmr.msra.gmra.mxu2 %vm87_vm0, %v3496_v40  ;;  %v6006_v40 = vld [vmem:[%s8653_s11 + $0x40] sm:$0xf] }
0x15f8   :  { %v6007_v26 = vor.u32 %v6375_v28, %v6006_v40  ;;  %v6392_v40 = vld [vmem:[%s8657_s15 + $0x30] sm:$0xff]  ;;  %v6391_v28 = vld [vmem:[%s8657_s15 + $0x28] sm:$0xff] }
0x15fa   :  { %3792 = vmatpush.bf16.msra.mxu3 %v6011_v24 }
0x167a   :  { %v3557_v37 = vpop.f32.mrf.mxu3  ;;  %v3571_v51 = vpop.f32.mrf.mxu2 }
0x167b   :  { %v3576_v39 = vmul.f32 %v3557_v37, %v3557_v37 }
0x167d   :  { %v3578_v45 = vmul.f32 %v3576_v39, %v3557_v37 }
0x167f   :  { %v3580_v42 = vmul.f32 0.044715, %v3578_v45 }
0x1681   :  { %v3582_v6 = vadd.f32 %v3580_v42, %v3557_v37 }
0x1682   :  { %v3559_v50 = vpop.f32.mrf.mxu3  ;;  %v3573_v52 = vpop.f32.mrf.mxu2 }
0x1683   :  { %v3584_v44 = vmul.f32 0.7978846, %v3582_v6  ;;  %v3577_v11 = vmul.f32 %v3559_v50, %v3559_v50 }
0x1685   :  { %6606 = vtanh.f32 %v3584_v44  ;;  %v3579_v35 = vmul.f32 %v3577_v11, %v3559_v50 }
0x1687   :  { %v3581_v47 = vmul.f32 0.044715, %v3579_v35 }
0x1689   :  { %v3583_v48 = vadd.f32 %v3581_v47, %v3559_v50 }
0x168b   :  { %v6607_v21 = vpop.eup %6606  ;;  %v3585_v49 = vmul.f32 0.7978846, %v3583_v48 }
0x168c   :  { %v3588_v46 = vadd.f32 1.0, %v6607_v21 }
0x168d   :  { %6608 = vtanh.f32 %v3585_v49 }
0x168e   :  { %v3590_v53 = vmul.f32 0.5, %v3588_v46 }
0x1690   :  { %v3592_v62 = vmul.f32 %v3590_v53, %v3557_v37 }
0x1692   :  { %v3594_v36 = vmul.f32 %v3592_v62, %v3571_v51  ;;  %v6431_v51 = vld [vmem:[%s8655_s13 + $0x1] ss:$0 sm:$0xff] }
0x1693   :  { %v6609_v7 = vpop.eup %6608 }
0x1694   :  { %v3589_v18 = vadd.f32 1.0, %v6609_v7 }
0x1696   :  { %v3591_v54 = vmul.f32 0.5, %v3589_v18 }
0x1698   :  { %v3593_v16 = vmul.f32 %v3591_v54, %v3559_v50 }
0x169a   :  { %v3595_v27 = vmul.f32 %v3593_v16, %v3573_v52 }
0x169c   :  { %v3596_v56 = vpack.c.bf16 %v3595_v27, %v3594_v36 }
0x169e   :  { %3669 = vmatmul.bf16.vlgmr.msrb.gmra.mxu0 %v3596_v56 }
0x171b   :  { %v3670_v57 = vpop.f32.mrf.mxu0 }
0x171c   :  { %v8071_v58 = vadd.f32 %v3670_v57, %v7978_v32  ;;  %v6030_v32 = vld [vmem:[%s8653_s11 + $0x70] sm:$0xf]  ;;  %s8733_s11 = sld [smem:[#allocation20_spill]] }
0x171e   :  { %v3679_v55 = vmul.f32 %v8071_v58, %v8071_v58 }
0x1720   :  { %v3681_v4 = vsel %vm87_vm0, %v3679_v55, 0.0 }
0x1721   :  { %3682 = vadd.xlane.f32.xlu1 %v3681_v4 }
0x1723   :  { %v3672_v59 = vpop.f32.mrf.mxu0 }
0x1724   :  { %v8077_v61 = vadd.f32 %v3672_v59, %v7984_v38  ;;  %v6031_v38 = vor.u32 %v6381_v2, %v6030_v32 }
0x1726   :  { %v3680_v63 = vmul.f32 %v8077_v61, %v8077_v61  ;;  %3775 = vmatpush.bf16.msra.mxu1 %v6031_v38 }
0x1728   :  { %v3684_v60 = vsel %vm87_vm0, %v3680_v63, 0.0 }
0x1729   :  { %3685 = vadd.xlane.f32.xlu2 %v3684_v60 }
0x172a   :  { %3776 = vmatpush.bf16.msra.mxu1 %v6023_v0 }
0x172e   :  { %3777 = vmatpush.bf16.msra.mxu1 %v6015_v20 }
0x1732   :  { %3778 = vmatpush.bf16.msra.mxu1 %v6007_v26 }
0x1794   :  { %v3683_v25 = vpop.xlane.xlu1 %3682 }
0x1795   :  { %v3687_v23 = vmul.f32 %v3683_v25, %v6925_v34  ;;  %v6393_v25 = vld [vmem:[%s8657_s15 + $0x38] sm:$0xff]  ;;  %s8732_s15 = sld [smem:[#allocation19_spill]] }
0x1797   :  { %v3689_v31 = vadd.f32 1e-06, %v3687_v23 }
0x1799   :  { %6610 = vrsqrt.f32 %v3689_v31  ;;  %vm3697_vm7 = vweird.f32 %v3689_v31 }
0x179c   :  { %v3686_v33 = vpop.xlane.xlu2 %3685 }
0x179d   :  { %v3688_v37 = vmul.f32 %v3686_v33, %v6925_v34 }
0x179f   :  { %v6611_v39 = vpop.eup %6610  ;;  %v3690_v41 = vadd.f32 1e-06, %v3688_v37 }
0x17a0   :  { %v3692_v45 = vmul.f32 %v6611_v39, %v3689_v31  ;;  %vm3698_vm6 = vweird.f32 %v6611_v39  ;;  %v6040_v31 = vld [vmem:[%s8727_s26 + $0x8] sm:$0xff] }
0x17a1   :  { %6612 = vrsqrt.f32 %v3690_v41  ;;  %vm3699_vm15 = vmor %vm3697_vm7, %vm3698_vm6  ;;  %vm3707_vm2 = vweird.f32 %v3690_v41 }
0x17a2   :  { %v3693_v42 = vmul.f32 %v6611_v39, %v3692_v45  ;;  %v6043_v45 = vld [vmem:[%s8727_s26 + $0x10] sm:$0xff] }
0x17a4   :  { %v3694_v6 = vmul.f32 0.5, %v3693_v42 }
0x17a6   :  { %v3695_v50 = vsub.f32 1.5, %v3694_v6 }
0x17a7   :  { %v6613_v44 = vpop.eup %6612 }
0x17a8   :  { %v3702_v11 = vmul.f32 %v6613_v44, %v3690_v41  ;;  %v3696_v35 = vmul.f32 %v6611_v39, %v3695_v50  ;;  %vm3708_vm1 = vweird.f32 %v6613_v44 }
0x17a9   :  { %vm3709_vm3 = vmor %vm3707_vm2, %vm3708_vm1 }
0x17aa   :  { %v3703_v47 = vmul.f32 %v6613_v44, %v3702_v11  ;;  %v3700_v21 = vsel %vm3699_vm15, %v6611_v39, %v3696_v35  ;;  %v6046_v11 = vld [vmem:[%s8727_s26 + $0x18] sm:$0xff] }
0x17ab   :  { %v3711_v53 = vmul.f32 %v3700_v21, %v8071_v58 }
0x17ac   :  { %v3704_v48 = vmul.f32 0.5, %v3703_v47 }
0x17ad   :  { %v3716_v62 = vmul.f32 %v6431_v51, %v3711_v53  ;;  %v6049_v53 = vld [vmem:[%s8727_s26 + $0x20] sm:$0xff] }
0x17ae   :  { %v3705_v49 = vsub.f32 1.5, %v3704_v48 }
0x17b0   :  { %v3706_v46 = vmul.f32 %v6613_v44, %v3705_v49 }
0x17b2   :  { %v3710_v7 = vsel %vm3709_vm3, %v6613_v44, %v3706_v46  ;;  %v3807_v44 = vld [vmem:[%s8727_s26] sm:$0xff] }
0x17b3   :  { %v3712_v18 = vmul.f32 %v3710_v7, %v8077_v61 }
0x17b5   :  { %v3717_v54 = vmul.f32 %v6431_v51, %v3712_v18 }
0x17b7   :  { %v3718_v16 = vpack.c.bf16 %v3717_v54, %v3716_v62  ;;  %v6052_v54 = vld [vmem:[%s8727_s26 + $0x28] sm:$0xff] }
0x17b9   :  { %6036 = vmatmul.msk.bf16.vlgmr.msra.gmra.mxu1 %vm87_vm0, %v3718_v16  ;;  %6037 = vmatmul.msk.bf16.vlgmr.msra.gmra.mxu3 %vm87_vm0, %v3718_v16 }
0x1836   :  { %v3780_v52 = vpop.f32.mrf.mxu1 }
0x1837   :  { %3799 = vst [vmem:[#allocation2] sm:$0xff] %v3780_v52  ;;  %v3863_v36 = vpack.c.bf16 %v3780_v52, %v3780_v52 }
0x1839   :  { %3868 = vrot.lane.b32.xlu2 %v3863_v36, %s8721_s5  ;;  %3870 = vrot.lane.b32.xlu0 %v3863_v36, %s8716_s3 }
0x183a   :  { %3809 = vrot.lane.b32.xlu1 %v3863_v36, %s8722_s0 }
0x183c   :  { %v3794_v27 = vpop.f32.mrf.mxu3 }
0x183d   :  { %3800 = vst.msk [vmem:[#allocation2 + $0x8] sm:$0xff] %vm87_vm0, %v3794_v27 }
0x183e   :  { %v3782_v56 = vpop.f32.mrf.mxu1 }
0x183f   :  { %3801 = vst [vmem:[#allocation2 + $0x10] sm:$0xff] %v3782_v56  ;;  %v4126_v57 = vpack.c.bf16 %v3782_v56, %v3782_v56 }
0x1841   :  { %4006 = vrot.lane.b32.xlu0 %v3863_v36, %s8723_s9  ;;  %4133 = vrot.lane.b32.xlu2 %v4126_v57, %s8716_s3 }
0x1842   :  { %3938 = vrot.lane.b32.xlu1 %v3863_v36, %s8725_s24 }
0x1844   :  { %v3796_v55 = vpop.f32.mrf.mxu3  ;;  %v3805_v4 = vld [vmem:[#allocation2 + $0x8] sm:$0xff] }
0x1845   :  { %3802 = vst.msk [vmem:[#allocation2 + $0x18] sm:$0xff] %vm87_vm0, %v3796_v55  ;;  %v8147_v59 = vpack.c.bf16 %v3805_v4, %v3805_v4 }
0x1847   :  { %v3846_v63 = vsel %vm260_vm8, %v8147_v59, 0 }
0x1848   :  { %3855 = vmatpush.bf16.msrb.mxu1 %v3846_v63 }
0x1849   :  { %4004 = vrot.lane.b32.xlu0 %v3863_v36, %s8726_s25  ;;  %4072 = vrot.lane.b32.xlu2 %v4126_v57, %s8722_s0 }
0x184a   :  { %4131 = vrot.lane.b32.xlu1 %v4126_v57, %s8721_s5 }
0x1851   :  { %3936 = vrot.lane.b32.xlu0 %v3863_v36, %s8724_s2  ;;  %4201 = vrot.lane.b32.xlu2 %v4126_v57, %s8725_s24 }
0x1852   :  { %4267 = vrot.lane.b32.xlu1 %v4126_v57, %s8726_s25 }
0x1859   :  { %4269 = vrot.lane.b32.xlu0 %v4126_v57, %s8723_s9 }
0x1861   :  { %4199 = vrot.lane.b32.xlu0 %v4126_v57, %s8724_s2 }
0x1893   :  { %v3869_v60 = vpop.permute.xlu2 %3868 }
0x189b   :  { %v4134_v32 = vpop.permute.xlu2 %4133 }
0x189c   :  { %v4139_v0 = vsel %vm224_vm9, %v4134_v32, 0 }
0x18a3   :  { %v4073_v9 = vpop.permute.xlu2 %4072 }
0x18a4   :  { %v4078_v5 = vsel %vm224_vm9, %v4073_v9, 0 }
0x18ab   :  { %v3871_v2 = vpop.permute.xlu0 %3870  ;;  %v4202_v17 = vpop.permute.xlu2 %4201 }
0x18ac   :  { %v3876_v3 = vsel %vm224_vm9, %v3871_v2, 0  ;;  %v3810_v38 = vpop.permute.xlu1 %3809  ;;  %v4207_v20 = vsel %vm224_vm9, %v4202_v17, 0 }
0x18ad   :  { %v3815_v8 = vsel %vm224_vm9, %v3810_v38, 0  ;;  %3885 = vmatpush.bf16.xpose.msrb.mxu3 %v3876_v3 }
0x18ae   :  { %3824 = vmatpush.bf16.xpose.msrb.mxu2 %v3815_v8 }
0x18b3   :  { %v4007_v10 = vpop.permute.xlu0 %4006 }
0x18b4   :  { %v4012_v12 = vsel %vm224_vm9, %v4007_v10, 0  ;;  %v3939_v13 = vpop.permute.xlu1 %3938  ;;  %6041 = vmatmul.msk.bf16.vlgmr.msrb.gmra.mxu3 %vm224_vm9, %v3869_v60  ;;  %v6058_v60 = vld [vmem:[%s8727_s26 + $0x38] sm:$0xff] }
0x18b5   :  { %v3944_v14 = vsel %vm224_vm9, %v3939_v13, 0  ;;  %6038 = vmatmul.msk.bf16.vlgmr.msrb.gmra.mxu2 %vm224_vm9, %v3863_v36  ;;  %4021 = vmatpush.bf16.xpose.msra.mxu3 %v4012_v12 }
0x18b6   :  { %3953 = vmatpush.bf16.xpose.msra.mxu0 %v3944_v14 }
0x18bb   :  { %v4005_v15 = vpop.permute.xlu0 %4004 }
0x18bc   :  { %v4132_v23 = vpop.permute.xlu1 %4131 }
0x18bd   :  { %4148 = vmatpush.bf16.xpose.msrb.mxu3 %v4139_v0 }
0x18be   :  { %4087 = vmatpush.bf16.xpose.msrb.mxu0 %v4078_v5 }
0x18c3   :  { %v3937_v19 = vpop.permute.xlu0 %3936 }
0x18c4   :  { %6044 = vmatmul.msk.bf16.vlgmr.msra.gmra.mxu0 %vm224_vm9, %v3937_v19  ;;  %6047 = vmatmul.msk.bf16.vlgmr.msra.gmra.mxu3 %vm224_vm9, %v4005_v15  ;;  %v4268_v26 = vpop.permute.xlu1 %4267 }
0x18c6   :  { %4216 = vmatpush.bf16.xpose.msra.mxu0 %v4207_v20 }
0x18cb   :  { %v4270_v1 = vpop.permute.xlu0 %4269 }
0x18cc   :  { %v4275_v22 = vsel %vm224_vm9, %v4270_v1, 0 }
0x18cd   :  { %4284 = vmatpush.bf16.xpose.msra.mxu3 %v4275_v22 }
0x18d3   :  { %v4200_v30 = vpop.permute.xlu0 %4199 }
0x18d4   :  { %6050 = vmatmul.msk.bf16.vlgmr.msrb.gmra.mxu0 %vm224_vm9, %v4126_v57  ;;  %6053 = vmatmul.msk.bf16.vlgmr.msrb.gmra.mxu3 %vm224_vm9, %v4132_v23  ;;  %v6055_v57 = vld [vmem:[%s8727_s26 + $0x30] sm:$0xff] }
0x18d5   :  { %4515 = vmatpush.bf16.msrb.mxu3 %v6393_v25 }
0x18d9   :  { %4516 = vmatpush.bf16.msrb.mxu3 %v6392_v40 }
0x18dd   :  { %4517 = vmatpush.bf16.msrb.mxu3 %v6391_v28 }
0x18e1   :  { %4518 = vmatpush.bf16.msrb.mxu3 %v6390_v29 }
0x18e4   :  { %6056 = vmatmul.msk.bf16.vlgmr.msra.gmra.mxu0 %vm224_vm9, %v4200_v30  ;;  %6059 = vmatmul.msk.bf16.vlgmr.msra.gmra.mxu3 %vm224_vm9, %v4268_v26 }
0x18f4   :  { %6136 = vmatmul.msk.bf16.vlgmr.msrb.gmra.mxu3 %vm87_vm0, %v7776_v43 }
0x1937   :  { %v3887_v24 = vpop.f32.mrf.mxu3 }
0x1938   :  { %v3826_v33 = vpop.f32.mrf.mxu2  ;;  %v3888_v37 = vadd.f32 %v6040_v31, %v3887_v24 }
0x1939   :  { %v3827_v47 = vadd.f32 %v3826_v33, %v3807_v44 }
0x193a   :  { %v3891_v39 = vsel %vm244_vm10, %v3888_v37, -inf }
0x193b   :  { %3892 = vmax.xlane.f32.xlu1 %v3891_v39  ;;  %v3830_v46 = vsel %vm244_vm10, %v3827_v47, -inf }
0x193f   :  { %v3889_v41 = vpop.f32.mrf.mxu3 }
0x1940   :  { %v3828_v42 = vpop.f32.mrf.mxu2 }
0x1941   :  { %v3955_v6 = vpop.f32.mrf.mxu0 }
0x1942   :  { %v3956_v50 = vadd.f32 %v6043_v45, %v3955_v6 }
0x1944   :  { %v3959_v43 = vsel %vm244_vm10, %v3956_v50, -inf }
0x1945   :  { %3960 = vmax.xlane.f32.xlu2 %v3959_v43 }
0x1947   :  { %v4023_v35 = vpop.f32.mrf.mxu3 }
0x1948   :  { %v4024_v48 = vadd.f32 %v6046_v11, %v4023_v35 }
0x1949   :  { %v3957_v21 = vpop.f32.mrf.mxu0 }
0x194a   :  { %v4027_v49 = vsel %vm244_vm10, %v4024_v48, -inf }
0x194b   :  { %4028 = vmax.xlane.f32.xlu0 %v4027_v49 }
0x194d   :  { %3831 = vmax.xlane.f32.xlu2 %v3830_v46 }
0x194f   :  { %v4025_v51 = vpop.f32.mrf.mxu3 }
0x1951   :  { %v4089_v7 = vpop.f32.mrf.mxu0 }
0x1952   :  { %v8208_v18 = vadd.f32 %v6049_v53, %v4089_v7 }
0x1954   :  { %v4093_v62 = vsel %vm244_vm10, %v8208_v18, -inf }
0x1955   :  { %4094 = vmax.xlane.f32.xlu2 %v4093_v62 }
0x1957   :  { %v4150_v16 = vpop.f32.mrf.mxu3 }
0x1958   :  { %v4151_v52 = vadd.f32 %v6052_v54, %v4150_v16 }
0x1959   :  { %v4091_v36 = vpop.f32.mrf.mxu0 }
0x195a   :  { %v4154_v27 = vsel %vm244_vm10, %v4151_v52, -inf }
0x195b   :  { %4155 = vmax.xlane.f32.xlu1 %v4154_v27 }
0x195f   :  { %v4152_v56 = vpop.f32.mrf.mxu3 }
0x1961   :  { %v4218_v55 = vpop.f32.mrf.mxu0 }
0x1962   :  { %v4219_v4 = vadd.f32 %v6055_v57, %v4218_v55 }
0x1964   :  { %v4222_v63 = vsel %vm244_vm10, %v4219_v4, -inf }
0x1965   :  { %4223 = vmax.xlane.f32.xlu2 %v4222_v63 }
0x1967   :  { %v4286_v32 = vpop.f32.mrf.mxu3 }
0x1968   :  { %v8223_v2 = vadd.f32 %v6058_v60, %v4286_v32 }
0x1969   :  { %v4220_v3 = vpop.f32.mrf.mxu0 }
0x196a   :  { %v4290_v38 = vsel %vm244_vm10, %v8223_v2, -inf }
0x196b   :  { %4291 = vmax.xlane.f32.xlu0 %v4290_v38 }
0x196f   :  { %v4288_v8 = vpop.f32.mrf.mxu3 }
0x1974   :  { %3904 = vrot.lane.b32.xlu1 %v8147_v59, %s8721_s5 }
0x197d   :  { %4040 = vrot.lane.b32.xlu2 %v8147_v59, %s8726_s25 }
0x19ae   :  { %v3893_v9 = vpop.xlane.xlu1 %3892 }
0x19af   :  { %v3894_v10 = vsub.f32 %v3888_v37, %v3893_v9 }
0x19b1   :  { %v3895_v12 = vmul.f32 1.442695, %v3894_v10 }
0x19b3   :  { %6614 = vpow2.f32 %v3895_v12 }
0x19b8   :  { %v3961_v13 = vpop.xlane.xlu2 %3960 }
0x19b9   :  { %v8231_v0 = vpop.eup %6614  ;;  %v3962_v14 = vsub.f32 %v3956_v50, %v3961_v13  ;;  %v4127_v50 = vld [vmem:[#allocation2 + $0x18] sm:$0xff] }
0x19ba   :  { %v3897_v5 = vsel %vm244_vm10, %v8231_v0, 0.0  ;;  %v4128_v43 = vpack.c.bf16 %v4127_v50, %v4127_v50 }
0x19bb   :  { %v3963_v15 = vmul.f32 1.442695, %v3962_v14  ;;  %3898 = vadd.xlane.f32.xlu1 %v3897_v5 }
0x19bc   :  { %v4109_v14 = vsel %vm260_vm8, %v4128_v43, 0 }
0x19bd   :  { %6616 = vpow2.f32 %v3963_v15 }
0x19be   :  { %v4029_v17 = vpop.xlane.xlu0 %4028 }
0x19bf   :  { %v4030_v19 = vsub.f32 %v4024_v48, %v4029_v17 }
0x19c0   :  { %v3832_v20 = vpop.xlane.xlu2 %3831 }
0x19c1   :  { %v4031_v1 = vmul.f32 1.442695, %v4030_v19  ;;  %v3833_v22 = vsub.f32 %v3827_v47, %v3832_v20 }
0x19c3   :  { %v8235_v25 = vpop.eup %6616  ;;  %6618 = vpow2.f32 %v4031_v1  ;;  %v3834_v23 = vmul.f32 1.442695, %v3833_v22 }
0x19c4   :  { %v3965_v40 = vsel %vm244_vm10, %v8235_v25, 0.0 }
0x19c5   :  { %6620 = vpow2.f32 %v3834_v23  ;;  %3966 = vadd.xlane.f32.xlu0 %v3965_v40 }
0x19c8   :  { %v4095_v33 = vpop.xlane.xlu2 %4094 }
0x19c9   :  { %v6619_v28 = vpop.eup %6618 }
0x19ca   :  { %v4033_v29 = vsel %vm244_vm10, %v6619_v28, 0.0 }
0x19cb   :  { %v6621_v26 = vpop.eup %6620  ;;  %4034 = vadd.xlane.f32.xlu2 %v4033_v29 }
0x19cc   :  { %v3836_v30 = vsel %vm244_vm10, %v6621_v26, 0.0 }
0x19cd   :  { %3837 = vadd.xlane.f32.xlu0 %v3836_v30 }
0x19ce   :  { %v4156_v31 = vpop.xlane.xlu1 %4155 }
0x19cf   :  { %v4157_v24 = vsub.f32 %v4151_v52, %v4156_v31 }
0x19d1   :  { %v4158_v37 = vmul.f32 1.442695, %v4157_v24 }
0x19d3   :  { %6622 = vpow2.f32 %v4158_v37 }
0x19d8   :  { %v4224_v39 = vpop.xlane.xlu2 %4223 }
0x19d9   :  { %v8241_v41 = vpop.eup %6622  ;;  %v4225_v45 = vsub.f32 %v4219_v4, %v4224_v39 }
0x19da   :  { %v4160_v42 = vsel %vm244_vm10, %v8241_v41, 0.0 }
0x19db   :  { %v4226_v6 = vmul.f32 1.442695, %v4225_v45  ;;  %4161 = vadd.xlane.f32.xlu1 %v4160_v42 }
0x19dd   :  { %6624 = vpow2.f32 %v4226_v6 }
0x19de   :  { %v4292_v49 = vpop.xlane.xlu0 %4291 }
0x19df   :  { %v4293_v46 = vsub.f32 %v8223_v2, %v4292_v49 }
0x19e0   :  { %v4041_v35 = vpop.permute.xlu2 %4040 }
0x19e1   :  { %3972 = vrot.lane.b32.xlu0 %v8147_v59, %s8724_s2  ;;  %v4046_v21 = vsel %vm260_vm8, %v4041_v35, 0  ;;  %v4096_v59 = vsub.f32 %v8208_v18, %v4095_v33  ;;  %v4294_v53 = vmul.f32 1.442695, %v4293_v46  ;;  %v4520_v46 = vpop.f32.mrf.mxu3 }
0x19e3   :  { %v8247_v44 = vpop.eup %6624  ;;  %4167 = vrot.lane.b32.xlu2 %v4128_v43, %s8721_s5  ;;  %v4097_v51 = vmul.f32 1.442695, %v4096_v59 }
0x19e4   :  { %v4228_v11 = vsel %vm244_vm10, %v8247_v44, 0.0 }
0x19e5   :  { %4229 = vadd.xlane.f32.xlu1 %v4228_v11  ;;  %6626 = vpow2.f32 %v4097_v51 }
0x19e6   :  { %v3905_v47 = vpop.permute.xlu1 %3904  ;;  %6628 = vpow2.f32 %v4294_v53 }
0x19e7   :  { %v3910_v48 = vsel %vm260_vm8, %v3905_v47, 0 }
0x19e8   :  { %3919 = vmatpush.bf16.msra.mxu2 %v3910_v48 }
0x19eb   :  { %v6627_v7 = vpop.eup %6626 }
0x19ec   :  { %4055 = vmatpush.bf16.msrb.mxu2 %v4046_v21  ;;  %v6629_v62 = vpop.eup %6628  ;;  %v4099_v54 = vsel %vm244_vm10, %v6627_v7, 0.0 }
0x19ed   :  { %v4296_v16 = vsel %vm244_vm10, %v6629_v62, 0.0 }
0x19fe   :  { %4303 = vrot.lane.b32.xlu1 %v4128_v43, %s8726_s25 }
0x1a0b   :  { %4100 = vadd.xlane.f32.xlu0 %v4099_v54 }
0x1a0c   :  { %4297 = vadd.xlane.f32.xlu2 %v4296_v16  ;;  %v6385_v16 = vld [vmem:[%s8654_s12 + $0x38] sm:$0xff] }
0x1a0d   :  { %4372 = vmatpush.bf16.msrb.mxu0 %v6385_v16 }
0x1a1f   :  { %4235 = vrot.lane.b32.xlu0 %v4128_v43, %s8724_s2 }
0x1a2e   :  { %v3899_v52 = vpop.xlane.xlu1 %3898 }
0x1a2f   :  { %6630 = vrcp.f32 %v3899_v52 }
0x1a35   :  { %v6631_v18 = vpop.eup %6630 }
0x1a36   :  { %v3901_v36 = vmul.f32 %v6631_v18, %v8231_v0 }
0x1a38   :  { %v3902_v27 = vpack.c.bf16 %v3901_v36, %v3901_v36  ;;  %v3967_v56 = vpop.xlane.xlu0 %3966  ;;  %v6384_v36 = vld [vmem:[%s8654_s12 + $0x30] sm:$0xff] }
0x1a39   :  { %4373 = vmatpush.bf16.msrb.mxu0 %v6384_v36 }
0x1a3a   :  { %6042 = vmatmul.msk.bf16.vlgmr.msra.gmra.mxu2 %vm244_vm10, %v3902_v27 }
0x1a3e   :  { %v4035_v57 = vpop.xlane.xlu2 %4034 }
0x1a3f   :  { %6632 = vrcp.f32 %v4035_v57  ;;  %v6382_v57 = vld [vmem:[%s8654_s12 + $0x20] sm:$0xff] }
0x1a40   :  { %v3838_v55 = vpop.xlane.xlu0 %3837 }
0x1a41   :  { %6634 = vrcp.f32 %v3838_v55 }
0x1a42   :  { %6636 = vrcp.f32 %v3967_v56  ;;  %v6383_v56 = vld [vmem:[%s8654_s12 + $0x28] sm:$0xff]  ;;  %s8734_s12 = sld [smem:[#allocation22_spill]] }
0x1a43   :  { %4374 = vmatpush.bf16.msrb.mxu0 %v6383_v56 }
0x1a45   :  { %v6633_v4 = vpop.eup %6632 }
0x1a46   :  { %v4037_v63 = vmul.f32 %v6633_v4, %v6619_v28  ;;  %v4168_v60 = vpop.permute.xlu2 %4167 }
0x1a47   :  { %v6635_v32 = vpop.eup %6634  ;;  %v4173_v2 = vsel %vm260_vm8, %v4168_v60, 0  ;;  %4375 = vmatpush.bf16.msrb.mxu0 %v6382_v57 }
0x1a48   :  { %v4038_v3 = vpack.c.bf16 %v4037_v63, %v4037_v63  ;;  %v3840_v38 = vmul.f32 %v6635_v32, %v6621_v26  ;;  %4182 = vmatpush.bf16.msra.mxu2 %v4173_v2  ;;  %v6637_v10 = vpop.eup %6636 }
0x1a49   :  { %v3969_v5 = vmul.f32 %v6637_v10, %v8235_v25 }
0x1a4a   :  { %v3841_v8 = vpack.c.bf16 %v3840_v38, %v3840_v38  ;;  %6048 = vmatmul.msk.bf16.vlgmr.msrb.gmra.mxu2 %vm244_vm10, %v4038_v3 }
0x1a4b   :  { %v3970_v19 = vpack.c.bf16 %v3969_v5, %v3969_v5 }
0x1a4c   :  { %6039 = vmatmul.msk.bf16.vlgmr.msrb.gmra.mxu1 %vm244_vm10, %v3841_v8 }
0x1a4e   :  { %v4162_v9 = vpop.xlane.xlu1 %4161 }
0x1a4f   :  { %6638 = vrcp.f32 %v4162_v9 }
0x1a53   :  { %v3973_v12 = vpop.permute.xlu0 %3972 }
0x1a54   :  { %v3978_v13 = vsel %vm260_vm8, %v3973_v12, 0 }
0x1a55   :  { %v6639_v0 = vpop.eup %6638  ;;  %3987 = vmatpush.bf16.msra.mxu1 %v3978_v13 }
0x1a56   :  { %v4164_v15 = vmul.f32 %v6639_v0, %v8241_v41 }
0x1a58   :  { %v4165_v17 = vpack.c.bf16 %v4164_v15, %v4164_v15  ;;  %v4230_v20 = vpop.xlane.xlu1 %4229 }
0x1a59   :  { %4118 = vmatpush.bf16.msrb.mxu1 %v4109_v14 }
0x1a5a   :  { %6054 = vmatmul.msk.bf16.vlgmr.msra.gmra.mxu2 %vm244_vm10, %v4165_v17 }
0x1a5c   :  { %6045 = vmatmul.msk.bf16.vlgmr.msra.gmra.mxu1 %vm244_vm10, %v3970_v19  ;;  %v6388_v19 = vld [vmem:[%s8656_s14 + $0x30] sm:$0xff] }
0x1a70   :  { %v4304_v1 = vpop.permute.xlu1 %4303 }
0x1a71   :  { %v4309_v22 = vsel %vm260_vm8, %v4304_v1, 0 }
0x1a72   :  { %4318 = vmatpush.bf16.msrb.mxu2 %v4309_v22  ;;  %v6386_v22 = vld [vmem:[%s8656_s14 + $0x20] sm:$0xff] }
0x1a7e   :  { %v4101_v23 = vpop.xlane.xlu0 %4100 }
0x1a7f   :  { %6640 = vrcp.f32 %v4101_v23  ;;  %v4298_v40 = vpop.xlane.xlu2 %4297 }
0x1a80   :  { %6642 = vrcp.f32 %v4298_v40 }
0x1a81   :  { %6644 = vrcp.f32 %v4230_v20 }
0x1a85   :  { %v6641_v28 = vpop.eup %6640 }
0x1a86   :  { %v6643_v25 = vpop.eup %6642  ;;  %v4103_v29 = vmul.f32 %v6641_v28, %v6627_v7 }
0x1a87   :  { %v4300_v26 = vmul.f32 %v6643_v25, %v6629_v62  ;;  %v6645_v24 = vpop.eup %6644  ;;  %v4522_v62 = vpop.f32.mrf.mxu3 }
0x1a88   :  { %v4104_v30 = vpack.c.bf16 %v4103_v29, %v4103_v29  ;;  %v4232_v39 = vmul.f32 %v6645_v24, %v8247_v44 }
0x1a89   :  { %v4301_v31 = vpack.c.bf16 %v4300_v26, %v4300_v26 }
0x1a8a   :  { %6051 = vmatmul.msk.bf16.vlgmr.msrb.gmra.mxu1 %vm244_vm10, %v4104_v30  ;;  %v4233_v41 = vpack.c.bf16 %v4232_v39, %v4232_v39 }
0x1a8b   :  { %6060 = vmatmul.msk.bf16.vlgmr.msrb.gmra.mxu2 %vm244_vm10, %v4301_v31 }
0x1a91   :  { %v4236_v33 = vpop.permute.xlu0 %4235 }
0x1a92   :  { %v4241_v37 = vsel %vm260_vm8, %v4236_v33, 0 }
0x1a93   :  { %4250 = vmatpush.bf16.msra.mxu1 %v4241_v37 }
0x1a9a   :  { %6057 = vmatmul.msk.bf16.vlgmr.msra.gmra.mxu1 %vm244_vm10, %v4233_v41 }
0x1abd   :  { %v3921_v45 = vpop.f32.mrf.mxu2 }
0x1abe   :  { %3926 = vrot.lane.b32.xlu2 %v3921_v45, %s8723_s9 }
0x1ac5   :  { %v3923_v42 = vpop.f32.mrf.mxu2 }
0x1ac9   :  { %v3857_v6 = vpop.f32.mrf.mxu1 }
0x1aca   :  { %3861 = vst.msk [vmem:[#allocation3] sm:$0xff] %vm224_vm9, %v3857_v6 }
0x1acd   :  { %v4057_v50 = vpop.f32.mrf.mxu2 }
0x1ad1   :  { %v3859_v43 = vpop.f32.mrf.mxu1 }
0x1ad2   :  { %v6432_v43 = vld [vmem:[%s8659_s17 + $0x1] ss:$0 sm:$0xff] }
0x1ad5   :  { %v4059_v11 = vpop.f32.mrf.mxu2 }
0x1ad9   :  { %v3989_v35 = vpop.f32.mrf.mxu1 }
0x1ada   :  { %3994 = vrot.lane.b32.xlu1 %v3989_v35, %s8725_s24 }
0x1add   :  { %v4184_v47 = vpop.f32.mrf.mxu2 }
0x1ade   :  { %4189 = vrot.lane.b32.xlu0 %v4184_v47, %s8723_s9 }
0x1ae1   :  { %v3991_v44 = vpop.f32.mrf.mxu1 }
0x1ae2   :  { %4062 = vrot.lane.b32.xlu1 %v4057_v50, %s8716_s3 }
0x1ae5   :  { %v4186_v48 = vpop.f32.mrf.mxu2 }
0x1b07   :  { %v4120_v21 = vpop.f32.mrf.mxu1 }
0x1b08   :  { %4124 = vst.msk [vmem:[#allocation3 + $0x8] sm:$0xff] %vm224_vm9, %v4120_v21 }
0x1b0e   :  { %v4320_v49 = vpop.f32.mrf.mxu2 }
0x1b0f   :  { %v4122_v59 = vpop.f32.mrf.mxu1  ;;  %4325 = vrot.lane.b32.xlu2 %v4320_v49, %s8716_s3 }
0x1b16   :  { %v4322_v51 = vpop.f32.mrf.mxu2 }
0x1b17   :  { %v4252_v53 = vpop.f32.mrf.mxu1  ;;  %4527 = vrot.lane.b32.xlu2 %v4520_v46, %s8722_s0 }
0x1b18   :  { %4257 = vrot.lane.b32.xlu0 %v4252_v53, %s8725_s24  ;;  %v3927_v7 = vpop.permute.xlu2 %3926 }
0x1b19   :  { %3929 = vst.msk [vmem:[#allocation3] sm:$0xff] %vm346_vm11, %v3927_v7 }
0x1b1f   :  { %v4254_v54 = vpop.f32.mrf.mxu1  ;;  %4529 = vrot.lane.b32.xlu2 %v4522_v62, %s8722_s0 }
0x1b4c   :  { %v3995_v52 = vpop.permute.xlu1 %3994 }
0x1b4d   :  { %3997 = vst.msk [vmem:[#allocation3] sm:$0xff] %vm416_vm12, %v3995_v52 }
0x1b50   :  { %v4190_v18 = vpop.permute.xlu0 %4189 }
0x1b51   :  { %4192 = vst.msk [vmem:[#allocation3 + $0x8] sm:$0xff] %vm346_vm11, %v4190_v18 }
0x1b54   :  { %v4063_v27 = vpop.permute.xlu1 %4062 }
0x1b55   :  { %4065 = vst.msk [vmem:[#allocation3] sm:$0xff] %vm486_vm13, %v4063_v27 }
0x1b5c   :  { %v4329_v38 = vld [vmem:[#allocation3] sm:$0xff] }
0x1b69   :  { %v4326_v55 = vpop.permute.xlu2 %4325 }
0x1b71   :  { %v8303_v4 = vpop.permute.xlu2 %4527 }
0x1b72   :  { %4534 = vst.msk [vmem:[#allocation2 + $0x8] sm:$0xff] %vm87_vm0, %v8303_v4 }
0x1b79   :  { %v8307_v63 = vpop.permute.xlu2 %4529  ;;  %v4539_v60 = vld [vmem:[#allocation2 + $0x8] sm:$0xff] }
0x1b7a   :  { %4536 = vst.msk [vmem:[#allocation2 + $0x18] sm:$0xff] %vm87_vm0, %v8307_v63  ;;  %v8311_v32 = vpack.c.bf16 %v4539_v60, %v4539_v60 }
0x1b7c   :  { %v4580_v2 = vsel %vm260_vm8, %v8311_v32, 0 }
0x1b7d   :  { %4589 = vmatpush.bf16.msra.mxu0 %v4580_v2 }
0x1b8a   :  { %v4258_v3 = vpop.permute.xlu0 %4257 }
0x1b8b   :  { %4260 = vst.msk [vmem:[#allocation3 + $0x8] sm:$0xff] %vm416_vm12, %v4258_v3 }
0x1b8c   :  { %4328 = vst.msk [vmem:[#allocation3 + $0x8] sm:$0xff] %vm486_vm13, %v4326_v55 }
0x1b93   :  { %v4330_v8 = vld [vmem:[#allocation3 + $0x8] sm:$0xff] }
0x1b94   :  { %v4331_v9 = vpack.c.bf16 %v4330_v8, %v4329_v38 }
0x1b96   :  { %6085 = vmatmul.msk.bf16.vlgmr.msrb.gmra.mxu0 %vm87_vm0, %v4331_v9 }
0x1c13   :  { %v4377_v10 = vpop.f32.mrf.mxu0 }
0x1c14   :  { %v8319_v12 = vadd.f32 %v4377_v10, %v8071_v58  ;;  %v6389_v58 = vld [vmem:[%s8656_s14 + $0x38] sm:$0xff] }
0x1c15   :  { %4466 = vmatpush.bf16.msrb.mxu1 %v6389_v58  ;;  %v6139_v58 = vld [vmem:[%s8728_s29 + $0x8] sm:$0xff] }
0x1c16   :  { %v4386_v13 = vmul.f32 %v8319_v12, %v8319_v12 }
0x1c18   :  { %v4388_v0 = vsel %vm87_vm0, %v4386_v13, 0.0 }
0x1c19   :  { %4389 = vadd.xlane.f32.xlu0 %v4388_v0  ;;  %4467 = vmatpush.bf16.msrb.mxu1 %v6388_v19 }
0x1c1b   :  { %v4379_v14 = vpop.f32.mrf.mxu0 }
0x1c1c   :  { %v8325_v5 = vadd.f32 %v4379_v14, %v8077_v61  ;;  %v6387_v61 = vld [vmem:[%s8656_s14 + $0x28] sm:$0xff] }
0x1c1d   :  { %4468 = vmatpush.bf16.msrb.mxu1 %v6387_v61 }
0x1c1e   :  { %v4387_v15 = vmul.f32 %v8325_v5, %v8325_v5 }
0x1c20   :  { %v4391_v17 = vsel %vm87_vm0, %v4387_v15, 0.0  ;;  %v4541_v15 = vld [vmem:[%s8728_s29] sm:$0xff] }
0x1c21   :  { %4392 = vadd.xlane.f32.xlu1 %v4391_v17  ;;  %4469 = vmatpush.bf16.msrb.mxu1 %v6386_v22 }
0x1c8c   :  { %v4390_v20 = vpop.xlane.xlu0 %4389 }
0x1c8d   :  { %v4394_v1 = vmul.f32 %v4390_v20, %v6925_v34 }
0x1c8f   :  { %v4396_v23 = vadd.f32 1e-06, %v4394_v1 }
0x1c91   :  { %6646 = vrsqrt.f32 %v4396_v23  ;;  %vm4404_vm5 = vweird.f32 %v4396_v23 }
0x1c94   :  { %v4393_v40 = vpop.xlane.xlu1 %4392 }
0x1c95   :  { %v4395_v28 = vmul.f32 %v4393_v40, %v6925_v34 }
0x1c97   :  { %v6647_v25 = vpop.eup %6646  ;;  %v4397_v29 = vadd.f32 1e-06, %v4395_v28  ;;  %v6145_v28 = vld [vmem:[%s8728_s29 + $0x18] sm:$0xff] }
0x1c98   :  { %v4399_v26 = vmul.f32 %v6647_v25, %v4396_v23  ;;  %vm4405_vm4 = vweird.f32 %v6647_v25 }
0x1c99   :  { %6648 = vrsqrt.f32 %v4397_v29  ;;  %vm4406_vm6 = vmor %vm4404_vm5, %vm4405_vm4  ;;  %vm4414_vm15 = vweird.f32 %v4397_v29 }
0x1c9a   :  { %v4400_v30 = vmul.f32 %v6647_v25, %v4399_v26 }
0x1c9c   :  { %v4401_v31 = vmul.f32 0.5, %v4400_v30  ;;  %v6142_v30 = vld [vmem:[%s8728_s29 + $0x10] sm:$0xff] }
0x1c9e   :  { %v4402_v24 = vsub.f32 1.5, %v4401_v31 }
0x1c9f   :  { %v6649_v33 = vpop.eup %6648 }
0x1ca0   :  { %v4409_v37 = vmul.f32 %v6649_v33, %v4397_v29  ;;  %v4403_v39 = vmul.f32 %v6647_v25, %v4402_v24  ;;  %vm4415_vm7 = vweird.f32 %v6649_v33 }
0x1ca1   :  { %vm4416_vm1 = vmor %vm4414_vm15, %vm4415_vm7  ;;  %vm5441_vm15 = vcmask 50176  }
0x1ca2   :  { %v4410_v41 = vmul.f32 %v6649_v33, %v4409_v37  ;;  %v4407_v42 = vsel %vm4406_vm6, %v6647_v25, %v4403_v39 }
0x1ca3   :  { %v4418_v11 = vmul.f32 %v4407_v42, %v8319_v12 }
0x1ca4   :  { %v4411_v45 = vmul.f32 0.5, %v4410_v41  ;;  %v6151_v41 = vld [vmem:[%s8728_s29 + $0x28] sm:$0xff] }
0x1ca5   :  { %v4423_v44 = vmul.f32 %v6432_v43, %v4418_v11 }
0x1ca6   :  { %v4412_v6 = vsub.f32 1.5, %v4411_v45 }
0x1ca8   :  { %v4413_v50 = vmul.f32 %v6649_v33, %v4412_v6 }
0x1caa   :  { %v4417_v35 = vsel %vm4416_vm1, %v6649_v33, %v4413_v50  ;;  %v6148_v50 = vld [vmem:[%s8728_s29 + $0x20] sm:$0xff] }
0x1cab   :  { %v4419_v47 = vmul.f32 %v4417_v35, %v8325_v5 }
0x1cad   :  { %v4424_v48 = vmul.f32 %v6432_v43, %v4419_v47 }
0x1caf   :  { %v4425_v21 = vpack.c.bf16 %v4424_v48, %v4423_v44  ;;  %v6157_v48 = vld [vmem:[%s8728_s29 + $0x38] sm:$0xff] }
0x1cb1   :  { %6111 = vmatmul.msk.bf16.vlgmr.msrb.gmra.mxu1 %vm87_vm0, %v4425_v21 }
0x1d2e   :  { %v4471_v49 = vpop.f32.mrf.mxu1 }
0x1d2f   :  { %4476 = vst.msk [vmem:[#allocation2] sm:$0xff] %vm87_vm0, %v4471_v49 }
0x1d30   :  { %4533 = vst.msk [vmem:[#allocation2] sm:$0xff] %vm2864_vm14, %v8303_v4 }
0x1d36   :  { %v4473_v59 = vpop.f32.mrf.mxu1 }
0x1d37   :  { %4477 = vst.msk [vmem:[#allocation2 + $0x10] sm:$0xff] %vm87_vm0, %v4473_v59  ;;  %v4732_v46 = vld [vmem:[#allocation2] sm:$0xff] }
0x1d38   :  { %4535 = vst.msk [vmem:[#allocation2 + $0x10] sm:$0xff] %vm2864_vm14, %v8307_v63  ;;  %v4733_v51 = vpack.c.bf16 %v4732_v46, %v4732_v46  ;;  %v6154_v46 = vld [vmem:[%s8728_s29 + $0x30] sm:$0xff] }
0x1d3a   :  { %4740 = vrot.lane.b32.xlu1 %v4733_v51, %s8723_s9  ;;  %4672 = vrot.lane.b32.xlu0 %v4733_v51, %s8725_s24 }
0x1d3b   :  { %4543 = vrot.lane.b32.xlu2 %v4733_v51, %s8722_s0 }
0x1d3f   :  { %v4859_v53 = vld [vmem:[#allocation2 + $0x10] sm:$0xff] }
0x1d40   :  { %v4860_v7 = vpack.c.bf16 %v4859_v53, %v4859_v53 }
0x1d42   :  { %4865 = vrot.lane.b32.xlu1 %v4860_v7, %s8721_s5  ;;  %4806 = vrot.lane.b32.xlu0 %v4860_v7, %s8722_s0 }
0x1d43   :  { %4604 = vrot.lane.b32.xlu2 %v4733_v51, %s8716_s3 }
0x1d4a   :  { %4933 = vrot.lane.b32.xlu1 %v4860_v7, %s8724_s2  ;;  %4935 = vrot.lane.b32.xlu0 %v4860_v7, %s8725_s24 }
0x1d4b   :  { %4602 = vrot.lane.b32.xlu2 %v4733_v51, %s8721_s5 }
0x1d52   :  { %5001 = vrot.lane.b32.xlu0 %v4860_v7, %s8726_s25 }
0x1d53   :  { %4670 = vrot.lane.b32.xlu2 %v4733_v51, %s8724_s2 }
0x1d5b   :  { %4738 = vrot.lane.b32.xlu2 %v4733_v51, %s8726_s25 }
0x1d63   :  { %4867 = vrot.lane.b32.xlu2 %v4860_v7, %s8716_s3 }
0x1d6b   :  { %5003 = vrot.lane.b32.xlu2 %v4860_v7, %s8723_s9 }
0x1d95   :  { %v4544_v62 = vpop.permute.xlu2 %4543 }
0x1d96   :  { %v4549_v54 = vsel %vm224_vm9, %v4544_v62, 0 }
0x1d97   :  { %4558 = vmatpush.bf16.xpose.msra.mxu2 %v4549_v54 }
0x1d9d   :  { %v4605_v16 = vpop.permute.xlu2 %4604 }
0x1d9e   :  { %v4610_v52 = vsel %vm224_vm9, %v4605_v16, 0  ;;  %6137 = vmatmul.msk.bf16.vlgmr.msra.gmra.mxu2 %vm224_vm9, %v4733_v51 }
0x1d9f   :  { %4619 = vmatpush.bf16.xpose.msra.mxu1 %v4610_v52 }
0x1da5   :  { %v4603_v18 = vpop.permute.xlu2 %4602 }
0x1da6   :  { %6140 = vmatmul.msk.bf16.vlgmr.msra.gmra.mxu1 %vm224_vm9, %v4603_v18 }
0x1dac   :  { %v4741_v36 = vpop.permute.xlu1 %4740  ;;  %v4673_v27 = vpop.permute.xlu0 %4672 }
0x1dad   :  { %v4746_v56 = vsel %vm224_vm9, %v4741_v36, 0  ;;  %v4678_v57 = vsel %vm224_vm9, %v4673_v27, 0  ;;  %v4671_v55 = vpop.permute.xlu2 %4670 }
0x1dae   :  { %4687 = vmatpush.bf16.xpose.msrb.mxu2 %v4678_v57  ;;  %4755 = vmatpush.bf16.xpose.msrb.mxu1 %v4746_v56 }
0x1db4   :  { %v4807_v4 = vpop.permute.xlu0 %4806  ;;  %v4866_v9 = vpop.permute.xlu1 %4865 }
0x1db5   :  { %v4812_v63 = vsel %vm224_vm9, %v4807_v4, 0  ;;  %v4739_v60 = vpop.permute.xlu2 %4738  ;;  %6143 = vmatmul.msk.bf16.vlgmr.msrb.gmra.mxu2 %vm224_vm9, %v4671_v55 }
0x1db6   :  { %6146 = vmatmul.msk.bf16.vlgmr.msrb.gmra.mxu1 %vm224_vm9, %v4739_v60  ;;  %4821 = vmatpush.bf16.xpose.msra.mxu2 %v4812_v63 }
0x1dbc   :  { %v4936_v2 = vpop.permute.xlu0 %4935  ;;  %v4934_v0 = vpop.permute.xlu1 %4933 }
0x1dbd   :  { %v4941_v3 = vsel %vm224_vm9, %v4936_v2, 0  ;;  %v4868_v38 = vpop.permute.xlu2 %4867 }
0x1dbe   :  { %v4873_v8 = vsel %vm224_vm9, %v4868_v38, 0  ;;  %4950 = vmatpush.bf16.xpose.msrb.mxu2 %v4941_v3 }
0x1dbf   :  { %4882 = vmatpush.bf16.xpose.msra.mxu1 %v4873_v8 }
0x1dc4   :  { %v5002_v14 = vpop.permute.xlu0 %5001 }
0x1dc5   :  { %v5004_v10 = vpop.permute.xlu2 %5003  ;;  %6149 = vmatmul.msk.bf16.vlgmr.msra.gmra.mxu2 %vm224_vm9, %v4860_v7 }
0x1dc6   :  { %v5009_v13 = vsel %vm224_vm9, %v5004_v10, 0  ;;  %6152 = vmatmul.msk.bf16.vlgmr.msra.gmra.mxu1 %vm224_vm9, %v4866_v9 }
0x1dc7   :  { %5018 = vmatpush.bf16.xpose.msrb.mxu1 %v5009_v13 }
0x1dd5   :  { %6155 = vmatmul.msk.bf16.vlgmr.msrb.gmra.mxu2 %vm224_vm9, %v4934_v0 }
0x1dd6   :  { %6158 = vmatmul.msk.bf16.vlgmr.msrb.gmra.mxu1 %vm224_vm9, %v5002_v14 }
0x1e21   :  { %v4560_v17 = vpop.f32.mrf.mxu2 }
0x1e22   :  { %v4561_v19 = vadd.f32 %v4560_v17, %v4541_v15 }
0x1e23   :  { %v4621_v61 = vpop.f32.mrf.mxu1 }
0x1e24   :  { %v4622_v20 = vadd.f32 %v6139_v58, %v4621_v61  ;;  %v4564_v1 = vsel %vm244_vm10, %v4561_v19, -inf  ;;  %v4861_v61 = vld [vmem:[#allocation2 + $0x18] sm:$0xff] }
0x1e25   :  { %4565 = vmax.xlane.f32.xlu1 %v4564_v1  ;;  %v4862_v1 = vpack.c.bf16 %v4861_v61, %v4861_v61 }
0x1e26   :  { %v4625_v22 = vsel %vm244_vm10, %v4622_v20, -inf }
0x1e27   :  { %4626 = vmax.xlane.f32.xlu2 %v4625_v22 }
0x1e29   :  { %v4562_v23 = vpop.f32.mrf.mxu2 }
0x1e2b   :  { %v4623_v40 = vpop.f32.mrf.mxu1 }
0x1e33   :  { %v4757_v25 = vpop.f32.mrf.mxu1 }
0x1e34   :  { %v4758_v29 = vadd.f32 %v6145_v28, %v4757_v25 }
0x1e36   :  { %v4761_v26 = vsel %vm244_vm10, %v4758_v29, -inf }
0x1e37   :  { %4762 = vmax.xlane.f32.xlu0 %v4761_v26 }
0x1e38   :  { %v4689_v31 = vpop.f32.mrf.mxu2 }
0x1e39   :  { %v4690_v24 = vadd.f32 %v6142_v30, %v4689_v31 }
0x1e3b   :  { %v4759_v33 = vpop.f32.mrf.mxu1  ;;  %v4693_v37 = vsel %vm244_vm10, %v4690_v24, -inf }
0x1e3c   :  { %4694 = vmax.xlane.f32.xlu2 %v4693_v37 }
0x1e40   :  { %v4691_v39 = vpop.f32.mrf.mxu2 }
0x1e43   :  { %v4884_v45 = vpop.f32.mrf.mxu1 }
0x1e44   :  { %v8405_v42 = vadd.f32 %v6151_v41, %v4884_v45 }
0x1e46   :  { %v4888_v6 = vsel %vm244_vm10, %v8405_v42, -inf }
0x1e47   :  { %4889 = vmax.xlane.f32.xlu1 %v4888_v6 }
0x1e48   :  { %v4823_v43 = vpop.f32.mrf.mxu2 }
0x1e49   :  { %v4824_v11 = vadd.f32 %v6148_v50, %v4823_v43 }
0x1e4b   :  { %v4886_v35 = vpop.f32.mrf.mxu1  ;;  %v4827_v47 = vsel %vm244_vm10, %v4824_v11, -inf }
0x1e4c   :  { %4828 = vmax.xlane.f32.xlu2 %v4827_v47  ;;  %v4843_v47 = vsel %vm260_vm8, %v4862_v1, 0 }
0x1e50   :  { %v4825_v44 = vpop.f32.mrf.mxu2 }
0x1e53   :  { %v5020_v21 = vpop.f32.mrf.mxu1 }
0x1e54   :  { %v8416_v49 = vadd.f32 %v6157_v48, %v5020_v21 }
0x1e56   :  { %v5024_v59 = vsel %vm244_vm10, %v8416_v49, -inf }
0x1e57   :  { %5025 = vmax.xlane.f32.xlu0 %v5024_v59 }
0x1e58   :  { %v4952_v51 = vpop.f32.mrf.mxu2 }
0x1e59   :  { %v4953_v53 = vadd.f32 %v6154_v46, %v4952_v51 }
0x1e5b   :  { %v5022_v7 = vpop.f32.mrf.mxu1  ;;  %v4956_v62 = vsel %vm244_vm10, %v4953_v53, -inf }
0x1e5c   :  { %4957 = vmax.xlane.f32.xlu2 %v4956_v62 }
0x1e60   :  { %v4954_v54 = vpop.f32.mrf.mxu2 }
0x1e6b   :  { %4706 = vrot.lane.b32.xlu0 %v8311_v32, %s8724_s2 }
0x1e74   :  { %4774 = vrot.lane.b32.xlu2 %v8311_v32, %s8726_s25 }
0x1e98   :  { %v4566_v16 = vpop.xlane.xlu1 %4565 }
0x1e99   :  { %v4567_v52 = vsub.f32 %v4561_v19, %v4566_v16 }
0x1e9a   :  { %v4627_v18 = vpop.xlane.xlu2 %4626 }
0x1e9b   :  { %v4568_v36 = vmul.f32 1.442695, %v4567_v52  ;;  %v4628_v27 = vsub.f32 %v4622_v20, %v4627_v18 }
0x1e9d   :  { %6650 = vpow2.f32 %v4568_v36  ;;  %v4629_v56 = vmul.f32 1.442695, %v4628_v27 }
0x1e9f   :  { %6652 = vpow2.f32 %v4629_v56 }
0x1ea3   :  { %v6651_v57 = vpop.eup %6650 }
0x1ea4   :  { %v4570_v55 = vsel %vm244_vm10, %v6651_v57, 0.0 }
0x1ea5   :  { %v8429_v4 = vpop.eup %6652  ;;  %4571 = vadd.xlane.f32.xlu0 %v4570_v55 }
0x1ea6   :  { %v4631_v63 = vsel %vm244_vm10, %v8429_v4, 0.0 }
0x1ea7   :  { %4632 = vadd.xlane.f32.xlu1 %v4631_v63 }
0x1eaa   :  { %v4763_v60 = vpop.xlane.xlu0 %4762 }
0x1eab   :  { %v4764_v2 = vsub.f32 %v4758_v29, %v4763_v60 }
0x1ead   :  { %v4765_v3 = vmul.f32 1.442695, %v4764_v2 }
0x1eaf   :  { %6654 = vpow2.f32 %v4765_v3  ;;  %v4695_v38 = vpop.xlane.xlu2 %4694 }
0x1eb0   :  { %v4696_v8 = vsub.f32 %v4690_v24, %v4695_v38 }
0x1eb2   :  { %v4697_v9 = vmul.f32 1.442695, %v4696_v8 }
0x1eb4   :  { %6656 = vpow2.f32 %v4697_v9 }
0x1eb5   :  { %v8433_v10 = vpop.eup %6654 }
0x1eb6   :  { %v4767_v13 = vsel %vm244_vm10, %v8433_v10, 0.0 }
0x1eb7   :  { %4768 = vadd.xlane.f32.xlu2 %v4767_v13 }
0x1eba   :  { %v8437_v0 = vpop.eup %6656  ;;  %v4890_v22 = vpop.xlane.xlu1 %4889 }
0x1ebb   :  { %v4699_v14 = vsel %vm244_vm10, %v8437_v0, 0.0  ;;  %v4891_v40 = vsub.f32 %v8405_v42, %v4890_v22 }
0x1ebc   :  { %4700 = vadd.xlane.f32.xlu0 %v4699_v14 }
0x1ebd   :  { %v4892_v28 = vmul.f32 1.442695, %v4891_v40 }
0x1ebf   :  { %v4829_v15 = vpop.xlane.xlu2 %4828 }
0x1ec0   :  { %4638 = vrot.lane.b32.xlu1 %v8311_v32, %s8721_s5  ;;  %v4830_v17 = vsub.f32 %v4824_v11, %v4829_v15 }
0x1ec2   :  { %v4831_v58 = vmul.f32 1.442695, %v4830_v17 }
0x1ec4   :  { %6658 = vpow2.f32 %v4831_v58 }
0x1ec5   :  { %6660 = vpow2.f32 %v4892_v28 }
0x1eca   :  { %v8443_v19 = vpop.eup %6658  ;;  %v5026_v23 = vpop.xlane.xlu0 %5025 }
0x1ecb   :  { %v4833_v20 = vsel %vm244_vm10, %v8443_v19, 0.0  ;;  %v6661_v31 = vpop.eup %6660  ;;  %v5027_v24 = vsub.f32 %v8416_v49, %v5026_v23 }
0x1ecc   :  { %4834 = vadd.xlane.f32.xlu0 %v4833_v20  ;;  %v4894_v33 = vsel %vm244_vm10, %v6661_v31, 0.0 }
0x1ecd   :  { %v5028_v37 = vmul.f32 1.442695, %v5027_v24 }
0x1ecf   :  { %4901 = vrot.lane.b32.xlu2 %v4862_v1, %s8721_s5  ;;  %v4958_v25 = vpop.xlane.xlu2 %4957 }
0x1ed0   :  { %v4959_v26 = vsub.f32 %v4953_v53, %v4958_v25 }
0x1ed2   :  { %v4960_v30 = vmul.f32 1.442695, %v4959_v26 }
0x1ed4   :  { %6662 = vpow2.f32 %v4960_v30 }
0x1ed5   :  { %6664 = vpow2.f32 %v5028_v37 }
0x1ed7   :  { %v4775_v11 = vpop.permute.xlu2 %4774 }
0x1ed8   :  { %v4780_v53 = vsel %vm260_vm8, %v4775_v11, 0  ;;  %v6395_v11 = vld [vmem:[%s8658_s16 + $0x28] sm:$0xff] }
0x1eda   :  { %v8453_v39 = vpop.eup %6662 }
0x1edb   :  { %v4962_v41 = vsel %vm244_vm10, %v8453_v39, 0.0  ;;  %v6665_v45 = vpop.eup %6664 }
0x1edc   :  { %v5030_v42 = vsel %vm244_vm10, %v6665_v45, 0.0 }
0x1edd   :  { %v4707_v32 = vpop.permute.xlu0 %4706 }
0x1ede   :  { %v4712_v29 = vsel %vm260_vm8, %v4707_v32, 0 }
0x1edf   :  { %4721 = vmatpush.bf16.msrb.mxu0 %v4712_v29 }
0x1ee0   :  { %5037 = vrot.lane.b32.xlu0 %v4862_v1, %s8726_s25 }
0x1eea   :  { %4895 = vadd.xlane.f32.xlu1 %v4894_v33 }
0x1ef2   :  { %4963 = vadd.xlane.f32.xlu1 %v4962_v41 }
0x1ef8   :  { %5031 = vadd.xlane.f32.xlu2 %v5030_v42 }
0x1f0b   :  { %4969 = vrot.lane.b32.xlu1 %v4862_v1, %s8724_s2 }
0x1f18   :  { %v4572_v6 = vpop.xlane.xlu0 %4571 }
0x1f19   :  { %6666 = vrcp.f32 %v4572_v6 }
0x1f1a   :  { %v4633_v44 = vpop.xlane.xlu1 %4632 }
0x1f1b   :  { %6668 = vrcp.f32 %v4633_v44 }
0x1f1f   :  { %v6667_v50 = vpop.eup %6666 }
0x1f20   :  { %v4574_v43 = vmul.f32 %v6667_v50, %v6651_v57  ;;  %v6397_v50 = vld [vmem:[%s8658_s16 + $0x38] sm:$0xff] }
0x1f21   :  { %v6669_v21 = vpop.eup %6668  ;;  %5106 = vmatpush.bf16.msra.mxu2 %v6397_v50 }
0x1f22   :  { %v4575_v35 = vpack.c.bf16 %v4574_v43, %v4574_v43  ;;  %v4635_v59 = vmul.f32 %v6669_v21, %v8429_v4  ;;  %v6396_v43 = vld [vmem:[%s8658_s16 + $0x30] sm:$0xff] }
0x1f24   :  { %6138 = vmatmul.msk.bf16.vlgmr.msra.gmra.mxu0 %vm244_vm10, %v4575_v35  ;;  %v4636_v62 = vpack.c.bf16 %v4635_v59, %v4635_v59  ;;  %v6394_v35 = vld [vmem:[%s8658_s16 + $0x20] sm:$0xff] }
0x1f25   :  { %4852 = vmatpush.bf16.msra.mxu0 %v4843_v47  ;;  %5107 = vmatpush.bf16.msra.mxu2 %v6396_v43 }
0x1f29   :  { %5108 = vmatpush.bf16.msra.mxu2 %v6395_v11 }
0x1f2a   :  { %v4769_v48 = vpop.xlane.xlu2 %4768 }
0x1f2d   :  { %5109 = vmatpush.bf16.msra.mxu2 %v6394_v35 }
0x1f2f   :  { %v4701_v49 = vpop.xlane.xlu0 %4700 }
0x1f30   :  { %6670 = vrcp.f32 %v4701_v49 }
0x1f31   :  { %6672 = vrcp.f32 %v4769_v48 }
0x1f32   :  { %v4639_v46 = vpop.permute.xlu1 %4638  ;;  %v4902_v7 = vpop.permute.xlu2 %4901 }
0x1f33   :  { %v4644_v51 = vsel %vm260_vm8, %v4639_v46, 0  ;;  %v4907_v52 = vsel %vm260_vm8, %v4902_v7, 0 }
0x1f34   :  { %4653 = vmatpush.bf16.msra.mxu3 %v4644_v51 }
0x1f36   :  { %v6671_v54 = vpop.eup %6670 }
0x1f37   :  { %v4703_v16 = vmul.f32 %v6671_v54, %v8437_v0  ;;  %6141 = vmatmul.msk.bf16.vlgmr.msra.gmra.mxu3 %vm244_vm10, %v4636_v62  ;;  %v6673_v36 = vpop.eup %6672 }
0x1f38   :  { %4789 = vmatpush.bf16.msrb.mxu3 %v4780_v53  ;;  %v4771_v56 = vmul.f32 %v6673_v36, %v8433_v10  ;;  %v6404_v36 = vld [vmem:[%s8660_s18 + $0x74] sm:$0xf] }
0x1f39   :  { %v4704_v18 = vpack.c.bf16 %v4703_v16, %v4703_v16 }
0x1f3a   :  { %v4772_v57 = vpack.c.bf16 %v4771_v56, %v4771_v56 }
0x1f3b   :  { %6144 = vmatmul.msk.bf16.vlgmr.msrb.gmra.mxu0 %vm244_vm10, %v4704_v18  ;;  %v6405_v18 = vld [vmem:[%s8660_s18 + $0x74] sm:$0xf0] }
0x1f3c   :  { %4916 = vmatpush.bf16.msra.mxu3 %v4907_v52 }
0x1f3f   :  { %v4835_v27 = vpop.xlane.xlu0 %4834 }
0x1f40   :  { %6674 = vrcp.f32 %v4835_v27  ;;  %v6222_v27 = vld [vmem:[%s8660_s18 + $0x78] sm:$0xf0] }
0x1f41   :  { %v6225_v56 = vor.u32 %v6404_v36, %v6222_v27 }
0x1f43   :  { %5230 = vmatpush.bf16.msra.mxu1 %v6225_v56 }
0x1f46   :  { %v6675_v55 = vpop.eup %6674 }
0x1f47   :  { %v4837_v4 = vmul.f32 %v6675_v55, %v8443_v19  ;;  %6147 = vmatmul.msk.bf16.vlgmr.msrb.gmra.mxu3 %vm244_vm10, %v4772_v57  ;;  %v6212_v57 = vld [vmem:[%s8660_s18 + $0x60] sm:$0xf]  ;;  %v6403_v55 = vld [vmem:[%s8660_s18 + $0x64] sm:$0xf0] }
0x1f49   :  { %v4838_v63 = vpack.c.bf16 %v4837_v4, %v4837_v4  ;;  %v6402_v4 = vld [vmem:[%s8660_s18 + $0x64] sm:$0xf] }
0x1f4b   :  { %6150 = vmatmul.msk.bf16.vlgmr.msra.gmra.mxu0 %vm244_vm10, %v4838_v63  ;;  %v6213_v63 = vor.u32 %v6403_v55, %v6212_v57 }
0x1f52   :  { %v5038_v60 = vpop.permute.xlu0 %5037 }
0x1f53   :  { %v5043_v2 = vsel %vm260_vm8, %v5038_v60, 0  ;;  %v6214_v60 = vld [vmem:[%s8660_s18 + $0x68] sm:$0xf0] }
0x1f54   :  { %5052 = vmatpush.bf16.msrb.mxu3 %v5043_v2  ;;  %v6217_v2 = vor.u32 %v6402_v4, %v6214_v60 }
0x1f56   :  { %5231 = vmatpush.bf16.msra.mxu1 %v6217_v2 }
0x1f5d   :  { %v4896_v3 = vpop.xlane.xlu1 %4895 }
0x1f5e   :  { %6676 = vrcp.f32 %v4896_v3  ;;  %v6204_v3 = vld [vmem:[%s8660_s18 + $0x50] sm:$0xf] }
0x1f64   :  { %v6677_v38 = vpop.eup %6676 }
0x1f65   :  { %v4898_v8 = vmul.f32 %v6677_v38, %v6661_v31  ;;  %v4964_v13 = vpop.xlane.xlu1 %4963  ;;  %v6401_v38 = vld [vmem:[%s8660_s18 + $0x54] sm:$0xf0] }
0x1f67   :  { %v4899_v9 = vpack.c.bf16 %v4898_v8, %v4898_v8  ;;  %v6400_v8 = vld [vmem:[%s8660_s18 + $0x54] sm:$0xf] }
0x1f69   :  { %6153 = vmatmul.msk.bf16.vlgmr.msra.gmra.mxu3 %vm244_vm10, %v4899_v9  ;;  %v6205_v9 = vor.u32 %v6401_v38, %v6204_v3 }
0x1f6b   :  { %v5032_v10 = vpop.xlane.xlu2 %5031 }
0x1f6c   :  { %6678 = vrcp.f32 %v5032_v10  ;;  %v6206_v10 = vld [vmem:[%s8660_s18 + $0x58] sm:$0xf0] }
0x1f6d   :  { %6680 = vrcp.f32 %v4964_v13  ;;  %v6209_v13 = vor.u32 %v6400_v8, %v6206_v10 }
0x1f6f   :  { %5232 = vmatpush.bf16.msra.mxu1 %v6209_v13 }
0x1f72   :  { %v6679_v0 = vpop.eup %6678 }
0x1f73   :  { %v5034_v14 = vmul.f32 %v6679_v0, %v6665_v45  ;;  %v6681_v17 = vpop.eup %6680 }
0x1f74   :  { %v4966_v58 = vmul.f32 %v6681_v17, %v8453_v39  ;;  %v6398_v17 = vld [vmem:[%s8660_s18 + $0x44] sm:$0xf] }
0x1f75   :  { %v5035_v15 = vpack.c.bf16 %v5034_v14, %v5034_v14  ;;  %v6196_v14 = vld [vmem:[%s8660_s18 + $0x40] sm:$0xf] }
0x1f76   :  { %v4967_v20 = vpack.c.bf16 %v4966_v58, %v4966_v58 }
0x1f79   :  { %6159 = vmatmul.msk.bf16.vlgmr.msrb.gmra.mxu3 %vm244_vm10, %v5035_v15  ;;  %v6399_v15 = vld [vmem:[%s8660_s18 + $0x44] sm:$0xf0] }
0x1f7d   :  { %v4970_v19 = vpop.permute.xlu1 %4969 }
0x1f7e   :  { %v4975_v61 = vsel %vm260_vm8, %v4970_v19, 0  ;;  %v6197_v19 = vor.u32 %v6399_v15, %v6196_v14 }
0x1f7f   :  { %4984 = vmatpush.bf16.msrb.mxu0 %v4975_v61  ;;  %v6198_v61 = vld [vmem:[%s8660_s18 + $0x48] sm:$0xf0] }
0x1f82   :  { %6156 = vmatmul.msk.bf16.vlgmr.msrb.gmra.mxu0 %vm244_vm10, %v4967_v20  ;;  %v6201_v20 = vor.u32 %v6398_v17, %v6198_v61 }
0x1f84   :  { %5233 = vmatpush.bf16.msra.mxu1 %v6201_v20 }
0x1fa1   :  { %v4591_v1 = vpop.f32.mrf.mxu0 }
0x1fa2   :  { %4595 = vst.msk [vmem:[#allocation3] sm:$0xff] %vm224_vm9, %v4591_v1 }
0x1fa9   :  { %v4593_v22 = vpop.f32.mrf.mxu0 }
0x1fb8   :  { %v4723_v23 = vpop.f32.mrf.mxu0 }
0x1fb9   :  { %4728 = vrot.lane.b32.xlu0 %v4723_v23, %s8725_s24 }
0x1fba   :  { %v4655_v40 = vpop.f32.mrf.mxu3 }
0x1fbb   :  { %4660 = vrot.lane.b32.xlu2 %v4655_v40, %s8723_s9 }
0x1fc0   :  { %v4725_v28 = vpop.f32.mrf.mxu0 }
0x1fc2   :  { %v4657_v25 = vpop.f32.mrf.mxu3 }
0x1fc8   :  { %v4854_v32 = vpop.f32.mrf.mxu0 }
0x1fc9   :  { %4858 = vst.msk [vmem:[#allocation3 + $0x8] sm:$0xff] %vm224_vm9, %v4854_v32 }
0x1fca   :  { %v4791_v29 = vpop.f32.mrf.mxu3 }
0x1fcb   :  { %4796 = vrot.lane.b32.xlu2 %v4791_v29, %s8716_s3 }
0x1fd0   :  { %v4856_v26 = vpop.f32.mrf.mxu0 }
0x1fd2   :  { %v4793_v30 = vpop.f32.mrf.mxu3 }
0x1fec   :  { %v4918_v31 = vpop.f32.mrf.mxu3 }
0x1fed   :  { %4923 = vrot.lane.b32.xlu0 %v4918_v31, %s8723_s9  ;;  %s8731_s9 = sld [smem:[#allocation21_spill]] }
0x1ff4   :  { %v4920_v24 = vpop.f32.mrf.mxu3 }
0x1ffc   :  { %v5054_v33 = vpop.f32.mrf.mxu3 }
0x1ffd   :  { %5059 = vrot.lane.b32.xlu0 %v5054_v33, %s8716_s3 }
0x1fff   :  { %v4986_v37 = vpop.f32.mrf.mxu0 }
0x2000   :  { %4991 = vrot.lane.b32.xlu1 %v4986_v37, %s8725_s24 }
0x2004   :  { %v5056_v39 = vpop.f32.mrf.mxu3 }
0x2007   :  { %v4988_v41 = vpop.f32.mrf.mxu0 }
0x2015   :  { %v4661_v45 = vpop.permute.xlu2 %4660 }
0x2016   :  { %4663 = vst.msk [vmem:[#allocation3] sm:$0xff] %vm346_vm11, %v4661_v45 }
0x2025   :  { %v4797_v6 = vpop.permute.xlu2 %4796 }
0x202b   :  { %v4729_v42 = vpop.permute.xlu0 %4728 }
0x202c   :  { %4731 = vst.msk [vmem:[#allocation3] sm:$0xff] %vm416_vm12, %v4729_v42  ;;  %v6433_v42 = vld [vmem:[%s8729_s10 + $0x1] ss:$0 sm:$0xff] }
0x202d   :  { %4799 = vst.msk [vmem:[#allocation3] sm:$0xff] %vm486_vm13, %v4797_v6 }
0x2034   :  { %v5063_v21 = vld [vmem:[#allocation3] sm:$0xff] }
0x205f   :  { %v4924_v47 = vpop.permute.xlu0 %4923 }
0x2060   :  { %4926 = vst.msk [vmem:[#allocation3 + $0x8] sm:$0xff] %vm346_vm11, %v4924_v47 }
0x206f   :  { %v5060_v48 = vpop.permute.xlu0 %5059 }
0x2072   :  { %v4992_v44 = vpop.permute.xlu1 %4991 }
0x2073   :  { %4994 = vst.msk [vmem:[#allocation3 + $0x8] sm:$0xff] %vm416_vm12, %v4992_v44  ;;  %v6413_v44 = vld [vmem:[%s8730_s20 + $0x78] sm:$0xff] }
0x2074   :  { %5062 = vst.msk [vmem:[#allocation3 + $0x8] sm:$0xff] %vm486_vm13, %v5060_v48  ;;  %5326 = vmatpush.bf16.msra.mxu3 %v6413_v44  ;;  %v6412_v48 = vld [vmem:[%s8730_s20 + $0x70] sm:$0xff] }
0x2078   :  { %5327 = vmatpush.bf16.msra.mxu3 %v6412_v48 }
0x207b   :  { %v5064_v49 = vld [vmem:[#allocation3 + $0x8] sm:$0xff] }
0x207c   :  { %v5065_v59 = vpack.c.bf16 %v5064_v49, %v5063_v21  ;;  %v6411_v21 = vld [vmem:[%s8730_s20 + $0x68] sm:$0xff]  ;;  %v6410_v49 = vld [vmem:[%s8730_s20 + $0x60] sm:$0xff] }
0x207d   :  { %5328 = vmatpush.bf16.msra.mxu3 %v6411_v21 }
0x207e   :  { %6184 = vmatmul.msk.bf16.vlgmr.msra.gmra.mxu2 %vm87_vm0, %v5065_v59  ;;  %v6409_v59 = vld [vmem:[%s8730_s20 + $0x58] sm:$0xff] }
0x2081   :  { %5329 = vmatpush.bf16.msra.mxu3 %v6410_v49 }
0x2085   :  { %5330 = vmatpush.bf16.msra.mxu3 %v6409_v59 }
0x2101   :  { %v5111_v46 = vpop.f32.mrf.mxu2 }
0x2102   :  { %v8506_v51 = vadd.f32 %v5111_v46, %v8319_v12  ;;  %v6220_v12 = vld [vmem:[%s8660_s18 + $0x70] sm:$0xf] }
0x2103   :  { %v6408_v46 = vld [vmem:[%s8730_s20 + $0x50] sm:$0xff] }
0x2104   :  { %v5120_v53 = vmul.f32 %v8506_v51, %v8506_v51  ;;  %5331 = vmatpush.bf16.msra.mxu3 %v6408_v46 }
0x2106   :  { %v5122_v7 = vsel %vm87_vm0, %v5120_v53, 0.0  ;;  %v6407_v53 = vld [vmem:[%s8730_s20 + $0x48] sm:$0xff] }
0x2107   :  { %5123 = vadd.xlane.f32.xlu1 %v5122_v7 }
0x2108   :  { %5332 = vmatpush.bf16.msra.mxu3 %v6407_v53  ;;  %v6434_v53 = vld [vmem:[%s8732_s15] ss:$0 sm:$0xff] }
0x2109   :  { %v5113_v62 = vpop.f32.mrf.mxu2 }
0x210a   :  { %v8512_v54 = vadd.f32 %v5113_v62, %v8325_v5  ;;  %v6221_v5 = vor.u32 %v6405_v18, %v6220_v12  ;;  %v6406_v62 = vld [vmem:[%s8730_s20 + $0x40] sm:$0xff]  ;;  %s5450_s20 = sshll.u32 %s8735_s22, 4  ;;  %s5451_s20 = int_to_ptr.hbm [resolvable:$true] %s5450_s20 }
0x210c   :  { %v5121_v16 = vmul.f32 %v8512_v54, %v8512_v54  ;;  %5216 = vmatpush.bf16.msra.mxu0 %v6221_v5  ;;  %5333 = vmatpush.bf16.msra.mxu3 %v6406_v62 }
0x210e   :  { %v5125_v52 = vsel %vm87_vm0, %v5121_v16, 0.0 }
0x210f   :  { %5126 = vadd.xlane.f32.xlu2 %v5125_v52 }
0x2110   :  { %5217 = vmatpush.bf16.msra.mxu0 %v6213_v63 }
0x2114   :  { %5218 = vmatpush.bf16.msra.mxu0 %v6205_v9 }
0x2118   :  { %5219 = vmatpush.bf16.msra.mxu0 %v6197_v19 }
0x217a   :  { %v5124_v0 = vpop.xlane.xlu1 %5123 }
0x217b   :  { %v5128_v58 = vmul.f32 %v5124_v0, %v6925_v34 }
0x217d   :  { %v5130_v1 = vadd.f32 1e-06, %v5128_v58 }
0x217f   :  { %6682 = vrsqrt.f32 %v5130_v1  ;;  %vm5138_vm10 = vweird.f32 %v5130_v1 }
0x2182   :  { %v5127_v22 = vpop.xlane.xlu2 %5126 }
0x2183   :  { %v5129_v23 = vmul.f32 %v5127_v22, %v6925_v34 }
0x2185   :  { %v6683_v40 = vpop.eup %6682  ;;  %v5131_v28 = vadd.f32 1e-06, %v5129_v23 }
0x2186   :  { %v5133_v25 = vmul.f32 %v6683_v40, %v5130_v1  ;;  %vm5139_vm8 = vweird.f32 %v6683_v40 }
0x2187   :  { %6684 = vrsqrt.f32 %v5131_v28  ;;  %vm5140_vm11 = vmor %vm5138_vm10, %vm5139_vm8  ;;  %vm5148_vm13 = vweird.f32 %v5131_v28 }
0x2188   :  { %v5134_v32 = vmul.f32 %v6683_v40, %v5133_v25 }
0x218a   :  { %v5135_v29 = vmul.f32 0.5, %v5134_v32 }
0x218c   :  { %v5136_v26 = vsub.f32 1.5, %v5135_v29  ;;  %v5412_v29 = vld [vmem:[%s8731_s9 + $0x30] sm:$0xff] }
0x218d   :  { %v6685_v30 = vpop.eup %6684 }
0x218e   :  { %v5143_v31 = vmul.f32 %v6685_v30, %v5131_v28  ;;  %v5137_v24 = vmul.f32 %v6683_v40, %v5136_v26  ;;  %vm5149_vm12 = vweird.f32 %v6685_v30 }
0x218f   :  { %vm5150_vm14 = vmor %vm5148_vm13, %vm5149_vm12 }
0x2190   :  { %v5144_v33 = vmul.f32 %v6685_v30, %v5143_v31  ;;  %v5141_v39 = vsel %vm5140_vm11, %v6683_v40, %v5137_v24  ;;  %v5410_v31 = vld [vmem:[%s8731_s9 + $0x20] sm:$0xff] }
0x2191   :  { %v5152_v6 = vmul.f32 %v5141_v39, %v8506_v51  ;;  %v5409_v39 = vld [vmem:[%s8731_s9 + $0x18] sm:$0xff] }
0x2192   :  { %v5145_v37 = vmul.f32 0.5, %v5144_v33 }
0x2193   :  { %v5157_v11 = vmul.f32 %v6433_v42, %v5152_v6  ;;  %v5406_v6 = vld [vmem:[%s8731_s9] sm:$0xff] }
0x2194   :  { %v5146_v41 = vsub.f32 1.5, %v5145_v37 }
0x2196   :  { %v5147_v45 = vmul.f32 %v6685_v30, %v5146_v41 }
0x2198   :  { %v5151_v50 = vsel %vm5150_vm14, %v6685_v30, %v5147_v45 }
0x2199   :  { %v5153_v43 = vmul.f32 %v5151_v50, %v8512_v54 }
0x219b   :  { %v5158_v35 = vmul.f32 %v6433_v42, %v5153_v43  ;;  %v5407_v42 = vld [vmem:[%s8731_s9 + $0x8] sm:$0xff] }
0x219d   :  { %v5159_v47 = vpack.c.bf16 %v5158_v35, %v5157_v11 }
0x219f   :  { %6226 = vmatmul.msk.bf16.vlgmr.msra.gmra.mxu0 %vm87_vm0, %v5159_v47  ;;  %6227 = vmatmul.msk.bf16.vlgmr.msra.gmra.mxu1 %vm87_vm0, %v5159_v47 }
0x221c   :  { %v5221_v7 = vpop.f32.mrf.mxu0  ;;  %v5235_v2 = vpop.f32.mrf.mxu1 }
0x221d   :  { %v5240_v16 = vmul.f32 %v5221_v7, %v5221_v7 }
0x221f   :  { %v5242_v52 = vmul.f32 %v5240_v16, %v5221_v7 }
0x2221   :  { %v5244_v12 = vmul.f32 0.044715, %v5242_v52  ;;  %v5382_v52 = vld [vmem:[%s8733_s11] sm:$0x3] }
0x2223   :  { %v5246_v18 = vadd.f32 %v5244_v12, %v5221_v7 }
0x2224   :  { %v5223_v36 = vpop.f32.mrf.mxu0  ;;  %v5237_v0 = vpop.f32.mrf.mxu1 }
0x2225   :  { %v5248_v5 = vmul.f32 0.7978846, %v5246_v18  ;;  %v5241_v27 = vmul.f32 %v5223_v36, %v5223_v36  ;;  %v6435_v18 = vld [vmem:[%s8734_s12] ss:$0 sm:$0xff] }
0x2227   :  { %6686 = vtanh.f32 %v5248_v5  ;;  %v5243_v56 = vmul.f32 %v5241_v27, %v5223_v36 }
0x2229   :  { %v5245_v57 = vmul.f32 0.044715, %v5243_v56 }
0x222b   :  { %v5247_v55 = vadd.f32 %v5245_v57, %v5223_v36 }
0x222d   :  { %v6687_v4 = vpop.eup %6686  ;;  %v5249_v63 = vmul.f32 0.7978846, %v5247_v55 }
0x222e   :  { %v5252_v60 = vadd.f32 1.0, %v6687_v4 }
0x222f   :  { %6688 = vtanh.f32 %v5249_v63 }
0x2230   :  { %v5254_v3 = vmul.f32 0.5, %v5252_v60 }
0x2232   :  { %v5256_v9 = vmul.f32 %v5254_v3, %v5221_v7 }
0x2234   :  { %v5258_v14 = vmul.f32 %v5256_v9, %v5235_v2 }
0x2235   :  { %v6689_v38 = vpop.eup %6688 }
0x2236   :  { %v5253_v8 = vadd.f32 1.0, %v6689_v38 }
0x2238   :  { %v5255_v10 = vmul.f32 0.5, %v5253_v8 }
0x223a   :  { %v5257_v13 = vmul.f32 %v5255_v10, %v5223_v36 }
0x223c   :  { %v5259_v15 = vmul.f32 %v5257_v13, %v5237_v0 }
0x223e   :  { %v5260_v17 = vpack.c.bf16 %v5259_v15, %v5258_v14 }
0x2240   :  { %5334 = vmatmul.bf16.vlgmr.msra.gmra.mxu3 %v5260_v17 }
0x22c3   :  { %v5335_v58 = vpop.f32.mrf.mxu3 }
0x22c4   :  { %v5340_v19 = vadd.f32 %v5335_v58, %v8506_v51  ;;  %v5413_v51 = vld [vmem:[%s8731_s9 + $0x38] sm:$0xff] }
0x22c5   :  { %5429 = vmatpush.msrb.mxu0 %v5413_v51 }
0x22c6   :  { %v5343_v61 = vmul.f32 %v5340_v19, %v5340_v19 }
0x22c7   :  { %5430 = vmatpush.msrb.mxu0 %v5412_v29 }
0x22c8   :  { %v5345_v20 = vsel %vm87_vm0, %v5343_v61, 0.0 }
0x22c9   :  { %5346 = vadd.xlane.f32.xlu0 %v5345_v20 }
0x22cb   :  { %v5337_v1 = vpop.f32.mrf.mxu3 }
0x22cc   :  { %v5341_v22 = vadd.f32 %v5337_v1, %v8512_v54  ;;  %v5411_v54 = vld [vmem:[%s8731_s9 + $0x28] sm:$0xff] }
0x22cd   :  { %5431 = vmatpush.msrb.mxu0 %v5411_v54 }
0x22ce   :  { %v5344_v23 = vmul.f32 %v5341_v22, %v5341_v22 }
0x22cf   :  { %5432 = vmatpush.msrb.mxu0 %v5410_v31 }
0x22d0   :  { %v5348_v40 = vsel %vm87_vm0, %v5344_v23, 0.0 }
0x22d1   :  { %5349 = vadd.xlane.f32.xlu1 %v5348_v40  ;;  %5433 = vmatpush.msrb.mxu0 %v5409_v39 }
0x233c   :  { %v5347_v28 = vpop.xlane.xlu0 %5346 }
0x233d   :  { %v5351_v25 = vmul.f32 %v5347_v28, %v6925_v34 }
0x233f   :  { %v5353_v32 = vadd.f32 1e-06, %v5351_v25 }
0x2341   :  { %6690 = vrsqrt.f32 %v5353_v32  ;;  %vm5361_vm3 = vweird.f32 %v5353_v32 }
0x2344   :  { %v5350_v26 = vpop.xlane.xlu1 %5349 }
0x2345   :  { %v5352_v30 = vmul.f32 %v5350_v26, %v6925_v34  ;;  %v5408_v34 = vld [vmem:[%s8731_s9 + $0x10] sm:$0xff] }
0x2346   :  { %5434 = vmatpush.msrb.mxu0 %v5408_v34 }
0x2347   :  { %v6691_v24 = vpop.eup %6690  ;;  %v5354_v33 = vadd.f32 1e-06, %v5352_v30 }
0x2348   :  { %v5356_v37 = vmul.f32 %v6691_v24, %v5353_v32  ;;  %5435 = vmatpush.msrb.mxu0 %v5407_v42  ;;  %vm5362_vm2 = vweird.f32 %v6691_v24 }
0x2349   :  { %6692 = vrsqrt.f32 %v5354_v33  ;;  %vm5363_vm5 = vmor %vm5361_vm3, %vm5362_vm2  ;;  %vm5371_vm6 = vweird.f32 %v5354_v33 }
0x234a   :  { %v5357_v41 = vmul.f32 %v6691_v24, %v5356_v37  ;;  %5436 = vmatpush.msrb.mxu0 %v5406_v6 }
0x234c   :  { %v5358_v45 = vmul.f32 0.5, %v5357_v41 }
0x234e   :  { %v5359_v43 = vsub.f32 1.5, %v5358_v45 }
0x234f   :  { %v6693_v50 = vpop.eup %6692 }
0x2350   :  { %v5366_v11 = vmul.f32 %v6693_v50, %v5354_v33  ;;  %v5360_v47 = vmul.f32 %v6691_v24, %v5359_v43  ;;  %vm5372_vm4 = vweird.f32 %v6693_v50 }
0x2351   :  { %vm5373_vm7 = vmor %vm5371_vm6, %vm5372_vm4 }
0x2352   :  { %v5367_v35 = vmul.f32 %v6693_v50, %v5366_v11  ;;  %v5364_v49 = vsel %vm5363_vm5, %v6691_v24, %v5360_v47 }
0x2353   :  { %v5375_v7 = vmul.f32 %v5364_v49, %v5340_v19 }
0x2354   :  { %v5368_v44 = vmul.f32 0.5, %v5367_v35 }
0x2355   :  { %v5380_v16 = vmul.f32 %v6434_v53, %v5375_v7 }
0x2356   :  { %v5369_v48 = vsub.f32 1.5, %v5368_v44 }
0x2358   :  { %v5370_v21 = vmul.f32 %v6693_v50, %v5369_v48 }
0x235a   :  { %v5374_v59 = vsel %vm5373_vm7, %v6693_v50, %v5370_v21 }
0x235b   :  { %v5376_v46 = vmul.f32 %v5374_v59, %v5341_v22 }
0x235d   :  { %v5381_v62 = vmul.f32 %v6434_v53, %v5376_v46 }
0x235f   :  { %5400 = vmatpush.msrb.mxu2 %v5381_v62 }
0x2361   :  { %5401 = vmatpush.msrb.mxu2 %v5380_v16 }
0x2362   :  { %6276 = vmatmul.msk.f32.vlgmr.msrb.gmra.mxu2 %vm224_vm9, %v5382_v52 }
0x23e5   :  { %v5403_v12 = vpop.f32.mrf.mxu2 }
0x23e6   :  { %6277 = vmatmul.msk.f32.vlgmr.msrb.gmra.mxu0 %vm87_vm0, %v5403_v12 }
0x2463   :  { %v5438_v36 = vpop.f32.mrf.mxu0 }
0x2464   :  { %v5439_v5 = vadd.f32 %v6435_v18, %v5438_v36 }
0x2466   :  { %5442 = vst.msk [vmem:[#allocation4] sm:$0x3] %vm5441_vm15, %v5439_v5 }
0x2467   :  { %5453 = dma.vmem_to_hbm [thread:$0]  %s5449_s27, 32, %s5451_s20, [#allocation5]  }
0x2468   :  { %6720 = dma.done.wait [#allocation5], 32  }
0x2469   :  { %6721 = vsyncadd [#allocation5], 4294967264 }
0x246a   :  { %5458 = vsyncpa [#allocation5], 1 }

</bundles_post_ra>
